<compile_context>
chip_gen: v6e
topology: v6e:2x2x1
jax: 0.10.0
libtpu: 0.0.40
codegen_flags: <defaults>
</compile_context>

<pallas_src>
import functools

import jax
import jax.numpy as jnp
from jax.experimental import pallas as pl
from jax.experimental.pallas import tpu as pltpu

NEG_SLOPE = 0.01   # nn.LeakyReLU default negative_slope
BN_EPS = 1e-5
_LPAD = 8          # sublane-aligned left pad of the dilation scratch (>= 2)


def _leaky_relu(x):
    return jnp.where(x >= 0, x, NEG_SLOPE * x)


def _round_up(x, m):
    return (x + m - 1) // m * m


def _pick_row_block(Ho, Wo, K1p, Cp, act_budget_bytes=12 << 20):
    """Output-row block size: biggest block whose per-step activation VMEM
    (double-buffered bf16 im2col + double-buffered f32 output + bf16 scratch)
    stays within the budget, but at least 2 row blocks for larger images so
    both v7x TensorCores get work even at batch 1."""
    per_row = Wo * K1p * 2 * 2 + Wo * Cp * 4 * 2 + (Wo + _LPAD + 2) * Cp * 2
    hb = max(8, (act_budget_bytes // max(per_row, 1)) // 8 * 8)
    hb = min(hb, _round_up(-(-Ho // 2), 8))
    return max(1, min(hb, Ho))


def rdb_kernel(xcol_ref, m1_ref, w1_ref, b1_ref, w2_ref, b2_ref, w3_ref, b3_ref,
               out_ref, pad_ref, *, Hb, Wo, Cp):
    """Per-(image, row-block) body.

    xcol_ref : [H1*Wo, K1p]  bf16  stride-2 im2col rows r0-4 .. r0+Hb+4
    m1_ref   : [H1*Wo, 1]    f32   1.0 inside the image, 0.0 on halo/pad rows
    w1_ref   : [K1p, 2*Cp]   bf16  conv1 (BN folded) | 1x1 identity, fused
    w2/w3    : [9, Cp, Cp]   bf16  per-tap dilated conv weights (BN folded)
    out_ref  : [Hb*Wo, Cp]   f32   final block rows r0 .. r0+Hb
    pad_ref  : [H1, Wo+LPAD+2, Cp] bf16 scratch for the dilated convs
    """
    H1 = Hb + 8
    H2 = Hb + 4
    f32 = jnp.float32
    bf16 = jnp.bfloat16
    L = _LPAD

    # Zero only the two 2-wide W-halo strips of the bf16 scratch (row halos are
    # handled by the host-built mask).  Done every grid step: each core's
    # scratch starts uninitialized and both grid axes are "parallel", so there
    # is no safe "first step" predicate; the strips are tiny.
    pad_ref[:, L - 2:L, :] = jnp.zeros((H1, 2, Cp), bf16)
    pad_ref[:, L + Wo:L + Wo + 2, :] = jnp.zeros((H1, 2, Cp), bf16)

    xcol = xcol_ref[...]                      # [H1*Wo, K1p] bf16
    m1 = m1_ref[...]                          # [H1*Wo, 1]  f32

    # ---- conv1 (BN1 folded) + fused 1x1 stride-2 identity: ONE MXU matmul.
    #      cols [0,Cp) = conv1, cols [Cp,2Cp) = identity branch.
    z = jnp.dot(xcol, w1_ref[...], preferred_element_type=f32) + b1_ref[...]
    y1 = (_leaky_relu(z[:, :Cp]) * m1).astype(bf16)        # halo rows -> exact 0
    pad_ref[0:H1, L:L + Wo, :] = y1.reshape(H1, Wo, Cp)

    def dilated_conv(w_ref, b_ref, nrows):
        # 3x3, dilation 2, padding 2; input is the bf16 padded scratch.
        # Accumulator starts from the (BN-folded) bias: no zeros init.
        # TODO(synk): on v6e/v7x pair taps along K (K=256) to fill the 256-deep MXU.
        acc = None
        for t in range(9):
            ky, kx = divmod(t, 3)
            tap = pad_ref[2 * ky:2 * ky + nrows,
                          (L - 2) + 2 * kx:(L - 2) + 2 * kx + Wo, :]
            d = jnp.dot(tap.reshape(nrows * Wo, Cp), w_ref[t],
                        preferred_element_type=f32)
            acc = d + b_ref[...] if acc is None else acc + d
        return _leaky_relu(acc)

    # ---- conv2 + BN2 + LeakyReLU over the Hb+4 rows conv3 needs.
    m2 = m1[2 * Wo:(2 + H2) * Wo, :]          # same mask, shifted by the 2-row halo
    y2 = (dilated_conv(w2_ref, b2_ref, H2) * m2).astype(bf16)
    pad_ref[0:H2, L:L + Wo, :] = y2.reshape(H2, Wo, Cp)

    # ---- conv3 + BN3 + LeakyReLU over the Hb final rows.
    y3 = dilated_conv(w3_ref, b3_ref, Hb)

    # Dropout2d(p=0.2) is identity at inference.
    # TODO(synk): training-mode Dropout2d / batch-statistics BatchNorm not implemented.

    # Identity branch: cols [Cp, 2Cp) of z, central Hb rows of the block.
    idp = z[4 * Wo:(4 + Hb) * Wo, Cp:2 * Cp]
    out_ref[...] = (y3 + idp).astype(out_ref.dtype)


def _fold_bn(w, b, gamma, beta, mean, var, eps=BN_EPS):
    """Fold eval-mode BatchNorm into conv weight (OIHW) and bias."""
    scale = gamma / jnp.sqrt(var + eps)
    w_eff = w * scale[:, None, None, None]
    b_eff = (b - mean) * scale + beta
    return w_eff, b_eff


def residual_dilated_block(x_nchw, params, *, row_block=None):
    """Forward pass. x_nchw: [N, Cin, H, W] float32. Returns [N, Cout, H//2, W//2]."""
    N, Cin, H, W = x_nchw.shape
    Cout = params['w1'].shape[0]
    Ho = (H - 1) // 2 + 1
    Wo = (W - 1) // 2 + 1
    Cp = _round_up(Cout, 128)         # lane-dense channel axis
    K1 = 9 * Cin
    K1p = _round_up(K1, 128)          # lane-dense conv1 im2col K axis

    x = jnp.transpose(x_nchw, (0, 2, 3, 1)).astype(jnp.float32)      # NHWC

    # Fold BN into conv weights/bias (eval semantics).
    w1e, b1e = _fold_bn(params['w1'], params['b1'], *params['bn1'])
    w2e, b2e = _fold_bn(params['w2'], params['b2'], *params['bn2'])
    w3e, b3e = _fold_bn(params['w3'], params['b3'], *params['bn3'])

    # conv1 and the 1x1 stride-2 identity fused into one [K1p, 2*Cp] weight:
    #   cols [0,Cp)    : conv1 (BN folded), tap-major / channel-minor K rows
    #   cols [Cp,2*Cp) : identity conv, nonzero only on the centre-tap rows.
    w1t = jnp.transpose(w1e, (2, 3, 1, 0)).reshape(K1, Cout)
    wid = params['wid'][:, :, 0, 0].T                                  # [Cin, Cout]
    w1aug = (jnp.zeros((K1p, 2 * Cp), jnp.float32)
             .at[:K1, :Cout].set(w1t)
             .at[4 * Cin:5 * Cin, Cp:Cp + Cout].set(wid)
             .astype(jnp.bfloat16))
    b1aug = (jnp.zeros((1, 2 * Cp), jnp.float32)
             .at[0, :Cout].set(b1e)
             .at[0, Cp:Cp + Cout].set(params['bid']))

    def tap_weights(we):                        # [9, Cp, Cp] bf16, zero padded
        wt = jnp.transpose(we, (2, 3, 1, 0)).reshape(9, Cout, Cout)
        return (jnp.zeros((9, Cp, Cp), jnp.float32)
                .at[:, :Cout, :Cout].set(wt).astype(jnp.bfloat16))

    w2p = tap_weights(w2e)
    b2p = jnp.zeros((1, Cp), jnp.float32).at[0, :Cout].set(b2e)
    w3p = tap_weights(w3e)
    b3p = jnp.zeros((1, Cp), jnp.float32).at[0, :Cout].set(b3e)

    # Stride-2 im2col for conv1 (9 taps concatenated along K), built in XLA.
    # TODO(synk): on v5e (HBM-bound) read the padded NHWC image and form the 9
    # stride-2 taps in-kernel instead of materializing the 9x im2col in HBM.
    x_pad = jnp.pad(x, ((0, 0), (1, 1), (1, 1), (0, 0)))
    taps = [x_pad[:, ky:ky + 2 * Ho:2, kx:kx + 2 * Wo:2, :]
            for ky in range(3) for kx in range(3)]
    xcol = jnp.concatenate(taps, axis=-1)                              # [N,Ho,Wo,9*Cin]
    xcol = jnp.pad(xcol, ((0, 0), (0, 0), (0, 0), (0, K1p - K1))).astype(jnp.bfloat16)

    # Output-row blocking: 4-row halo per side covers the two chained
    # dilation-2 convs; halo rows outside the image are zeroed via m1.
    Hb = int(row_block) if row_block is not None else _pick_row_block(Ho, Wo, K1p, Cp)
    Hb = max(1, min(Hb, Ho))
    nblk = -(-Ho // Hb)
    H1, H2 = Hb + 8, Hb + 4

    xcol_p = jnp.pad(xcol, ((0, 0), (4, nblk * Hb - Ho + 4), (0, 0), (0, 0)))
    slabs = jnp.stack([xcol_p[:, b * Hb:b * Hb + H1] for b in range(nblk)], axis=1)
    slabs = slabs.reshape(N, nblk, H1 * Wo, K1p)

    rows_abs = (jnp.arange(nblk) * Hb)[:, None] + jnp.arange(H1)[None, :] - 4
    m1 = ((rows_abs >= 0) & (rows_abs < Ho)).astype(jnp.float32)       # [nblk, H1]
    m1 = jnp.repeat(m1, Wo, axis=1)[..., None]                         # [nblk, H1*Wo, 1]

    kernel = functools.partial(rdb_kernel, Hb=Hb, Wo=Wo, Cp=Cp)

    # VMEM limit: 3/4 of the chip's capacity, capped at 96 MiB
    # (-> ~48 MiB on v7x, 96 MiB on v5e/v6e).
    try:
        vmem_cap = int(pltpu.get_tpu_info().vmem_capacity_bytes)
    except Exception:
        vmem_cap = 128 * 1024 * 1024
    vmem_limit = int(min(96 * 1024 * 1024, vmem_cap * 3 // 4))

    def run(single_buffer_weights):
        def wspec(shape):
            if single_buffer_weights:
                return pl.BlockSpec(shape, lambda n, b: (0,) * len(shape),
                                    pipeline_mode=pl.Buffered(1))
            return pl.BlockSpec(shape, lambda n, b: (0,) * len(shape))

        return pl.pallas_call(
            kernel,
            out_shape=jax.ShapeDtypeStruct((N, nblk, Hb * Wo, Cp), jnp.float32),
            grid=(N, nblk),
            in_specs=[
                pl.BlockSpec((None, None, H1 * Wo, K1p), lambda n, b: (n, b, 0, 0)),
                pl.BlockSpec((None, H1 * Wo, 1), lambda n, b: (b, 0, 0)),
                wspec((K1p, 2 * Cp)),          # conv1 + identity (fused)
                wspec((1, 2 * Cp)),
                wspec((9, Cp, Cp)),            # conv2
                wspec((1, Cp)),
                wspec((9, Cp, Cp)),            # conv3
                wspec((1, Cp)),
            ],
            out_specs=pl.BlockSpec((None, None, Hb * Wo, Cp), lambda n, b: (n, b, 0, 0)),
            scratch_shapes=[pltpu.VMEM((H1, Wo + _LPAD + 2, Cp), jnp.bfloat16)],
            compiler_params=pltpu.CompilerParams(
                dimension_semantics=("parallel", "parallel"),
                vmem_limit_bytes=vmem_limit),
        )(slabs, m1, w1aug, b1aug, w2p, b2p, w3p, b3p)

    try:
        out4 = run(True)      # weights single-buffered (pl.Buffered(1))
    except Exception:
        out4 = run(False)     # fallback: default double-buffered weights

    out = out4.reshape(N, nblk * Hb, Wo, Cp)[:, :Ho, :, :Cout]
    # TODO(synk): emit bf16 (and skip the Cp->Cout slice) when the consumer
    # allows, to cut output HBM writeback.
    return jnp.transpose(out, (0, 3, 1, 2))                           # back to NCHW


# ---------------- references (for verification) ----------------
def _conv_ref(inp, w, b, stride, pad, dil):
    wt = jnp.transpose(w, (2, 3, 1, 0))            # OIHW -> HWIO
    y = jax.lax.conv_general_dilated(
        inp, wt, (stride, stride), ((pad, pad), (pad, pad)),
        rhs_dilation=(dil, dil),
        dimension_numbers=('NHWC', 'HWIO', 'NHWC'),
        precision=jax.lax.Precision.HIGHEST)
    return y + b


def _ref_forward_f32(x_nchw, params):
    """Pure f32 reference (informational; kernel runs the MXU in bf16)."""
    x = jnp.transpose(x_nchw, (0, 2, 3, 1)).astype(jnp.float32)

    def bn(y, g, bta, m, v, eps=BN_EPS):
        return (y - m) / jnp.sqrt(v + eps) * g + bta

    y = _leaky_relu(bn(_conv_ref(x, params['w1'], params['b1'], 2, 1, 1), *params['bn1']))
    y = _leaky_relu(bn(_conv_ref(y, params['w2'], params['b2'], 1, 2, 2), *params['bn2']))
    y = _leaky_relu(bn(_conv_ref(y, params['w3'], params['b3'], 1, 2, 2), *params['bn3']))
    yid = _conv_ref(x, params['wid'], params['bid'], 2, 0, 1)
    return jnp.transpose(y + yid, (0, 3, 1, 2))


def _ref_forward_bf16(x_nchw, params):
    """Reference with the SAME precision policy as the kernel: BN folded in f32,
    bf16-rounded matmul inputs (weights + activations), f32 accumulation and
    f32 bias/LeakyReLU."""
    q = lambda a: a.astype(jnp.bfloat16).astype(jnp.float32)
    x = q(jnp.transpose(x_nchw, (0, 2, 3, 1)).astype(jnp.float32))

    w1e, b1e = _fold_bn(params['w1'], params['b1'], *params['bn1'])
    w2e, b2e = _fold_bn(params['w2'], params['b2'], *params['bn2'])
    w3e, b3e = _fold_bn(params['w3'], params['b3'], *params['bn3'])

    y = q(_leaky_relu(_conv_ref(x, q(w1e), b1e, 2, 1, 1)))
    y = q(_leaky_relu(_conv_ref(y, q(w2e), b2e, 1, 2, 2)))
    y = _leaky_relu(_conv_ref(y, q(w3e), b3e, 1, 2, 2))
    yid = _conv_ref(x, q(params['wid']), params['bid'], 2, 0, 1)
    return jnp.transpose(y + yid, (0, 3, 1, 2))


if __name__ == "__main__":
    root = jax.random.PRNGKey(0)

    def make_params(key, Cin, Cout):
        ks = jax.random.split(key, 8)

        def bn(lo, hi):
            return (jnp.linspace(lo, hi, Cout, dtype=jnp.float32),    # gamma
                    jnp.linspace(-0.2, 0.2, Cout, dtype=jnp.float32), # beta
                    jnp.linspace(-0.1, 0.1, Cout, dtype=jnp.float32), # running_mean
                    jnp.linspace(0.5, 2.0, Cout, dtype=jnp.float32))  # running_var

        return {
            'w1': 0.2 * jax.random.normal(ks[0], (Cout, Cin, 3, 3), jnp.float32),
            'b1': 0.1 * jax.random.normal(ks[1], (Cout,), jnp.float32),
            'bn1': bn(0.5, 1.5),
            'w2': 0.2 * jax.random.normal(ks[2], (Cout, Cout, 3, 3), jnp.float32),
            'b2': 0.1 * jax.random.normal(ks[3], (Cout,), jnp.float32),
            'bn2': bn(0.7, 1.3),
            'w3': 0.2 * jax.random.normal(ks[4], (Cout, Cout, 3, 3), jnp.float32),
            'b3': 0.1 * jax.random.normal(ks[5], (Cout,), jnp.float32),
            'bn3': bn(0.8, 1.2),
            'wid': 0.2 * jax.random.normal(ks[6], (Cout, Cin, 1, 1), jnp.float32),
            'bid': 0.1 * jax.random.normal(ks[7], (Cout,), jnp.float32),
        }

    def check(out, x, p, name):
        ref_q = _ref_forward_bf16(x, p)
        if not bool(jnp.allclose(out, ref_q, atol=2e-3, rtol=2e-3)):
            err_q = float(jnp.max(jnp.abs(out - ref_q)))
            err_f = float(jnp.max(jnp.abs(out - _ref_forward_f32(x, p))))
            raise AssertionError(
                f"{name}: mismatch vs bf16-policy reference (max_err={err_q}; "
                f"deviation vs pure-f32 reference={err_f})")

    k1, k2, k3, k4 = jax.random.split(root, 4)

    # Config A: toy shape (Cin=4, Cout=8, 16x16) -> single row block per image.
    xA = jax.random.normal(k1, (2, 4, 16, 16), jnp.float32)
    pA = make_params(k2, 4, 8)
    outA = jax.block_until_ready(residual_dilated_block(xA, pA))
    assert outA.shape == (2, 8, 8, 8), outA.shape
    check(outA, xA, pA, "configA")

    # Config B: K1 = 144 > 128, Cout not a multiple of 128, and several row
    # blocks with a ragged last block (Ho=16, row_block=6) -> exercises the
    # halo masks and the multi-block path.
    xB = jax.random.normal(k3, (2, 16, 32, 32), jnp.float32)
    pB = make_params(k4, 16, 24)
    outB = jax.block_until_ready(residual_dilated_block(xB, pB, row_block=6))
    assert outB.shape == (2, 24, 16, 16), outB.shape
    check(outB, xB, pB, "configB")

    print("KERNEL_OK")
</pallas_src>

<mosaic_0001>
module attributes {stable_mosaic.version = 11 : i64} {
  func.func @rdb_kernel(%arg0: i32, %arg1: i32, %arg2: memref<1x1x128x128xbf16, #tpu.memory_space<vmem>>, %arg3: memref<1x128x1xf32, #tpu.memory_space<vmem>>, %arg4: memref<128x256xbf16, #tpu.memory_space<vmem>>, %arg5: memref<1x256xf32, #tpu.memory_space<vmem>>, %arg6: memref<9x128x128xbf16, #tpu.memory_space<vmem>>, %arg7: memref<1x128xf32, #tpu.memory_space<vmem>>, %arg8: memref<9x128x128xbf16, #tpu.memory_space<vmem>>, %arg9: memref<1x128xf32, #tpu.memory_space<vmem>>, %arg10: memref<1x1x64x128xf32, #tpu.memory_space<vmem>>, %arg11: memref<16x18x128xbf16, #tpu.memory_space<vmem>>) attributes {dimension_semantics = [#tpu.dimension_semantics<parallel>, #tpu.dimension_semantics<parallel>], iteration_bounds = array<i64: 2, 1>, scalar_prefetch = 0 : i64, scratch_operands = 1 : i64, tpu.core_type = #tpu.core_type<tc>, window_params = [{transform_indices = @transform_0, window_bounds = array<i64: 1, 1, 128, 128>}, {transform_indices = @transform_1, window_bounds = array<i64: 1, 128, 1>}, {pipeline_mode = #tpu.pipeline_mode<synchronous>, transform_indices = @transform_2, window_bounds = array<i64: 128, 256>}, {pipeline_mode = #tpu.pipeline_mode<synchronous>, transform_indices = @transform_3, window_bounds = array<i64: 1, 256>}, {pipeline_mode = #tpu.pipeline_mode<synchronous>, transform_indices = @transform_4, window_bounds = array<i64: 9, 128, 128>}, {pipeline_mode = #tpu.pipeline_mode<synchronous>, transform_indices = @transform_5, window_bounds = array<i64: 1, 128>}, {pipeline_mode = #tpu.pipeline_mode<synchronous>, transform_indices = @transform_6, window_bounds = array<i64: 9, 128, 128>}, {pipeline_mode = #tpu.pipeline_mode<synchronous>, transform_indices = @transform_7, window_bounds = array<i64: 1, 128>}, {transform_indices = @transform_8, window_bounds = array<i64: 1, 1, 64, 128>}]} {
    %cst = arith.constant 0.000000e+00 : bf16
    %0 = vector.broadcast %cst : bf16 to vector<16x2x128xbf16>
    %c0 = arith.constant 0 : index
    %c6 = arith.constant 6 : index
    %c0_0 = arith.constant 0 : index
    %1 = vector.load %arg11[%c0, %c6, %c0_0] : memref<16x18x128xbf16, #tpu.memory_space<vmem>>, vector<16x2x128xbf16>
    tpu.vector_store %arg11[%c0, %c6, %c0_0], %0 {strides = array<i32>} : memref<16x18x128xbf16, #tpu.memory_space<vmem>>, vector<16x2x128xbf16>,
    %cst_1 = arith.constant 0.000000e+00 : bf16
    %2 = vector.broadcast %cst_1 : bf16 to vector<16x2x128xbf16>
    %c0_2 = arith.constant 0 : index
    %c16 = arith.constant 16 : index
    %c0_3 = arith.constant 0 : index
    %3 = vector.load %arg11[%c0_2, %c16, %c0_3] : memref<16x18x128xbf16, #tpu.memory_space<vmem>>, vector<16x2x128xbf16>
    tpu.vector_store %arg11[%c0_2, %c16, %c0_3], %2 {strides = array<i32>} : memref<16x18x128xbf16, #tpu.memory_space<vmem>>, vector<16x2x128xbf16>,
    %c0_4 = arith.constant 0 : index
    %c0_5 = arith.constant 0 : index
    %c0_6 = arith.constant 0 : index
    %c0_7 = arith.constant 0 : index
    %4 = vector.load %arg2[%c0_4, %c0_5, %c0_6, %c0_7] : memref<1x1x128x128xbf16, #tpu.memory_space<vmem>>, vector<1x1x128x128xbf16>
    %5 = vector.shape_cast %4 : vector<1x1x128x128xbf16> to vector<128x128xbf16>
    %c0_8 = arith.constant 0 : index
    %c0_9 = arith.constant 0 : index
    %c0_10 = arith.constant 0 : index
    %6 = vector.load %arg3[%c0_8, %c0_9, %c0_10] : memref<1x128x1xf32, #tpu.memory_space<vmem>>, vector<1x128x1xf32>
    %7 = vector.shape_cast %6 : vector<1x128x1xf32> to vector<128x1xf32>
    %c0_11 = arith.constant 0 : index
    %c0_12 = arith.constant 0 : index
    %8 = vector.load %arg4[%c0_11, %c0_12] : memref<128x256xbf16, #tpu.memory_space<vmem>>, vector<128x256xbf16>
    %cst_13 = arith.constant dense<0.000000e+00> : vector<128x256xf32>
    %9 = tpu.matmul %5, %8, %cst_13 {dimension_numbers = #tpu.dot_dimension_numbers<[1], [0], [0], [1], [0, 0, 1, 1], [], []>} : vector<128x128xbf16>, vector<128x256xbf16>, vector<128x256xf32> -> vector<128x256xf32>
    %c0_14 = arith.constant 0 : index
    %c0_15 = arith.constant 0 : index
    %10 = vector.load %arg5[%c0_14, %c0_15] : memref<1x256xf32, #tpu.memory_space<vmem>>, vector<1x256xf32>
    %11 = vector.broadcast %10 : vector<1x256xf32> to vector<128x256xf32>
    %12 = arith.addf %9, %11 : vector<128x256xf32>
    %13 = vector.extract_strided_slice %12 {offsets = [0, 0], sizes = [128, 128], strides = [1, 1]} : vector<128x256xf32> to vector<128x128xf32>
    %cst_16 = arith.constant 0.000000e+00 : f32
    %14 = vector.broadcast %cst_16 : f32 to vector<128x128xf32>
    %15 = arith.cmpf oge, %13, %14 : vector<128x128xf32>
    %cst_17 = arith.constant 0.00999999977 : f32
    %16 = vector.broadcast %cst_17 : f32 to vector<128x128xf32>
    %17 = arith.mulf %16, %13 : vector<128x128xf32>
    %18 = arith.select %15, %13, %17 : vector<128x128xi1>, vector<128x128xf32>
    %19 = vector.broadcast %7 : vector<128x1xf32> to vector<128x128xf32>
    %20 = arith.mulf %18, %19 : vector<128x128xf32>
    %21 = arith.truncf %20 : vector<128x128xf32> to vector<128x128xbf16>
    %22 = vector.shape_cast %21 : vector<128x128xbf16> to vector<16x8x128xbf16>
    %c0_18 = arith.constant 0 : index
    %c8 = arith.constant 8 : index
    %c0_19 = arith.constant 0 : index
    %23 = vector.load %arg11[%c0_18, %c8, %c0_19] : memref<16x18x128xbf16, #tpu.memory_space<vmem>>, vector<16x8x128xbf16>
    tpu.vector_store %arg11[%c0_18, %c8, %c0_19], %22 {strides = array<i32>} : memref<16x18x128xbf16, #tpu.memory_space<vmem>>, vector<16x8x128xbf16>,
    %24 = vector.extract_strided_slice %7 {offsets = [16, 0], sizes = [96, 1], strides = [1, 1]} : vector<128x1xf32> to vector<96x1xf32>
    %c0_20 = arith.constant 0 : index
    %c6_21 = arith.constant 6 : index
    %c0_22 = arith.constant 0 : index
    %25 = vector.load %arg11[%c0_20, %c6_21, %c0_22] : memref<16x18x128xbf16, #tpu.memory_space<vmem>>, vector<12x8x128xbf16>
    %26 = vector.shape_cast %25 : vector<12x8x128xbf16> to vector<96x128xbf16>
    %c0_23 = arith.constant 0 : index
    %c0_24 = arith.constant 0 : index
    %c0_25 = arith.constant 0 : index
    %27 = vector.load %arg6[%c0_23, %c0_24, %c0_25] : memref<9x128x128xbf16, #tpu.memory_space<vmem>>, vector<1x128x128xbf16>
    %28 = vector.shape_cast %27 : vector<1x128x128xbf16> to vector<128x128xbf16>
    %cst_26 = arith.constant dense<0.000000e+00> : vector<96x128xf32>
    %29 = tpu.matmul %26, %28, %cst_26 {dimension_numbers = #tpu.dot_dimension_numbers<[1], [0], [0], [1], [0, 0, 1, 1], [], []>} : vector<96x128xbf16>, vector<128x128xbf16>, vector<96x128xf32> -> vector<96x128xf32>
    %c0_27 = arith.constant 0 : index
    %c0_28 = arith.constant 0 : index
    %30 = vector.load %arg7[%c0_27, %c0_28] : memref<1x128xf32, #tpu.memory_space<vmem>>, vector<1x128xf32>
    %31 = vector.broadcast %30 : vector<1x128xf32> to vector<96x128xf32>
    %32 = arith.addf %29, %31 : vector<96x128xf32>
    %c0_29 = arith.constant 0 : index
    %c8_30 = arith.constant 8 : index
    %c0_31 = arith.constant 0 : index
    %33 = vector.load %arg11[%c0_29, %c8_30, %c0_31] : memref<16x18x128xbf16, #tpu.memory_space<vmem>>, vector<12x8x128xbf16>
    %34 = vector.shape_cast %33 : vector<12x8x128xbf16> to vector<96x128xbf16>
    %c1 = arith.constant 1 : index
    %c0_32 = arith.constant 0 : index
    %c0_33 = arith.constant 0 : index
    %35 = vector.load %arg6[%c1, %c0_32, %c0_33] : memref<9x128x128xbf16, #tpu.memory_space<vmem>>, vector<1x128x128xbf16>
    %36 = vector.shape_cast %35 : vector<1x128x128xbf16> to vector<128x128xbf16>
    %cst_34 = arith.constant dense<0.000000e+00> : vector<96x128xf32>
    %37 = tpu.matmul %34, %36, %cst_34 {dimension_numbers = #tpu.dot_dimension_numbers<[1], [0], [0], [1], [0, 0, 1, 1], [], []>} : vector<96x128xbf16>, vector<128x128xbf16>, vector<96x128xf32> -> vector<96x128xf32>
    %38 = arith.addf %32, %37 : vector<96x128xf32>
    %c0_35 = arith.constant 0 : index
    %c10 = arith.constant 10 : index
    %c0_36 = arith.constant 0 : index
    %39 = vector.load %arg11[%c0_35, %c10, %c0_36] : memref<16x18x128xbf16, #tpu.memory_space<vmem>>, vector<12x8x128xbf16>
    %40 = vector.shape_cast %39 : vector<12x8x128xbf16> to vector<96x128xbf16>
    %c2 = arith.constant 2 : index
    %c0_37 = arith.constant 0 : index
    %c0_38 = arith.constant 0 : index
    %41 = vector.load %arg6[%c2, %c0_37, %c0_38] : memref<9x128x128xbf16, #tpu.memory_space<vmem>>, vector<1x128x128xbf16>
    %42 = vector.shape_cast %41 : vector<1x128x128xbf16> to vector<128x128xbf16>
    %cst_39 = arith.constant dense<0.000000e+00> : vector<96x128xf32>
    %43 = tpu.matmul %40, %42, %cst_39 {dimension_numbers = #tpu.dot_dimension_numbers<[1], [0], [0], [1], [0, 0, 1, 1], [], []>} : vector<96x128xbf16>, vector<128x128xbf16>, vector<96x128xf32> -> vector<96x128xf32>
    %44 = arith.addf %38, %43 : vector<96x128xf32>
    %c2_40 = arith.constant 2 : index
    %c6_41 = arith.constant 6 : index
    %c0_42 = arith.constant 0 : index
    %45 = vector.load %arg11[%c2_40, %c6_41, %c0_42] : memref<16x18x128xbf16, #tpu.memory_space<vmem>>, vector<12x8x128xbf16>
    %46 = vector.shape_cast %45 : vector<12x8x128xbf16> to vector<96x128xbf16>
    %c3 = arith.constant 3 : index
    %c0_43 = arith.constant 0 : index
    %c0_44 = arith.constant 0 : index
    %47 = vector.load %arg6[%c3, %c0_43, %c0_44] : memref<9x128x128xbf16, #tpu.memory_space<vmem>>, vector<1x128x128xbf16>
    %48 = vector.shape_cast %47 : vector<1x128x128xbf16> to vector<128x128xbf16>
    %cst_45 = arith.constant dense<0.000000e+00> : vector<96x128xf32>
    %49 = tpu.matmul %46, %48, %cst_45 {dimension_numbers = #tpu.dot_dimension_numbers<[1], [0], [0], [1], [0, 0, 1, 1], [], []>} : vector<96x128xbf16>, vector<128x128xbf16>, vector<96x128xf32> -> vector<96x128xf32>
    %50 = arith.addf %44, %49 : vector<96x128xf32>
    %c2_46 = arith.constant 2 : index
    %c8_47 = arith.constant 8 : index
    %c0_48 = arith.constant 0 : index
    %51 = vector.load %arg11[%c2_46, %c8_47, %c0_48] : memref<16x18x128xbf16, #tpu.memory_space<vmem>>, vector<12x8x128xbf16>
    %52 = vector.shape_cast %51 : vector<12x8x128xbf16> to vector<96x128xbf16>
    %c4 = arith.constant 4 : index
    %c0_49 = arith.constant 0 : index
    %c0_50 = arith.constant 0 : index
    %53 = vector.load %arg6[%c4, %c0_49, %c0_50] : memref<9x128x128xbf16, #tpu.memory_space<vmem>>, vector<1x128x128xbf16>
    %54 = vector.shape_cast %53 : vector<1x128x128xbf16> to vector<128x128xbf16>
    %cst_51 = arith.constant dense<0.000000e+00> : vector<96x128xf32>
    %55 = tpu.matmul %52, %54, %cst_51 {dimension_numbers = #tpu.dot_dimension_numbers<[1], [0], [0], [1], [0, 0, 1, 1], [], []>} : vector<96x128xbf16>, vector<128x128xbf16>, vector<96x128xf32> -> vector<96x128xf32>
    %56 = arith.addf %50, %55 : vector<96x128xf32>
    %c2_52 = arith.constant 2 : index
    %c10_53 = arith.constant 10 : index
    %c0_54 = arith.constant 0 : index
    %57 = vector.load %arg11[%c2_52, %c10_53, %c0_54] : memref<16x18x128xbf16, #tpu.memory_space<vmem>>, vector<12x8x128xbf16>
    %58 = vector.shape_cast %57 : vector<12x8x128xbf16> to vector<96x128xbf16>
    %c5 = arith.constant 5 : index
    %c0_55 = arith.constant 0 : index
    %c0_56 = arith.constant 0 : index
    %59 = vector.load %arg6[%c5, %c0_55, %c0_56] : memref<9x128x128xbf16, #tpu.memory_space<vmem>>, vector<1x128x128xbf16>
    %60 = vector.shape_cast %59 : vector<1x128x128xbf16> to vector<128x128xbf16>
    %cst_57 = arith.constant dense<0.000000e+00> : vector<96x128xf32>
    %61 = tpu.matmul %58, %60, %cst_57 {dimension_numbers = #tpu.dot_dimension_numbers<[1], [0], [0], [1], [0, 0, 1, 1], [], []>} : vector<96x128xbf16>, vector<128x128xbf16>, vector<96x128xf32> -> vector<96x128xf32>
    %62 = arith.addf %56, %61 : vector<96x128xf32>
    %c4_58 = arith.constant 4 : index
    %c6_59 = arith.constant 6 : index
    %c0_60 = arith.constant 0 : index
    %63 = vector.load %arg11[%c4_58, %c6_59, %c0_60] : memref<16x18x128xbf16, #tpu.memory_space<vmem>>, vector<12x8x128xbf16>
    %64 = vector.shape_cast %63 : vector<12x8x128xbf16> to vector<96x128xbf16>
    %c6_61 = arith.constant 6 : index
    %c0_62 = arith.constant 0 : index
    %c0_63 = arith.constant 0 : index
    %65 = vector.load %arg6[%c6_61, %c0_62, %c0_63] : memref<9x128x128xbf16, #tpu.memory_space<vmem>>, vector<1x128x128xbf16>
    %66 = vector.shape_cast %65 : vector<1x128x128xbf16> to vector<128x128xbf16>
    %cst_64 = arith.constant dense<0.000000e+00> : vector<96x128xf32>
    %67 = tpu.matmul %64, %66, %cst_64 {dimension_numbers = #tpu.dot_dimension_numbers<[1], [0], [0], [1], [0, 0, 1, 1], [], []>} : vector<96x128xbf16>, vector<128x128xbf16>, vector<96x128xf32> -> vector<96x128xf32>
    %68 = arith.addf %62, %67 : vector<96x128xf32>
    %c4_65 = arith.constant 4 : index
    %c8_66 = arith.constant 8 : index
    %c0_67 = arith.constant 0 : index
    %69 = vector.load %arg11[%c4_65, %c8_66, %c0_67] : memref<16x18x128xbf16, #tpu.memory_space<vmem>>, vector<12x8x128xbf16>
    %70 = vector.shape_cast %69 : vector<12x8x128xbf16> to vector<96x128xbf16>
    %c7 = arith.constant 7 : index
    %c0_68 = arith.constant 0 : index
    %c0_69 = arith.constant 0 : index
    %71 = vector.load %arg6[%c7, %c0_68, %c0_69] : memref<9x128x128xbf16, #tpu.memory_space<vmem>>, vector<1x128x128xbf16>
    %72 = vector.shape_cast %71 : vector<1x128x128xbf16> to vector<128x128xbf16>
    %cst_70 = arith.constant dense<0.000000e+00> : vector<96x128xf32>
    %73 = tpu.matmul %70, %72, %cst_70 {dimension_numbers = #tpu.dot_dimension_numbers<[1], [0], [0], [1], [0, 0, 1, 1], [], []>} : vector<96x128xbf16>, vector<128x128xbf16>, vector<96x128xf32> -> vector<96x128xf32>
    %74 = arith.addf %68, %73 : vector<96x128xf32>
    %c4_71 = arith.constant 4 : index
    %c10_72 = arith.constant 10 : index
    %c0_73 = arith.constant 0 : index
    %75 = vector.load %arg11[%c4_71, %c10_72, %c0_73] : memref<16x18x128xbf16, #tpu.memory_space<vmem>>, vector<12x8x128xbf16>
    %76 = vector.shape_cast %75 : vector<12x8x128xbf16> to vector<96x128xbf16>
    %c8_74 = arith.constant 8 : index
    %c0_75 = arith.constant 0 : index
    %c0_76 = arith.constant 0 : index
    %77 = vector.load %arg6[%c8_74, %c0_75, %c0_76] : memref<9x128x128xbf16, #tpu.memory_space<vmem>>, vector<1x128x128xbf16>
    %78 = vector.shape_cast %77 : vector<1x128x128xbf16> to vector<128x128xbf16>
    %cst_77 = arith.constant dense<0.000000e+00> : vector<96x128xf32>
    %79 = tpu.matmul %76, %78, %cst_77 {dimension_numbers = #tpu.dot_dimension_numbers<[1], [0], [0], [1], [0, 0, 1, 1], [], []>} : vector<96x128xbf16>, vector<128x128xbf16>, vector<96x128xf32> -> vector<96x128xf32>
    %80 = arith.addf %74, %79 : vector<96x128xf32>
    %cst_78 = arith.constant 0.000000e+00 : f32
    %81 = vector.broadcast %cst_78 : f32 to vector<96x128xf32>
    %82 = arith.cmpf oge, %80, %81 : vector<96x128xf32>
    %cst_79 = arith.constant 0.00999999977 : f32
    %83 = vector.broadcast %cst_79 : f32 to vector<96x128xf32>
    %84 = arith.mulf %83, %80 : vector<96x128xf32>
    %85 = arith.select %82, %80, %84 : vector<96x128xi1>, vector<96x128xf32>
    %86 = vector.broadcast %24 : vector<96x1xf32> to vector<96x128xf32>
    %87 = arith.mulf %85, %86 : vector<96x128xf32>
    %88 = arith.truncf %87 : vector<96x128xf32> to vector<96x128xbf16>
    %89 = vector.shape_cast %88 : vector<96x128xbf16> to vector<12x8x128xbf16>
    %c0_80 = arith.constant 0 : index
    %c8_81 = arith.constant 8 : index
    %c0_82 = arith.constant 0 : index
    %90 = vector.load %arg11[%c0_80, %c8_81, %c0_82] : memref<16x18x128xbf16, #tpu.memory_space<vmem>>, vector<12x8x128xbf16>
    tpu.vector_store %arg11[%c0_80, %c8_81, %c0_82], %89 {strides = array<i32>} : memref<16x18x128xbf16, #tpu.memory_space<vmem>>, vector<12x8x128xbf16>,
    %c0_83 = arith.constant 0 : index
    %c6_84 = arith.constant 6 : index
    %c0_85 = arith.constant 0 : index
    %91 = vector.load %arg11[%c0_83, %c6_84, %c0_85] : memref<16x18x128xbf16, #tpu.memory_space<vmem>>, vector<8x8x128xbf16>
    %92 = vector.shape_cast %91 : vector<8x8x128xbf16> to vector<64x128xbf16>
    %c0_86 = arith.constant 0 : index
    %c0_87 = arith.constant 0 : index
    %c0_88 = arith.constant 0 : index
    %93 = vector.load %arg8[%c0_86, %c0_87, %c0_88] : memref<9x128x128xbf16, #tpu.memory_space<vmem>>, vector<1x128x128xbf16>
    %94 = vector.shape_cast %93 : vector<1x128x128xbf16> to vector<128x128xbf16>
    %cst_89 = arith.constant dense<0.000000e+00> : vector<64x128xf32>
    %95 = tpu.matmul %92, %94, %cst_89 {dimension_numbers = #tpu.dot_dimension_numbers<[1], [0], [0], [1], [0, 0, 1, 1], [], []>} : vector<64x128xbf16>, vector<128x128xbf16>, vector<64x128xf32> -> vector<64x128xf32>
    %c0_90 = arith.constant 0 : index
    %c0_91 = arith.constant 0 : index
    %96 = vector.load %arg9[%c0_90, %c0_91] : memref<1x128xf32, #tpu.memory_space<vmem>>, vector<1x128xf32>
    %97 = vector.broadcast %96 : vector<1x128xf32> to vector<64x128xf32>
    %98 = arith.addf %95, %97 : vector<64x128xf32>
    %c0_92 = arith.constant 0 : index
    %c8_93 = arith.constant 8 : index
    %c0_94 = arith.constant 0 : index
    %99 = vector.load %arg11[%c0_92, %c8_93, %c0_94] : memref<16x18x128xbf16, #tpu.memory_space<vmem>>, vector<8x8x128xbf16>
    %100 = vector.shape_cast %99 : vector<8x8x128xbf16> to vector<64x128xbf16>
    %c1_95 = arith.constant 1 : index
    %c0_96 = arith.constant 0 : index
    %c0_97 = arith.constant 0 : index
    %101 = vector.load %arg8[%c1_95, %c0_96, %c0_97] : memref<9x128x128xbf16, #tpu.memory_space<vmem>>, vector<1x128x128xbf16>
    %102 = vector.shape_cast %101 : vector<1x128x128xbf16> to vector<128x128xbf16>
    %cst_98 = arith.constant dense<0.000000e+00> : vector<64x128xf32>
    %103 = tpu.matmul %100, %102, %cst_98 {dimension_numbers = #tpu.dot_dimension_numbers<[1], [0], [0], [1], [0, 0, 1, 1], [], []>} : vector<64x128xbf16>, vector<128x128xbf16>, vector<64x128xf32> -> vector<64x128xf32>
    %104 = arith.addf %98, %103 : vector<64x128xf32>
    %c0_99 = arith.constant 0 : index
    %c10_100 = arith.constant 10 : index
    %c0_101 = arith.constant 0 : index
    %105 = vector.load %arg11[%c0_99, %c10_100, %c0_101] : memref<16x18x128xbf16, #tpu.memory_space<vmem>>, vector<8x8x128xbf16>
    %106 = vector.shape_cast %105 : vector<8x8x128xbf16> to vector<64x128xbf16>
    %c2_102 = arith.constant 2 : index
    %c0_103 = arith.constant 0 : index
    %c0_104 = arith.constant 0 : index
    %107 = vector.load %arg8[%c2_102, %c0_103, %c0_104] : memref<9x128x128xbf16, #tpu.memory_space<vmem>>, vector<1x128x128xbf16>
    %108 = vector.shape_cast %107 : vector<1x128x128xbf16> to vector<128x128xbf16>
    %cst_105 = arith.constant dense<0.000000e+00> : vector<64x128xf32>
    %109 = tpu.matmul %106, %108, %cst_105 {dimension_numbers = #tpu.dot_dimension_numbers<[1], [0], [0], [1], [0, 0, 1, 1], [], []>} : vector<64x128xbf16>, vector<128x128xbf16>, vector<64x128xf32> -> vector<64x128xf32>
    %110 = arith.addf %104, %109 : vector<64x128xf32>
    %c2_106 = arith.constant 2 : index
    %c6_107 = arith.constant 6 : index
    %c0_108 = arith.constant 0 : index
    %111 = vector.load %arg11[%c2_106, %c6_107, %c0_108] : memref<16x18x128xbf16, #tpu.memory_space<vmem>>, vector<8x8x128xbf16>
    %112 = vector.shape_cast %111 : vector<8x8x128xbf16> to vector<64x128xbf16>
    %c3_109 = arith.constant 3 : index
    %c0_110 = arith.constant 0 : index
    %c0_111 = arith.constant 0 : index
    %113 = vector.load %arg8[%c3_109, %c0_110, %c0_111] : memref<9x128x128xbf16, #tpu.memory_space<vmem>>, vector<1x128x128xbf16>
    %114 = vector.shape_cast %113 : vector<1x128x128xbf16> to vector<128x128xbf16>
    %cst_112 = arith.constant dense<0.000000e+00> : vector<64x128xf32>
    %115 = tpu.matmul %112, %114, %cst_112 {dimension_numbers = #tpu.dot_dimension_numbers<[1], [0], [0], [1], [0, 0, 1, 1], [], []>} : vector<64x128xbf16>, vector<128x128xbf16>, vector<64x128xf32> -> vector<64x128xf32>
    %116 = arith.addf %110, %115 : vector<64x128xf32>
    %c2_113 = arith.constant 2 : index
    %c8_114 = arith.constant 8 : index
    %c0_115 = arith.constant 0 : index
    %117 = vector.load %arg11[%c2_113, %c8_114, %c0_115] : memref<16x18x128xbf16, #tpu.memory_space<vmem>>, vector<8x8x128xbf16>
    %118 = vector.shape_cast %117 : vector<8x8x128xbf16> to vector<64x128xbf16>
    %c4_116 = arith.constant 4 : index
    %c0_117 = arith.constant 0 : index
    %c0_118 = arith.constant 0 : index
    %119 = vector.load %arg8[%c4_116, %c0_117, %c0_118] : memref<9x128x128xbf16, #tpu.memory_space<vmem>>, vector<1x128x128xbf16>
    %120 = vector.shape_cast %119 : vector<1x128x128xbf16> to vector<128x128xbf16>
    %cst_119 = arith.constant dense<0.000000e+00> : vector<64x128xf32>
    %121 = tpu.matmul %118, %120, %cst_119 {dimension_numbers = #tpu.dot_dimension_numbers<[1], [0], [0], [1], [0, 0, 1, 1], [], []>} : vector<64x128xbf16>, vector<128x128xbf16>, vector<64x128xf32> -> vector<64x128xf32>
    %122 = arith.addf %116, %121 : vector<64x128xf32>
    %c2_120 = arith.constant 2 : index
    %c10_121 = arith.constant 10 : index
    %c0_122 = arith.constant 0 : index
    %123 = vector.load %arg11[%c2_120, %c10_121, %c0_122] : memref<16x18x128xbf16, #tpu.memory_space<vmem>>, vector<8x8x128xbf16>
    %124 = vector.shape_cast %123 : vector<8x8x128xbf16> to vector<64x128xbf16>
    %c5_123 = arith.constant 5 : index
    %c0_124 = arith.constant 0 : index
    %c0_125 = arith.constant 0 : index
    %125 = vector.load %arg8[%c5_123, %c0_124, %c0_125] : memref<9x128x128xbf16, #tpu.memory_space<vmem>>, vector<1x128x128xbf16>
    %126 = vector.shape_cast %125 : vector<1x128x128xbf16> to vector<128x128xbf16>
    %cst_126 = arith.constant dense<0.000000e+00> : vector<64x128xf32>
    %127 = tpu.matmul %124, %126, %cst_126 {dimension_numbers = #tpu.dot_dimension_numbers<[1], [0], [0], [1], [0, 0, 1, 1], [], []>} : vector<64x128xbf16>, vector<128x128xbf16>, vector<64x128xf32> -> vector<64x128xf32>
    %128 = arith.addf %122, %127 : vector<64x128xf32>
    %c4_127 = arith.constant 4 : index
    %c6_128 = arith.constant 6 : index
    %c0_129 = arith.constant 0 : index
    %129 = vector.load %arg11[%c4_127, %c6_128, %c0_129] : memref<16x18x128xbf16, #tpu.memory_space<vmem>>, vector<8x8x128xbf16>
    %130 = vector.shape_cast %129 : vector<8x8x128xbf16> to vector<64x128xbf16>
    %c6_130 = arith.constant 6 : index
    %c0_131 = arith.constant 0 : index
    %c0_132 = arith.constant 0 : index
    %131 = vector.load %arg8[%c6_130, %c0_131, %c0_132] : memref<9x128x128xbf16, #tpu.memory_space<vmem>>, vector<1x128x128xbf16>
    %132 = vector.shape_cast %131 : vector<1x128x128xbf16> to vector<128x128xbf16>
    %cst_133 = arith.constant dense<0.000000e+00> : vector<64x128xf32>
    %133 = tpu.matmul %130, %132, %cst_133 {dimension_numbers = #tpu.dot_dimension_numbers<[1], [0], [0], [1], [0, 0, 1, 1], [], []>} : vector<64x128xbf16>, vector<128x128xbf16>, vector<64x128xf32> -> vector<64x128xf32>
    %134 = arith.addf %128, %133 : vector<64x128xf32>
    %c4_134 = arith.constant 4 : index
    %c8_135 = arith.constant 8 : index
    %c0_136 = arith.constant 0 : index
    %135 = vector.load %arg11[%c4_134, %c8_135, %c0_136] : memref<16x18x128xbf16, #tpu.memory_space<vmem>>, vector<8x8x128xbf16>
    %136 = vector.shape_cast %135 : vector<8x8x128xbf16> to vector<64x128xbf16>
    %c7_137 = arith.constant 7 : index
    %c0_138 = arith.constant 0 : index
    %c0_139 = arith.constant 0 : index
    %137 = vector.load %arg8[%c7_137, %c0_138, %c0_139] : memref<9x128x128xbf16, #tpu.memory_space<vmem>>, vector<1x128x128xbf16>
    %138 = vector.shape_cast %137 : vector<1x128x128xbf16> to vector<128x128xbf16>
    %cst_140 = arith.constant dense<0.000000e+00> : vector<64x128xf32>
    %139 = tpu.matmul %136, %138, %cst_140 {dimension_numbers = #tpu.dot_dimension_numbers<[1], [0], [0], [1], [0, 0, 1, 1], [], []>} : vector<64x128xbf16>, vector<128x128xbf16>, vector<64x128xf32> -> vector<64x128xf32>
    %140 = arith.addf %134, %139 : vector<64x128xf32>
    %c4_141 = arith.constant 4 : index
    %c10_142 = arith.constant 10 : index
    %c0_143 = arith.constant 0 : index
    %141 = vector.load %arg11[%c4_141, %c10_142, %c0_143] : memref<16x18x128xbf16, #tpu.memory_space<vmem>>, vector<8x8x128xbf16>
    %142 = vector.shape_cast %141 : vector<8x8x128xbf16> to vector<64x128xbf16>
    %c8_144 = arith.constant 8 : index
    %c0_145 = arith.constant 0 : index
    %c0_146 = arith.constant 0 : index
    %143 = vector.load %arg8[%c8_144, %c0_145, %c0_146] : memref<9x128x128xbf16, #tpu.memory_space<vmem>>, vector<1x128x128xbf16>
    %144 = vector.shape_cast %143 : vector<1x128x128xbf16> to vector<128x128xbf16>
    %cst_147 = arith.constant dense<0.000000e+00> : vector<64x128xf32>
    %145 = tpu.matmul %142, %144, %cst_147 {dimension_numbers = #tpu.dot_dimension_numbers<[1], [0], [0], [1], [0, 0, 1, 1], [], []>} : vector<64x128xbf16>, vector<128x128xbf16>, vector<64x128xf32> -> vector<64x128xf32>
    %146 = arith.addf %140, %145 : vector<64x128xf32>
    %cst_148 = arith.constant 0.000000e+00 : f32
    %147 = vector.broadcast %cst_148 : f32 to vector<64x128xf32>
    %148 = arith.cmpf oge, %146, %147 : vector<64x128xf32>
    %cst_149 = arith.constant 0.00999999977 : f32
    %149 = vector.broadcast %cst_149 : f32 to vector<64x128xf32>
    %150 = arith.mulf %149, %146 : vector<64x128xf32>
    %151 = arith.select %148, %146, %150 : vector<64x128xi1>, vector<64x128xf32>
    %152 = vector.extract_strided_slice %12 {offsets = [32, 128], sizes = [64, 128], strides = [1, 1]} : vector<128x256xf32> to vector<64x128xf32>
    %153 = arith.addf %151, %152 : vector<64x128xf32>
    %c0_150 = arith.constant 0 : index
    %c0_151 = arith.constant 0 : index
    %c0_152 = arith.constant 0 : index
    %c0_153 = arith.constant 0 : index
    %154 = vector.load %arg10[%c0_150, %c0_151, %c0_152, %c0_153] : memref<1x1x64x128xf32, #tpu.memory_space<vmem>>, vector<1x1x64x128xf32>
    %155 = vector.shape_cast %154 : vector<1x1x64x128xf32> to vector<64x128xf32>
    %156 = vector.shape_cast %153 : vector<64x128xf32> to vector<1x1x64x128xf32>
    tpu.vector_store %arg10[%c0_150, %c0_151, %c0_152, %c0_153], %156 {strides = array<i32>} : memref<1x1x64x128xf32, #tpu.memory_space<vmem>>, vector<1x1x64x128xf32>,
    return
  }
  func.func @transform_0(%arg0: i32, %arg1: i32) -> (i32, i32, i32, i32) {
    %c0_i32 = arith.constant 0 : i32
    %c0_i32_0 = arith.constant 0 : i32
    %c0_i32_1 = arith.constant 0 : i32
    return %arg0, %arg1, %c0_i32, %c0_i32_0 : i32, i32, i32, i32
  }
  func.func @transform_1(%arg0: i32, %arg1: i32) -> (i32, i32, i32) {
    %c0_i32 = arith.constant 0 : i32
    %c0_i32_0 = arith.constant 0 : i32
    %c0_i32_1 = arith.constant 0 : i32
    return %arg1, %c0_i32, %c0_i32_0 : i32, i32, i32
  }
  func.func @transform_2(%arg0: i32, %arg1: i32) -> (i32, i32) {
    %c0_i32 = arith.constant 0 : i32
    %c0_i32_0 = arith.constant 0 : i32
    %c0_i32_1 = arith.constant 0 : i32
    return %c0_i32, %c0_i32_0 : i32, i32
  }
  func.func @transform_3(%arg0: i32, %arg1: i32) -> (i32, i32) {
    %c0_i32 = arith.constant 0 : i32
    %c0_i32_0 = arith.constant 0 : i32
    %c0_i32_1 = arith.constant 0 : i32
    return %c0_i32, %c0_i32_0 : i32, i32
  }
  func.func @transform_4(%arg0: i32, %arg1: i32) -> (i32, i32, i32) {
    %c0_i32 = arith.constant 0 : i32
    %c0_i32_0 = arith.constant 0 : i32
    %c0_i32_1 = arith.constant 0 : i32
    %c0_i32_2 = arith.constant 0 : i32
    return %c0_i32, %c0_i32_0, %c0_i32_1 : i32, i32, i32
  }
  func.func @transform_5(%arg0: i32, %arg1: i32) -> (i32, i32) {
    %c0_i32 = arith.constant 0 : i32
    %c0_i32_0 = arith.constant 0 : i32
    %c0_i32_1 = arith.constant 0 : i32
    return %c0_i32, %c0_i32_0 : i32, i32
  }
  func.func @transform_6(%arg0: i32, %arg1: i32) -> (i32, i32, i32) {
    %c0_i32 = arith.constant 0 : i32
    %c0_i32_0 = arith.constant 0 : i32
    %c0_i32_1 = arith.constant 0 : i32
    %c0_i32_2 = arith.constant 0 : i32
    return %c0_i32, %c0_i32_0, %c0_i32_1 : i32, i32, i32
  }
  func.func @transform_7(%arg0: i32, %arg1: i32) -> (i32, i32) {
    %c0_i32 = arith.constant 0 : i32
    %c0_i32_0 = arith.constant 0 : i32
    %c0_i32_1 = arith.constant 0 : i32
    return %c0_i32, %c0_i32_0 : i32, i32
  }
  func.func @transform_8(%arg0: i32, %arg1: i32) -> (i32, i32, i32, i32) {
    %c0_i32 = arith.constant 0 : i32
    %c0_i32_0 = arith.constant 0 : i32
    %c0_i32_1 = arith.constant 0 : i32
    return %arg0, %arg1, %c0_i32, %c0_i32_0 : i32, i32, i32, i32
  }
}

module attributes {stable_mosaic.version = 11 : i64} {
  func.func @rdb_kernel(%arg0: i32, %arg1: i32, %arg2: memref<1x1x128x128xbf16, #tpu.memory_space<vmem>>, %arg3: memref<1x128x1xf32, #tpu.memory_space<vmem>>, %arg4: memref<128x256xbf16, #tpu.memory_space<vmem>>, %arg5: memref<1x256xf32, #tpu.memory_space<vmem>>, %arg6: memref<9x128x128xbf16, #tpu.memory_space<vmem>>, %arg7: memref<1x128xf32, #tpu.memory_space<vmem>>, %arg8: memref<9x128x128xbf16, #tpu.memory_space<vmem>>, %arg9: memref<1x128xf32, #tpu.memory_space<vmem>>, %arg10: memref<1x1x64x128xf32, #tpu.memory_space<vmem>>, %arg11: memref<16x18x128xbf16, #tpu.memory_space<vmem>>) attributes {dimension_semantics = [#tpu.dimension_semantics<parallel>, #tpu.dimension_semantics<parallel>], iteration_bounds = array<i64: 2, 1>, scalar_prefetch = 0 : i64, scratch_operands = 1 : i64, tpu.core_type = #tpu.core_type<tc>, window_params = [{transform_indices = @transform_0, window_bounds = array<i64: 1, 1, 128, 128>}, {transform_indices = @transform_1, window_bounds = array<i64: 1, 128, 1>}, {pipeline_mode = #tpu.pipeline_mode<synchronous>, transform_indices = @transform_2, window_bounds = array<i64: 128, 256>}, {pipeline_mode = #tpu.pipeline_mode<synchronous>, transform_indices = @transform_3, window_bounds = array<i64: 1, 256>}, {pipeline_mode = #tpu.pipeline_mode<synchronous>, transform_indices = @transform_4, window_bounds = array<i64: 9, 128, 128>}, {pipeline_mode = #tpu.pipeline_mode<synchronous>, transform_indices = @transform_5, window_bounds = array<i64: 1, 128>}, {pipeline_mode = #tpu.pipeline_mode<synchronous>, transform_indices = @transform_6, window_bounds = array<i64: 9, 128, 128>}, {pipeline_mode = #tpu.pipeline_mode<synchronous>, transform_indices = @transform_7, window_bounds = array<i64: 1, 128>}, {transform_indices = @transform_8, window_bounds = array<i64: 1, 1, 64, 128>}]} {
    %cst = arith.constant 0.000000e+00 : bf16
    %0 = vector.broadcast %cst : bf16 to vector<16x2x128xbf16>
    %c0 = arith.constant 0 : index
    %c6 = arith.constant 6 : index
    %c0_0 = arith.constant 0 : index
    %1 = vector.load %arg11[%c0, %c6, %c0_0] : memref<16x18x128xbf16, #tpu.memory_space<vmem>>, vector<16x2x128xbf16>
    tpu.vector_store %arg11[%c0, %c6, %c0_0], %0 {strides = array<i32>} : memref<16x18x128xbf16, #tpu.memory_space<vmem>>, vector<16x2x128xbf16>,
    %cst_1 = arith.constant 0.000000e+00 : bf16
    %2 = vector.broadcast %cst_1 : bf16 to vector<16x2x128xbf16>
    %c0_2 = arith.constant 0 : index
    %c16 = arith.constant 16 : index
    %c0_3 = arith.constant 0 : index
    %3 = vector.load %arg11[%c0_2, %c16, %c0_3] : memref<16x18x128xbf16, #tpu.memory_space<vmem>>, vector<16x2x128xbf16>
    tpu.vector_store %arg11[%c0_2, %c16, %c0_3], %2 {strides = array<i32>} : memref<16x18x128xbf16, #tpu.memory_space<vmem>>, vector<16x2x128xbf16>,
    %c0_4 = arith.constant 0 : index
    %c0_5 = arith.constant 0 : index
    %c0_6 = arith.constant 0 : index
    %c0_7 = arith.constant 0 : index
    %4 = vector.load %arg2[%c0_4, %c0_5, %c0_6, %c0_7] : memref<1x1x128x128xbf16, #tpu.memory_space<vmem>>, vector<1x1x128x128xbf16>
    %5 = vector.shape_cast %4 : vector<1x1x128x128xbf16> to vector<128x128xbf16>
    %c0_8 = arith.constant 0 : index
    %c0_9 = arith.constant 0 : index
    %c0_10 = arith.constant 0 : index
    %6 = vector.load %arg3[%c0_8, %c0_9, %c0_10] : memref<1x128x1xf32, #tpu.memory_space<vmem>>, vector<1x128x1xf32>
    %7 = vector.shape_cast %6 : vector<1x128x1xf32> to vector<128x1xf32>
    %c0_11 = arith.constant 0 : index
    %c0_12 = arith.constant 0 : index
    %8 = vector.load %arg4[%c0_11, %c0_12] : memref<128x256xbf16, #tpu.memory_space<vmem>>, vector<128x256xbf16>
    %cst_13 = arith.constant dense<0.000000e+00> : vector<128x256xf32>
    %9 = tpu.matmul %5, %8, %cst_13 {dimension_numbers = #tpu.dot_dimension_numbers<[1], [0], [0], [1], [0, 0, 1, 1], [], []>} : vector<128x128xbf16>, vector<128x256xbf16>, vector<128x256xf32> -> vector<128x256xf32>
    %c0_14 = arith.constant 0 : index
    %c0_15 = arith.constant 0 : index
    %10 = vector.load %arg5[%c0_14, %c0_15] : memref<1x256xf32, #tpu.memory_space<vmem>>, vector<1x256xf32>
    %11 = vector.broadcast %10 : vector<1x256xf32> to vector<128x256xf32>
    %12 = arith.addf %9, %11 : vector<128x256xf32>
    %13 = vector.extract_strided_slice %12 {offsets = [0, 0], sizes = [128, 128], strides = [1, 1]} : vector<128x256xf32> to vector<128x128xf32>
    %cst_16 = arith.constant 0.000000e+00 : f32
    %14 = vector.broadcast %cst_16 : f32 to vector<128x128xf32>
    %15 = arith.cmpf oge, %13, %14 : vector<128x128xf32>
    %cst_17 = arith.constant 0.00999999977 : f32
    %16 = vector.broadcast %cst_17 : f32 to vector<128x128xf32>
    %17 = arith.mulf %16, %13 : vector<128x128xf32>
    %18 = arith.select %15, %13, %17 : vector<128x128xi1>, vector<128x128xf32>
    %19 = vector.broadcast %7 : vector<128x1xf32> to vector<128x128xf32>
    %20 = arith.mulf %18, %19 : vector<128x128xf32>
    %21 = arith.truncf %20 : vector<128x128xf32> to vector<128x128xbf16>
    %22 = vector.shape_cast %21 : vector<128x128xbf16> to vector<16x8x128xbf16>
    %c0_18 = arith.constant 0 : index
    %c8 = arith.constant 8 : index
    %c0_19 = arith.constant 0 : index
    %23 = vector.load %arg11[%c0_18, %c8, %c0_19] : memref<16x18x128xbf16, #tpu.memory_space<vmem>>, vector<16x8x128xbf16>
    tpu.vector_store %arg11[%c0_18, %c8, %c0_19], %22 {strides = array<i32>} : memref<16x18x128xbf16, #tpu.memory_space<vmem>>, vector<16x8x128xbf16>,
    %24 = vector.extract_strided_slice %7 {offsets = [16, 0], sizes = [96, 1], strides = [1, 1]} : vector<128x1xf32> to vector<96x1xf32>
    %c0_20 = arith.constant 0 : index
    %c6_21 = arith.constant 6 : index
    %c0_22 = arith.constant 0 : index
    %25 = vector.load %arg11[%c0_20, %c6_21, %c0_22] : memref<16x18x128xbf16, #tpu.memory_space<vmem>>, vector<12x8x128xbf16>
    %26 = vector.shape_cast %25 : vector<12x8x128xbf16> to vector<96x128xbf16>
    %c0_23 = arith.constant 0 : index
    %c0_24 = arith.constant 0 : index
    %c0_25 = arith.constant 0 : index
    %27 = vector.load %arg6[%c0_23, %c0_24, %c0_25] : memref<9x128x128xbf16, #tpu.memory_space<vmem>>, vector<1x128x128xbf16>
    %28 = vector.shape_cast %27 : vector<1x128x128xbf16> to vector<128x128xbf16>
    %cst_26 = arith.constant dense<0.000000e+00> : vector<96x128xf32>
    %29 = tpu.matmul %26, %28, %cst_26 {dimension_numbers = #tpu.dot_dimension_numbers<[1], [0], [0], [1], [0, 0, 1, 1], [], []>} : vector<96x128xbf16>, vector<128x128xbf16>, vector<96x128xf32> -> vector<96x128xf32>
    %c0_27 = arith.constant 0 : index
    %c0_28 = arith.constant 0 : index
    %30 = vector.load %arg7[%c0_27, %c0_28] : memref<1x128xf32, #tpu.memory_space<vmem>>, vector<1x128xf32>
    %31 = vector.broadcast %30 : vector<1x128xf32> to vector<96x128xf32>
    %32 = arith.addf %29, %31 : vector<96x128xf32>
    %c0_29 = arith.constant 0 : index
    %c8_30 = arith.constant 8 : index
    %c0_31 = arith.constant 0 : index
    %33 = vector.load %arg11[%c0_29, %c8_30, %c0_31] : memref<16x18x128xbf16, #tpu.memory_space<vmem>>, vector<12x8x128xbf16>
    %34 = vector.shape_cast %33 : vector<12x8x128xbf16> to vector<96x128xbf16>
    %c1 = arith.constant 1 : index
    %c0_32 = arith.constant 0 : index
    %c0_33 = arith.constant 0 : index
    %35 = vector.load %arg6[%c1, %c0_32, %c0_33] : memref<9x128x128xbf16, #tpu.memory_space<vmem>>, vector<1x128x128xbf16>
    %36 = vector.shape_cast %35 : vector<1x128x128xbf16> to vector<128x128xbf16>
    %cst_34 = arith.constant dense<0.000000e+00> : vector<96x128xf32>
    %37 = tpu.matmul %34, %36, %cst_34 {dimension_numbers = #tpu.dot_dimension_numbers<[1], [0], [0], [1], [0, 0, 1, 1], [], []>} : vector<96x128xbf16>, vector<128x128xbf16>, vector<96x128xf32> -> vector<96x128xf32>
    %38 = arith.addf %32, %37 : vector<96x128xf32>
    %c0_35 = arith.constant 0 : index
    %c10 = arith.constant 10 : index
    %c0_36 = arith.constant 0 : index
    %39 = vector.load %arg11[%c0_35, %c10, %c0_36] : memref<16x18x128xbf16, #tpu.memory_space<vmem>>, vector<12x8x128xbf16>
    %40 = vector.shape_cast %39 : vector<12x8x128xbf16> to vector<96x128xbf16>
    %c2 = arith.constant 2 : index
    %c0_37 = arith.constant 0 : index
    %c0_38 = arith.constant 0 : index
    %41 = vector.load %arg6[%c2, %c0_37, %c0_38] : memref<9x128x128xbf16, #tpu.memory_space<vmem>>, vector<1x128x128xbf16>
    %42 = vector.shape_cast %41 : vector<1x128x128xbf16> to vector<128x128xbf16>
    %cst_39 = arith.constant dense<0.000000e+00> : vector<96x128xf32>
    %43 = tpu.matmul %40, %42, %cst_39 {dimension_numbers = #tpu.dot_dimension_numbers<[1], [0], [0], [1], [0, 0, 1, 1], [], []>} : vector<96x128xbf16>, vector<128x128xbf16>, vector<96x128xf32> -> vector<96x128xf32>
    %44 = arith.addf %38, %43 : vector<96x128xf32>
    %c2_40 = arith.constant 2 : index
    %c6_41 = arith.constant 6 : index
    %c0_42 = arith.constant 0 : index
    %45 = vector.load %arg11[%c2_40, %c6_41, %c0_42] : memref<16x18x128xbf16, #tpu.memory_space<vmem>>, vector<12x8x128xbf16>
    %46 = vector.shape_cast %45 : vector<12x8x128xbf16> to vector<96x128xbf16>
    %c3 = arith.constant 3 : index
    %c0_43 = arith.constant 0 : index
    %c0_44 = arith.constant 0 : index
    %47 = vector.load %arg6[%c3, %c0_43, %c0_44] : memref<9x128x128xbf16, #tpu.memory_space<vmem>>, vector<1x128x128xbf16>
    %48 = vector.shape_cast %47 : vector<1x128x128xbf16> to vector<128x128xbf16>
    %cst_45 = arith.constant dense<0.000000e+00> : vector<96x128xf32>
    %49 = tpu.matmul %46, %48, %cst_45 {dimension_numbers = #tpu.dot_dimension_numbers<[1], [0], [0], [1], [0, 0, 1, 1], [], []>} : vector<96x128xbf16>, vector<128x128xbf16>, vector<96x128xf32> -> vector<96x128xf32>
    %50 = arith.addf %44, %49 : vector<96x128xf32>
    %c2_46 = arith.constant 2 : index
    %c8_47 = arith.constant 8 : index
    %c0_48 = arith.constant 0 : index
    %51 = vector.load %arg11[%c2_46, %c8_47, %c0_48] : memref<16x18x128xbf16, #tpu.memory_space<vmem>>, vector<12x8x128xbf16>
    %52 = vector.shape_cast %51 : vector<12x8x128xbf16> to vector<96x128xbf16>
    %c4 = arith.constant 4 : index
    %c0_49 = arith.constant 0 : index
    %c0_50 = arith.constant 0 : index
    %53 = vector.load %arg6[%c4, %c0_49, %c0_50] : memref<9x128x128xbf16, #tpu.memory_space<vmem>>, vector<1x128x128xbf16>
    %54 = vector.shape_cast %53 : vector<1x128x128xbf16> to vector<128x128xbf16>
    %cst_51 = arith.constant dense<0.000000e+00> : vector<96x128xf32>
    %55 = tpu.matmul %52, %54, %cst_51 {dimension_numbers = #tpu.dot_dimension_numbers<[1], [0], [0], [1], [0, 0, 1, 1], [], []>} : vector<96x128xbf16>, vector<128x128xbf16>, vector<96x128xf32> -> vector<96x128xf32>
    %56 = arith.addf %50, %55 : vector<96x128xf32>
    %c2_52 = arith.constant 2 : index
    %c10_53 = arith.constant 10 : index
    %c0_54 = arith.constant 0 : index
    %57 = vector.load %arg11[%c2_52, %c10_53, %c0_54] : memref<16x18x128xbf16, #tpu.memory_space<vmem>>, vector<12x8x128xbf16>
    %58 = vector.shape_cast %57 : vector<12x8x128xbf16> to vector<96x128xbf16>
    %c5 = arith.constant 5 : index
    %c0_55 = arith.constant 0 : index
    %c0_56 = arith.constant 0 : index
    %59 = vector.load %arg6[%c5, %c0_55, %c0_56] : memref<9x128x128xbf16, #tpu.memory_space<vmem>>, vector<1x128x128xbf16>
    %60 = vector.shape_cast %59 : vector<1x128x128xbf16> to vector<128x128xbf16>
    %cst_57 = arith.constant dense<0.000000e+00> : vector<96x128xf32>
    %61 = tpu.matmul %58, %60, %cst_57 {dimension_numbers = #tpu.dot_dimension_numbers<[1], [0], [0], [1], [0, 0, 1, 1], [], []>} : vector<96x128xbf16>, vector<128x128xbf16>, vector<96x128xf32> -> vector<96x128xf32>
    %62 = arith.addf %56, %61 : vector<96x128xf32>
    %c4_58 = arith.constant 4 : index
    %c6_59 = arith.constant 6 : index
    %c0_60 = arith.constant 0 : index
    %63 = vector.load %arg11[%c4_58, %c6_59, %c0_60] : memref<16x18x128xbf16, #tpu.memory_space<vmem>>, vector<12x8x128xbf16>
    %64 = vector.shape_cast %63 : vector<12x8x128xbf16> to vector<96x128xbf16>
    %c6_61 = arith.constant 6 : index
    %c0_62 = arith.constant 0 : index
    %c0_63 = arith.constant 0 : index
    %65 = vector.load %arg6[%c6_61, %c0_62, %c0_63] : memref<9x128x128xbf16, #tpu.memory_space<vmem>>, vector<1x128x128xbf16>
    %66 = vector.shape_cast %65 : vector<1x128x128xbf16> to vector<128x128xbf16>
    %cst_64 = arith.constant dense<0.000000e+00> : vector<96x128xf32>
    %67 = tpu.matmul %64, %66, %cst_64 {dimension_numbers = #tpu.dot_dimension_numbers<[1], [0], [0], [1], [0, 0, 1, 1], [], []>} : vector<96x128xbf16>, vector<128x128xbf16>, vector<96x128xf32> -> vector<96x128xf32>
    %68 = arith.addf %62, %67 : vector<96x128xf32>
    %c4_65 = arith.constant 4 : index
    %c8_66 = arith.constant 8 : index
    %c0_67 = arith.constant 0 : index
    %69 = vector.load %arg11[%c4_65, %c8_66, %c0_67] : memref<16x18x128xbf16, #tpu.memory_space<vmem>>, vector<12x8x128xbf16>
    %70 = vector.shape_cast %69 : vector<12x8x128xbf16> to vector<96x128xbf16>
    %c7 = arith.constant 7 : index
    %c0_68 = arith.constant 0 : index
    %c0_69 = arith.constant 0 : index
    %71 = vector.load %arg6[%c7, %c0_68, %c0_69] : memref<9x128x128xbf16, #tpu.memory_space<vmem>>, vector<1x128x128xbf16>
    %72 = vector.shape_cast %71 : vector<1x128x128xbf16> to vector<128x128xbf16>
    %cst_70 = arith.constant dense<0.000000e+00> : vector<96x128xf32>
    %73 = tpu.matmul %70, %72, %cst_70 {dimension_numbers = #tpu.dot_dimension_numbers<[1], [0], [0], [1], [0, 0, 1, 1], [], []>} : vector<96x128xbf16>, vector<128x128xbf16>, vector<96x128xf32> -> vector<96x128xf32>
    %74 = arith.addf %68, %73 : vector<96x128xf32>
    %c4_71 = arith.constant 4 : index
    %c10_72 = arith.constant 10 : index
    %c0_73 = arith.constant 0 : index
    %75 = vector.load %arg11[%c4_71, %c10_72, %c0_73] : memref<16x18x128xbf16, #tpu.memory_space<vmem>>, vector<12x8x128xbf16>
    %76 = vector.shape_cast %75 : vector<12x8x128xbf16> to vector<96x128xbf16>
    %c8_74 = arith.constant 8 : index
    %c0_75 = arith.constant 0 : index
    %c0_76 = arith.constant 0 : index
    %77 = vector.load %arg6[%c8_74, %c0_75, %c0_76] : memref<9x128x128xbf16, #tpu.memory_space<vmem>>, vector<1x128x128xbf16>
    %78 = vector.shape_cast %77 : vector<1x128x128xbf16> to vector<128x128xbf16>
    %cst_77 = arith.constant dense<0.000000e+00> : vector<96x128xf32>
    %79 = tpu.matmul %76, %78, %cst_77 {dimension_numbers = #tpu.dot_dimension_numbers<[1], [0], [0], [1], [0, 0, 1, 1], [], []>} : vector<96x128xbf16>, vector<128x128xbf16>, vector<96x128xf32> -> vector<96x128xf32>
    %80 = arith.addf %74, %79 : vector<96x128xf32>
    %cst_78 = arith.constant 0.000000e+00 : f32
    %81 = vector.broadcast %cst_78 : f32 to vector<96x128xf32>
    %82 = arith.cmpf oge, %80, %81 : vector<96x128xf32>
    %cst_79 = arith.constant 0.00999999977 : f32
    %83 = vector.broadcast %cst_79 : f32 to vector<96x128xf32>
    %84 = arith.mulf %83, %80 : vector<96x128xf32>
    %85 = arith.select %82, %80, %84 : vector<96x128xi1>, vector<96x128xf32>
    %86 = vector.broadcast %24 : vector<96x1xf32> to vector<96x128xf32>
    %87 = arith.mulf %85, %86 : vector<96x128xf32>
    %88 = arith.truncf %87 : vector<96x128xf32> to vector<96x128xbf16>
    %89 = vector.shape_cast %88 : vector<96x128xbf16> to vector<12x8x128xbf16>
    %c0_80 = arith.constant 0 : index
    %c8_81 = arith.constant 8 : index
    %c0_82 = arith.constant 0 : index
    %90 = vector.load %arg11[%c0_80, %c8_81, %c0_82] : memref<16x18x128xbf16, #tpu.memory_space<vmem>>, vector<12x8x128xbf16>
    tpu.vector_store %arg11[%c0_80, %c8_81, %c0_82], %89 {strides = array<i32>} : memref<16x18x128xbf16, #tpu.memory_space<vmem>>, vector<12x8x128xbf16>,
    %c0_83 = arith.constant 0 : index
    %c6_84 = arith.constant 6 : index
    %c0_85 = arith.constant 0 : index
    %91 = vector.load %arg11[%c0_83, %c6_84, %c0_85] : memref<16x18x128xbf16, #tpu.memory_space<vmem>>, vector<8x8x128xbf16>
    %92 = vector.shape_cast %91 : vector<8x8x128xbf16> to vector<64x128xbf16>
    %c0_86 = arith.constant 0 : index
    %c0_87 = arith.constant 0 : index
    %c0_88 = arith.constant 0 : index
    %93 = vector.load %arg8[%c0_86, %c0_87, %c0_88] : memref<9x128x128xbf16, #tpu.memory_space<vmem>>, vector<1x128x128xbf16>
    %94 = vector.shape_cast %93 : vector<1x128x128xbf16> to vector<128x128xbf16>
    %cst_89 = arith.constant dense<0.000000e+00> : vector<64x128xf32>
    %95 = tpu.matmul %92, %94, %cst_89 {dimension_numbers = #tpu.dot_dimension_numbers<[1], [0], [0], [1], [0, 0, 1, 1], [], []>} : vector<64x128xbf16>, vector<128x128xbf16>, vector<64x128xf32> -> vector<64x128xf32>
    %c0_90 = arith.constant 0 : index
    %c0_91 = arith.constant 0 : index
    %96 = vector.load %arg9[%c0_90, %c0_91] : memref<1x128xf32, #tpu.memory_space<vmem>>, vector<1x128xf32>
    %97 = vector.broadcast %96 : vector<1x128xf32> to vector<64x128xf32>
    %98 = arith.addf %95, %97 : vector<64x128xf32>
    %c0_92 = arith.constant 0 : index
    %c8_93 = arith.constant 8 : index
    %c0_94 = arith.constant 0 : index
    %99 = vector.load %arg11[%c0_92, %c8_93, %c0_94] : memref<16x18x128xbf16, #tpu.memory_space<vmem>>, vector<8x8x128xbf16>
    %100 = vector.shape_cast %99 : vector<8x8x128xbf16> to vector<64x128xbf16>
    %c1_95 = arith.constant 1 : index
    %c0_96 = arith.constant 0 : index
    %c0_97 = arith.constant 0 : index
    %101 = vector.load %arg8[%c1_95, %c0_96, %c0_97] : memref<9x128x128xbf16, #tpu.memory_space<vmem>>, vector<1x128x128xbf16>
    %102 = vector.shape_cast %101 : vector<1x128x128xbf16> to vector<128x128xbf16>
    %cst_98 = arith.constant dense<0.000000e+00> : vector<64x128xf32>
    %103 = tpu.matmul %100, %102, %cst_98 {dimension_numbers = #tpu.dot_dimension_numbers<[1], [0], [0], [1], [0, 0, 1, 1], [], []>} : vector<64x128xbf16>, vector<128x128xbf16>, vector<64x128xf32> -> vector<64x128xf32>
    %104 = arith.addf %98, %103 : vector<64x128xf32>
    %c0_99 = arith.constant 0 : index
    %c10_100 = arith.constant 10 : index
    %c0_101 = arith.constant 0 : index
    %105 = vector.load %arg11[%c0_99, %c10_100, %c0_101] : memref<16x18x128xbf16, #tpu.memory_space<vmem>>, vector<8x8x128xbf16>
    %106 = vector.shape_cast %105 : vector<8x8x128xbf16> to vector<64x128xbf16>
    %c2_102 = arith.constant 2 : index
    %c0_103 = arith.constant 0 : index
    %c0_104 = arith.constant 0 : index
    %107 = vector.load %arg8[%c2_102, %c0_103, %c0_104] : memref<9x128x128xbf16, #tpu.memory_space<vmem>>, vector<1x128x128xbf16>
    %108 = vector.shape_cast %107 : vector<1x128x128xbf16> to vector<128x128xbf16>
    %cst_105 = arith.constant dense<0.000000e+00> : vector<64x128xf32>
    %109 = tpu.matmul %106, %108, %cst_105 {dimension_numbers = #tpu.dot_dimension_numbers<[1], [0], [0], [1], [0, 0, 1, 1], [], []>} : vector<64x128xbf16>, vector<128x128xbf16>, vector<64x128xf32> -> vector<64x128xf32>
    %110 = arith.addf %104, %109 : vector<64x128xf32>
    %c2_106 = arith.constant 2 : index
    %c6_107 = arith.constant 6 : index
    %c0_108 = arith.constant 0 : index
    %111 = vector.load %arg11[%c2_106, %c6_107, %c0_108] : memref<16x18x128xbf16, #tpu.memory_space<vmem>>, vector<8x8x128xbf16>
    %112 = vector.shape_cast %111 : vector<8x8x128xbf16> to vector<64x128xbf16>
    %c3_109 = arith.constant 3 : index
    %c0_110 = arith.constant 0 : index
    %c0_111 = arith.constant 0 : index
    %113 = vector.load %arg8[%c3_109, %c0_110, %c0_111] : memref<9x128x128xbf16, #tpu.memory_space<vmem>>, vector<1x128x128xbf16>
    %114 = vector.shape_cast %113 : vector<1x128x128xbf16> to vector<128x128xbf16>
    %cst_112 = arith.constant dense<0.000000e+00> : vector<64x128xf32>
    %115 = tpu.matmul %112, %114, %cst_112 {dimension_numbers = #tpu.dot_dimension_numbers<[1], [0], [0], [1], [0, 0, 1, 1], [], []>} : vector<64x128xbf16>, vector<128x128xbf16>, vector<64x128xf32> -> vector<64x128xf32>
    %116 = arith.addf %110, %115 : vector<64x128xf32>
    %c2_113 = arith.constant 2 : index
    %c8_114 = arith.constant 8 : index
    %c0_115 = arith.constant 0 : index
    %117 = vector.load %arg11[%c2_113, %c8_114, %c0_115] : memref<16x18x128xbf16, #tpu.memory_space<vmem>>, vector<8x8x128xbf16>
    %118 = vector.shape_cast %117 : vector<8x8x128xbf16> to vector<64x128xbf16>
    %c4_116 = arith.constant 4 : index
    %c0_117 = arith.constant 0 : index
    %c0_118 = arith.constant 0 : index
    %119 = vector.load %arg8[%c4_116, %c0_117, %c0_118] : memref<9x128x128xbf16, #tpu.memory_space<vmem>>, vector<1x128x128xbf16>
    %120 = vector.shape_cast %119 : vector<1x128x128xbf16> to vector<128x128xbf16>
    %cst_119 = arith.constant dense<0.000000e+00> : vector<64x128xf32>
    %121 = tpu.matmul %118, %120, %cst_119 {dimension_numbers = #tpu.dot_dimension_numbers<[1], [0], [0], [1], [0, 0, 1, 1], [], []>} : vector<64x128xbf16>, vector<128x128xbf16>, vector<64x128xf32> -> vector<64x128xf32>
    %122 = arith.addf %116, %121 : vector<64x128xf32>
    %c2_120 = arith.constant 2 : index
    %c10_121 = arith.constant 10 : index
    %c0_122 = arith.constant 0 : index
    %123 = vector.load %arg11[%c2_120, %c10_121, %c0_122] : memref<16x18x128xbf16, #tpu.memory_space<vmem>>, vector<8x8x128xbf16>
    %124 = vector.shape_cast %123 : vector<8x8x128xbf16> to vector<64x128xbf16>
    %c5_123 = arith.constant 5 : index
    %c0_124 = arith.constant 0 : index
    %c0_125 = arith.constant 0 : index
    %125 = vector.load %arg8[%c5_123, %c0_124, %c0_125] : memref<9x128x128xbf16, #tpu.memory_space<vmem>>, vector<1x128x128xbf16>
    %126 = vector.shape_cast %125 : vector<1x128x128xbf16> to vector<128x128xbf16>
    %cst_126 = arith.constant dense<0.000000e+00> : vector<64x128xf32>
    %127 = tpu.matmul %124, %126, %cst_126 {dimension_numbers = #tpu.dot_dimension_numbers<[1], [0], [0], [1], [0, 0, 1, 1], [], []>} : vector<64x128xbf16>, vector<128x128xbf16>, vector<64x128xf32> -> vector<64x128xf32>
    %128 = arith.addf %122, %127 : vector<64x128xf32>
    %c4_127 = arith.constant 4 : index
    %c6_128 = arith.constant 6 : index
    %c0_129 = arith.constant 0 : index
    %129 = vector.load %arg11[%c4_127, %c6_128, %c0_129] : memref<16x18x128xbf16, #tpu.memory_space<vmem>>, vector<8x8x128xbf16>
    %130 = vector.shape_cast %129 : vector<8x8x128xbf16> to vector<64x128xbf16>
    %c6_130 = arith.constant 6 : index
    %c0_131 = arith.constant 0 : index
    %c0_132 = arith.constant 0 : index
    %131 = vector.load %arg8[%c6_130, %c0_131, %c0_132] : memref<9x128x128xbf16, #tpu.memory_space<vmem>>, vector<1x128x128xbf16>
    %132 = vector.shape_cast %131 : vector<1x128x128xbf16> to vector<128x128xbf16>
    %cst_133 = arith.constant dense<0.000000e+00> : vector<64x128xf32>
    %133 = tpu.matmul %130, %132, %cst_133 {dimension_numbers = #tpu.dot_dimension_numbers<[1], [0], [0], [1], [0, 0, 1, 1], [], []>} : vector<64x128xbf16>, vector<128x128xbf16>, vector<64x128xf32> -> vector<64x128xf32>
    %134 = arith.addf %128, %133 : vector<64x128xf32>
    %c4_134 = arith.constant 4 : index
    %c8_135 = arith.constant 8 : index
    %c0_136 = arith.constant 0 : index
    %135 = vector.load %arg11[%c4_134, %c8_135, %c0_136] : memref<16x18x128xbf16, #tpu.memory_space<vmem>>, vector<8x8x128xbf16>
    %136 = vector.shape_cast %135 : vector<8x8x128xbf16> to vector<64x128xbf16>
    %c7_137 = arith.constant 7 : index
    %c0_138 = arith.constant 0 : index
    %c0_139 = arith.constant 0 : index
    %137 = vector.load %arg8[%c7_137, %c0_138, %c0_139] : memref<9x128x128xbf16, #tpu.memory_space<vmem>>, vector<1x128x128xbf16>
    %138 = vector.shape_cast %137 : vector<1x128x128xbf16> to vector<128x128xbf16>
    %cst_140 = arith.constant dense<0.000000e+00> : vector<64x128xf32>
    %139 = tpu.matmul %136, %138, %cst_140 {dimension_numbers = #tpu.dot_dimension_numbers<[1], [0], [0], [1], [0, 0, 1, 1], [], []>} : vector<64x128xbf16>, vector<128x128xbf16>, vector<64x128xf32> -> vector<64x128xf32>
    %140 = arith.addf %134, %139 : vector<64x128xf32>
    %c4_141 = arith.constant 4 : index
    %c10_142 = arith.constant 10 : index
    %c0_143 = arith.constant 0 : index
    %141 = vector.load %arg11[%c4_141, %c10_142, %c0_143] : memref<16x18x128xbf16, #tpu.memory_space<vmem>>, vector<8x8x128xbf16>
    %142 = vector.shape_cast %141 : vector<8x8x128xbf16> to vector<64x128xbf16>
    %c8_144 = arith.constant 8 : index
    %c0_145 = arith.constant 0 : index
    %c0_146 = arith.constant 0 : index
    %143 = vector.load %arg8[%c8_144, %c0_145, %c0_146] : memref<9x128x128xbf16, #tpu.memory_space<vmem>>, vector<1x128x128xbf16>
    %144 = vector.shape_cast %143 : vector<1x128x128xbf16> to vector<128x128xbf16>
    %cst_147 = arith.constant dense<0.000000e+00> : vector<64x128xf32>
    %145 = tpu.matmul %142, %144, %cst_147 {dimension_numbers = #tpu.dot_dimension_numbers<[1], [0], [0], [1], [0, 0, 1, 1], [], []>} : vector<64x128xbf16>, vector<128x128xbf16>, vector<64x128xf32> -> vector<64x128xf32>
    %146 = arith.addf %140, %145 : vector<64x128xf32>
    %cst_148 = arith.constant 0.000000e+00 : f32
    %147 = vector.broadcast %cst_148 : f32 to vector<64x128xf32>
    %148 = arith.cmpf oge, %146, %147 : vector<64x128xf32>
    %cst_149 = arith.constant 0.00999999977 : f32
    %149 = vector.broadcast %cst_149 : f32 to vector<64x128xf32>
    %150 = arith.mulf %149, %146 : vector<64x128xf32>
    %151 = arith.select %148, %146, %150 : vector<64x128xi1>, vector<64x128xf32>
    %152 = vector.extract_strided_slice %12 {offsets = [32, 128], sizes = [64, 128], strides = [1, 1]} : vector<128x256xf32> to vector<64x128xf32>
    %153 = arith.addf %151, %152 : vector<64x128xf32>
    %c0_150 = arith.constant 0 : index
    %c0_151 = arith.constant 0 : index
    %c0_152 = arith.constant 0 : index
    %c0_153 = arith.constant 0 : index
    %154 = vector.load %arg10[%c0_150, %c0_151, %c0_152, %c0_153] : memref<1x1x64x128xf32, #tpu.memory_space<vmem>>, vector<1x1x64x128xf32>
    %155 = vector.shape_cast %154 : vector<1x1x64x128xf32> to vector<64x128xf32>
    %156 = vector.shape_cast %153 : vector<64x128xf32> to vector<1x1x64x128xf32>
    tpu.vector_store %arg10[%c0_150, %c0_151, %c0_152, %c0_153], %156 {strides = array<i32>} : memref<1x1x64x128xf32, #tpu.memory_space<vmem>>, vector<1x1x64x128xf32>,
    return
  }
  func.func @transform_0(%arg0: i32, %arg1: i32) -> (i32, i32, i32, i32) {
    %c0_i32 = arith.constant 0 : i32
    %c0_i32_0 = arith.constant 0 : i32
    %c0_i32_1 = arith.constant 0 : i32
    return %arg0, %arg1, %c0_i32, %c0_i32_0 : i32, i32, i32, i32
  }
  func.func @transform_1(%arg0: i32, %arg1: i32) -> (i32, i32, i32) {
    %c0_i32 = arith.constant 0 : i32
    %c0_i32_0 = arith.constant 0 : i32
    %c0_i32_1 = arith.constant 0 : i32
    return %arg1, %c0_i32, %c0_i32_0 : i32, i32, i32
  }
  func.func @transform_2(%arg0: i32, %arg1: i32) -> (i32, i32) {
    %c0_i32 = arith.constant 0 : i32
    %c0_i32_0 = arith.constant 0 : i32
    %c0_i32_1 = arith.constant 0 : i32
    return %c0_i32, %c0_i32_0 : i32, i32
  }
  func.func @transform_3(%arg0: i32, %arg1: i32) -> (i32, i32) {
    %c0_i32 = arith.constant 0 : i32
    %c0_i32_0 = arith.constant 0 : i32
    %c0_i32_1 = arith.constant 0 : i32
    return %c0_i32, %c0_i32_0 : i32, i32
  }
  func.func @transform_4(%arg0: i32, %arg1: i32) -> (i32, i32, i32) {
    %c0_i32 = arith.constant 0 : i32
    %c0_i32_0 = arith.constant 0 : i32
    %c0_i32_1 = arith.constant 0 : i32
    %c0_i32_2 = arith.constant 0 : i32
    return %c0_i32, %c0_i32_0, %c0_i32_1 : i32, i32, i32
  }
  func.func @transform_5(%arg0: i32, %arg1: i32) -> (i32, i32) {
    %c0_i32 = arith.constant 0 : i32
    %c0_i32_0 = arith.constant 0 : i32
    %c0_i32_1 = arith.constant 0 : i32
    return %c0_i32, %c0_i32_0 : i32, i32
  }
  func.func @transform_6(%arg0: i32, %arg1: i32) -> (i32, i32, i32) {
    %c0_i32 = arith.constant 0 : i32
    %c0_i32_0 = arith.constant 0 : i32
    %c0_i32_1 = arith.constant 0 : i32
    %c0_i32_2 = arith.constant 0 : i32
    return %c0_i32, %c0_i32_0, %c0_i32_1 : i32, i32, i32
  }
  func.func @transform_7(%arg0: i32, %arg1: i32) -> (i32, i32) {
    %c0_i32 = arith.constant 0 : i32
    %c0_i32_0 = arith.constant 0 : i32
    %c0_i32_1 = arith.constant 0 : i32
    return %c0_i32, %c0_i32_0 : i32, i32
  }
  func.func @transform_8(%arg0: i32, %arg1: i32) -> (i32, i32, i32, i32) {
    %c0_i32 = arith.constant 0 : i32
    %c0_i32_0 = arith.constant 0 : i32
    %c0_i32_1 = arith.constant 0 : i32
    return %arg0, %arg1, %c0_i32, %c0_i32_0 : i32, i32, i32, i32
  }
}

</mosaic_0001>

<bundles_post_ra>
// kernel: tpu_custom_call.1
= control target key start
LH: loop header
LB: loop body
LE: loop exit
PB: predicated region body
PF: predicated region fallthrough
CT: control target
= control target key end

     0   :  { %13 = vsyncpa [#allocation4], 0  ;;  %s8132_s0 = inlined_call_operand.vmem [shape: bf16[2,1,128,128], index: 0, kind: input, shape index: {}]   ;;  %s8133_s1 = inlined_call_operand.vmem [shape: f32[1,128,1], index: 1, kind: input, shape index: {}]   ;;  %s8134_s2 = inlined_call_operand.hbm [shape: bf16[128,256], index: 2, kind: input, shape index: {}]   ;;  %s8135_s3 = inlined_call_operand.vmem [shape: f32[1,256], index: 3, kind: input, shape index: {}]   ;;  %s8136_s4 = inlined_call_operand.hbm [shape: bf16[9,128,128], index: 4, kind: input, shape index: {}]   ;;  %s8137_s5 = inlined_call_operand.vmem [shape: f32[1,128], index: 5, kind: input, shape index: {}]   ;;  %s8138_s6 = inlined_call_operand.hbm [shape: bf16[9,128,128], index: 6, kind: input, shape index: {}]   ;;  %s8139_s7 = inlined_call_operand.vmem [shape: f32[1,128], index: 7, kind: input, shape index: {}]   ;;  %s8140_s8 = inlined_call_operand.hbm [shape: f32[2,1,64,128], index: 8, kind: output, shape index: {}]  }
   0x1   :  { %14 = vsyncpa [#allocation7], 0 }
   0x2   :  { %15 = vsyncpa [#allocation5], 0 }
   0x3   :  { %17 = vsyncpa [#allocation5 + $0x1], 0  ;;  %s7024_s27 = smov 0   ;;  %s7026_s28 = smov 0  }
   0x4   :  { %s7028_s29 = smov 0   ;;  %s7030_s30 = smov 0  }
   0x5   :  { %s7032_s9 = smov 0   ;;  %s7034_s10 = smov 0  }
   0x6 LB: > { %s5342_s11 = sadd.s32 4294967295, %s6966_s10   ;;  %s5343_s12 = sadd.s32 4294967294, %s6966_s10   ;;  %s6966_s10 = sphi %s7034_s10, %s23_s10   ;;  %s6962_s9 = sphi %s7032_s9, %s8302_s9   ;;  %s6958_s30 = sphi %s7030_s30, %s8301_s30   ;;  %s6954_s29 = sphi %s7028_s29, %s8300_s29   ;;  %s6950_s28 = sphi %s7026_s28, %s8299_s28   ;;  %s6946_s27 = sphi %s7024_s27, %s8298_s27  }
   0x7   : > { %s35_s13 = sadd.s32 1, %s6962_s9  ;;  %s224_s14 = sadd.s32 1, %s6954_s29 }
   0x8   : > { %p37_p0 = scmp.ge.s32.totalorder %s35_s13, 2  ;;  %p234_p1 = scmp.ne.s32.totalorder %s6954_s29, %s6950_s28 }
   0x9   : > { %p235_p2 = scmp.eq.s32.totalorder %s5342_s11, 1  ;;  %p240_p3 = scmp.ne.s32.totalorder %s6950_s28, %s6946_s27 }
   0xa   : > { %s8304_s13 = smov (%p37_p0, %s35_s13), 0  ;;  %p241_p5 = scmp.eq.s32.totalorder %s5343_s12, 1 }
   0xb   : > { %8162 = sst [smem:[#allocation13_spill]] %s8304_s13  ;;  %p7064_p4 = por %p235_p2, %p234_p1 }
   0xc   : > { %s219_s16 = ssub.s32 %s6962_s9, %s8304_s13  ;;  %p5344_p6 = scmp.ge.s32.totalorder %s6966_s10, 1 }
   0xd   : > { %p222_p7 = scmp.eq.s32.totalorder %s219_s16, 0  ;;  %p7071_p8 = por %p241_p5, %p240_p3 }
   0xe   : > { %p248_p9 = scmp.lt.s32.totalorder %s6966_s10, 3  ;;  %p7083_p11 = scmp.eq.s32.totalorder %s5342_s11, 0 }
   0xf   : > { %s7077_s18 = scalar_select %p222_p7, %s6954_s29, %s224_s14  }
  0x10   : > { %p7079_p10 = pnand %p5344_p6, %p248_p9  ;;  %s6968_s21 = smov [#allocation6]  }
  0x11   : > { %s284_s22 = sshll.u32 %s6968_s21, 4  ;;  %s6969_s24 = smov [#allocation3]   ;;  %s285_s22 = int_to_ptr.vmem [resolvable:$true] %s284_s22 }
  0x12   : > { %p6516_p12 = pneg %p7079_p10  ;;  %s268_s25 = sshll.u32 %s6969_s24, 4  ;;  %s269_s25 = int_to_ptr.vmem [resolvable:$true] %s268_s25 }
  0x13   : > { %s6815_s26 = scalar_lea.vmem %s285_s22, 9216  ;;  %p6823_p5 = scmp.lt.s32.totalorder %s285_s22, %s285_s22 }
  0x14   : > { %p7091_p13 = pnand %p7083_p11, %p6516_p12  ;;  %p6816_p1 = scmp.ne.s32.totalorder %s285_s22, %s6815_s26 }
  0x15   : > { %p6824_p6 = scmp.lt.s32.totalorder %s6815_s26, %s6815_s26 }
  0x16   : > { %p6806_p0 = pneg %p7091_p13 }
  0x17   : > { %p6825_p7 = por %p6824_p6, %p6823_p5 }
  0x18   : > { %p6818_p2 = pnand %p6816_p1, %p6806_p0 }
  0x1a   : > { %p6819_p3 = pneg %p6818_p2 }
  0x1c   : > { %p6826_p9 = pnand %p6825_p7, %p6819_p3 }
  0x1e   : > { %6829 = shalt.err (!%p6826_p9)
}
  0x1f   : > { %s8142_s11 = smov 64   ;;  %s6971_s12 = smov 4  }
  0x20   : > { %6522 = dma.hbm_to_vmem [thread:$0]  (!%p7091_p13), %s8136_s4, 9216, %s285_s22, [#allocation7], %s8142_s11, %s8142_s11, %s6971_s12  }
  0x21   : > { %s6841_s21 = scalar_lea.vmem %s269_s25, 2048  ;;  %p6849_p3 = scmp.lt.s32.totalorder %s269_s25, %s269_s25 }
  0x22   : > { %p6842_p12 = scmp.ne.s32.totalorder %s269_s25, %s6841_s21  ;;  %p6850_p5 = scmp.lt.s32.totalorder %s6841_s21, %s6841_s21 }
  0x24   : > { %p6844_p1 = pnand %p6842_p12, %p6806_p0  ;;  %p6851_p6 = por %p6850_p5, %p6849_p3 }
  0x26   : > { %p6845_p2 = pneg %p6844_p1 }
  0x28   : > { %p6852_p7 = pnand %p6851_p6, %p6845_p2 }
  0x2a   : > { %6855 = shalt.err (!%p6852_p7)
}
  0x2b   : > { %s6972_s24 = smov 128   ;;  %s6973_s26 = smov 8  }
  0x2c   : > { %6519 = dma.hbm_to_vmem [thread:$0]  (!%p7091_p13), %s8134_s2, 2048, %s269_s25, [#allocation4], %s6972_s24, %s6972_s24, %s6973_s26  }
  0x2d   : > { %s6974_s22 = smov [#allocation8]  }
  0x2e   : > { %s300_s16 = sshll.u32 %s6974_s22, 4  ;;  %s301_s16 = int_to_ptr.vmem [resolvable:$true] %s300_s16 }
  0x2f   : > { %s6867_s11 = scalar_lea.vmem %s301_s16, 9216  ;;  %p6875_p2 = scmp.lt.s32.totalorder %s301_s16, %s301_s16 }
  0x30   : > { %p6868_p9 = scmp.ne.s32.totalorder %s301_s16, %s6867_s11  ;;  %p6876_p3 = scmp.lt.s32.totalorder %s6867_s11, %s6867_s11 }
  0x32   : > { %p6870_p12 = pnand %p6868_p9, %p6806_p0  ;;  %p6877_p5 = por %p6876_p3, %p6875_p2 }
  0x34   : > { %p6871_p1 = pneg %p6870_p12 }
  0x36   : > { %p6878_p6 = pnand %p6877_p5, %p6871_p1 }
  0x38   : > { %6881 = shalt.err (!%p6878_p6)
}
  0x39   : > { %s8168_s21 = smov 64   ;;  %331 = sbr.rel (%p7079_p10) target bundleno = 1047 (0x417), region = 52 }
  0x3a   : > { %6525 = dma.hbm_to_vmem [thread:$0]  (!%p7091_p13), %s8138_s6, 9216, %s301_s16, [#allocation7], %s8168_s21, %s8168_s21, %s6971_s12  }
  0x3e   : > { %6933 = dma.done.wait (%p7083_p11), [#allocation4], 2048  }
  0x3f   : > { %6935 = vsyncadd (%p7083_p11), [#allocation4], 4294965248 }
  0x40   : > { %6937 = dma.done.wait (%p7083_p11), [#allocation7], 18432  }
  0x41   : > { %6939 = vsyncadd (%p7083_p11), [#allocation7], 4294948864  ;;  %v6975_v0 = vmov 0   ;;  %p382_p10 = scmp.lt.s32.totalorder %s6958_s30, 1  ;;  %v6597_v1 = vld [vmem:[#allocation3 + $0x74] ss:$8 sps:$4 sm:$0xff]   ;;  %v479_v59 = vlaneseq }
  0x42   : > { %649 = vmatprep.mubr.bf16.mxu0 %v6975_v0  ;;  %397 = vst [vmem:[#allocation2] sm:$0x8] %v6975_v0  ;;  %398 = vst [vmem:[#allocation2 + $0xc] sm:$0x8] %v6975_v0  ;;  %6595 = vset.pattern.permute.xlu0 %v6975_v0  ;;  %v6599_v2 = vld [vmem:[#allocation3 + $0x70] ss:$8 sps:$4 sm:$0xff]  }
  0x43   : > { %399 = vst [vmem:[#allocation2 + $0x18] sm:$0x8] %v6975_v0  ;;  %400 = vst [vmem:[#allocation2 + $0x24] sm:$0x8] %v6975_v0  ;;  %6596 = vset.pattern.permute.xlu1 %v6975_v0  ;;  %617 = vmatprep.subr.bf16.mxu0 %v6597_v1  ;;  %v6600_v3 = vld [vmem:[#allocation3 + $0x64] ss:$8 sps:$4 sm:$0xff]  }
  0x44   : > { %401 = vst [vmem:[#allocation2 + $0x30] sm:$0x8] %v6975_v0  ;;  %402 = vst [vmem:[#allocation2 + $0x3c] sm:$0x8] %v6975_v0  ;;  %s383_s19 = scalar_select %p382_p10, %s6958_s30, 1  ;;  %618 = vmatpush1.bf16.msra.mxu0 %v6599_v2  ;;  %v445_v12 = vld [vmem:[%s8133_s1] sm:$0xff] }
  0x45   : > { %403 = vst [vmem:[#allocation2 + $0x48] sm:$0x8] %v6975_v0  ;;  %404 = vst [vmem:[#allocation2 + $0x54] sm:$0x8] %v6975_v0  ;;  %v6602_v4 = vld [vmem:[#allocation3 + $0x60] ss:$8 sps:$4 sm:$0xff]   ;;  %619 = vmatprep.subr.bf16.mxu0 %v6600_v3  ;;  %772 = vperm.xlu0 %6595, %v445_v12  }
  0x46   : > { %405 = vst [vmem:[#allocation2 + $0x60] sm:$0x8] %v6975_v0  ;;  %406 = vst [vmem:[#allocation2 + $0x6c] sm:$0x8] %v6975_v0  ;;  %v6603_v5 = vld [vmem:[#allocation3 + $0x54] ss:$8 sps:$4 sm:$0xff]  }
  0x47   : > { %407 = vst [vmem:[#allocation2 + $0x78] sm:$0x8] %v6975_v0  ;;  %408 = vst [vmem:[#allocation2 + $0x84] sm:$0x8] %v6975_v0  ;;  %s5770_s20 = sshll.u32 %s383_s19, 6  ;;  %v447_v14 = vld [vmem:[%s8133_s1 + $0x10] sm:$0xff] }
  0x48   : > { %409 = vst [vmem:[#allocation2 + $0x90] sm:$0x8] %v6975_v0  ;;  %410 = vst [vmem:[#allocation2 + $0x9c] sm:$0x8] %v6975_v0  ;;  %620 = vmatpush1.bf16.msra.mxu0 %v6602_v4  ;;  %v6605_v6 = vld [vmem:[#allocation3 + $0x50] ss:$8 sps:$4 sm:$0xff]   ;;  %s7177_s12 = scalar_lea.vmem %s8132_s0, %s5770_s20  ;;  %782 = vperm.xlu1 %6596, %v447_v14  }
  0x49   : > { %411 = vst [vmem:[#allocation2 + $0xa8] sm:$0x8] %v6975_v0  ;;  %412 = vst [vmem:[#allocation2 + $0xb4] sm:$0x8] %v6975_v0  ;;  %621 = vmatprep.subr.bf16.mxu0 %v6603_v5  ;;  %v6606_v7 = vld [vmem:[#allocation3 + $0x44] ss:$8 sps:$4 sm:$0xff]  }
  0x4a   : > { %413 = vst [vmem:[#allocation2 + $0x8] sm:$0x1] %v6975_v0  ;;  %414 = vst [vmem:[#allocation2 + $0x14] sm:$0x1] %v6975_v0  ;;  %v6608_v8 = vld [vmem:[#allocation3 + $0x40] ss:$8 sps:$4 sm:$0xff]  }
  0x4b   : > { %415 = vst [vmem:[#allocation2 + $0x20] sm:$0x1] %v6975_v0  ;;  %416 = vst [vmem:[#allocation2 + $0x2c] sm:$0x1] %v6975_v0  ;;  %v6609_v9 = vld [vmem:[#allocation3 + $0x34] ss:$8 sps:$4 sm:$0xff]  }
  0x4c   : > { %417 = vst [vmem:[#allocation2 + $0x38] sm:$0x1] %v6975_v0  ;;  %418 = vst [vmem:[#allocation2 + $0x44] sm:$0x1] %v6975_v0  ;;  %622 = vmatpush1.bf16.msra.mxu0 %v6605_v6  ;;  %v6611_v10 = vld [vmem:[#allocation3 + $0x30] ss:$8 sps:$4 sm:$0xff]  }
  0x4d   : > { %419 = vst [vmem:[#allocation2 + $0x50] sm:$0x1] %v6975_v0  ;;  %420 = vst [vmem:[#allocation2 + $0x5c] sm:$0x1] %v6975_v0  ;;  %623 = vmatprep.subr.bf16.mxu0 %v6606_v7  ;;  %v6612_v11 = vld [vmem:[#allocation3 + $0x24] ss:$8 sps:$4 sm:$0xff]  }
  0x4e   : > { %421 = vst [vmem:[#allocation2 + $0x68] sm:$0x1] %v6975_v0  ;;  %422 = vst [vmem:[#allocation2 + $0x74] sm:$0x1] %v6975_v0  ;;  %v6614_v13 = vld [vmem:[#allocation3 + $0x20] ss:$8 sps:$4 sm:$0xff]  }
  0x4f   : > { %423 = vst [vmem:[#allocation2 + $0x80] sm:$0x1] %v6975_v0  ;;  %424 = vst [vmem:[#allocation2 + $0x8c] sm:$0x1] %v6975_v0  ;;  %v6615_v15 = vld [vmem:[#allocation3 + $0x14] ss:$8 sps:$4 sm:$0xff]  }
  0x50   : > { %425 = vst [vmem:[#allocation2 + $0x98] sm:$0x1] %v6975_v0  ;;  %426 = vst [vmem:[#allocation2 + $0xa4] sm:$0x1] %v6975_v0  ;;  %624 = vmatpush1.bf16.msra.mxu0 %v6608_v8  ;;  %v446_v16 = vld [vmem:[%s8133_s1 + $0x8] sm:$0xff]  ;;  %v448_v17 = vld [vmem:[%s8133_s1 + $0x18] sm:$0xff] }
  0x51   : > { %427 = vst [vmem:[#allocation2 + $0xb0] sm:$0x1] %v6975_v0  ;;  %428 = vst [vmem:[#allocation2 + $0xbc] sm:$0x1] %v6975_v0  ;;  %625 = vmatprep.subr.bf16.mxu0 %v6609_v9  ;;  %v6617_v18 = vld [vmem:[#allocation3 + $0x10] ss:$8 sps:$4 sm:$0xff]   ;;  %777 = vperm.xlu0 %6595, %v446_v16  }
  0x52   : > { %v6618_v19 = vld [vmem:[#allocation3 + $0x4] ss:$8 sps:$4 sm:$0xff]   ;;  %787 = vperm.xlu1 %6596, %v448_v17   ;;  %v6620_v22 = vld [vmem:[#allocation3] ss:$8 sps:$4 sm:$0xff]   ;;  %v451_v23 = vld [vmem:[%s8133_s1 + $0x30] sm:$0xff]  ;;  %v7248_v60 = vshrl.u32 %v479_v59, 7 }
  0x53   : > { %v449_v20 = vld [vmem:[%s8133_s1 + $0x20] sm:$0xff]  ;;  %v450_v21 = vld [vmem:[%s8133_s1 + $0x28] sm:$0xff]  ;;  %v452_v24 = vld [vmem:[%s8133_s1 + $0x38] sm:$0xff]  ;;  %vm994_vm3 = vcmask 1040384   ;;  %vm995_vm5 = vcmask 1044484   ;;  %vm1475_vm6 = vcmask 1042432  }
  0x54   : > { %626 = vmatpush1.bf16.msra.mxu0 %v6611_v10  ;;  %v6621_v25 = vld [vmem:[%s7177_s12] sm:$0xff]   ;;  %v454_v27 = vld [vmem:[%s8133_s1 + $0x48] sm:$0xff]  ;;  %v455_v28 = vld [vmem:[%s8133_s1 + $0x50] sm:$0xff]  ;;  %8169 = vst [vmem:[#allocation14_spill] sm:$0xff] %v7248_v60  ;;  %v481_v61 = vsub.s32 0, %v7248_v60  ;;  %vm1476_vm7 = vcmask 1046532  }
  0x55   : > { %627 = vmatprep.subr.bf16.mxu0 %v6612_v11  ;;  %792 = vperm.xlu0 %6595, %v449_v20   ;;  %v453_v26 = vld [vmem:[%s8133_s1 + $0x40] sm:$0xff]  ;;  %v456_v29 = vld [vmem:[%s8133_s1 + $0x58] sm:$0xff]  ;;  %v6622_v30 = vld [vmem:[%s7177_s12 + $0x8] sm:$0xff]   ;;  %s379_s22 = sand.u32 1, %s6950_s28   ;;  %s5799_s13 = sshll.u32 %s6958_s30, 10 }
  0x56   : > { %797 = vperm.xlu1 %6596, %v450_v21   ;;  %v457_v31 = vld [vmem:[%s8133_s1 + $0x60] sm:$0xff]  ;;  %v458_v32 = vld [vmem:[%s8133_s1 + $0x68] sm:$0xff]  ;;  %v459_v33 = vld [vmem:[%s8133_s1 + $0x70] sm:$0xff]  ;;  %s5354_s16 = sshll.u32 %s379_s22, 6  ;;  %s8079_s20 = scalar_lea.hbm %s8140_s8, %s5799_s13 }
  0x57   : > { %v460_v34 = vld [vmem:[%s8133_s1 + $0x78] sm:$0xff]  ;;  %v6623_v35 = vld [vmem:[%s7177_s12 + $0x10] sm:$0xff]   ;;  %v6625_v37 = vld [vmem:[%s7177_s12 + $0x20] sm:$0xff]   ;;  %s8056_s21 = scalar_lea.vmem [#allocation9], %s5354_s16  ;;  %s8087_s30 = scalar_lea.sflag [#allocation5], %s379_s22 }
  0x58   : > { %628 = vmatpush1.bf16.msra.mxu0 %v6614_v13  ;;  %v6624_v36 = vld [vmem:[%s7177_s12 + $0x18] sm:$0xff]   ;;  %v6626_v38 = vld [vmem:[%s7177_s12 + $0x28] sm:$0xff]   ;;  %v6627_v39 = vld [vmem:[%s7177_s12 + $0x30] sm:$0xff]   ;;  %s5214_s25 = sshll.u32 %s8056_s21, 4  ;;  %s6976_s11 = smov [#allocation9]   ;;  %s8081_s25 = int_to_ptr.vmem [resolvable:$true] %s5214_s25 }
  0x59   : > { %629 = vmatprep.subr.bf16.mxu0 %v6615_v15  ;;  %802 = vperm.xlu0 %6595, %v451_v23   ;;  %v6628_v40 = vld [vmem:[%s7177_s12 + $0x38] sm:$0xff]   ;;  %v6631_v43 = vld [vmem:[#allocation6 + $0x30] sm:$0xff]   ;;  %v6633_v45 = vld [vmem:[#allocation6 + $0x28] sm:$0xff]   ;;  %s6882_s23 = scalar_lea.vmem %s8081_s25, 1024  ;;  %s6886_s24 = sshll.u32 %s6976_s11, 4  ;;  %s6887_s24 = int_to_ptr.vmem [resolvable:$false] %s6886_s24 }
  0x5a   : > { %807 = vperm.xlu1 %6596, %v452_v24   ;;  %v6629_v41 = vld [vmem:[#allocation6 + $0x38] sm:$0xff]   ;;  %v6632_v44 = vld [vmem:[#allocation6 + $0xb0] sm:$0xff]   ;;  %v6634_v46 = vld [vmem:[#allocation6 + $0xa8] sm:$0xff]   ;;  %p6883_p11 = scmp.ne.s32.totalorder %s8081_s25, %s6882_s23  ;;  %s6888_s26 = scalar_lea.vmem %s6887_s24, 2048 }
  0x5b   : > { %v6630_v42 = vld [vmem:[#allocation6 + $0xb8] sm:$0xff]   ;;  %6034 = vmatprep.subr.bf16.mxu1 %v6629_v41  ;;  %v6635_v47 = vld [vmem:[#allocation6 + $0x20] sm:$0xff]   ;;  %v6639_v51 = vld [vmem:[#allocation6 + $0x10] sm:$0xff]   ;;  %p6889_p7 = scmp.lt.s32.totalorder %s8081_s25, %s6887_s24  ;;  %p6890_p9 = scmp.lt.s32.totalorder %s6888_s26, %s6882_s23 }
  0x5c   : > { %630 = vmatpush1.bf16.msra.mxu0 %v6617_v18  ;;  %6035 = vmatpush3.bf16.msra.mxu1 %v6629_v41  ;;  %v6636_v48 = vld [vmem:[#allocation6 + $0xa0] sm:$0xff]   ;;  %v6637_v49 = vld [vmem:[#allocation6 + $0x18] sm:$0xff]   ;;  %v6640_v52 = vld [vmem:[#allocation6 + $0x90] sm:$0xff]   ;;  %p6884_p13 = pnand %p6883_p11, %p7064_p4 }
  0x5d   : > { %631 = vmatprep.subr.bf16.mxu0 %v6618_v19  ;;  %812 = vperm.xlu0 %6595, %v453_v26   ;;  %v6638_v50 = vld [vmem:[#allocation6 + $0x98] sm:$0xff]   ;;  %v6641_v53 = vld [vmem:[#allocation6 + $0x8] sm:$0xff]   ;;  %v6643_v55 = vld [vmem:[#allocation6] sm:$0xff]   ;;  %p6891_p12 = por %p6890_p9, %p6889_p7 }
  0x5e   : > { %817 = vperm.xlu1 %6596, %v454_v27   ;;  %6036 = vmatprep.subr.bf16.mxu1 %v6631_v43  ;;  %v6642_v54 = vld [vmem:[#allocation6 + $0x88] sm:$0xff]   ;;  %v6644_v56 = vld [vmem:[#allocation6 + $0x80] sm:$0xff]   ;;  %v7242_v57 = vld [vmem:[#allocation6 + $0x78] sm:$0xff]   ;;  %p6885_p0 = pneg %p6884_p13 }
  0x5f   : > { %v7244_v58 = vld [vmem:[#allocation6 + $0x138] sm:$0xff]   ;;  %v477_v62 = vld [vmem:[%s8135_s3] sm:$0x3]  ;;  %v946_v26 = vld [vmem:[#allocation2] sm:$0x8] }
  0x60   : > { %632 = vmatpush1.bf16.msra.mxu0 %v6620_v22  ;;  %6037 = vmatpush3.bf16.msra.mxu1 %v6631_v43  ;;  %v7254_v63 = vrot.slane %v477_v62, %v481_v61  ;;  %vm7271_vm9 = vmor %vm994_vm3, %vm995_vm5  ;;  %p6892_p1 = pnand %p6891_p12, %p6885_p0 }
  0x61   : > { %822 = vperm.xlu0 %6595, %v455_v28   ;;  %6090 = vmatprep.subr.bf16.mxu0 %v6630_v42  ;;  %v1428_v28 = vld [vmem:[#allocation2 + $0x8] sm:$0x1]  ;;  %vm7277_vm10 = vmor %vm1475_vm6, %vm1476_vm7 }
  0x62   : > { %827 = vperm.xlu1 %6596, %v456_v29   ;;  %6038 = vmatprep.subr.bf16.mxu1 %v6633_v45 }
  0x63   : > { %650 = vmatmul.mubr.bf16.vlgmr.msra.gmra.mxu0 %v6621_v25 }
  0x64   : > { %657 = vmatprep.mubr.bf16.mxu0 %v6975_v0  ;;  %6091 = vmatpush3.bf16.msra.mxu0 %v6630_v42  ;;  %v8173_v42 = vmov 0 }
  0x65   : > { %832 = vperm.xlu0 %6595, %v457_v31   ;;  %6092 = vmatprep.subr.bf16.mxu0 %v6632_v44  ;;  %v948_v31 = vld [vmem:[#allocation2 + $0xc] sm:$0x8]  ;;  %v8174_v42 = vsel %vm7271_vm9, 4294967295, %v8173_v42 }
  0x66   : > { %837 = vperm.xlu1 %6596, %v458_v32   ;;  %6039 = vmatpush3.bf16.msra.mxu1 %v6633_v45  ;;  %v1430_v32 = vld [vmem:[#allocation2 + $0x14] sm:$0x1]  ;;  %8175 = vst [vmem:[#allocation18_spill] sm:$0xff] %v8174_v42 }
  0x67   : > { %6040 = vmatprep.subr.bf16.mxu1 %v6635_v47 }
  0x68   : > { %6093 = vmatpush3.bf16.msra.mxu0 %v6632_v44  ;;  %v1480_v44 = vrot.slane %v1428_v28, 5 }
  0x69   : > { %842 = vperm.xlu0 %6595, %v459_v33   ;;  %6094 = vmatprep.subr.bf16.mxu0 %v6634_v46 }
  0x6a   : > { %847 = vperm.xlu1 %6596, %v460_v34   ;;  %6041 = vmatpush3.bf16.msra.mxu1 %v6635_v47  ;;  %v5398_v47 = vrot.slane %v948_v31, 11 }
  0x6b   : > { %658 = vmatmul.mubr.bf16.gmra.mxu0 %v6622_v30  ;;  %6042 = vmatprep.subr.bf16.mxu1 %v6637_v49 }
  0x6c   : > { %665 = vmatprep.mubr.bf16.mxu0 %v6975_v0  ;;  %6095 = vmatpush3.bf16.msra.mxu0 %v6634_v46 }
  0x6d   : > { %6096 = vmatprep.subr.bf16.mxu0 %v6636_v48 }
  0x6e   : > { %6043 = vmatpush3.bf16.msra.mxu1 %v6637_v49 }
  0x6f   : > { %6044 = vmatprep.subr.bf16.mxu1 %v6639_v51 }
  0x70   : > { %6097 = vmatpush3.bf16.msra.mxu0 %v6636_v48  ;;  %v8176_v48 = vmov 0 }
  0x71   : > { %6098 = vmatprep.subr.bf16.mxu0 %v6638_v50  ;;  %v8177_v48 = vsel %vm7277_vm10, 4294967295, %v8176_v48 }
  0x72   : > { %6045 = vmatpush3.bf16.msra.mxu1 %v6639_v51  ;;  %8178 = vst [vmem:[#allocation19_spill] sm:$0xff] %v8177_v48 }
  0x73   : > { %666 = vmatmul.mubr.bf16.gmra.mxu0 %v6623_v35  ;;  %6046 = vmatprep.subr.bf16.mxu1 %v6641_v53 }
  0x74   : > { %675 = vmatprep.mubr.bf16.mxu0 %v6975_v0  ;;  %6099 = vmatpush3.bf16.msra.mxu0 %v6638_v50  ;;  %v1484_v50 = vrot.slane %v1430_v32, 5 }
  0x75   : > { %6100 = vmatprep.subr.bf16.mxu0 %v6640_v52 }
  0x76   : > { %6047 = vmatpush3.bf16.msra.mxu1 %v6641_v53 }
  0x77   : > { %6048 = vmatprep.subr.bf16.mxu1 %v6643_v55 }
  0x78   : > { %6101 = vmatpush3.bf16.msra.mxu0 %v6640_v52 }
  0x79   : > { %6102 = vmatprep.subr.bf16.mxu0 %v6642_v54 }
  0x7a   : > { %6049 = vmatpush3.bf16.msra.mxu1 %v6643_v55 }
  0x7b   : > { %676 = vmatmul.mubr.bf16.gmra.mxu0 %v6624_v36  ;;  %6062 = vmatprep.subr.bf16.mxu1 %v7242_v57 }
  0x7c   : > { %685 = vmatprep.mubr.bf16.mxu0 %v6975_v0  ;;  %6103 = vmatpush3.bf16.msra.mxu0 %v6642_v54 }
  0x7d   : > { %6104 = vmatprep.subr.bf16.mxu0 %v6644_v56 }
  0x80   : > { %6105 = vmatpush3.bf16.msra.mxu0 %v6644_v56 }
  0x81   : > { %6146 = vmatprep.subr.bf16.mxu0 %v7244_v58 }
  0x83   : > { %686 = vmatmul.mubr.bf16.gmra.mxu0 %v6625_v37 }
  0x84   : > { %695 = vmatprep.mubr.bf16.mxu0 %v6975_v0 }
  0x8b   : > { %696 = vmatmul.mubr.bf16.gmra.mxu0 %v6626_v38 }
  0x8c   : > { %705 = vmatprep.mubr.bf16.mxu0 %v6975_v0 }
  0x93   : > { %706 = vmatmul.mubr.bf16.gmra.mxu0 %v6627_v39 }
  0x94   : > { %713 = vmatprep.mubr.bf16.mxu0 %v6975_v0 }
  0x9b   : > { %714 = vmatmul.mubr.bf16.gmra.mxu0 %v6628_v40  ;;  %v5397_v40 = vrot.slane %v946_v26, 11 }
  0xc0   : > { %v773_v3 = vpop.permute.xlu0 %772 }
  0xc3   : > { %v7259_v18 = vpop.permute.xlu1 %782 }
  0xc4   : > { %8170 = vst [vmem:[#allocation15_spill] sm:$0xff] %v7259_v18 }
  0xcc   : > { %v778_v13 = vpop.permute.xlu0 %777 }
  0xcd   : > { %v7263_v33 = vpop.permute.xlu1 %787 }
  0xce   : > { %8171 = vst [vmem:[#allocation16_spill] sm:$0xff] %v7263_v33 }
  0xd0   : > { %v7281_v51 = vpop.permute.xlu0 %792 }
  0xd1   : > { %8179 = vst [vmem:[#allocation20_spill] sm:$0xff] %v7281_v51 }
 0x123   : > { %v651_v0 = vpop.f32.mrf.mxu0 }
 0x124   : > { %v652_v1 = vadd.f32 %v651_v0, %v7254_v63 }
 0x125   : > { %v653_v2 = vpop.f32.mrf.mxu0 }
 0x126   : > { %vm722_vm0 = vcmp.ge.f32.partialorder %v652_v1, 0.0  ;;  %v738_v4 = vmul.f32 0.01, %v652_v1  ;;  %v950_v2 = vld [vmem:[#allocation2 + $0x18] sm:$0x8] }
 0x127   : > { %v654_v5 = vpop.f32.mrf.mxu0 }
 0x128   : > { %v754_v6 = vsel %vm722_vm0, %v652_v1, %v738_v4  ;;  %v655_v7 = vadd.f32 %v654_v5, %v7254_v63 }
 0x129   : > { %v850_v8 = vmul.f32 %v773_v3, %v754_v6  ;;  %v656_v9 = vpop.f32.mrf.mxu0 }
 0x12a   : > { %vm723_vm1 = vcmp.ge.f32.partialorder %v655_v7, 0.0  ;;  %v739_v10 = vmul.f32 0.01, %v655_v7  ;;  %v1432_v9 = vld [vmem:[#allocation2 + $0x20] sm:$0x1] }
 0x12b   : > { %v5771_v11 = vpack.c.bf16 %v850_v8, %v850_v8  ;;  %v659_v12 = vpop.f32.mrf.mxu0  ;;  %v952_v8 = vld [vmem:[#allocation2 + $0x24] sm:$0x8] }
 0x12c   : > { %v755_v14 = vsel %vm723_vm1, %v655_v7, %v739_v10  ;;  %v660_v15 = vadd.f32 %v659_v12, %v7254_v63  ;;  %v1434_v10 = vld [vmem:[#allocation2 + $0x2c] sm:$0x1] }
 0x12d   : > { %930 = vst [vmem:[#allocation2 + $0x4] sm:$0xf] %v5771_v11  ;;  %v851_v16 = vmul.f32 %v778_v13, %v755_v14  ;;  %v661_v17 = vpop.f32.mrf.mxu0  ;;  %v7295_v11 = vpop.permute.xlu1 %797 }
 0x12e   : > { %vm724_vm2 = vcmp.ge.f32.partialorder %v660_v15, 0.0  ;;  %v740_v19 = vmul.f32 0.01, %v660_v15  ;;  %8181 = vst [vmem:[#allocation22_spill] sm:$0xff] %v7295_v11 }
 0x12f   : > { %v5772_v20 = vpack.c.bf16 %v851_v16, %v851_v16  ;;  %v662_v21 = vpop.f32.mrf.mxu0 }
 0x130   : > { %v756_v22 = vsel %vm724_vm2, %v660_v15, %v740_v19  ;;  %v663_v23 = vadd.f32 %v662_v21, %v7254_v63  ;;  %v5399_v21 = vrot.slane %v950_v2, 11 }
 0x131   : > { %931 = vst [vmem:[#allocation2 + $0x10] sm:$0xf] %v5772_v20  ;;  %v852_v24 = vmul.f32 %v7259_v18, %v756_v22  ;;  %v664_v25 = vpop.f32.mrf.mxu0 }
 0x132   : > { %vm725_vm4 = vcmp.ge.f32.partialorder %v663_v23, 0.0  ;;  %v741_v27 = vmul.f32 0.01, %v663_v23 }
 0x133   : > { %v5773_v29 = vpack.c.bf16 %v852_v24, %v852_v24  ;;  %v667_v30 = vpop.f32.mrf.mxu0  ;;  %v1488_v24 = vrot.slane %v1432_v9, 5 }
 0x134   : > { %v757_v34 = vsel %vm725_vm4, %v663_v23, %v741_v27  ;;  %v668_v35 = vadd.f32 %v667_v30, %v7254_v63  ;;  %v947_v36 = vld [vmem:[#allocation2 + $0x4] sm:$0x7]  ;;  %v5400_v27 = vrot.slane %v952_v8, 11  ;;  %v7301_v30 = vpop.permute.xlu0 %802 }
 0x135   : > { %v1427_v37 = vld [vmem:[#allocation2 + $0x4] sm:$0xe]  ;;  %932 = vst [vmem:[#allocation2 + $0x1c] sm:$0xf] %v5773_v29  ;;  %v853_v38 = vmul.f32 %v7263_v33, %v757_v34  ;;  %v7267_v39 = vpop.f32.mrf.mxu0  ;;  %v999_v43 = vrot.slane %v947_v36, 7  ;;  %v1492_v29 = vrot.slane %v1434_v10, 5 }
 0x136   : > { %8172 = vst [vmem:[#allocation17_spill] sm:$0xff] %v7267_v39  ;;  %vm726_vm8 = vcmp.ge.f32.partialorder %v668_v35, 0.0  ;;  %v742_v41 = vmul.f32 0.01, %v668_v35  ;;  %v5438_v49 = vrot.slane %v1427_v37, 9  ;;  %8183 = vst [vmem:[#allocation24_spill] sm:$0xff] %v7301_v30 }
 0x137   : > { %v5774_v45 = vpack.c.bf16 %v853_v38, %v853_v38  ;;  %v671_v46 = vpop.f32.mrf.mxu0  ;;  %v1000_v1 = vsel %vm7271_vm9, %v5397_v40, %v999_v43  ;;  %v7304_v36 = vld [vmem:[#allocation2 + $0x30] sm:$0x8]  ;;  %v1436_v43 = vld [vmem:[#allocation2 + $0x38] sm:$0x1] }
 0x138   : > { %v758_v52 = vsel %vm726_vm8, %v668_v35, %v742_v41  ;;  %v672_v53 = vadd.f32 %v671_v46, %v7254_v63  ;;  %v949_v54 = vld [vmem:[#allocation2 + $0x10] sm:$0x7]  ;;  %v1481_v6 = vsel %vm7277_vm10, %v5438_v49, %v1480_v44  ;;  %v956_v46 = vld [vmem:[#allocation2 + $0x3c] sm:$0x8]  ;;  %v1496_v8 = vrot.slane %v1436_v43, 5 }
 0x139   : > { %v1429_v55 = vld [vmem:[#allocation2 + $0x10] sm:$0xe]  ;;  %933 = vst [vmem:[#allocation2 + $0x28] sm:$0xf] %v5774_v45  ;;  %v854_v56 = vmul.f32 %v7281_v51, %v758_v52  ;;  %v7285_v59 = vpop.f32.mrf.mxu0  ;;  %v1003_v61 = vrot.slane %v949_v54, 7 }
 0x13a   : > { %8180 = vst [vmem:[#allocation21_spill] sm:$0xff] %v7285_v59  ;;  %v5439_v62 = vrot.slane %v1429_v55, 9  ;;  %vm727_vm11 = vcmp.ge.f32.partialorder %v672_v53, 0.0  ;;  %v743_v0 = vmul.f32 0.01, %v672_v53  ;;  %v6647_v55 = vld [vmem:[#allocation6 + $0x70] sm:$0xff]  }
 0x13b   : > { %v5775_v3 = vpack.c.bf16 %v854_v56, %v854_v56  ;;  %v677_v4 = vpop.f32.mrf.mxu0  ;;  %v1004_v5 = vsel %vm7271_vm9, %v5398_v47, %v1003_v61  ;;  %v1438_v54 = vld [vmem:[#allocation2 + $0x44] sm:$0x1]  ;;  %v6648_v56 = vld [vmem:[#allocation6 + $0x130] sm:$0xff]   ;;  %v7317_v61 = vpop.permute.xlu1 %807  ;;  %v1442_v43 = vld [vmem:[#allocation2 + $0x5c] sm:$0x1] }
 0x13c   : > { %v1485_v7 = vsel %vm7277_vm10, %v5439_v62, %v1484_v50  ;;  %v759_v12 = vsel %vm727_vm11, %v672_v53, %v743_v0  ;;  %v678_v13 = vadd.f32 %v677_v4, %v7254_v63  ;;  %v5410_v14 = vcombine.low %v1000_v1, %v1004_v5  ;;  %v951_v16 = vld [vmem:[#allocation2 + $0x1c] sm:$0x7]  ;;  %8185 = vst [vmem:[#allocation26_spill] sm:$0xff] %v7317_v61 }
 0x13d   : > { %v5450_v15 = vcombine.low %v1481_v6, %v1485_v7  ;;  %v1431_v17 = vld [vmem:[#allocation2 + $0x1c] sm:$0xe]  ;;  %934 = vst [vmem:[#allocation2 + $0x34] sm:$0xf] %v5775_v3  ;;  %v855_v19 = vmul.f32 %v7295_v11, %v759_v12  ;;  %v7299_v20 = vpop.f32.mrf.mxu0  ;;  %v1007_v23 = vrot.slane %v951_v16, 7  ;;  %v5401_v7 = vrot.slane %v7304_v36, 11 }
 0x13e   : > { %8182 = vst [vmem:[#allocation23_spill] sm:$0xff] %v7299_v20  ;;  %vm728_vm12 = vcmp.ge.f32.partialorder %v678_v13, 0.0  ;;  %v744_v22 = vmul.f32 0.01, %v678_v13  ;;  %6050 = vmatprep.mubr.bf16.mxu1 %v5410_v14  ;;  %v5440_v28 = vrot.slane %v1431_v17, 9  ;;  %v1500_v16 = vrot.slane %v1438_v54, 5 }
 0x13f   : > { %6106 = vmatprep.mubr.bf16.mxu0 %v5450_v15  ;;  %v5776_v25 = vpack.c.bf16 %v855_v19, %v855_v19  ;;  %v681_v26 = vpop.f32.mrf.mxu0  ;;  %v1008_v45 = vsel %vm7271_vm9, %v5399_v21, %v1007_v23  ;;  %v5402_v15 = vrot.slane %v956_v46, 11  ;;  %v6649_v17 = vld [vmem:[#allocation6 + $0x68] sm:$0xff]   ;;  %v7326_v19 = vpop.permute.xlu0 %812 }
 0x140   : > { %v760_v31 = vsel %vm728_vm12, %v678_v13, %v744_v22  ;;  %v682_v32 = vadd.f32 %v681_v26, %v7254_v63  ;;  %v953_v34 = vld [vmem:[#allocation2 + $0x28] sm:$0x7]  ;;  %v1489_v52 = vsel %vm7277_vm10, %v5440_v28, %v1488_v24  ;;  %8187 = vst [vmem:[#allocation28_spill] sm:$0xff] %v7326_v19  ;;  %v7331_v26 = vld [vmem:[#allocation2 + $0x50] sm:$0x1]  ;;  %v7344_v46 = vpop.permute.xlu1 %817 }
 0x141   : > { %v1433_v35 = vld [vmem:[#allocation2 + $0x28] sm:$0xe]  ;;  %935 = vst [vmem:[#allocation2 + $0x40] sm:$0xf] %v5776_v25  ;;  %v856_v37 = vmul.f32 %v7301_v30, %v760_v31  ;;  %v7307_v38 = vpop.f32.mrf.mxu0  ;;  %v1011_v40 = vrot.slane %v953_v34, 7  ;;  %8189 = vst [vmem:[#allocation30_spill] sm:$0xff] %v7344_v46 }
 0x142   : > { %8184 = vst [vmem:[#allocation25_spill] sm:$0xff] %v7307_v38  ;;  %v5441_v41 = vrot.slane %v1433_v35, 9  ;;  %vm729_vm13 = vcmp.ge.f32.partialorder %v682_v32, 0.0  ;;  %v745_v44 = vmul.f32 0.01, %v682_v32 }
 0x143   : > { %v5777_v47 = vpack.c.bf16 %v856_v37, %v856_v37  ;;  %v687_v49 = vpop.f32.mrf.mxu0  ;;  %v1012_v50 = vsel %vm7271_vm9, %v5400_v27, %v1011_v40  ;;  %v7329_v25 = vld [vmem:[#allocation2 + $0x48] sm:$0x8]  ;;  %v960_v35 = vld [vmem:[#allocation2 + $0x54] sm:$0x8] }
 0x144   : > { %v1493_v53 = vsel %vm7277_vm10, %v5441_v41, %v1492_v29  ;;  %v761_v62 = vsel %vm729_vm13, %v682_v32, %v745_v44  ;;  %v688_v0 = vadd.f32 %v687_v49, %v7254_v63  ;;  %v5411_v1 = vcombine.low %v1008_v45, %v1012_v50  ;;  %v955_v3 = vld [vmem:[#allocation2 + $0x34] sm:$0x7]  ;;  %v6650_v29 = vld [vmem:[#allocation6 + $0x128] sm:$0xff]   ;;  %v6651_v44 = vld [vmem:[#allocation6 + $0x60] sm:$0xff]  }
 0x145   : > { %v5451_v2 = vcombine.low %v1489_v52, %v1493_v53  ;;  %v1435_v4 = vld [vmem:[#allocation2 + $0x34] sm:$0xe]  ;;  %936 = vst [vmem:[#allocation2 + $0x4c] sm:$0xf] %v5777_v47  ;;  %v857_v5 = vmul.f32 %v7317_v61, %v761_v62  ;;  %v7321_v6 = vpop.f32.mrf.mxu0  ;;  %v1015_v10 = vrot.slane %v955_v3, 7  ;;  %v6652_v45 = vld [vmem:[#allocation6 + $0x120] sm:$0xff]  }
 0x146   : > { %8186 = vst [vmem:[#allocation27_spill] sm:$0xff] %v7321_v6  ;;  %vm730_vm14 = vcmp.ge.f32.partialorder %v688_v0, 0.0  ;;  %v746_v9 = vmul.f32 0.01, %v688_v0  ;;  %6051 = vmatmul.mubr.bf16.vlgmr.msra.gmra.mxu1 %v5411_v1  ;;  %v5442_v12 = vrot.slane %v1435_v4, 9 }
 0x147   : > { %6107 = vmatmul.mubr.bf16.vlgmr.msra.gmra.mxu0 %v5451_v2  ;;  %v5778_v13 = vpack.c.bf16 %v857_v5, %v857_v5  ;;  %v691_v14 = vpop.f32.mrf.mxu0  ;;  %6063 = vmatpush3.bf16.msra.mxu1 %v7242_v57  ;;  %v1016_v32 = vsel %vm7271_vm9, %v5401_v7, %v1015_v10  ;;  %v5404_v7 = vrot.slane %v960_v35, 11  ;;  %v7352_v10 = vpop.permute.xlu0 %822  ;;  %v1446_v35 = vld [vmem:[#allocation2 + $0x74] sm:$0x1] }
 0x148   : > { %6147 = vmatpush3.bf16.msra.mxu0 %v7244_v58  ;;  %v762_v21 = vsel %vm730_vm14, %v688_v0, %v746_v9  ;;  %v692_v22 = vadd.f32 %v691_v14, %v7254_v63  ;;  %v957_v23 = vld [vmem:[#allocation2 + $0x40] sm:$0x7]  ;;  %6064 = vmatprep.subr.bf16.mxu1 %v6647_v55  ;;  %v1497_v34 = vsel %vm7277_vm10, %v5442_v12, %v1496_v8  ;;  %v1508_v8 = vrot.slane %v1442_v43, 5  ;;  %v6653_v9 = vld [vmem:[#allocation6 + $0x58] sm:$0xff]  }
 0x149   : > { %v1437_v24 = vld [vmem:[#allocation2 + $0x40] sm:$0xe]  ;;  %6148 = vmatprep.subr.bf16.mxu0 %v6648_v56  ;;  %937 = vst [vmem:[#allocation2 + $0x58] sm:$0xf] %v5778_v13  ;;  %v858_v57 = vmul.f32 %v7326_v19, %v762_v21  ;;  %v7334_v27 = vpop.f32.mrf.mxu0  ;;  %v1019_v58 = vrot.slane %v957_v23, 7  ;;  %8191 = vst [vmem:[#allocation32_spill] sm:$0xff] %v7352_v10 }
 0x14a   : > { %8188 = vst [vmem:[#allocation29_spill] sm:$0xff] %v7334_v27  ;;  %v5443_v28 = vrot.slane %v1437_v24, 9  ;;  %vm731_vm15 = vcmp.ge.f32.partialorder %v692_v22, 0.0  ;;  %v747_v31 = vmul.f32 0.01, %v692_v22 }
 0x14b   : > { %v5779_v36 = vpack.c.bf16 %v858_v57, %v858_v57  ;;  %v697_v37 = vpop.f32.mrf.mxu0  ;;  %v1020_v40 = vsel %vm7271_vm9, %v5402_v15, %v1019_v58  ;;  %6065 = vmatpush3.bf16.msra.mxu1 %v6647_v55  ;;  %v5403_v55 = vrot.slane %v7329_v25, 11  ;;  %v7357_v21 = vld [vmem:[#allocation2 + $0x68] sm:$0x1]  ;;  %v6654_v25 = vld [vmem:[#allocation6 + $0x118] sm:$0xff]  }
 0x14c   : > { %v1501_v41 = vsel %vm7277_vm10, %v5443_v28, %v1500_v16  ;;  %6149 = vmatpush3.bf16.msra.mxu0 %v6648_v56  ;;  %v763_v47 = vsel %vm731_vm15, %v692_v22, %v747_v31  ;;  %v698_v49 = vadd.f32 %v697_v37, %v7254_v63  ;;  %v5412_v50 = vcombine.low %v1016_v32, %v1020_v40  ;;  %v959_v53 = vld [vmem:[#allocation2 + $0x4c] sm:$0x7]  ;;  %v7355_v16 = vld [vmem:[#allocation2 + $0x60] sm:$0x8]  ;;  %v964_v28 = vld [vmem:[#allocation2 + $0x6c] sm:$0x8]  ;;  %v7370_v40 = vpop.permute.xlu1 %827 }
 0x14d   : > { %v5452_v52 = vcombine.low %v1497_v34, %v1501_v41  ;;  %6066 = vmatprep.subr.bf16.mxu1 %v6649_v17  ;;  %v1439_v54 = vld [vmem:[#allocation2 + $0x4c] sm:$0xe]  ;;  %938 = vst [vmem:[#allocation2 + $0x64] sm:$0xf] %v5779_v36  ;;  %v859_v62 = vmul.f32 %v7344_v46, %v763_v47  ;;  %v7348_v0 = vpop.f32.mrf.mxu0  ;;  %6150 = vmatprep.subr.bf16.mxu0 %v6650_v29  ;;  %v1504_v56 = vrot.slane %v7331_v26, 5  ;;  %v1023_v2 = vrot.slane %v959_v53, 7 }
 0x14e   : > { %8190 = vst [vmem:[#allocation31_spill] sm:$0xff] %v7348_v0  ;;  %vm732_vm0 = vcmp.ge.f32.partialorder %v698_v49, 0.0  ;;  %v748_v1 = vmul.f32 0.01, %v698_v49  ;;  %6054 = vmatprep.mubr.bf16.mxu1 %v5412_v50  ;;  %v5444_v3 = vrot.slane %v1439_v54, 9  ;;  %v6655_v36 = vld [vmem:[#allocation6 + $0x50] sm:$0xff]  }
 0x14f   : > { %6110 = vmatprep.mubr.bf16.mxu0 %v5452_v52  ;;  %v5780_v4 = vpack.c.bf16 %v859_v62, %v859_v62  ;;  %v701_v5 = vpop.f32.mrf.mxu0  ;;  %6067 = vmatpush3.bf16.msra.mxu1 %v6649_v17  ;;  %v1024_v57 = vsel %vm7271_vm9, %v5403_v55, %v1023_v2  ;;  %v6656_v37 = vld [vmem:[#allocation6 + $0x110] sm:$0xff]   ;;  %8193 = vst [vmem:[#allocation34_spill] sm:$0xff] %v7370_v40 }
 0x150   : > { %6151 = vmatpush3.bf16.msra.mxu0 %v6650_v29  ;;  %v764_v12 = vsel %vm732_vm0, %v698_v49, %v748_v1  ;;  %v702_v13 = vadd.f32 %v701_v5, %v7254_v63  ;;  %v961_v14 = vld [vmem:[#allocation2 + $0x58] sm:$0x7]  ;;  %6068 = vmatprep.subr.bf16.mxu1 %v6651_v44  ;;  %v1505_v58 = vsel %vm7277_vm10, %v5444_v3, %v1504_v56  ;;  %v5406_v3 = vrot.slane %v964_v28, 11  ;;  %v6657_v5 = vld [vmem:[#allocation6 + $0x48] sm:$0xff]  }
 0x151   : > { %v1441_v15 = vld [vmem:[#allocation2 + $0x58] sm:$0xe]  ;;  %6152 = vmatprep.subr.bf16.mxu0 %v6652_v45  ;;  %939 = vst [vmem:[#allocation2 + $0x70] sm:$0xf] %v5780_v4  ;;  %v860_v22 = vmul.f32 %v7352_v10, %v764_v12  ;;  %v7360_v17 = vpop.f32.mrf.mxu0  ;;  %v1027_v23 = vrot.slane %v961_v14, 7  ;;  %v1516_v4 = vrot.slane %v1446_v35, 5 }
 0x152   : > { %8192 = vst [vmem:[#allocation33_spill] sm:$0xff] %v7360_v17  ;;  %v5445_v24 = vrot.slane %v1441_v15, 9  ;;  %vm733_vm1 = vcmp.ge.f32.partialorder %v702_v13, 0.0  ;;  %v749_v26 = vmul.f32 0.01, %v702_v13  ;;  %v6661_v35 = vld [vmem:[#allocation6 + $0x40] sm:$0xff]  }
 0x153   : > { %v5781_v29 = vpack.c.bf16 %v860_v22, %v860_v22  ;;  %v707_v31 = vpop.f32.mrf.mxu0  ;;  %v1028_v32 = vsel %vm7271_vm9, %v5404_v7, %v1027_v23  ;;  %6069 = vmatpush3.bf16.msra.mxu1 %v6651_v44  ;;  %v5405_v44 = vrot.slane %v7355_v16, 11  ;;  %v7376_v7 = vpop.permute.xlu0 %832  ;;  %v7379_v15 = vld [vmem:[#allocation2 + $0x78] sm:$0x8]  ;;  %v7381_v16 = vld [vmem:[#allocation2 + $0x80] sm:$0x1] }
 0x154   : > { %v1509_v34 = vsel %vm7277_vm10, %v5445_v24, %v1508_v8  ;;  %6153 = vmatpush3.bf16.msra.mxu0 %v6652_v45  ;;  %v765_v41 = vsel %vm733_vm1, %v702_v13, %v749_v26  ;;  %v708_v43 = vadd.f32 %v707_v31, %v7254_v63  ;;  %v5413_v47 = vcombine.low %v1024_v57, %v1028_v32  ;;  %v963_v50 = vld [vmem:[#allocation2 + $0x64] sm:$0x7]  ;;  %v6658_v24 = vld [vmem:[#allocation6 + $0x108] sm:$0xff]  }
 0x155   : > { %v5453_v49 = vcombine.low %v1505_v58, %v1509_v34  ;;  %6070 = vmatprep.subr.bf16.mxu1 %v6653_v9  ;;  %v1443_v52 = vld [vmem:[#allocation2 + $0x64] sm:$0xe]  ;;  %940 = vst [vmem:[#allocation2 + $0x7c] sm:$0xf] %v5781_v29  ;;  %v861_v53 = vmul.f32 %v7370_v40, %v765_v41  ;;  %v709_v54 = vpop.f32.mrf.mxu0  ;;  %6154 = vmatprep.subr.bf16.mxu0 %v6654_v25  ;;  %v1512_v45 = vrot.slane %v7357_v21, 5  ;;  %v1031_v55 = vrot.slane %v963_v50, 7 }
 0x156   : > { %vm734_vm2 = vcmp.ge.f32.partialorder %v708_v43, 0.0  ;;  %v750_v62 = vmul.f32 0.01, %v708_v43  ;;  %6055 = vmatmul.mubr.bf16.gmra.mxu1 %v5413_v47  ;;  %v5446_v56 = vrot.slane %v1443_v52, 9  ;;  %8194 = vst [vmem:[#allocation35_spill] sm:$0xff] %v7376_v7  ;;  %v6662_v41 = vld [vmem:[#allocation6 + $0x100] sm:$0xff]  }
 0x157   : > { %6111 = vmatmul.mubr.bf16.gmra.mxu0 %v5453_v49  ;;  %v5782_v1 = vpack.c.bf16 %v861_v53, %v861_v53  ;;  %v710_v2 = vpop.f32.mrf.mxu0  ;;  %6071 = vmatpush3.bf16.msra.mxu1 %v6653_v9  ;;  %v1032_v26 = vsel %vm7271_vm9, %v5405_v44, %v1031_v55  ;;  %v968_v58 = vld [vmem:[#allocation2 + $0x84] sm:$0x8]  ;;  %v1450_v34 = vld [vmem:[#allocation2 + $0x8c] sm:$0x1] }
 0x158   : > { %6155 = vmatpush3.bf16.msra.mxu0 %v6654_v25  ;;  %v766_v8 = vsel %vm734_vm2, %v708_v43, %v750_v62  ;;  %v711_v12 = vadd.f32 %v710_v2, %v7254_v63  ;;  %v965_v13 = vld [vmem:[#allocation2 + $0x70] sm:$0x7]  ;;  %6072 = vmatprep.subr.bf16.mxu1 %v6655_v36  ;;  %v1513_v57 = vsel %vm7277_vm10, %v5446_v56, %v1512_v45  ;;  %v7392_v43 = vpop.permute.xlu1 %837 }
 0x159   : > { %v1445_v14 = vld [vmem:[#allocation2 + $0x70] sm:$0xe]  ;;  %6156 = vmatprep.subr.bf16.mxu0 %v6656_v37  ;;  %941 = vst [vmem:[#allocation2 + $0x88] sm:$0xf] %v5782_v1  ;;  %v862_v21 = vmul.f32 %v7376_v7, %v766_v8  ;;  %v712_v9 = vpop.f32.mrf.mxu0  ;;  %v1035_v22 = vrot.slane %v965_v13, 7  ;;  %8195 = vst [vmem:[#allocation36_spill] sm:$0xff] %v7392_v43  ;;  %v843_v13 = vpop.permute.xlu0 %842 }
 0x15a   : > { %v5447_v23 = vrot.slane %v1445_v14, 9  ;;  %vm735_vm3 = vcmp.ge.f32.partialorder %v711_v12, 0.0  ;;  %v751_v25 = vmul.f32 0.01, %v711_v12  ;;  %v6663_v8 = vld [vmem:[#allocation6 + $0xf8] sm:$0xff]  }
 0x15b   : > { %v5783_v28 = vpack.c.bf16 %v862_v21, %v862_v21  ;;  %v715_v29 = vpop.f32.mrf.mxu0  ;;  %v1036_v31 = vsel %vm7271_vm9, %v5406_v3, %v1035_v22  ;;  %6073 = vmatpush3.bf16.msra.mxu1 %v6655_v36  ;;  %v5407_v36 = vrot.slane %v7379_v15, 11  ;;  %v5408_v3 = vrot.slane %v968_v58, 11 }
 0x15c   : > { %v1517_v32 = vsel %vm7277_vm10, %v5447_v23, %v1516_v4  ;;  %6157 = vmatpush3.bf16.msra.mxu0 %v6656_v37  ;;  %v767_v47 = vsel %vm735_vm3, %v711_v12, %v751_v25  ;;  %v716_v49 = vadd.f32 %v715_v29, %v7254_v63  ;;  %v5414_v50 = vcombine.low %v1032_v26, %v1036_v31  ;;  %v967_v53 = vld [vmem:[#allocation2 + $0x7c] sm:$0x7] }
 0x15d   : > { %v5454_v52 = vcombine.low %v1513_v57, %v1517_v32  ;;  %6074 = vmatprep.subr.bf16.mxu1 %v6657_v5  ;;  %v1447_v54 = vld [vmem:[#allocation2 + $0x7c] sm:$0xe]  ;;  %942 = vst [vmem:[#allocation2 + $0x94] sm:$0xf] %v5783_v28  ;;  %v863_v44 = vmul.f32 %v7392_v43, %v767_v47  ;;  %v717_v45 = vpop.f32.mrf.mxu0  ;;  %6158 = vmatprep.subr.bf16.mxu0 %v6658_v24  ;;  %v1520_v37 = vrot.slane %v7381_v16, 5  ;;  %v1039_v55 = vrot.slane %v967_v53, 7  ;;  %v848_v28 = vpop.permute.xlu1 %847 }
 0x15e   : > { %vm736_vm4 = vcmp.ge.f32.partialorder %v716_v49, 0.0  ;;  %v752_v62 = vmul.f32 0.01, %v716_v49  ;;  %6058 = vmatprep.mubr.bf16.mxu1 %v5414_v50  ;;  %v5448_v56 = vrot.slane %v1447_v54, 9  ;;  %v1524_v4 = vrot.slane %v1450_v34, 5  ;;  %v6664_v12 = vld [vmem:[#allocation6 + $0x1b8] sm:$0xff]  }
 0x15f   : > { %6114 = vmatprep.mubr.bf16.mxu0 %v5454_v52  ;;  %v5784_v1 = vpack.c.bf16 %v863_v44, %v863_v44  ;;  %v718_v2 = vpop.f32.mrf.mxu0  ;;  %6075 = vmatpush3.bf16.msra.mxu1 %v6657_v5  ;;  %v1040_v5 = vsel %vm7271_vm9, %v5407_v36, %v1039_v55  ;;  %v6659_v47 = vld [vmem:[#allocation2 + $0x4] ss:$12 sps:$4 sm:$0xff]   ;;  %v6665_v52 = vld [vmem:[#allocation2 + $0x1c] ss:$12 sps:$4 sm:$0xff]   ;;  %v6666_v53 = vld [vmem:[#allocation2 + $0x34] ss:$12 sps:$4 sm:$0xff]  }
 0x160   : > { %6159 = vmatpush3.bf16.msra.mxu0 %v6658_v24  ;;  %v768_v14 = vsel %vm736_vm4, %v716_v49, %v752_v62  ;;  %v719_v15 = vadd.f32 %v718_v2, %v7254_v63  ;;  %v969_v21 = vld [vmem:[#allocation2 + $0x88] sm:$0x7]  ;;  %6076 = vmatprep.subr.bf16.mxu1 %v6661_v35  ;;  %v1521_v24 = vsel %vm7277_vm10, %v5448_v56, %v1520_v37  ;;  %v6667_v54 = vld [vmem:[#allocation2 + $0x34] ss:$12 sps:$4 sm:$0xff]   ;;  %v6668_v44 = vld [vmem:[#allocation2 + $0x4c] ss:$12 sps:$4 sm:$0xff]  }
 0x161   : > { %v1449_v16 = vld [vmem:[#allocation2 + $0x88] sm:$0xe]  ;;  %6160 = vmatprep.subr.bf16.mxu0 %v6662_v41  ;;  %943 = vst [vmem:[#allocation2 + $0xa0] sm:$0xf] %v5784_v1  ;;  %v864_v9 = vmul.f32 %v843_v13, %v768_v14  ;;  %v1043_v22 = vrot.slane %v969_v21, 7  ;;  %v720_v25 = vpop.f32.mrf.mxu0  ;;  %v6677_v1 = vld [vmem:[#allocation6 + $0xe0] sm:$0xff]  }
 0x162   : > { %v5449_v23 = vrot.slane %v1449_v16, 9  ;;  %vm737_vm5 = vcmp.ge.f32.partialorder %v719_v15, 0.0  ;;  %v753_v26 = vmul.f32 0.01, %v719_v15  ;;  %v6660_v49 = vld [vmem:[#allocation2 + $0x1c] ss:$12 sps:$4 sm:$0xff]  }
 0x163   : > { %v5785_v57 = vpack.c.bf16 %v864_v9, %v864_v9  ;;  %v1044_v63 = vsel %vm7271_vm9, %v5408_v3, %v1043_v22  ;;  %6077 = vmatpush3.bf16.msra.mxu1 %v6661_v35  ;;  %v6669_v35 = vld [vmem:[#allocation6 + $0xf0] sm:$0xff]   ;;  %v6671_v45 = vld [vmem:[#allocation6 + $0xe8] sm:$0xff]   ;;  %v1711_v37 = vld [vmem:[#allocation2 + $0x24] sm:$0x8] }
 0x164   : > { %v1525_v58 = vsel %vm7277_vm10, %v5449_v23, %v1524_v4  ;;  %6161 = vmatpush3.bf16.msra.mxu0 %v6662_v41  ;;  %v769_v29 = vsel %vm737_vm5, %v719_v15, %v753_v26  ;;  %v5415_v31 = vcombine.low %v1040_v5, %v1044_v63  ;;  %6118 = vmatprep.subr.bf16.mxu1 %v6663_v8  ;;  %v6670_v41 = vld [vmem:[#allocation6 + $0x1b0] sm:$0xff]   ;;  %v6672_v36 = vld [vmem:[#allocation6 + $0x1a8] sm:$0xff]   ;;  %v2474_v55 = vld [vmem:[#allocation2 + $0x3c] sm:$0x8]  ;;  %v5465_v16 = vrot.slane %v1711_v37, 11 }
 0x165   : > { %v5455_v32 = vcombine.low %v1521_v24, %v1525_v58  ;;  %6202 = vmatprep.subr.bf16.mxu0 %v6664_v12  ;;  %944 = vst [vmem:[#allocation2 + $0xac] sm:$0xf] %v5785_v57  ;;  %v865_v34 = vmul.f32 %v848_v28, %v769_v29  ;;  %v1712_v62 = vld [vmem:[#allocation2 + $0x28] sm:$0x7]  ;;  %v6673_v56 = vld [vmem:[#allocation2 + $0x4c] ss:$12 sps:$4 sm:$0xff]  }
 0x166   : > { %6059 = vmatmul.mubr.bf16.gmra.mxu1 %v5415_v31  ;;  %v6678_v2 = vld [vmem:[#allocation6 + $0x1a0] sm:$0xff]   ;;  %v1709_v3 = vld [vmem:[#allocation2 + $0x18] sm:$0x8]  ;;  %v2472_v4 = vld [vmem:[#allocation2 + $0x30] sm:$0x8]  ;;  %v1763_v9 = vrot.slane %v1712_v62, 7 }
 0x167   : > { %6115 = vmatmul.mubr.bf16.gmra.mxu0 %v5455_v32  ;;  %v5786_v50 = vpack.c.bf16 %v865_v34, %v865_v34  ;;  %6078 = vmatprep.mubr.bf16.mxu1 %v6659_v47  ;;  %v2475_v13 = vld [vmem:[#allocation2 + $0x40] sm:$0x7]  ;;  %v1710_v14 = vld [vmem:[#allocation2 + $0x1c] sm:$0x7]  ;;  %v2473_v15 = vld [vmem:[#allocation2 + $0x34] sm:$0x7] }
 0x168   : > { %6162 = vmatprep.mubr.bf16.mxu0 %v6660_v49  ;;  %v6676_v21 = vld [vmem:[#allocation2 + $0x7c] ss:$12 sps:$4 sm:$0xff]   ;;  %v5531_v22 = vrot.slane %v2474_v55, 11  ;;  %v2526_v23 = vrot.slane %v2475_v13, 7  ;;  %v5464_v5 = vrot.slane %v1709_v3, 11  ;;  %v5530_v24 = vrot.slane %v2472_v4, 11 }
 0x169   : > { %945 = vst [vmem:[#allocation2 + $0xb8] sm:$0xf] %v5786_v50  ;;  %v6679_v25 = vld [vmem:[#allocation6 + $0xd8] sm:$0xff]   ;;  %v1759_v57 = vrot.slane %v1710_v14, 7  ;;  %v2522_v63 = vrot.slane %v2473_v15, 7  ;;  %v1764_v58 = vsel %vm7271_vm9, %v5465_v16, %v1763_v9  ;;  %v6683_v49 = vld [vmem:[#allocation6 + $0xd0] sm:$0xff]  }
 0x16a   : > { %v6680_v26 = vld [vmem:[#allocation6 + $0x198] sm:$0xff]   ;;  %v2527_v28 = vsel %vm7271_vm9, %v5531_v22, %v2526_v23  ;;  %v6682_v31 = vld [vmem:[#allocation2 + $0x94] ss:$12 sps:$4 sm:$0xff]   ;;  %v7411_v32 = vld [vmem:[#allocation2 + $0x30] sm:$0x8] }
 0x16b   : > { %v6681_v29 = vld [vmem:[#allocation2 + $0x7c] ss:$12 sps:$4 sm:$0xff]   ;;  %v1760_v34 = vsel %vm7271_vm9, %v5464_v5, %v1759_v57  ;;  %v2523_v47 = vsel %vm7271_vm9, %v5530_v24, %v2522_v63  ;;  %v6684_v50 = vld [vmem:[#allocation6 + $0x190] sm:$0xff]   ;;  %v5466_v62 = vrot.slane %v7411_v32, 11  ;;  %v7422_v55 = vld [vmem:[#allocation2 + $0x60] sm:$0x8] }
 0x16c   : > { %v6686_v37 = vld [vmem:[#allocation6 + $0x188] sm:$0xff]   ;;  %v7426_v4 = vld [vmem:[#allocation2 + $0x60] sm:$0x8]  ;;  %v1716_v13 = vld [vmem:[#allocation2 + $0x40] sm:$0x7]  ;;  %v5534_v9 = vrot.slane %v7422_v55, 11 }
 0x16d   : > { %v6687_v14 = vld [vmem:[#allocation6 + $0xc0] sm:$0xff]   ;;  %v1714_v22 = vld [vmem:[#allocation2 + $0x34] sm:$0x7]  ;;  %v2477_v23 = vld [vmem:[#allocation2 + $0x4c] sm:$0x7] }
 0x16e   : > { %6079 = vmatmul.mubr.bf16.vlgmr.msra.gmra.mxu1 %v6665_v52  ;;  %v1715_v52 = vld [vmem:[#allocation2 + $0x3c] sm:$0x8]  ;;  %v6688_v15 = vld [vmem:[#allocation6 + $0x180] sm:$0xff]   ;;  %v1718_v24 = vld [vmem:[#allocation2 + $0x4c] sm:$0x7]  ;;  %v2530_v32 = vrot.slane %v2477_v23, 7 }
 0x16f   : > { %6163 = vmatmul.mubr.bf16.vlgmr.msra.gmra.mxu0 %v6666_v53  ;;  %6119 = vmatpush3.bf16.msra.mxu1 %v6663_v8  ;;  %v6674_v8 = vld [vmem:[#allocation2 + $0x64] ss:$12 sps:$4 sm:$0xff]   ;;  %v5476_v53 = vcombine.low %v1760_v34, %v1764_v58  ;;  %v7429_v57 = vld [vmem:[#allocation2 + $0x6c] sm:$0x8]  ;;  %v2487_v55 = vld [vmem:[#allocation2 + $0x88] sm:$0x7] }
 0x170   : > { %6203 = vmatpush3.bf16.msra.mxu0 %v6664_v12  ;;  %6082 = vmatprep.mubr.bf16.mxu1 %v6667_v54  ;;  %v6675_v12 = vld [vmem:[#allocation2 + $0x64] ss:$12 sps:$4 sm:$0xff]   ;;  %v2478_v54 = vld [vmem:[#allocation2 + $0x54] sm:$0x8]  ;;  %v2490_v23 = vld [vmem:[#allocation2 + $0x9c] sm:$0x8] }
 0x171   : > { %6166 = vmatprep.mubr.bf16.mxu0 %v6668_v44  ;;  %6120 = vmatprep.subr.bf16.mxu1 %v6669_v35  ;;  %v7419_v44 = vld [vmem:[#allocation2 + $0x48] sm:$0x8]  ;;  %v2481_v58 = vld [vmem:[#allocation2 + $0x64] sm:$0x7] }
 0x172   : > { %6204 = vmatprep.subr.bf16.mxu0 %v6670_v41  ;;  %v5468_v3 = vrot.slane %v7419_v44, 11  ;;  %v2538_v44 = vrot.slane %v2481_v58, 7  ;;  %v2550_v58 = vrot.slane %v2487_v55, 7 }
 0x173   : > { %6121 = vmatpush3.bf16.msra.mxu1 %v6669_v35  ;;  %v5542_v35 = vcombine.low %v2523_v47, %v2527_v28  ;;  %v5470_v28 = vrot.slane %v7426_v4, 11 }
 0x174   : > { %6205 = vmatpush3.bf16.msra.mxu0 %v6670_v41  ;;  %6122 = vmatprep.subr.bf16.mxu1 %v6671_v45  ;;  %v7417_v41 = vld [vmem:[#allocation2 + $0x48] sm:$0x8] }
 0x175   : > { %6206 = vmatprep.subr.bf16.mxu0 %v6672_v36 }
 0x176   : > { %6083 = vmatmul.mubr.bf16.gmra.mxu1 %v6673_v56  ;;  %v5467_v56 = vrot.slane %v1715_v52, 11  ;;  %v1775_v52 = vrot.slane %v1718_v24, 7  ;;  %v6691_v24 = vld [vmem:[#allocation6 + $0x170] sm:$0xff]  }
 0x177   : > { %6167 = vmatmul.mubr.bf16.gmra.mxu0 %v6674_v8  ;;  %6123 = vmatpush3.bf16.msra.mxu1 %v6671_v45  ;;  %v1719_v45 = vld [vmem:[#allocation2 + $0x54] sm:$0x8]  ;;  %v2479_v8 = vld [vmem:[#allocation2 + $0x58] sm:$0x7] }
 0x178   : > { %6207 = vmatpush3.bf16.msra.mxu0 %v6672_v36  ;;  %6086 = vmatprep.mubr.bf16.mxu1 %v6675_v12  ;;  %v6685_v36 = vld [vmem:[#allocation6 + $0xc8] sm:$0xff]   ;;  %v5469_v16 = vrot.slane %v1719_v45, 11  ;;  %v2534_v5 = vrot.slane %v2479_v8, 7 }
 0x179   : > { %6170 = vmatprep.mubr.bf16.mxu0 %v6676_v21  ;;  %6124 = vmatprep.subr.bf16.mxu1 %v6677_v1  ;;  %v2482_v12 = vld [vmem:[#allocation2 + $0x6c] sm:$0x8]  ;;  %v1720_v21 = vld [vmem:[#allocation2 + $0x58] sm:$0x7] }
 0x17a   : > { %6208 = vmatprep.subr.bf16.mxu0 %v6678_v2  ;;  %v1779_v63 = vrot.slane %v1720_v21, 7  ;;  %v5535_v34 = vrot.slane %v2482_v12, 11  ;;  %v7448_v21 = vld [vmem:[#allocation2 + $0x78] sm:$0x8] }
 0x17b   : > { %6125 = vmatpush3.bf16.msra.mxu1 %v6677_v1  ;;  %v5532_v1 = vrot.slane %v7417_v41, 11  ;;  %v5472_v55 = vrot.slane %v7448_v21, 11  ;;  %v1732_v21 = vld [vmem:[#allocation2 + $0xa0] sm:$0x7] }
 0x17c   : > { %6209 = vmatpush3.bf16.msra.mxu0 %v6678_v2  ;;  %6126 = vmatprep.subr.bf16.mxu1 %v6679_v25  ;;  %v5533_v2 = vrot.slane %v2478_v54, 11 }
 0x17d   : > { %6210 = vmatprep.subr.bf16.mxu0 %v6680_v26 }
 0x17e   : > { %6087 = vmatmul.mubr.bf16.gmra.mxu1 %v6681_v29  ;;  %v7432_v29 = vld [vmem:[#allocation2 + $0x78] sm:$0x8]  ;;  %v2535_v54 = vsel %vm7271_vm9, %v5533_v2, %v2534_v5 }
 0x17f   : > { %6171 = vmatmul.mubr.bf16.gmra.mxu0 %v6682_v31  ;;  %6127 = vmatpush3.bf16.msra.mxu1 %v6679_v25  ;;  %v2483_v25 = vld [vmem:[#allocation2 + $0x70] sm:$0x7]  ;;  %v1767_v31 = vrot.slane %v1714_v22, 7  ;;  %v5536_v45 = vrot.slane %v7432_v29, 11  ;;  %v1728_v22 = vld [vmem:[#allocation2 + $0x88] sm:$0x7] }
 0x180   : > { %6211 = vmatpush3.bf16.msra.mxu0 %v6680_v26  ;;  %6134 = vmatprep.mubr.bf16.mxu1 %v5476_v53  ;;  %v1771_v26 = vrot.slane %v1716_v13, 7  ;;  %v2542_v47 = vrot.slane %v2483_v25, 7  ;;  %v5471_v53 = vrot.slane %v7429_v57, 11  ;;  %v1727_v13 = vld [vmem:[#allocation2 + $0x84] sm:$0x8]  ;;  %v6692_v57 = vld [vmem:[#allocation6 + $0x230] sm:$0xff]  }
 0x181   : > { %6218 = vmatprep.mubr.bf16.mxu0 %v5542_v35  ;;  %6128 = vmatprep.subr.bf16.mxu1 %v6683_v49  ;;  %v2486_v35 = vld [vmem:[#allocation2 + $0x84] sm:$0x8]  ;;  %v1768_v8 = vsel %vm7271_vm9, %v5466_v62, %v1767_v31  ;;  %v2485_v62 = vld [vmem:[#allocation2 + $0x7c] sm:$0x7]  ;;  %v2493_v29 = vld [vmem:[#allocation2 + $0xac] sm:$0x7] }
 0x182   : > { %6212 = vmatprep.subr.bf16.mxu0 %v6684_v50  ;;  %v1772_v41 = vsel %vm7271_vm9, %v5467_v56, %v1771_v26  ;;  %v2531_v56 = vsel %vm7271_vm9, %v5532_v1, %v2530_v32  ;;  %v2543_v2 = vsel %vm7271_vm9, %v5535_v34, %v2542_v47  ;;  %v5537_v12 = vrot.slane %v2486_v35, 11  ;;  %v2491_v26 = vld [vmem:[#allocation2 + $0xa0] sm:$0x7]  ;;  %v1726_v31 = vld [vmem:[#allocation2 + $0x7c] sm:$0x7] }
 0x183   : > { %6129 = vmatpush3.bf16.msra.mxu1 %v6683_v49  ;;  %v6689_v49 = vld [vmem:[#allocation6 + $0x178] sm:$0xff]   ;;  %v5543_v25 = vcombine.low %v2531_v56, %v2535_v54  ;;  %v2539_v1 = vsel %vm7271_vm9, %v5534_v9, %v2538_v44  ;;  %v7454_v32 = vld [vmem:[#allocation2 + $0x2c] sm:$0x1]  ;;  %v5473_v47 = vrot.slane %v1727_v13, 11  ;;  %v1795_v35 = vrot.slane %v1728_v22, 7 }
 0x184   : > { %6213 = vmatpush3.bf16.msra.mxu0 %v6684_v50  ;;  %6130 = vmatprep.subr.bf16.mxu1 %v6685_v36  ;;  %v6690_v50 = vld [vmem:[#allocation6 + $0x238] sm:$0xff]   ;;  %v5544_v34 = vcombine.low %v2539_v1, %v2543_v2  ;;  %v2546_v54 = vrot.slane %v2485_v62, 7  ;;  %v2558_v9 = vrot.slane %v2491_v26, 7  ;;  %v7459_v56 = vld [vmem:[#allocation2 + $0xb4] sm:$0x8]  ;;  %v6694_v2 = vld [vmem:[#allocation6 + $0x228] sm:$0xff]  }
 0x185   : > { %6214 = vmatprep.subr.bf16.mxu0 %v6686_v37  ;;  %v7456_v44 = vld [vmem:[#allocation2 + $0x9c] sm:$0x8]  ;;  %v2247_v62 = vrot.slane %v7454_v32, 5  ;;  %v5541_v1 = vrot.slane %v7459_v56, 11  ;;  %v2957_v32 = vld [vmem:[#allocation2 + $0x38] sm:$0x1] }
 0x187   : > { %6131 = vmatpush3.bf16.msra.mxu1 %v6685_v36  ;;  %v1780_v36 = vsel %vm7271_vm9, %v5469_v16, %v1779_v63  ;;  %v5477_v16 = vcombine.low %v1768_v8, %v1772_v41  ;;  %v1791_v8 = vrot.slane %v1726_v31, 7  ;;  %v1730_v31 = vld [vmem:[#allocation2 + $0x94] sm:$0x7] }
 0x188   : > { %6215 = vmatpush3.bf16.msra.mxu0 %v6686_v37  ;;  %6132 = vmatprep.subr.bf16.mxu1 %v6687_v14  ;;  %v1724_v37 = vld [vmem:[#allocation2 + $0x70] sm:$0x7] }
 0x189   : > { %6216 = vmatprep.subr.bf16.mxu0 %v6688_v15  ;;  %v1787_v63 = vrot.slane %v1724_v37, 7  ;;  %v6693_v37 = vld [vmem:[#allocation6 + $0x168] sm:$0xff]  }
 0x18b   : > { %6133 = vmatpush3.bf16.msra.mxu1 %v6687_v14  ;;  %v1776_v14 = vsel %vm7271_vm9, %v5468_v3, %v1775_v52  ;;  %v2488_v3 = vld [vmem:[#allocation2 + $0x90] sm:$0x8]  ;;  %v2489_v52 = vld [vmem:[#allocation2 + $0x94] sm:$0x7]  ;;  %v1788_v13 = vsel %vm7271_vm9, %v5471_v53, %v1787_v63  ;;  %v2194_v63 = vld [vmem:[#allocation2 + $0x20] sm:$0x1] }
 0x18c   : > { %6217 = vmatpush3.bf16.msra.mxu0 %v6688_v15  ;;  %6174 = vmatprep.subr.bf16.mxu1 %v6689_v49  ;;  %v1722_v15 = vld [vmem:[#allocation2 + $0x64] sm:$0x7]  ;;  %v5478_v5 = vcombine.low %v1776_v14, %v1780_v36  ;;  %v5539_v36 = vrot.slane %v2490_v23, 11  ;;  %v5538_v22 = vrot.slane %v2488_v3, 11  ;;  %v2554_v23 = vrot.slane %v2489_v52, 7 }
 0x18d   : > { %6258 = vmatprep.subr.bf16.mxu0 %v6690_v50  ;;  %v1783_v41 = vrot.slane %v1722_v15, 7  ;;  %v5475_v14 = vrot.slane %v7456_v44, 11  ;;  %v2495_v15 = vld [vmem:[#allocation2 + $0xb8] sm:$0x7]  ;;  %v6696_v3 = vld [vmem:[#allocation6 + $0x220] sm:$0xff]   ;;  %v1803_v52 = vrot.slane %v1732_v21, 7 }
 0x18e   : > { %6135 = vmatmul.mubr.bf16.vlgmr.msra.gmra.mxu1 %v5477_v16  ;;  %v1729_v16 = vld [vmem:[#allocation2 + $0x90] sm:$0x8]  ;;  %v2559_v26 = vsel %vm7271_vm9, %v5539_v36, %v2558_v9  ;;  %v2956_v44 = vld [vmem:[#allocation2 + $0x34] sm:$0xe] }
 0x18f   : > { %6219 = vmatmul.mubr.bf16.vlgmr.msra.gmra.mxu0 %v5543_v25  ;;  %6138 = vmatprep.mubr.bf16.mxu1 %v5478_v5  ;;  %v2959_v25 = vld [vmem:[#allocation2 + $0x44] sm:$0x1]  ;;  %v1784_v53 = vsel %vm7271_vm9, %v5470_v28, %v1783_v41  ;;  %v2492_v5 = vld [vmem:[#allocation2 + $0xa8] sm:$0x8]  ;;  %v1792_v28 = vsel %vm7271_vm9, %v5472_v55, %v1791_v8  ;;  %v2566_v41 = vrot.slane %v2495_v15, 7  ;;  %v5474_v36 = vrot.slane %v1729_v16, 11 }
 0x190   : > { %6175 = vmatpush3.bf16.msra.mxu1 %v6689_v49  ;;  %6222 = vmatprep.mubr.bf16.mxu0 %v5544_v34  ;;  %v2551_v49 = vsel %vm7271_vm9, %v5537_v12, %v2550_v58  ;;  %v2547_v12 = vsel %vm7271_vm9, %v5536_v45, %v2546_v54  ;;  %v2195_v58 = vld [vmem:[#allocation2 + $0x28] sm:$0xe]  ;;  %v2958_v34 = vld [vmem:[#allocation2 + $0x40] sm:$0xe]  ;;  %v3010_v55 = vrot.slane %v2959_v25, 5  ;;  %v1799_v8 = vrot.slane %v1730_v31, 7 }
 0x191   : > { %6259 = vmatpush3.bf16.msra.mxu0 %v6690_v50  ;;  %6176 = vmatprep.subr.bf16.mxu1 %v6691_v24  ;;  %v1796_v50 = vsel %vm7271_vm9, %v5473_v47, %v1795_v35  ;;  %v5545_v4 = vcombine.low %v2547_v12, %v2551_v49  ;;  %v2555_v47 = vsel %vm7271_vm9, %v5538_v22, %v2554_v23  ;;  %v6695_v35 = vld [vmem:[#allocation6 + $0x160] sm:$0xff]   ;;  %v5505_v9 = vrot.slane %v2195_v58, 9  ;;  %v6697_v22 = vld [vmem:[#allocation6 + $0x158] sm:$0xff]   ;;  %v6699_v58 = vld [vmem:[#allocation6 + $0x150] sm:$0xff]  }
 0x192   : > { %6260 = vmatprep.subr.bf16.mxu0 %v6692_v57  ;;  %v5480_v45 = vcombine.low %v1792_v28, %v1796_v50  ;;  %v5546_v54 = vcombine.low %v2555_v47, %v2559_v26  ;;  %v5540_v56 = vrot.slane %v2492_v5, 11  ;;  %v5571_v49 = vrot.slane %v2958_v34, 9  ;;  %v6698_v25 = vld [vmem:[#allocation6 + $0x218] sm:$0xff]   ;;  %v2200_v31 = vld [vmem:[#allocation2 + $0x44] sm:$0x1]  ;;  %v6702_v34 = vld [vmem:[#allocation6 + $0x208] sm:$0xff]  }
 0x193   : > { %v2243_v50 = vrot.slane %v2194_v63, 5  ;;  %v1804_v21 = vsel %vm7271_vm9, %v5475_v14, %v1803_v52  ;;  %v2567_v16 = vsel %vm7271_vm9, %v5541_v1, %v2566_v41  ;;  %v5570_v15 = vrot.slane %v2956_v44, 9  ;;  %v7500_v28 = vld [vmem:[#allocation2 + $0x38] sm:$0x1]  ;;  %v2204_v47 = vld [vmem:[#allocation2 + $0x5c] sm:$0x1] }
 0x194   : > { %6177 = vmatpush3.bf16.msra.mxu1 %v6691_v24  ;;  %v5479_v24 = vcombine.low %v1784_v53, %v1788_v13  ;;  %v2562_v13 = vrot.slane %v2493_v29, 7  ;;  %v2248_v53 = vsel %vm7277_vm10, %v5505_v9, %v2247_v62  ;;  %v3011_v26 = vsel %vm7277_vm10, %v5571_v49, %v3010_v55  ;;  %v2963_v29 = vld [vmem:[#allocation2 + $0x5c] sm:$0x1]  ;;  %v2961_v52 = vld [vmem:[#allocation2 + $0x50] sm:$0x1]  ;;  %v6703_v44 = vld [vmem:[#allocation6 + $0x140] sm:$0xff]  }
 0x195   : > { %6261 = vmatpush3.bf16.msra.mxu0 %v6692_v57  ;;  %6178 = vmatprep.subr.bf16.mxu1 %v6693_v37  ;;  %v2193_v57 = vld [vmem:[#allocation2 + $0x1c] sm:$0xe]  ;;  %v3018_v41 = vrot.slane %v2963_v29, 5  ;;  %v2967_v9 = vld [vmem:[#allocation2 + $0x74] sm:$0x1]  ;;  %v6704_v49 = vld [vmem:[#allocation6 + $0x200] sm:$0xff]  }
 0x196   : > { %6262 = vmatprep.subr.bf16.mxu0 %v6694_v2  ;;  %6139 = vmatmul.mubr.bf16.gmra.mxu1 %v5479_v24  ;;  %v5504_v23 = vrot.slane %v2193_v57, 9  ;;  %v2563_v12 = vsel %vm7271_vm9, %v5540_v56, %v2562_v13  ;;  %v6700_v24 = vld [vmem:[#allocation6 + $0x210] sm:$0xff]   ;;  %v2962_v57 = vld [vmem:[#allocation2 + $0x58] sm:$0xe]  ;;  %v2965_v56 = vld [vmem:[#allocation2 + $0x68] sm:$0x1] }
 0x197   : > { %6223 = vmatmul.mubr.bf16.gmra.mxu0 %v5545_v4  ;;  %6142 = vmatprep.mubr.bf16.mxu1 %v5480_v45  ;;  %v5547_v5 = vcombine.low %v2563_v12, %v2567_v16  ;;  %v2251_v45 = vrot.slane %v7500_v28, 5  ;;  %v2197_v55 = vld [vmem:[#allocation2 + $0x34] sm:$0xe]  ;;  %v2966_v13 = vld [vmem:[#allocation2 + $0x70] sm:$0xe]  ;;  %v3026_v12 = vrot.slane %v2967_v9, 5 }
 0x198   : > { %6179 = vmatpush3.bf16.msra.mxu1 %v6693_v37  ;;  %6226 = vmatprep.mubr.bf16.mxu0 %v5546_v54  ;;  %v3006_v37 = vrot.slane %v2957_v32, 5  ;;  %v2244_v1 = vsel %vm7277_vm10, %v5504_v23, %v2243_v50  ;;  %v6701_v32 = vld [vmem:[#allocation6 + $0x148] sm:$0xff]   ;;  %v2202_v54 = vld [vmem:[#allocation2 + $0x50] sm:$0x1] }
 0x199   : > { %6263 = vmatpush3.bf16.msra.mxu0 %v6694_v2  ;;  %6180 = vmatprep.subr.bf16.mxu1 %v6695_v35  ;;  %v1800_v2 = vsel %vm7271_vm9, %v5474_v36, %v1799_v8  ;;  %v5516_v63 = vcombine.low %v2244_v1, %v2248_v53  ;;  %v2203_v36 = vld [vmem:[#allocation2 + $0x58] sm:$0xe]  ;;  %v2263_v8 = vrot.slane %v2204_v47, 5  ;;  %v2960_v23 = vld [vmem:[#allocation2 + $0x4c] sm:$0xe]  ;;  %v3014_v53 = vrot.slane %v2961_v52, 5 }
 0x19a   : > { %6264 = vmatprep.subr.bf16.mxu0 %v6696_v3  ;;  %v5481_v14 = vcombine.low %v1800_v2, %v1804_v21  ;;  %v3007_v62 = vsel %vm7277_vm10, %v5570_v15, %v3006_v37  ;;  %v2201_v50 = vld [vmem:[#allocation2 + $0x4c] sm:$0xe]  ;;  %v5573_v21 = vrot.slane %v2962_v57, 9  ;;  %v5509_v16 = vrot.slane %v2203_v36, 9  ;;  %v7503_v15 = vld [vmem:[#allocation2 + $0x74] sm:$0x1] }
 0x19b   : > { %v5582_v4 = vcombine.low %v3007_v62, %v3011_v26  ;;  %v5506_v37 = vrot.slane %v2197_v55, 9  ;;  %v5575_v2 = vrot.slane %v2966_v13, 9  ;;  %v7505_v26 = vld [vmem:[#allocation2 + $0x8c] sm:$0x1]  ;;  %v5508_v1 = vrot.slane %v2201_v50, 9  ;;  %v6706_v50 = vld [vmem:[#allocation6 + $0x1f0] sm:$0xff]  }
 0x19c   : > { %6181 = vmatpush3.bf16.msra.mxu1 %v6695_v35  ;;  %v2199_v35 = vld [vmem:[#allocation2 + $0x40] sm:$0xe]  ;;  %v2212_v62 = vld [vmem:[#allocation2 + $0x8c] sm:$0x1]  ;;  %v3019_v28 = vsel %vm7277_vm10, %v5573_v21, %v3018_v41  ;;  %v2206_v29 = vld [vmem:[#allocation2 + $0x68] sm:$0x1] }
 0x19d   : > { %6265 = vmatpush3.bf16.msra.mxu0 %v6696_v3  ;;  %6182 = vmatprep.subr.bf16.mxu1 %v6697_v22  ;;  %v2255_v3 = vrot.slane %v2200_v31, 5  ;;  %v2264_v31 = vsel %vm7277_vm10, %v5509_v16, %v2263_v8  ;;  %v2252_v47 = vsel %vm7277_vm10, %v5506_v37, %v2251_v45  ;;  %v2970_v52 = vld [vmem:[#allocation2 + $0x88] sm:$0xe]  ;;  %v3034_v57 = vrot.slane %v7505_v26, 5  ;;  %v2205_v45 = vld [vmem:[#allocation2 + $0x64] sm:$0xe] }
 0x19e   : > { %6266 = vmatprep.subr.bf16.mxu0 %v6698_v25  ;;  %6143 = vmatmul.mubr.bf16.gmra.mxu1 %v5481_v14  ;;  %v6705_v14 = vld [vmem:[#allocation6 + $0x1f8] sm:$0xff]   ;;  %v2211_v41 = vld [vmem:[#allocation2 + $0x88] sm:$0xe]  ;;  %v2279_v36 = vrot.slane %v2212_v62, 5  ;;  %v2974_v8 = vld [vmem:[#allocation2 + $0xa0] sm:$0xe] }
 0x19f   : > { %6227 = vmatmul.mubr.bf16.gmra.mxu0 %v5547_v5  ;;  %6190 = vmatprep.mubr.bf16.mxu1 %v5516_v63  ;;  %v5572_v5 = vrot.slane %v2960_v23, 9  ;;  %v2259_v63 = vrot.slane %v2202_v54, 5  ;;  %v2210_v54 = vld [vmem:[#allocation2 + $0x80] sm:$0x1]  ;;  %v2968_v16 = vld [vmem:[#allocation2 + $0x7c] sm:$0xe] }
 0x1a0   : > { %6183 = vmatpush3.bf16.msra.mxu1 %v6697_v22  ;;  %6274 = vmatprep.mubr.bf16.mxu0 %v5582_v4  ;;  %v5507_v22 = vrot.slane %v2199_v35, 9  ;;  %v3022_v4 = vrot.slane %v2965_v56, 5  ;;  %v3027_v35 = vsel %vm7277_vm10, %v5575_v2, %v3026_v12  ;;  %v2975_v56 = vld [vmem:[#allocation2 + $0xa4] sm:$0x1]  ;;  %v5513_v37 = vrot.slane %v2211_v41, 9 }
 0x1a1   : > { %6267 = vmatpush3.bf16.msra.mxu0 %v6698_v25  ;;  %6184 = vmatprep.subr.bf16.mxu1 %v6699_v58  ;;  %v2964_v25 = vld [vmem:[#allocation2 + $0x64] sm:$0xe]  ;;  %v3015_v55 = vsel %vm7277_vm10, %v5572_v5, %v3014_v53  ;;  %v2972_v53 = vld [vmem:[#allocation2 + $0x94] sm:$0xe]  ;;  %v2973_v2 = vld [vmem:[#allocation2 + $0x98] sm:$0x1] }
 0x1a2   : > { %6268 = vmatprep.subr.bf16.mxu0 %v6700_v24  ;;  %v5583_v13 = vcombine.low %v3015_v55, %v3019_v28  ;;  %v5510_v12 = vrot.slane %v2205_v45, 9  ;;  %v2267_v26 = vrot.slane %v2206_v29, 5  ;;  %v5579_v5 = vrot.slane %v2974_v8, 9  ;;  %v6707_v28 = vld [vmem:[#allocation6 + $0x1e8] sm:$0xff]   ;;  %v2979_v41 = vld [vmem:[#allocation2 + $0xbc] sm:$0x1] }
 0x1a3   : > { %v2280_v29 = vsel %vm7277_vm10, %v5513_v37, %v2279_v36  ;;  %v2213_v55 = vld [vmem:[#allocation2 + $0x94] sm:$0xe] }
 0x1a4   : > { %6185 = vmatpush3.bf16.msra.mxu1 %v6699_v58  ;;  %v2256_v58 = vsel %vm7277_vm10, %v5507_v22, %v2255_v3  ;;  %v2969_v3 = vld [vmem:[#allocation2 + $0x80] sm:$0x1] }
 0x1a5   : > { %6269 = vmatpush3.bf16.msra.mxu0 %v6700_v24  ;;  %6186 = vmatprep.subr.bf16.mxu1 %v6701_v32  ;;  %v5574_v24 = vrot.slane %v2964_v25, 9  ;;  %v5517_v9 = vcombine.low %v2252_v47, %v2256_v58  ;;  %v3030_v62 = vrot.slane %v2969_v3, 5  ;;  %v2216_v47 = vld [vmem:[#allocation2 + $0xa4] sm:$0x1]  ;;  %v2268_v3 = vsel %vm7277_vm10, %v5510_v12, %v2267_v26  ;;  %v6709_v12 = vld [vmem:[#allocation6 + $0x1d8] sm:$0xff]  }
 0x1a6   : > { %6270 = vmatprep.subr.bf16.mxu0 %v6702_v34  ;;  %v2287_v36 = vrot.slane %v2216_v47, 5  ;;  %v6716_v47 = vld [vmem:[#allocation2 + $0x7c] ss:$12 sps:$4 sm:$0xff]  }
 0x1a7   : > { %v3023_v23 = vsel %vm7277_vm10, %v5574_v24, %v3022_v4  ;;  %v2275_v24 = vrot.slane %v2210_v54, 5  ;;  %v2978_v54 = vld [vmem:[#allocation2 + $0xb8] sm:$0xe] }
 0x1a8   : > { %6187 = vmatpush3.bf16.msra.mxu1 %v6701_v32  ;;  %v2207_v32 = vld [vmem:[#allocation2 + $0x70] sm:$0xe]  ;;  %v5584_v25 = vcombine.low %v3023_v23, %v3027_v35  ;;  %v2976_v23 = vld [vmem:[#allocation2 + $0xac] sm:$0xe] }
 0x1a9   : > { %6271 = vmatpush3.bf16.msra.mxu0 %v6702_v34  ;;  %6188 = vmatprep.subr.bf16.mxu1 %v6703_v44  ;;  %v2271_v34 = vrot.slane %v7503_v15, 5  ;;  %v5511_v21 = vrot.slane %v2207_v32, 9  ;;  %v5577_v15 = vrot.slane %v2970_v52, 9  ;;  %v3038_v32 = vrot.slane %v2973_v2, 5 }
 0x1aa   : > { %6272 = vmatprep.subr.bf16.mxu0 %v6704_v49  ;;  %v5580_v37 = vrot.slane %v2976_v23, 9  ;;  %v6723_v23 = vld [vmem:[#allocation8 + $0x68] sm:$0xff]  }
 0x1ab   : > { %v2272_v4 = vsel %vm7277_vm10, %v5511_v21, %v2271_v34  ;;  %v3035_v35 = vsel %vm7277_vm10, %v5577_v15, %v3034_v57 }
 0x1ac   : > { %6189 = vmatpush3.bf16.msra.mxu1 %v6703_v44  ;;  %v2260_v44 = vsel %vm7277_vm10, %v5508_v1, %v2259_v63  ;;  %v3042_v1 = vrot.slane %v2975_v56, 5  ;;  %v5576_v63 = vrot.slane %v2968_v16, 9  ;;  %v5519_v34 = vcombine.low %v2268_v3, %v2272_v4  ;;  %v6712_v4 = vld [vmem:[#allocation6 + $0x1c8] sm:$0xff]   ;;  %v6720_v3 = vld [vmem:[#allocation8 + $0x38] sm:$0xff]  }
 0x1ad   : > { %6273 = vmatpush3.bf16.msra.mxu0 %v6704_v49  ;;  %6230 = vmatprep.subr.bf16.mxu1 %v6705_v14  ;;  %v5518_v22 = vcombine.low %v2260_v44, %v2264_v31  ;;  %v2209_v49 = vld [vmem:[#allocation2 + $0x7c] sm:$0xe]  ;;  %v5578_v31 = vrot.slane %v2972_v53, 9  ;;  %v2214_v44 = vld [vmem:[#allocation2 + $0x98] sm:$0x1]  ;;  %v5581_v16 = vrot.slane %v2978_v54, 9 }
 0x1ae   : > { %v5512_v58 = vrot.slane %v2209_v49, 9  ;;  %v3043_v52 = vsel %vm7277_vm10, %v5579_v5, %v3042_v1  ;;  %v3050_v49 = vrot.slane %v2979_v41, 5  ;;  %v2283_v15 = vrot.slane %v2214_v44, 5 }
 0x1af   : > { %6191 = vmatmul.mubr.bf16.vlgmr.msra.gmra.mxu1 %v5517_v9  ;;  %v3031_v9 = vsel %vm7277_vm10, %v5576_v63, %v3030_v62  ;;  %v3039_v56 = vsel %vm7277_vm10, %v5578_v31, %v3038_v32  ;;  %v6714_v31 = vld [vmem:[#allocation2 + $0x4c] ss:$12 sps:$4 sm:$0xff]   ;;  %v6715_v32 = vld [vmem:[#allocation2 + $0x64] ss:$12 sps:$4 sm:$0xff]  }
 0x1b0   : > { %6275 = vmatmul.mubr.bf16.vlgmr.msra.gmra.mxu0 %v5583_v13  ;;  %6194 = vmatprep.mubr.bf16.mxu1 %v5518_v22  ;;  %v2276_v57 = vsel %vm7277_vm10, %v5512_v58, %v2275_v24  ;;  %v5585_v45 = vcombine.low %v3031_v9, %v3035_v35  ;;  %v6708_v13 = vld [vmem:[#allocation6 + $0x1e0] sm:$0xff]   ;;  %v5586_v21 = vcombine.low %v3039_v56, %v3043_v52  ;;  %v6711_v24 = vld [vmem:[#allocation6 + $0x1d0] sm:$0xff]  }
 0x1b1   : > { %6231 = vmatpush3.bf16.msra.mxu1 %v6705_v14  ;;  %6278 = vmatprep.mubr.bf16.mxu0 %v5584_v25  ;;  %v2215_v14 = vld [vmem:[#allocation2 + $0xa0] sm:$0xe]  ;;  %v5520_v8 = vcombine.low %v2276_v57, %v2280_v29  ;;  %v5514_v25 = vrot.slane %v2213_v55, 9  ;;  %v3051_v26 = vsel %vm7277_vm10, %v5581_v16, %v3050_v49  ;;  %v6718_v29 = vld [vmem:[#allocation2 + $0xac] ss:$12 sps:$4 sm:$0xff]  }
 0x1b2   : > { %6232 = vmatprep.subr.bf16.mxu1 %v6706_v50  ;;  %v5515_v22 = vrot.slane %v2215_v14, 9  ;;  %v6710_v58 = vld [vmem:[#allocation2 + $0x34] ss:$12 sps:$4 sm:$0xff]   ;;  %v6719_v14 = vld [vmem:[#allocation8 + $0x78] sm:$0xff]   ;;  %v6724_v16 = vld [vmem:[#allocation8 + $0x28] sm:$0xff]  }
 0x1b3   : > { %v2284_v5 = vsel %vm7277_vm10, %v5514_v25, %v2283_v15  ;;  %v6717_v35 = vld [vmem:[#allocation2 + $0x94] ss:$12 sps:$4 sm:$0xff]   ;;  %6310 = vmatprep.subr.bf16.mxu0 %v6719_v14 }
 0x1b4   : > { %v2288_v2 = vsel %vm7277_vm10, %v5515_v22, %v2287_v36  ;;  %6311 = vmatpush3.bf16.msra.mxu0 %v6719_v14  ;;  %v6722_v22 = vld [vmem:[#allocation8 + $0x30] sm:$0xff]   ;;  %v6725_v49 = vld [vmem:[#allocation8 + $0x60] sm:$0xff]  }
 0x1b5   : > { %6233 = vmatpush3.bf16.msra.mxu1 %v6706_v50  ;;  %v2977_v50 = vld [vmem:[#allocation2 + $0xb0] sm:$0x1]  ;;  %v5521_v1 = vcombine.low %v2284_v5, %v2288_v2  ;;  %v6727_v5 = vld [vmem:[#allocation8 + $0x58] sm:$0xff]  }
 0x1b6   : > { %6234 = vmatprep.subr.bf16.mxu1 %v6707_v28  ;;  %v3046_v53 = vrot.slane %v2977_v50, 5 }
 0x1b7   : > { %6195 = vmatmul.mubr.bf16.gmra.mxu1 %v5519_v34 }
 0x1b8   : > { %6279 = vmatmul.mubr.bf16.gmra.mxu0 %v5585_v45  ;;  %6198 = vmatprep.mubr.bf16.mxu1 %v5520_v8  ;;  %v3047_v63 = vsel %vm7277_vm10, %v5580_v37, %v3046_v53  ;;  %v6721_v8 = vld [vmem:[#allocation8 + $0x70] sm:$0xff]   ;;  %v6726_v37 = vld [vmem:[#allocation8 + $0x20] sm:$0xff]  }
 0x1b9   : > { %6235 = vmatpush3.bf16.msra.mxu1 %v6707_v28  ;;  %6282 = vmatprep.mubr.bf16.mxu0 %v5586_v21  ;;  %v5587_v62 = vcombine.low %v3047_v63, %v3051_v26  ;;  %v6713_v28 = vld [vmem:[#allocation6 + $0x1c0] sm:$0xff]  }
 0x1ba   : > { %6236 = vmatprep.subr.bf16.mxu1 %v6708_v13  ;;  %6312 = vmatprep.subr.bf16.mxu0 %v6721_v8 }
 0x1bb   : > { %6313 = vmatpush3.bf16.msra.mxu0 %v6721_v8  ;;  %v6732_v8 = vld [vmem:[#allocation8 + $0x8] sm:$0xff]  }
 0x1bc   : > { %6314 = vmatprep.subr.bf16.mxu0 %v6723_v23 }
 0x1bd   : > { %6237 = vmatpush3.bf16.msra.mxu1 %v6708_v13 }
 0x1be   : > { %6238 = vmatprep.subr.bf16.mxu1 %v6709_v12 }
 0x1bf   : > { %6199 = vmatmul.mubr.bf16.gmra.mxu1 %v5521_v1  ;;  %6315 = vmatpush3.bf16.msra.mxu0 %v6723_v23  ;;  %v6734_v23 = vld [vmem:[#allocation8] sm:$0xff]  }
 0x1c0   : > { %6283 = vmatmul.mubr.bf16.gmra.mxu0 %v5587_v62  ;;  %6246 = vmatprep.mubr.bf16.mxu1 %v6710_v58  ;;  %v6728_v62 = vld [vmem:[#allocation8 + $0x18] sm:$0xff]  }
 0x1c1   : > { %6239 = vmatpush3.bf16.msra.mxu1 %v6709_v12  ;;  %6316 = vmatprep.subr.bf16.mxu0 %v6725_v49 }
 0x1c2   : > { %6240 = vmatprep.subr.bf16.mxu1 %v6711_v24 }
 0x1c3   : > { %6317 = vmatpush3.bf16.msra.mxu0 %v6725_v49 }
 0x1c4   : > { %6318 = vmatprep.subr.bf16.mxu0 %v6727_v5 }
 0x1c5   : > { %6241 = vmatpush3.bf16.msra.mxu1 %v6711_v24 }
 0x1c6   : > { %6242 = vmatprep.subr.bf16.mxu1 %v6712_v4 }
 0x1c7   : > { %6319 = vmatpush3.bf16.msra.mxu0 %v6727_v5 }
 0x1c9   : > { %6243 = vmatpush3.bf16.msra.mxu1 %v6712_v4  ;;  %v6729_v4 = vld [vmem:[#allocation8 + $0x50] sm:$0xff]  }
 0x1ca   : > { %6244 = vmatprep.subr.bf16.mxu1 %v6713_v28  ;;  %6320 = vmatprep.subr.bf16.mxu0 %v6729_v4 }
 0x1cb   : > { %6321 = vmatpush3.bf16.msra.mxu0 %v6729_v4  ;;  %v7619_v4 = vld [vmem:[#allocation8 + $0xb8] sm:$0xff]  }
 0x1cc   : > { %8198 = vst [vmem:[#allocation39_spill] sm:$0xff] %v7619_v4 }
 0x1cd   : > { %6245 = vmatpush3.bf16.msra.mxu1 %v6713_v28 }
 0x1ce   : > { %6286 = vmatprep.subr.bf16.mxu1 %v6720_v3 }
 0x1d0   : > { %6247 = vmatmul.mubr.bf16.vlgmr.msra.gmra.mxu1 %v6714_v31 }
 0x1d1   : > { %6250 = vmatprep.mubr.bf16.mxu1 %v6715_v32  ;;  %6287 = vmatpush3.bf16.msra.mxu1 %v6720_v3  ;;  %v6730_v32 = vld [vmem:[#allocation8 + $0x10] sm:$0xff]  }
 0x1d2   : > { %6288 = vmatprep.subr.bf16.mxu1 %v6722_v22 }
 0x1d5   : > { %6289 = vmatpush3.bf16.msra.mxu1 %v6722_v22  ;;  %v6733_v22 = vld [vmem:[#allocation8 + $0x40] sm:$0xff]  }
 0x1d6   : > { %6290 = vmatprep.subr.bf16.mxu1 %v6724_v16 }
 0x1d8   : > { %6251 = vmatmul.mubr.bf16.gmra.mxu1 %v6716_v47 }
 0x1d9   : > { %6254 = vmatprep.mubr.bf16.mxu1 %v6717_v35  ;;  %6291 = vmatpush3.bf16.msra.mxu1 %v6724_v16 }
 0x1da   : > { %6292 = vmatprep.subr.bf16.mxu1 %v6726_v37 }
 0x1dd   : > { %6293 = vmatpush3.bf16.msra.mxu1 %v6726_v37  ;;  %v7613_v37 = vld [vmem:[#allocation8 + $0xf8] sm:$0xff]  }
 0x1de   : > { %6294 = vmatprep.subr.bf16.mxu1 %v6728_v62  ;;  %8196 = vst [vmem:[#allocation37_spill] sm:$0xff] %v7613_v37 }
 0x1e0   : > { %6255 = vmatmul.mubr.bf16.gmra.mxu1 %v6718_v29  ;;  %v6731_v29 = vld [vmem:[#allocation8 + $0x48] sm:$0xff]  }
 0x1e1   : > { %6295 = vmatpush3.bf16.msra.mxu1 %v6728_v62  ;;  %6322 = vmatprep.subr.bf16.mxu0 %v6731_v29 }
 0x1e2   : > { %6296 = vmatprep.subr.bf16.mxu1 %v6730_v32  ;;  %6323 = vmatpush3.bf16.msra.mxu0 %v6731_v29 }
 0x1e3   : > { %6324 = vmatprep.subr.bf16.mxu0 %v6733_v22 }
 0x1e5   : > { %6297 = vmatpush3.bf16.msra.mxu1 %v6730_v32 }
 0x1e6   : > { %6298 = vmatprep.subr.bf16.mxu1 %v6732_v8  ;;  %6325 = vmatpush3.bf16.msra.mxu0 %v6733_v22 }
 0x1e7   : > { %6358 = vmatprep.subr.bf16.mxu0 %v7613_v37 }
 0x1e9   : > { %6299 = vmatpush3.bf16.msra.mxu1 %v6732_v8 }
 0x1ea   : > { %6300 = vmatprep.subr.bf16.mxu1 %v6734_v23 }
 0x1ed   : > { %6301 = vmatpush3.bf16.msra.mxu1 %v6734_v23 }
 0x1ee   : > { %6334 = vmatprep.subr.bf16.mxu1 %v7619_v4 }
 0x206   : > { %v7549_v52 = vpop.f32.mrf.mxu1 }
 0x207   : > { %v7551_v54 = vpop.f32.mrf.mxu0 }
 0x208   : > { %v7553_v41 = vpop.f32.mrf.mxu1 }
 0x209   : > { %v7555_v34 = vpop.f32.mrf.mxu0 }
 0x20a   : > { %v7557_v9 = vpop.f32.mrf.mxu1 }
 0x20b   : > { %v7559_v57 = vpop.f32.mrf.mxu0 }
 0x20c   : > { %v7561_v55 = vpop.f32.mrf.mxu1 }
 0x20d   : > { %v7563_v44 = vpop.f32.mrf.mxu0 }
 0x216   : > { %v7565_v36 = vpop.f32.mrf.mxu1 }
 0x217   : > { %v7567_v45 = vpop.f32.mrf.mxu0 }
 0x218   : > { %v7569_v56 = vpop.f32.mrf.mxu1 }
 0x219   : > { %v7571_v13 = vpop.f32.mrf.mxu0 }
 0x21a   : > { %v7573_v50 = vpop.f32.mrf.mxu1 }
 0x21b   : > { %v7575_v21 = vpop.f32.mrf.mxu0 }
 0x21c   : > { %v7577_v25 = vpop.f32.mrf.mxu1 }
 0x21d   : > { %v7579_v15 = vpop.f32.mrf.mxu0 }
 0x226   : > { %v7581_v53 = vpop.f32.mrf.mxu1 }
 0x227   : > { %v7583_v2 = vpop.f32.mrf.mxu0 }
 0x228   : > { %v7585_v12 = vpop.f32.mrf.mxu1 }
 0x229   : > { %v7587_v26 = vpop.f32.mrf.mxu0 }
 0x22a   : > { %v7589_v1 = vpop.f32.mrf.mxu1 }
 0x22b   : > { %v7591_v63 = vpop.f32.mrf.mxu0 }
 0x22c   : > { %v7593_v58 = vpop.f32.mrf.mxu1 }
 0x22d   : > { %v7595_v24 = vpop.f32.mrf.mxu0 }
 0x22e   : > { %v7597_v28 = vpop.f32.mrf.mxu1 }
 0x22f   : > { %v7599_v31 = vpop.f32.mrf.mxu0 }
 0x230   : > { %v7601_v47 = vpop.f32.mrf.mxu1 }
 0x231   : > { %v7603_v35 = vpop.f32.mrf.mxu0 }
 0x232   : > { %v7605_v14 = vpop.f32.mrf.mxu1 }
 0x233   : > { %v7607_v3 = vpop.f32.mrf.mxu0 }
 0x234   : > { %v7609_v16 = vpop.f32.mrf.mxu1 }
 0x235   : > { %v7611_v49 = vpop.f32.mrf.mxu0 }
 0x236   : > { %v7615_v5 = vpop.f32.mrf.mxu1 }
 0x237   : > { %v7617_v62 = vpop.f32.mrf.mxu0 }
 0x238   : > { %8197 = vst [vmem:[#allocation38_spill] sm:$0xff] %v7617_v62  ;;  %v7621_v32 = vpop.f32.mrf.mxu1 }
 0x239   : > { %v7623_v27 = vpop.f32.mrf.mxu0 }
 0x23a   : > { %8199 = vst [vmem:[#allocation40_spill] sm:$0xff] %v7623_v27  ;;  %v7626_v29 = vpop.f32.mrf.mxu1 }
 0x23b   : > { %v7628_v17 = vpop.f32.mrf.mxu0 }
 0x23c   : > { %8200 = vst [vmem:[#allocation41_spill] sm:$0xff] %v7628_v17  ;;  %v7631_v6 = vpop.f32.mrf.mxu1 }
 0x23d   : > { %v7633_v8 = vpop.f32.mrf.mxu0 }
 0x23e   : > { %8201 = vst [vmem:[#allocation42_spill] sm:$0xff] %v7633_v8  ;;  %v7635_v0 = vpop.f32.mrf.mxu1 }
 0x23f   : > { %v7637_v59 = vpop.f32.mrf.mxu0 }
 0x240   : > { %8202 = vst [vmem:[#allocation43_spill] sm:$0xff] %v7637_v59  ;;  %v7639_v38 = vpop.f32.mrf.mxu1 }
 0x241   : > { %v7641_v22 = vpop.f32.mrf.mxu0 }
 0x242   : > { %8203 = vst [vmem:[#allocation44_spill] sm:$0xff] %v7641_v22  ;;  %v7643_v20 = vpop.f32.mrf.mxu1 }
 0x243   : > { %v7645_v39 = vpop.f32.mrf.mxu0 }
 0x244   : > { %8204 = vst [vmem:[#allocation45_spill] sm:$0xff] %v7645_v39  ;;  %v7647_v60 = vpop.f32.mrf.mxu1 }
 0x245   : > { %v7649_v23 = vpop.f32.mrf.mxu0 }
 0x246   : > { %8205 = vst [vmem:[#allocation46_spill] sm:$0xff] %v7649_v23 }
 0x24e   : > { %v6136_v48 = vpop.f32.mrf.mxu1 }
 0x24f   : > { %v7651_v4 = vpop.f32.mrf.mxu0 }
 0x250   : > { %8206 = vst [vmem:[#allocation47_spill] sm:$0xff] %v7651_v4  ;;  %v7653_v40 = vpop.f32.mrf.mxu1 }
 0x251   : > { %v7655_v37 = vpop.f32.mrf.mxu0 }
 0x252   : > { %8207 = vst [vmem:[#allocation48_spill] sm:$0xff] %v7655_v37  ;;  %v7657_v43 = vpop.f32.mrf.mxu1 }
 0x253   : > { %v7661_v10 = vpop.f32.mrf.mxu0 }
 0x254   : > { %v7659_v42 = vpop.f32.mrf.mxu1  ;;  %8208 = vst [vmem:[#allocation49_spill] sm:$0xff] %v7661_v10 }
 0x255   : > { %v7667_v46 = vpop.f32.mrf.mxu0 }
 0x256   : > { %v7663_v7 = vpop.f32.mrf.mxu1  ;;  %8209 = vst [vmem:[#allocation50_spill] sm:$0xff] %v7667_v46 }
 0x257   : > { %v7673_v33 = vpop.f32.mrf.mxu0 }
 0x258   : > { %v7665_v61 = vpop.f32.mrf.mxu1  ;;  %8210 = vst [vmem:[#allocation51_spill] sm:$0xff] %v7673_v33 }
 0x259   : > { %v7677_v18 = vpop.f32.mrf.mxu0 }
 0x25a   : > { %v7669_v30 = vpop.f32.mrf.mxu1  ;;  %8211 = vst [vmem:[#allocation52_spill] sm:$0xff] %v7677_v18 }
 0x25b   : > { %v7681_v23 = vpop.f32.mrf.mxu0 }
 0x25c   : > { %v7671_v19 = vpop.f32.mrf.mxu1  ;;  %8213 = vst [vmem:[#allocation54_spill] sm:$0xff] %v7681_v23 }
 0x25d   : > { %v7685_v22 = vpop.f32.mrf.mxu0 }
 0x25e   : > { %v7675_v11 = vpop.f32.mrf.mxu1  ;;  %8215 = vst [vmem:[#allocation56_spill] sm:$0xff] %v7685_v22 }
 0x25f   : > { %v7689_v46 = vpop.f32.mrf.mxu0 }
 0x260   : > { %v7679_v51 = vpop.f32.mrf.mxu1  ;;  %8217 = vst [vmem:[#allocation58_spill] sm:$0xff] %v7689_v46  ;;  %v5409_v46 = vld [vmem:[%s8137_s5] ss:$0 sm:$0xff] }
 0x261   : > { %8212 = vst [vmem:[#allocation53_spill] sm:$0xff] %v7679_v51  ;;  %v7695_v33 = vpop.f32.mrf.mxu0 }
 0x262   : > { %v7683_v39 = vpop.f32.mrf.mxu1  ;;  %8218 = vst [vmem:[#allocation59_spill] sm:$0xff] %v7695_v33  ;;  %v1183_v33 = vadd.f32 %v7549_v52, %v5409_v46  ;;  %v1191_v52 = vadd.f32 %v5409_v46, %v7569_v56  ;;  %v7743_v56 = vld [vmem:[#allocation2 + $0x18] sm:$0x8] }
 0x263   : > { %8214 = vst [vmem:[#allocation55_spill] sm:$0xff] %v7683_v39  ;;  %v7701_v17 = vpop.f32.mrf.mxu0 }
 0x264   : > { %v7687_v10 = vpop.f32.mrf.mxu1  ;;  %8220 = vst [vmem:[#allocation61_spill] sm:$0xff] %v7701_v17  ;;  %v1175_v17 = vadd.f32 %v5409_v46, %v7553_v41 }
 0x265   : > { %8216 = vst [vmem:[#allocation57_spill] sm:$0xff] %v7687_v10  ;;  %v7710_v22 = vpop.f32.mrf.mxu0 }
 0x266   : > { %8223 = vst [vmem:[#allocation64_spill] sm:$0xff] %v7710_v22  ;;  %v1415_v4 = vadd.f32 %v7601_v47, %v1175_v17  ;;  %v1178_v22 = vadd.f32 %v5409_v46, %v7561_v55  ;;  %v1194_v17 = vadd.f32 %v5409_v46, %v7577_v25  ;;  %v1207_v55 = vadd.f32 %v5409_v46, %v7585_v12 }
 0x267   : > { %v1210_v25 = vadd.f32 %v5409_v46, %v7593_v58 }
 0x26f   : > { %v7691_v59 = vpop.f32.mrf.mxu1 }
 0x270   : > { %v7714_v39 = vpop.f32.mrf.mxu0 }
 0x271   : > { %v7693_v8 = vpop.f32.mrf.mxu1 }
 0x273   : > { %v7697_v37 = vpop.f32.mrf.mxu1 }
 0x275   : > { %v7699_v18 = vpop.f32.mrf.mxu1 }
 0x276   : > { %8219 = vst [vmem:[#allocation60_spill] sm:$0xff] %v7699_v18  ;;  %v7721_v18 = vpop.f32.mrf.mxu0 }
 0x277   : > { %v7703_v23 = vpop.f32.mrf.mxu1  ;;  %8226 = vst [vmem:[#allocation67_spill] sm:$0xff] %v7721_v18  ;;  %v7735_v18 = vld [vmem:[#allocation2 + $0xc] sm:$0x8] }
 0x278   : > { %8221 = vst [vmem:[#allocation62_spill] sm:$0xff] %v7703_v23  ;;  %v1417_v23 = vadd.f32 %v7597_v28, %v1183_v33  ;;  %v7733_v28 = vld [vmem:[#allocation2] sm:$0x8]  ;;  %v7741_v47 = vpop.f32.mrf.mxu0 }
 0x279   : > { %v7705_v27 = vpop.f32.mrf.mxu1 }
 0x27a   : > { %8222 = vst [vmem:[#allocation63_spill] sm:$0xff] %v7705_v27  ;;  %v1186_v27 = vadd.f32 %v7557_v9, %v5409_v46  ;;  %v1698_v33 = vadd.f32 %v7551_v54, %v1417_v23  ;;  %v1215_v9 = vadd.f32 %v7581_v53, %v5409_v46  ;;  %v7748_v23 = vld [vmem:[#allocation2 + $0x24] sm:$0x8]  ;;  %v1419_v53 = vadd.f32 %v7621_v32, %v1191_v52 }
 0x27b   : > { %v7712_v10 = vpop.f32.mrf.mxu1  ;;  %v1423_v32 = vadd.f32 %v7639_v38, %v1207_v55  ;;  %v8228_v55 = vld [vmem:[#allocation38_spill] sm:$0xff] }
 0x27c   : > { %8224 = vst [vmem:[#allocation65_spill] sm:$0xff] %v7712_v10  ;;  %v1199_v10 = vadd.f32 %v7565_v36, %v5409_v46  ;;  %v1418_v41 = vadd.f32 %v7605_v14, %v1186_v27  ;;  %v1416_v36 = vadd.f32 %v7609_v16, %v1178_v22  ;;  %v1218_v27 = vadd.f32 %v7589_v1, %v5409_v46 }
 0x27d   : > { %v7717_v51 = vpop.f32.mrf.mxu1  ;;  %v1696_v14 = vadd.f32 %v7555_v34, %v1415_v4  ;;  %v5608_v16 = vrot.slane %v7733_v28, 11  ;;  %v5609_v22 = vrot.slane %v7735_v18, 11  ;;  %v1420_v34 = vadd.f32 %v7631_v6, %v1194_v17 }
 0x27e   : > { %8225 = vst [vmem:[#allocation66_spill] sm:$0xff] %v7717_v51  ;;  %v1202_v51 = vadd.f32 %v7573_v50, %v5409_v46  ;;  %v1421_v54 = vadd.f32 %v7615_v5, %v1199_v10  ;;  %v1977_v50 = vadd.f32 %v6136_v48, %v1698_v33  ;;  %v1699_v48 = vadd.f32 %v7559_v57, %v1418_v41  ;;  %v7763_v5 = vpop.f32.mrf.mxu0 }
 0x27f   : > { %v7727_v62 = vpop.f32.mrf.mxu1  ;;  %v1975_v1 = vadd.f32 %v7653_v40, %v1696_v14  ;;  %v5610_v10 = vrot.slane %v7743_v56, 11  ;;  %v1425_v46 = vadd.f32 %v7635_v0, %v1215_v9  ;;  %v1697_v58 = vadd.f32 %v7563_v44, %v1416_v36  ;;  %v7798_v9 = vld [vmem:[#allocation2 + $0x24] sm:$0x8]  ;;  %v8229_v36 = vld [vmem:[#allocation47_spill] sm:$0xff]  ;;  %v8233_v14 = vld [vmem:[#allocation40_spill] sm:$0xff] }
 0x280   : > { %8227 = vst [vmem:[#allocation68_spill] sm:$0xff] %v7727_v62  ;;  %v1422_v62 = vadd.f32 %v7626_v29, %v1202_v51  ;;  %v5611_v4 = vrot.slane %v7748_v23, 11  ;;  %v1978_v51 = vadd.f32 %v7657_v43, %v1699_v48  ;;  %v1702_v40 = vadd.f32 %v7567_v45, %v1421_v54  ;;  %v7770_v29 = vld [vmem:[#allocation2 + $0x18] sm:$0x8]  ;;  %v7785_v17 = vpop.f32.mrf.mxu0  ;;  %v8231_v54 = vld [vmem:[#allocation55_spill] sm:$0xff] }
 0x281   : > { %v7752_v12 = vpop.f32.mrf.mxu1  ;;  %v2183_v57 = vadd.f32 %v7599_v31, %v1977_v50  ;;  %v1426_v6 = vadd.f32 %v7643_v20, %v1218_v27  ;;  %v1424_v0 = vadd.f32 %v7647_v60, %v1210_v25  ;;  %v1976_v44 = vadd.f32 %v7659_v42, %v1697_v58  ;;  %v8230_v27 = vld [vmem:[#allocation53_spill] sm:$0xff]  ;;  %v8236_v58 = vld [vmem:[#allocation60_spill] sm:$0xff] }
 0x282   : > { %v1700_v52 = vadd.f32 %v7571_v13, %v1419_v53  ;;  %v1981_v38 = vadd.f32 %v7663_v7, %v1702_v40  ;;  %v1703_v43 = vadd.f32 %v7575_v21, %v1422_v62  ;;  %v2181_v31 = vadd.f32 %v7603_v35, %v1975_v1  ;;  %v8232_v50 = vld [vmem:[#allocation57_spill] sm:$0xff]  ;;  %v3191_v25 = vpop.f32.mrf.mxu0 }
 0x283   : > { %v7776_v41 = vpop.f32.mrf.mxu1  ;;  %v2461_v45 = vadd.f32 %v7691_v59, %v2183_v57  ;;  %v1701_v20 = vadd.f32 %v7579_v15, %v1420_v34  ;;  %v1706_v60 = vadd.f32 %v7583_v2, %v1425_v46  ;;  %v5661_v42 = vrot.slane %v7770_v29, 11  ;;  %v8234_v1 = vld [vmem:[#allocation41_spill] sm:$0xff]  ;;  %v8238_v57 = vld [vmem:[#allocation63_spill] sm:$0xff] }
 0x284   : > { %v1979_v33 = vadd.f32 %v7665_v61, %v1700_v52  ;;  %v1982_v13 = vadd.f32 %v7669_v30, %v1703_v43  ;;  %v1704_v7 = vadd.f32 %v7587_v26, %v1423_v32  ;;  %v2459_v21 = vadd.f32 %v7693_v8, %v2181_v31 }
 0x285   : > { %v2184_v59 = vadd.f32 %v7607_v3, %v1978_v51  ;;  %v1980_v35 = vadd.f32 %v7671_v19, %v1701_v20  ;;  %v1707_v61 = vadd.f32 %v7591_v63, %v1426_v6  ;;  %v1705_v15 = vadd.f32 %v7595_v24, %v1424_v0  ;;  %v7796_v62 = vpop.f32.mrf.mxu1  ;;  %v8237_v51 = vld [vmem:[#allocation62_spill] sm:$0xff] }
 0x286   : > { %v2182_v2 = vadd.f32 %v7611_v49, %v1976_v44  ;;  %v1985_v30 = vadd.f32 %v7675_v11, %v1706_v60  ;;  %v2187_v8 = vadd.f32 %v8228_v55, %v1981_v38  ;;  %v2740_v3 = vadd.f32 %v8229_v36, %v2461_v45  ;;  %v8235_v11 = vld [vmem:[#allocation48_spill] sm:$0xff]  ;;  %v8239_v0 = vld [vmem:[#allocation42_spill] sm:$0xff]  ;;  %v8240_v38 = vld [vmem:[#allocation43_spill] sm:$0xff] }
 0x287   : > { %v2462_v26 = vadd.f32 %v7697_v37, %v2184_v59  ;;  %v1983_v19 = vadd.f32 %v8230_v27, %v1704_v7  ;;  %v1986_v63 = vadd.f32 %v8231_v54, %v1707_v61  ;;  %v1984_v24 = vadd.f32 %v8232_v50, %v1705_v15  ;;  %v8242_v60 = vld [vmem:[#allocation65_spill] sm:$0xff]  ;;  %v6281_v7 = vpop.f32.mrf.mxu0  ;;  %v8246_v36 = vld [vmem:[#allocation67_spill] sm:$0xff]  ;;  %v8247_v27 = vld [vmem:[#allocation66_spill] sm:$0xff] }
 0x288   : > { %v2185_v49 = vadd.f32 %v8233_v14, %v1979_v33  ;;  %v2188_v48 = vadd.f32 %v8234_v1, %v1982_v13  ;;  %v2738_v46 = vadd.f32 %v8235_v11, %v2459_v21  ;;  %v5662_v37 = vrot.slane %v7798_v9, 11  ;;  %v8241_v33 = vld [vmem:[#allocation49_spill] sm:$0xff]  ;;  %v8243_v21 = vld [vmem:[#allocation44_spill] sm:$0xff]  ;;  %v8248_v54 = vld [vmem:[#allocation50_spill] sm:$0xff] }
 0x289   : > { %v2460_v32 = vadd.f32 %v8236_v58, %v2182_v2  ;;  %v2465_v40 = vadd.f32 %v8237_v51, %v2187_v8  ;;  %v2186_v44 = vadd.f32 %v8239_v0, %v1980_v35  ;;  %v2191_v43 = vadd.f32 %v8240_v38, %v1985_v30  ;;  %v8244_v61 = vld [vmem:[#allocation45_spill] sm:$0xff]  ;;  %v8245_v2 = vld [vmem:[#allocation46_spill] sm:$0xff]  ;;  %v8249_v14 = vld [vmem:[#allocation51_spill] sm:$0xff] }
 0x28a   : > { %v2463_v6 = vadd.f32 %v8238_v57, %v2185_v49  ;;  %v2741_v20 = vadd.f32 %v8241_v33, %v2462_v26  ;;  %v2466_v13 = vadd.f32 %v8242_v60, %v2188_v48  ;;  %v2189_v59 = vadd.f32 %v8243_v21, %v1983_v19  ;;  %v3194_v48 = vpop.f32.mrf.mxu0  ;;  %v8253_v0 = vld [vmem:[#allocation54_spill] sm:$0xff] }
 0x28b   : > { %v2192_v15 = vadd.f32 %v8244_v61, %v1986_v63  ;;  %v2190_v55 = vadd.f32 %v8245_v2, %v1984_v24  ;;  %v2739_v50 = vadd.f32 %v8248_v54, %v2460_v32  ;;  %v2744_v49 = vadd.f32 %v8249_v14, %v2465_v40  ;;  %v6745_v9 = vld [vmem:[#allocation8 + $0xe0] sm:$0xff]  }
 0x28c   : > { %v6284_v2 = vpop.f32.mrf.mxu0 }
 0x290   : > { %v6248_v53 = vpop.f32.mrf.mxu1 }
 0x291   : > { %v2946_v34 = vadd.f32 %v6248_v53, %v2740_v3  ;;  %v8250_v53 = vld [vmem:[#allocation52_spill] sm:$0xff] }
 0x292   : > { %v2897_v52 = vpop.f32.mrf.mxu1  ;;  %v2742_v1 = vadd.f32 %v8250_v53, %v2463_v6  ;;  %v8254_v6 = vld [vmem:[#allocation15_spill] sm:$0xff] }
 0x293   : > { %v3224_v45 = vadd.f32 %v7714_v39, %v2946_v34  ;;  %v2944_v31 = vadd.f32 %v2897_v52, %v2738_v46  ;;  %v2464_v39 = vadd.f32 %v8247_v27, %v2186_v44  ;;  %v8251_v34 = vld [vmem:[#allocation68_spill] sm:$0xff]  ;;  %v2745_v44 = vadd.f32 %v8253_v0, %v2466_v13 }
 0x294   : > { %v6249_v8 = vpop.f32.mrf.mxu1  ;;  %v2469_v11 = vadd.f32 %v8251_v34, %v2191_v43  ;;  %v8252_v46 = vld [vmem:[#allocation20_spill] sm:$0xff]  ;;  %v2467_v43 = vadd.f32 %v7752_v12, %v2189_v59 }
 0x295   : > { %vm3236_vm6 = vcmp.ge.f32.partialorder %v3224_v45, 0.0  ;;  %v3248_v35 = vmul.f32 0.01, %v3224_v45  ;;  %v3222_v3 = vadd.f32 %v8246_v36, %v2944_v31  ;;  %v2947_v30 = vadd.f32 %v6249_v8, %v2741_v20  ;;  %v8256_v8 = vld [vmem:[#allocation22_spill] sm:$0xff] }
 0x296   : > { %v2900_v26 = vpop.f32.mrf.mxu1 }
 0x297   : > { %v3260_v19 = vsel %vm3236_vm6, %v3224_v45, %v3248_v35  ;;  %vm3234_vm7 = vcmp.ge.f32.partialorder %v3222_v3, 0.0  ;;  %v3246_v63 = vmul.f32 0.01, %v3222_v3  ;;  %v3225_v24 = vadd.f32 %v7741_v47, %v2947_v30  ;;  %v8255_v47 = vld [vmem:[#allocation56_spill] sm:$0xff] }
 0x298   : > { %v3272_v58 = vmul.f32 %v3260_v19, %v8252_v46  ;;  %v2945_v51 = vadd.f32 %v2900_v26, %v2739_v50  ;;  %v6252_v57 = vpop.f32.mrf.mxu1  ;;  %v2743_v20 = vadd.f32 %v8255_v47, %v2464_v39  ;;  %v2470_v39 = vadd.f32 %v7776_v41, %v2192_v15  ;;  %v8258_v26 = vld [vmem:[#allocation16_spill] sm:$0xff]  ;;  %v8262_v47 = vld [vmem:[#allocation61_spill] sm:$0xff] }
 0x299   : > { %v3258_v32 = vsel %vm3234_vm7, %v3222_v3, %v3246_v63  ;;  %vm3237_vm8 = vcmp.ge.f32.partialorder %v3225_v24, 0.0  ;;  %v3249_v52 = vmul.f32 0.01, %v3225_v24  ;;  %v2950_v40 = vadd.f32 %v6252_v57, %v2744_v49  ;;  %v8259_v63 = vld [vmem:[#allocation28_spill] sm:$0xff] }
 0x29a   : > { %v5789_v38 = vpack.c.bf16 %v3272_v58, %v3272_v58  ;;  %v3270_v45 = vmul.f32 %v3258_v32, %v8254_v6  ;;  %v3223_v31 = vadd.f32 %v7763_v5, %v2945_v51  ;;  %v2913_v33 = vpop.f32.mrf.mxu1  ;;  %v2468_v19 = vadd.f32 %v7796_v62, %v2190_v55  ;;  %v7842_v15 = vld [vmem:[#allocation2 + $0x30] sm:$0x8] }
 0x29b   : > { %v3261_v60 = vsel %vm3237_vm8, %v3225_v24, %v3249_v52  ;;  %v3228_v21 = vadd.f32 %v7785_v17, %v2950_v40  ;;  %v2948_v61 = vadd.f32 %v2913_v33, %v2742_v1  ;;  %v8257_v17 = vld [vmem:[#allocation58_spill] sm:$0xff]  ;;  %v3207_v1 = vpop.f32.mrf.mxu0  ;;  %v5612_v6 = vrot.slane %v7842_v15, 11 }
 0x29c   : > { %3332 = vst [vmem:[#allocation2 + $0x1c] sm:$0xf] %v5789_v38  ;;  %v5787_v13 = vpack.c.bf16 %v3270_v45, %v3270_v45  ;;  %v3273_v35 = vmul.f32 %v3261_v60, %v8256_v8  ;;  %vm3235_vm11 = vcmp.ge.f32.partialorder %v3223_v31, 0.0  ;;  %v3247_v36 = vmul.f32 0.01, %v3223_v31  ;;  %v6253_v3 = vpop.f32.mrf.mxu1  ;;  %v8263_v60 = vld [vmem:[#allocation64_spill] sm:$0xff] }
 0x29d   : > { %vm3240_vm12 = vcmp.ge.f32.partialorder %v3228_v21, 0.0  ;;  %v3252_v30 = vmul.f32 0.01, %v3228_v21  ;;  %v3226_v5 = vadd.f32 %v3191_v25, %v2948_v61  ;;  %v2951_v27 = vadd.f32 %v6253_v3, %v2745_v44  ;;  %v8261_v44 = vld [vmem:[#allocation24_spill] sm:$0xff]  ;;  %v6285_v45 = vpop.f32.mrf.mxu0 }
 0x29e   : > { %3330 = vst [vmem:[#allocation2 + $0x4] sm:$0xf] %v5787_v13  ;;  %v5790_v12 = vpack.c.bf16 %v3273_v35, %v3273_v35  ;;  %v3259_v59 = vsel %vm3235_vm11, %v3223_v31, %v3247_v36  ;;  %v2916_v54 = vpop.f32.mrf.mxu1  ;;  %v2748_v50 = vadd.f32 %v8257_v17, %v2469_v11  ;;  %v8260_v11 = vld [vmem:[#allocation59_spill] sm:$0xff]  ;;  %v8264_v13 = vld [vmem:[#allocation30_spill] sm:$0xff] }
 0x29f   : > { %v3271_v14 = vmul.f32 %v3259_v59, %v8258_v26  ;;  %v3264_v49 = vsel %vm3240_vm12, %v3228_v21, %v3252_v30  ;;  %vm3238_vm13 = vcmp.ge.f32.partialorder %v3226_v5, 0.0  ;;  %v3250_v53 = vmul.f32 0.01, %v3226_v5  ;;  %v8265_v17 = vld [vmem:[#allocation26_spill] sm:$0xff] }
 0x2a0   : > { %3333 = vst [vmem:[#allocation2 + $0x28] sm:$0xf] %v5790_v12  ;;  %v3276_v25 = vmul.f32 %v3264_v49, %v8259_v63  ;;  %v3229_v24 = vadd.f32 %v6281_v7, %v2951_v27  ;;  %v2949_v34 = vadd.f32 %v2916_v54, %v2743_v20  ;;  %v6256_v41 = vpop.f32.mrf.mxu1  ;;  %v2746_v57 = vadd.f32 %v8260_v11, %v2467_v43  ;;  %v7846_v7 = vld [vmem:[#allocation2 + $0x3c] sm:$0x8]  ;;  %v3210_v54 = vpop.f32.mrf.mxu0  ;;  %v8266_v49 = vld [vmem:[#allocation35_spill] sm:$0xff] }
 0x2a1   : > { %v5788_v46 = vpack.c.bf16 %v3271_v14, %v3271_v14  ;;  %v3262_v58 = vsel %vm3238_vm13, %v3226_v5, %v3250_v53  ;;  %v2954_v51 = vadd.f32 %v6256_v41, %v2748_v50  ;;  %v2749_v20 = vadd.f32 %v8262_v47, %v2470_v39 }
 0x2a2   : > { %v5793_v0 = vpack.c.bf16 %v3276_v25, %v3276_v25  ;;  %v3274_v32 = vmul.f32 %v3262_v58, %v8261_v44  ;;  %vm3241_vm14 = vcmp.ge.f32.partialorder %v3229_v24, 0.0  ;;  %v3253_v52 = vmul.f32 0.01, %v3229_v24  ;;  %v2929_v40 = vpop.f32.mrf.mxu1 }
 0x2a3   : > { %3331 = vst [vmem:[#allocation2 + $0x10] sm:$0xf] %v5788_v46  ;;  %v3227_v62 = vadd.f32 %v3194_v48, %v2949_v34  ;;  %v3232_v55 = vadd.f32 %v6284_v2, %v2954_v51  ;;  %v2952_v38 = vadd.f32 %v2929_v40, %v2746_v57  ;;  %v2747_v21 = vadd.f32 %v8263_v60, %v2468_v19  ;;  %v7851_v61 = vld [vmem:[#allocation2 + $0x1c] sm:$0x7]  ;;  %v8267_v57 = vld [vmem:[#allocation32_spill] sm:$0xff] }
 0x2a4   : > { %3336 = vst [vmem:[#allocation2 + $0x4c] sm:$0xf] %v5793_v0  ;;  %v5791_v31 = vpack.c.bf16 %v3274_v32, %v3274_v32  ;;  %v3265_v33 = vsel %vm3241_vm14, %v3229_v24, %v3253_v52  ;;  %v6257_v43 = vpop.f32.mrf.mxu1  ;;  %v5613_v5 = vrot.slane %v7846_v7, 11  ;;  %v3384_v59 = vrot.slane %v7851_v61, 7  ;;  %v6739_v32 = vld [vmem:[#allocation8 + $0xf0] sm:$0xff]   ;;  %v8270_v61 = vld [vmem:[#allocation37_spill] sm:$0xff] }
 0x2a5   : > { %v3277_v8 = vmul.f32 %v3265_v33, %v8264_v13  ;;  %vm3239_vm15 = vcmp.ge.f32.partialorder %v3227_v62, 0.0  ;;  %v3251_v48 = vmul.f32 0.01, %v3227_v62  ;;  %vm3244_vm0 = vcmp.ge.f32.partialorder %v3232_v55, 0.0  ;;  %v3343_v30 = vld [vmem:[#allocation2 + $0x4] sm:$0x7] }
 0x2a6   : > { %3334 = vst [vmem:[#allocation2 + $0x34] sm:$0xf] %v5791_v31  ;;  %v3256_v2 = vmul.f32 0.01, %v3232_v55  ;;  %v3230_v35 = vadd.f32 %v3207_v1, %v2952_v38  ;;  %v2955_v36 = vadd.f32 %v6257_v43, %v2749_v20  ;;  %v2932_v3 = vpop.f32.mrf.mxu1  ;;  %v3376_v25 = vrot.slane %v3343_v30, 7  ;;  %v8269_v43 = vld [vmem:[#allocation36_spill] sm:$0xff] }
 0x2a7   : > { %v5794_v27 = vpack.c.bf16 %v3277_v8, %v3277_v8  ;;  %v3263_v39 = vsel %vm3239_vm15, %v3227_v62, %v3251_v48  ;;  %v2953_v12 = vadd.f32 %v2932_v3, %v2747_v21  ;;  %v6737_v63 = vld [vmem:[#allocation2 + $0x1c] ss:$12 sps:$4 sm:$0xff]   ;;  %v3356_v20 = vld [vmem:[#allocation2 + $0x54] sm:$0x8]  ;;  %v3385_v18 = vsel %vm7271_vm9, %v5610_v10, %v3384_v59 }
 0x2a8   : > { %v3275_v50 = vmul.f32 %v3263_v39, %v8265_v17  ;;  %v3268_v26 = vsel %vm3244_vm0, %v3232_v55, %v3256_v2  ;;  %vm3242_vm1 = vcmp.ge.f32.partialorder %v3230_v35, 0.0  ;;  %v3254_v14 = vmul.f32 0.01, %v3230_v35  ;;  %v3349_v24 = vld [vmem:[#allocation2 + $0x28] sm:$0x7]  ;;  %v6740_v8 = vld [vmem:[#allocation8 + $0xb0] sm:$0xff]  }
 0x2a9   : > { %3337 = vst [vmem:[#allocation2 + $0x58] sm:$0xf] %v5794_v27  ;;  %v3280_v53 = vmul.f32 %v3268_v26, %v8266_v49  ;;  %v3233_v1 = vadd.f32 %v6285_v45, %v2955_v36  ;;  %v3231_v19 = vadd.f32 %v3210_v54, %v2953_v12  ;;  %v7858_v34 = vld [vmem:[#allocation2 + $0x28] sm:$0x7]  ;;  %v7861_v52 = vld [vmem:[#allocation2 + $0x48] sm:$0x8]  ;;  %v3377_v33 = vsel %vm7271_vm9, %v5608_v16, %v3376_v25 }
 0x2aa   : > { %v5792_v41 = vpack.c.bf16 %v3275_v50, %v3275_v50  ;;  %v3266_v46 = vsel %vm3242_vm1, %v3230_v35, %v3254_v14  ;;  %v6735_v58 = vld [vmem:[#allocation2 + $0x4] ss:$12 sps:$4 sm:$0xff]   ;;  %v3388_v55 = vrot.slane %v3349_v24, 7  ;;  %v3984_v47 = vrot.slane %v7858_v34, 7  ;;  %v6742_v16 = vld [vmem:[#allocation8 + $0xe8] sm:$0xff]  }
 0x2ab   : > { %v3345_v51 = vld [vmem:[#allocation2 + $0x10] sm:$0x7]  ;;  %v5797_v11 = vpack.c.bf16 %v3280_v53, %v3280_v53  ;;  %v3278_v0 = vmul.f32 %v3266_v46, %v8267_v57  ;;  %vm3245_vm2 = vcmp.ge.f32.partialorder %v3233_v1, 0.0  ;;  %v3257_v44 = vmul.f32 0.01, %v3233_v1  ;;  %6326 = vmatprep.mubr.bf16.mxu0 %v6735_v58  ;;  %v8271_v35 = vld [vmem:[#allocation34_spill] sm:$0xff] }
 0x2ac   : > { %3335 = vst [vmem:[#allocation2 + $0x40] sm:$0xf] %v5792_v41  ;;  %vm3243_vm3 = vcmp.ge.f32.partialorder %v3231_v19, 0.0  ;;  %v3255_v40 = vmul.f32 0.01, %v3231_v19  ;;  %v3380_v62 = vrot.slane %v3345_v51, 7  ;;  %6327 = vmatmul.mubr.bf16.vlgmr.msra.gmra.mxu0 %v6737_v63  ;;  %v3389_v28 = vsel %vm7271_vm9, %v5611_v4, %v3388_v55 }
 0x2ad   : > { %3340 = vst [vmem:[#allocation2 + $0x7c] sm:$0xf] %v5797_v11  ;;  %v5795_v38 = vpack.c.bf16 %v3278_v0, %v3278_v0  ;;  %v3269_v45 = vsel %vm3245_vm2, %v3233_v1, %v3257_v44  ;;  %6359 = vmatpush3.bf16.msra.mxu0 %v8270_v61  ;;  %v3947_v48 = vld [vmem:[#allocation2 + $0x1c] sm:$0x7]  ;;  %v3731_v2 = vld [vmem:[#allocation2 + $0x14] sm:$0x1]  ;;  %v5618_v39 = vcombine.low %v3385_v18, %v3389_v28 }
 0x2ae   : > { %v3281_v60 = vmul.f32 %v3269_v45, %v8269_v43  ;;  %v3267_v21 = vsel %vm3243_vm3, %v3231_v19, %v3255_v40  ;;  %v3381_v13 = vsel %vm7271_vm9, %v5609_v22, %v3380_v62  ;;  %6360 = vmatprep.subr.bf16.mxu0 %v6739_v32  ;;  %v3351_v22 = vld [vmem:[#allocation2 + $0x34] sm:$0x7]  ;;  %v3355_v30 = vld [vmem:[#allocation2 + $0x4c] sm:$0x7]  ;;  %v3730_v23 = vld [vmem:[#allocation2 + $0x10] sm:$0xe]  ;;  %v3985_v63 = vsel %vm7271_vm9, %v5662_v37, %v3984_v47 }
 0x2af   : > { %3338 = vst [vmem:[#allocation2 + $0x64] sm:$0xf] %v5795_v38  ;;  %v3279_v36 = vmul.f32 %v3267_v21, %v8271_v35  ;;  %v5617_v3 = vcombine.low %v3377_v33, %v3381_v13  ;;  %v5614_v4 = vrot.slane %v7861_v52, 11  ;;  %v5615_v12 = vrot.slane %v3356_v20, 11  ;;  %v3729_v54 = vld [vmem:[#allocation2 + $0x8] sm:$0x1] }
 0x2b0   : > { %v5798_v27 = vpack.c.bf16 %v3281_v60, %v3281_v60  ;;  %v3980_v50 = vrot.slane %v3947_v48, 7  ;;  %v3357_v26 = vld [vmem:[#allocation2 + $0x58] sm:$0x7]  ;;  %v3728_v14 = vld [vmem:[#allocation2 + $0x4] sm:$0xe]  ;;  %v3766_v49 = vrot.slane %v3731_v2, 5 }
 0x2b1   : > { %v5796_v17 = vpack.c.bf16 %v3279_v36, %v3279_v36  ;;  %6302 = vmatprep.mubr.bf16.mxu1 %v5617_v3  ;;  %6361 = vmatpush3.bf16.msra.mxu0 %v6739_v32  ;;  %v3392_v56 = vrot.slane %v3351_v22, 7  ;;  %v3400_v10 = vrot.slane %v3355_v30, 7  ;;  %v3404_v59 = vrot.slane %v3357_v26, 7  ;;  %v8272_v1 = vld [vmem:[#allocation39_spill] sm:$0xff]  ;;  %v6746_v52 = vld [vmem:[#allocation8 + $0xa0] sm:$0xff]   ;;  %v6748_v40 = vld [vmem:[#allocation8 + $0x98] sm:$0xff]  }
 0x2b2   : > { %3341 = vst [vmem:[#allocation2 + $0x88] sm:$0xf] %v5798_v27  ;;  %6303 = vmatmul.mubr.bf16.vlgmr.msra.gmra.mxu1 %v5618_v39  ;;  %v5642_v53 = vrot.slane %v3730_v23, 9  ;;  %6362 = vmatprep.subr.bf16.mxu0 %v6742_v16  ;;  %v6743_v24 = vld [vmem:[#allocation2 + $0x4c] ss:$12 sps:$4 sm:$0xff]   ;;  %v5641_v46 = vrot.slane %v3728_v14, 9  ;;  %v3981_v51 = vsel %vm7271_vm9, %v5661_v42, %v3980_v50 }
 0x2b3   : > { %3339 = vst [vmem:[#allocation2 + $0x70] sm:$0xf] %v5796_v17  ;;  %6335 = vmatpush3.bf16.msra.mxu1 %v8272_v1  ;;  %v6741_v19 = vld [vmem:[#allocation2 + $0x34] ss:$12 sps:$4 sm:$0xff]   ;;  %v6744_v41 = vld [vmem:[#allocation8 + $0xa8] sm:$0xff]   ;;  %v3762_v58 = vrot.slane %v3729_v54, 5  ;;  %v3405_v11 = vsel %vm7271_vm9, %v5615_v12, %v3404_v59  ;;  %v5669_v57 = vcombine.low %v3981_v51, %v3985_v63  ;;  %v3393_v37 = vsel %vm7271_vm9, %v5612_v6, %v3392_v56 }
 0x2b4   : > { %v3353_v25 = vld [vmem:[#allocation2 + $0x40] sm:$0x7]  ;;  %6336 = vmatprep.subr.bf16.mxu1 %v6740_v8  ;;  %6330 = vmatprep.mubr.bf16.mxu0 %v6741_v19  ;;  %v3767_v44 = vsel %vm7277_vm10, %v5642_v53, %v3766_v49  ;;  %v3401_v32 = vsel %vm7271_vm9, %v5614_v4, %v3400_v10  ;;  %v6749_v62 = vld [vmem:[#allocation8 + $0xd0] sm:$0xff]   ;;  %v6751_v38 = vld [vmem:[#allocation8 + $0xc8] sm:$0xff]  }
 0x2b5   : > { %v3396_v34 = vrot.slane %v3353_v25, 7  ;;  %6331 = vmatmul.mubr.bf16.gmra.mxu0 %v6743_v24  ;;  %v5620_v15 = vcombine.low %v3401_v32, %v3405_v11  ;;  %v3763_v6 = vsel %vm7277_vm10, %v5641_v46, %v3762_v58  ;;  %v6750_v55 = vld [vmem:[#allocation8 + $0x90] sm:$0xff]   ;;  %v6752_v45 = vld [vmem:[#allocation8 + $0x88] sm:$0xff]   ;;  %v3952_v33 = vld [vmem:[#allocation2 + $0x3c] sm:$0x8] }
 0x2b6   : > { %6363 = vmatpush3.bf16.msra.mxu0 %v6742_v16  ;;  %6374 = vmatprep.mubr.bf16.mxu0 %v5669_v57  ;;  %v5649_v7 = vcombine.low %v3763_v6, %v3767_v44  ;;  %v6753_v47 = vld [vmem:[#allocation8 + $0xc0] sm:$0xff]   ;;  %v3950_v20 = vld [vmem:[#allocation2 + $0x30] sm:$0x8]  ;;  %v3954_v60 = vld [vmem:[#allocation2 + $0x48] sm:$0x8]  ;;  %v5664_v2 = vrot.slane %v3952_v33, 11 }
 0x2b7   : > { %v3397_v0 = vsel %vm7271_vm9, %v5613_v5, %v3396_v34  ;;  %6337 = vmatpush3.bf16.msra.mxu1 %v6740_v8  ;;  %6364 = vmatprep.subr.bf16.mxu0 %v6745_v9  ;;  %v6747_v5 = vld [vmem:[#allocation8 + $0xd8] sm:$0xff]   ;;  %v3953_v43 = vld [vmem:[#allocation2 + $0x40] sm:$0x7]  ;;  %v3956_v21 = vld [vmem:[#allocation2 + $0x54] sm:$0x8]  ;;  %v5663_v27 = vrot.slane %v3950_v20, 11 }
 0x2b8   : > { %v5619_v42 = vcombine.low %v3393_v37, %v3397_v0  ;;  %6338 = vmatprep.subr.bf16.mxu1 %v6744_v41  ;;  %v3957_v61 = vld [vmem:[#allocation2 + $0x58] sm:$0x7]  ;;  %v3735_v13 = vld [vmem:[#allocation2 + $0x2c] sm:$0x1]  ;;  %v3951_v28 = vld [vmem:[#allocation2 + $0x34] sm:$0x7] }
 0x2b9   : > { %v3955_v8 = vld [vmem:[#allocation2 + $0x4c] sm:$0x7]  ;;  %v3734_v16 = vld [vmem:[#allocation2 + $0x28] sm:$0xe]  ;;  %v6754_v48 = vld [vmem:[#allocation8 + $0x80] sm:$0xff]   ;;  %v3992_v35 = vrot.slane %v3953_v43, 7 }
 0x2ba   : > { %6306 = vmatprep.mubr.bf16.mxu1 %v5619_v42  ;;  %6365 = vmatpush3.bf16.msra.mxu0 %v6745_v9  ;;  %v3733_v36 = vld [vmem:[#allocation2 + $0x20] sm:$0x1]  ;;  %v6755_v3 = vld [vmem:[#allocation8 + $0x178] sm:$0xff]   ;;  %v5666_v18 = vrot.slane %v3956_v21, 11  ;;  %v4000_v22 = vrot.slane %v3957_v61, 7  ;;  %v3988_v39 = vrot.slane %v3951_v28, 7 }
 0x2bb   : > { %6307 = vmatmul.mubr.bf16.gmra.mxu1 %v5620_v15  ;;  %6366 = vmatprep.subr.bf16.mxu0 %v6747_v5  ;;  %v3738_v30 = vld [vmem:[#allocation2 + $0x40] sm:$0xe]  ;;  %v3739_v23 = vld [vmem:[#allocation2 + $0x44] sm:$0x1]  ;;  %v5665_v4 = vrot.slane %v3954_v60, 11  ;;  %v3774_v54 = vrot.slane %v3735_v13, 5  ;;  %v3993_v49 = vsel %vm7271_vm9, %v5664_v2, %v3992_v35 }
 0x2bc   : > { %6339 = vmatpush3.bf16.msra.mxu1 %v6744_v41  ;;  %6350 = vmatprep.mubr.bf16.mxu1 %v5649_v7  ;;  %v3732_v12 = vld [vmem:[#allocation2 + $0x1c] sm:$0xe]  ;;  %v3996_v17 = vrot.slane %v3955_v8, 7  ;;  %v5644_v50 = vrot.slane %v3734_v16, 9  ;;  %v3736_v26 = vld [vmem:[#allocation2 + $0x34] sm:$0xe]  ;;  %v4001_v1 = vsel %vm7271_vm9, %v5666_v18, %v4000_v22  ;;  %v3989_v34 = vsel %vm7271_vm9, %v5663_v27, %v3988_v39 }
 0x2bd   : > { %6340 = vmatprep.subr.bf16.mxu1 %v6746_v52  ;;  %v3737_v14 = vld [vmem:[#allocation2 + $0x38] sm:$0x1]  ;;  %v5646_v56 = vrot.slane %v3738_v30, 9  ;;  %v3782_v10 = vrot.slane %v3739_v23, 5  ;;  %v7911_v59 = vld [vmem:[#allocation2 + $0x20] sm:$0x1]  ;;  %v5670_v9 = vcombine.low %v3989_v34, %v3993_v49 }
 0x2be   : > { %6367 = vmatpush3.bf16.msra.mxu0 %v6747_v5  ;;  %v4337_v53 = vld [vmem:[#allocation2 + $0x2c] sm:$0x1]  ;;  %v5643_v19 = vrot.slane %v3732_v12, 9  ;;  %v3770_v63 = vrot.slane %v3733_v36, 5  ;;  %v3960_v25 = vld [vmem:[#allocation2 + $0x6c] sm:$0x8]  ;;  %v3997_v57 = vsel %vm7271_vm9, %v5665_v4, %v3996_v17  ;;  %v3775_v37 = vsel %vm7277_vm10, %v5644_v50, %v3774_v54 }
 0x2bf   : > { %6368 = vmatprep.subr.bf16.mxu0 %v6749_v62  ;;  %v3961_v24 = vld [vmem:[#allocation2 + $0x70] sm:$0x7]  ;;  %v6756_v41 = vld [vmem:[#allocation8 + $0x138] sm:$0xff]   ;;  %v5645_v46 = vrot.slane %v3736_v26, 9  ;;  %v3778_v58 = vrot.slane %v3737_v14, 5  ;;  %v5671_v32 = vcombine.low %v3997_v57, %v4001_v1  ;;  %v3783_v15 = vsel %vm7277_vm10, %v5646_v56, %v3782_v10  ;;  %v6759_v13 = vld [vmem:[#allocation8 + $0x168] sm:$0xff]  }
 0x2c0   : > { %6341 = vmatpush3.bf16.msra.mxu1 %v6746_v52  ;;  %v6757_v51 = vld [vmem:[#allocation8 + $0x170] sm:$0xff]   ;;  %v4336_v11 = vld [vmem:[#allocation2 + $0x28] sm:$0xe]  ;;  %v3958_v0 = vld [vmem:[#allocation2 + $0x60] sm:$0x8]  ;;  %v5668_v6 = vrot.slane %v3960_v25, 11 }
 0x2c1   : > { %6342 = vmatprep.subr.bf16.mxu1 %v6748_v40  ;;  %v3959_v44 = vld [vmem:[#allocation2 + $0x64] sm:$0x7]  ;;  %v3743_v42 = vld [vmem:[#allocation2 + $0x5c] sm:$0x1]  ;;  %v4008_v52 = vrot.slane %v3961_v24, 7  ;;  %v5667_v20 = vrot.slane %v3958_v0, 11 }
 0x2c2   : > { %6369 = vmatpush3.bf16.msra.mxu0 %v6749_v62  ;;  %v4334_v7 = vld [vmem:[#allocation2 + $0x1c] sm:$0xe]  ;;  %v3742_v5 = vld [vmem:[#allocation2 + $0x58] sm:$0xe]  ;;  %v6758_v62 = vld [vmem:[#allocation8 + $0x130] sm:$0xff]   ;;  %v4004_v43 = vrot.slane %v3959_v44, 7 }
 0x2c3   : > { %6370 = vmatprep.subr.bf16.mxu0 %v6751_v38  ;;  %v3740_v60 = vld [vmem:[#allocation2 + $0x4c] sm:$0xe]  ;;  %v3741_v21 = vld [vmem:[#allocation2 + $0x50] sm:$0x1]  ;;  %v5693_v28 = vrot.slane %v4334_v7, 9  ;;  %v5648_v8 = vrot.slane %v3742_v5, 9 }
 0x2c4   : > { %6343 = vmatpush3.bf16.msra.mxu1 %v6748_v40  ;;  %v3771_v40 = vsel %vm7277_vm10, %v5643_v19, %v3770_v63  ;;  %v3790_v16 = vrot.slane %v3743_v42, 5  ;;  %v5647_v35 = vrot.slane %v3740_v60, 9  ;;  %v3786_v36 = vrot.slane %v3741_v21, 5  ;;  %v6760_v23 = vld [vmem:[#allocation8 + $0x128] sm:$0xff]   ;;  %v6762_v27 = vld [vmem:[#allocation8 + $0x160] sm:$0xff]   ;;  %v6764_v50 = vld [vmem:[#allocation8 + $0x158] sm:$0xff]  }
 0x2c5   : > { %6344 = vmatprep.subr.bf16.mxu1 %v6750_v55  ;;  %v5650_v33 = vcombine.low %v3771_v40, %v3775_v37  ;;  %v6763_v54 = vld [vmem:[#allocation8 + $0x120] sm:$0xff]   ;;  %v6761_v17 = vld [vmem:[#allocation2 + $0x1c] ss:$12 sps:$4 sm:$0xff]   ;;  %v6766_v14 = vld [vmem:[#allocation8 + $0x150] sm:$0xff]  }
 0x2c6   : > { %6371 = vmatpush3.bf16.msra.mxu0 %v6751_v38  ;;  %v5694_v38 = vrot.slane %v4336_v11, 9  ;;  %v3791_v30 = vsel %vm7277_vm10, %v5648_v8, %v3790_v16  ;;  %v3787_v4 = vsel %vm7277_vm10, %v5647_v35, %v3786_v36  ;;  %v6765_v26 = vld [vmem:[#allocation8 + $0x118] sm:$0xff]   ;;  %v6767_v49 = vld [vmem:[#allocation8 + $0x110] sm:$0xff]   ;;  %v6768_v56 = vld [vmem:[#allocation8 + $0x148] sm:$0xff]  }
 0x2c7   : > { %6372 = vmatprep.subr.bf16.mxu0 %v6753_v47  ;;  %v5652_v12 = vcombine.low %v3787_v4, %v3791_v30  ;;  %v4340_v10 = vld [vmem:[#allocation2 + $0x40] sm:$0xe]  ;;  %v4344_v1 = vld [vmem:[#allocation2 + $0x58] sm:$0xe]  ;;  %v4345_v19 = vld [vmem:[#allocation2 + $0x5c] sm:$0x1] }
 0x2c8   : > { %6345 = vmatpush3.bf16.msra.mxu1 %v6750_v55  ;;  %v4368_v55 = vrot.slane %v7911_v59, 5  ;;  %v4341_v59 = vld [vmem:[#allocation2 + $0x44] sm:$0x1]  ;;  %v4338_v25 = vld [vmem:[#allocation2 + $0x34] sm:$0xe]  ;;  %v5696_v34 = vrot.slane %v4340_v10, 9 }
 0x2c9   : > { %6346 = vmatprep.subr.bf16.mxu1 %v6752_v45  ;;  %v6770_v63 = vld [vmem:[#allocation8 + $0x140] sm:$0xff]   ;;  %v4339_v24 = vld [vmem:[#allocation2 + $0x38] sm:$0x1]  ;;  %v4388_v11 = vrot.slane %v4345_v19, 5  ;;  %v5695_v57 = vrot.slane %v4338_v25, 9  ;;  %v6787_v10 = vld [vmem:[#allocation8 + $0x190] sm:$0xff]  }
 0x2ca   : > { %6373 = vmatpush3.bf16.msra.mxu0 %v6753_v47  ;;  %v3779_v47 = vsel %vm7277_vm10, %v5645_v46, %v3778_v58  ;;  %v4369_v22 = vsel %vm7277_vm10, %v5693_v28, %v4368_v55  ;;  %v4342_v46 = vld [vmem:[#allocation2 + $0x4c] sm:$0xe]  ;;  %v4343_v58 = vld [vmem:[#allocation2 + $0x50] sm:$0x1]  ;;  %v4376_v37 = vrot.slane %v4339_v24, 5  ;;  %v6772_v0 = vld [vmem:[#allocation8 + $0x1f8] sm:$0xff]  }
 0x2cb   : > { %6406 = vmatprep.subr.bf16.mxu0 %v6755_v3  ;;  %v5651_v61 = vcombine.low %v3779_v47, %v3783_v15  ;;  %v5697_v44 = vrot.slane %v4342_v46, 9  ;;  %v4384_v42 = vrot.slane %v4343_v58, 5  ;;  %v4347_v5 = vld [vmem:[#allocation2 + $0x68] sm:$0x1]  ;;  %v6774_v55 = vld [vmem:[#allocation8 + $0x1b8] sm:$0xff]  }
 0x2cc   : > { %6347 = vmatpush3.bf16.msra.mxu1 %v6752_v45  ;;  %v4372_v45 = vrot.slane %v4337_v53, 5  ;;  %v6769_v53 = vld [vmem:[#allocation8 + $0x108] sm:$0xff]   ;;  %v4377_v7 = vsel %vm7277_vm10, %v5695_v57, %v4376_v37  ;;  %v4554_v60 = vld [vmem:[#allocation2 + $0x3c] sm:$0x8]  ;;  %v4555_v21 = vld [vmem:[#allocation2 + $0x40] sm:$0x7] }
 0x2cd   : > { %6348 = vmatprep.subr.bf16.mxu1 %v6754_v48  ;;  %6375 = vmatmul.mubr.bf16.vlgmr.msra.gmra.mxu0 %v5670_v9  ;;  %v6771_v9 = vld [vmem:[#allocation8 + $0x100] sm:$0xff]   ;;  %v4392_v8 = vrot.slane %v4347_v5, 5  ;;  %v6775_v16 = vld [vmem:[#allocation2 + $0x4c] ss:$12 sps:$4 sm:$0xff]   ;;  %v5714_v36 = vrot.slane %v4554_v60, 11 }
 0x2ce   : > { %6378 = vmatprep.mubr.bf16.mxu0 %v5671_v32  ;;  %6407 = vmatpush3.bf16.msra.mxu0 %v6755_v3  ;;  %v4373_v2 = vsel %vm7277_vm10, %v5694_v38, %v4372_v45  ;;  %v4005_v3 = vsel %vm7271_vm9, %v5667_v20, %v4004_v43  ;;  %v6776_v38 = vld [vmem:[#allocation8 + $0x1f0] sm:$0xff]   ;;  %v4346_v45 = vld [vmem:[#allocation2 + $0x64] sm:$0xe]  ;;  %v4562_v25 = vld [vmem:[#allocation2 + $0x6c] sm:$0x8] }
 0x2cf   : > { %6408 = vmatprep.subr.bf16.mxu0 %v6757_v51  ;;  %v5701_v39 = vcombine.low %v4369_v22, %v4373_v2  ;;  %v4552_v43 = vld [vmem:[#allocation2 + $0x30] sm:$0x8]  ;;  %v5699_v28 = vrot.slane %v4346_v45, 9  ;;  %v4553_v2 = vld [vmem:[#allocation2 + $0x34] sm:$0x7]  ;;  %v5718_v57 = vrot.slane %v4562_v25, 11 }
 0x2d0   : > { %6349 = vmatpush3.bf16.msra.mxu1 %v6754_v48  ;;  %v4009_v48 = vsel %vm7271_vm9, %v5668_v6, %v4008_v52  ;;  %v4348_v6 = vld [vmem:[#allocation2 + $0x70] sm:$0xe]  ;;  %v4349_v52 = vld [vmem:[#allocation2 + $0x74] sm:$0x1]  ;;  %v5713_v22 = vrot.slane %v4552_v43, 11  ;;  %v4586_v30 = vrot.slane %v4553_v2, 7 }
 0x2d1   : > { %6382 = vmatprep.subr.bf16.mxu1 %v6756_v41  ;;  %v5672_v18 = vcombine.low %v4005_v3, %v4009_v48  ;;  %v5700_v47 = vrot.slane %v4348_v6, 9  ;;  %v4396_v20 = vrot.slane %v4349_v52, 5  ;;  %v6778_v48 = vld [vmem:[#allocation8 + $0x1e8] sm:$0xff]   ;;  %v4590_v3 = vrot.slane %v4555_v21, 7  ;;  %v6779_v4 = vld [vmem:[#allocation2 + $0x34] ss:$12 sps:$4 sm:$0xff]  }
 0x2d2   : > { %6409 = vmatpush3.bf16.msra.mxu0 %v6757_v51  ;;  %v5698_v51 = vrot.slane %v4344_v1, 9  ;;  %v6790_v1 = vld [vmem:[#allocation8 + $0x1c0] sm:$0xff]   ;;  %v4558_v19 = vld [vmem:[#allocation2 + $0x54] sm:$0x8]  ;;  %v4563_v24 = vld [vmem:[#allocation2 + $0x70] sm:$0x7] }
 0x2d3   : > { %6351 = vmatmul.mubr.bf16.vlgmr.msra.gmra.mxu1 %v5650_v33  ;;  %6410 = vmatprep.subr.bf16.mxu0 %v6759_v13  ;;  %v4397_v35 = vsel %vm7277_vm10, %v5700_v47, %v4396_v20  ;;  %v4557_v46 = vld [vmem:[#allocation2 + $0x4c] sm:$0x7]  ;;  %v5716_v58 = vrot.slane %v4558_v19, 11  ;;  %v4606_v37 = vrot.slane %v4563_v24, 7  ;;  %v4943_v45 = vld [vmem:[#allocation2 + $0x44] sm:$0x1] }
 0x2d4   : > { %6354 = vmatprep.mubr.bf16.mxu1 %v5651_v61  ;;  %6383 = vmatpush3.bf16.msra.mxu1 %v6756_v41  ;;  %v4380_v41 = vrot.slane %v4341_v59, 5  ;;  %v4389_v15 = vsel %vm7277_vm10, %v5698_v51, %v4388_v11  ;;  %v6773_v61 = vld [vmem:[#allocation2 + $0x34] ss:$12 sps:$4 sm:$0xff]   ;;  %v6788_v59 = vld [vmem:[#allocation8 + $0x1c8] sm:$0xff]   ;;  %v4564_v43 = vld [vmem:[#allocation2 + $0x78] sm:$0x8] }
 0x2d5   : > { %6384 = vmatprep.subr.bf16.mxu1 %v6758_v62  ;;  %6379 = vmatmul.mubr.bf16.gmra.mxu0 %v5672_v18  ;;  %v4393_v18 = vsel %vm7277_vm10, %v5699_v28, %v4392_v8  ;;  %v4560_v11 = vld [vmem:[#allocation2 + $0x60] sm:$0x8]  ;;  %v6792_v6 = vld [vmem:[#allocation2 + $0x4c] ss:$12 sps:$4 sm:$0xff]   ;;  %v4607_v5 = vsel %vm7271_vm9, %v5718_v57, %v4606_v37  ;;  %v6795_v20 = vld [vmem:[#allocation8 + $0x230] sm:$0xff]   ;;  %v5719_v2 = vrot.slane %v4564_v43, 11 }
 0x2d6   : > { %6411 = vmatpush3.bf16.msra.mxu0 %v6759_v13  ;;  %6422 = vmatprep.mubr.bf16.mxu0 %v5701_v39  ;;  %v4381_v32 = vsel %vm7277_vm10, %v5696_v34, %v4380_v41  ;;  %v6777_v13 = vld [vmem:[#allocation8 + $0x1b0] sm:$0xff]   ;;  %v6782_v39 = vld [vmem:[#allocation8 + $0x1e0] sm:$0xff]   ;;  %v4556_v41 = vld [vmem:[#allocation2 + $0x48] sm:$0x8] }
 0x2d7   : > { %6412 = vmatprep.subr.bf16.mxu0 %v6762_v27  ;;  %v5702_v40 = vcombine.low %v4377_v7, %v4381_v32  ;;  %v6791_v34 = vld [vmem:[#allocation8 + $0x180] sm:$0xff]   ;;  %v5717_v32 = vrot.slane %v4560_v11, 11  ;;  %v4565_v60 = vld [vmem:[#allocation2 + $0x7c] sm:$0x7]  ;;  %v4940_v28 = vld [vmem:[#allocation2 + $0x34] sm:$0xe] }
 0x2d8   : > { %6385 = vmatpush3.bf16.msra.mxu1 %v6758_v62  ;;  %v4385_v62 = vsel %vm7277_vm10, %v5697_v44, %v4384_v42  ;;  %v4594_v44 = vrot.slane %v4557_v46, 7  ;;  %v6794_v42 = vld [vmem:[#allocation8 + $0x238] sm:$0xff]   ;;  %v6793_v7 = vld [vmem:[#allocation2 + $0x64] ss:$12 sps:$4 sm:$0xff]   ;;  %v4949_v25 = vld [vmem:[#allocation2 + $0x68] sm:$0x1] }
 0x2d9   : > { %6386 = vmatprep.subr.bf16.mxu1 %v6760_v23  ;;  %v5703_v33 = vcombine.low %v4385_v62, %v4389_v15  ;;  %v4567_v62 = vld [vmem:[#allocation2 + $0x88] sm:$0x7]  ;;  %v4941_v8 = vld [vmem:[#allocation2 + $0x38] sm:$0x1]  ;;  %v4946_v31 = vld [vmem:[#allocation2 + $0x58] sm:$0xe] }
 0x2da   : > { %6413 = vmatpush3.bf16.msra.mxu0 %v6762_v27  ;;  %v6781_v27 = vld [vmem:[#allocation8 + $0x1a8] sm:$0xff]  }
 0x2db   : > { %6355 = vmatmul.mubr.bf16.gmra.mxu1 %v5652_v12  ;;  %6414 = vmatprep.subr.bf16.mxu0 %v6764_v50  ;;  %v4591_v12 = vsel %vm7271_vm9, %v5714_v36, %v4590_v3  ;;  %v6797_v36 = vld [vmem:[#allocation8 + $0x228] sm:$0xff]   ;;  %v5745_v3 = vrot.slane %v4940_v28, 9 }
 0x2dc   : > { %6387 = vmatpush3.bf16.msra.mxu1 %v6760_v23  ;;  %6398 = vmatprep.mubr.bf16.mxu1 %v6761_v17  ;;  %v5704_v23 = vcombine.low %v4393_v18, %v4397_v35  ;;  %v4587_v17 = vsel %vm7271_vm9, %v5713_v22, %v4586_v30  ;;  %v4610_v35 = vrot.slane %v4565_v60, 7  ;;  %v4974_v18 = vrot.slane %v4941_v8, 5  ;;  %v6796_v22 = vld [vmem:[#allocation2 + $0x7c] ss:$12 sps:$4 sm:$0xff]   ;;  %v4955_v37 = vld [vmem:[#allocation2 + $0x8c] sm:$0x1] }
 0x2dd   : > { %6388 = vmatprep.subr.bf16.mxu1 %v6763_v54  ;;  %v4954_v57 = vld [vmem:[#allocation2 + $0x88] sm:$0xe] }
 0x2de   : > { %6415 = vmatpush3.bf16.msra.mxu0 %v6764_v50  ;;  %v6783_v50 = vld [vmem:[#allocation8 + $0x1a0] sm:$0xff]  }
 0x2df   : > { %6416 = vmatprep.subr.bf16.mxu0 %v6766_v14 }
 0x2e0   : > { %6389 = vmatpush3.bf16.msra.mxu1 %v6763_v54  ;;  %v6780_v54 = vld [vmem:[#allocation2 + $0x64] ss:$12 sps:$4 sm:$0xff]  }
 0x2e1   : > { %6390 = vmatprep.subr.bf16.mxu1 %v6765_v26 }
 0x2e2   : > { %6417 = vmatpush3.bf16.msra.mxu0 %v6766_v14  ;;  %v6784_v14 = vld [vmem:[#allocation8 + $0x1d8] sm:$0xff]  }
 0x2e3   : > { %6418 = vmatprep.subr.bf16.mxu0 %v6768_v56 }
 0x2e4   : > { %6391 = vmatpush3.bf16.msra.mxu1 %v6765_v26  ;;  %v5721_v26 = vcombine.low %v4587_v17, %v4591_v12  ;;  %v6798_v12 = vld [vmem:[#allocation8 + $0x220] sm:$0xff]   ;;  %v6799_v17 = vld [vmem:[#allocation8 + $0x218] sm:$0xff]  }
 0x2e5   : > { %6392 = vmatprep.subr.bf16.mxu1 %v6767_v49 }
 0x2e6   : > { %6419 = vmatpush3.bf16.msra.mxu0 %v6768_v56  ;;  %v6786_v56 = vld [vmem:[#allocation8 + $0x1d0] sm:$0xff]  }
 0x2e7   : > { %6420 = vmatprep.subr.bf16.mxu0 %v6770_v63 }
 0x2e8   : > { %6393 = vmatpush3.bf16.msra.mxu1 %v6767_v49  ;;  %v6785_v49 = vld [vmem:[#allocation8 + $0x198] sm:$0xff]  }
 0x2e9   : > { %6394 = vmatprep.subr.bf16.mxu1 %v6769_v53 }
 0x2ea   : > { %6421 = vmatpush3.bf16.msra.mxu0 %v6770_v63  ;;  %v4559_v63 = vld [vmem:[#allocation2 + $0x58] sm:$0x7] }
 0x2eb   : > { %6454 = vmatprep.subr.bf16.mxu0 %v6772_v0  ;;  %v4598_v51 = vrot.slane %v4559_v63, 7  ;;  %v4948_v63 = vld [vmem:[#allocation2 + $0x64] sm:$0xe] }
 0x2ec   : > { %6395 = vmatpush3.bf16.msra.mxu1 %v6769_v53  ;;  %v6789_v53 = vld [vmem:[#allocation8 + $0x188] sm:$0xff]  }
 0x2ed   : > { %6396 = vmatprep.subr.bf16.mxu1 %v6771_v9  ;;  %6423 = vmatmul.mubr.bf16.vlgmr.msra.gmra.mxu0 %v5702_v40  ;;  %v4599_v52 = vsel %vm7271_vm9, %v5716_v58, %v4598_v51  ;;  %v4566_v40 = vld [vmem:[#allocation2 + $0x84] sm:$0x8]  ;;  %v5749_v58 = vrot.slane %v4948_v63, 9  ;;  %v4990_v51 = vrot.slane %v4949_v25, 5 }
 0x2ee   : > { %6426 = vmatprep.mubr.bf16.mxu0 %v5703_v33  ;;  %6455 = vmatpush3.bf16.msra.mxu0 %v6772_v0  ;;  %v5715_v0 = vrot.slane %v4556_v41, 11 }
 0x2ef   : > { %6456 = vmatprep.subr.bf16.mxu0 %v6776_v38 }
 0x2f0   : > { %6397 = vmatpush3.bf16.msra.mxu1 %v6771_v9  ;;  %v4561_v9 = vld [vmem:[#allocation2 + $0x64] sm:$0x7] }
 0x2f1   : > { %6430 = vmatprep.subr.bf16.mxu1 %v6774_v55  ;;  %v4602_v15 = vrot.slane %v4561_v9, 7 }
 0x2f2   : > { %6457 = vmatpush3.bf16.msra.mxu0 %v6776_v38  ;;  %v4942_v38 = vld [vmem:[#allocation2 + $0x40] sm:$0xe] }
 0x2f3   : > { %6399 = vmatmul.mubr.bf16.vlgmr.msra.gmra.mxu1 %v6773_v61  ;;  %6458 = vmatprep.subr.bf16.mxu0 %v6778_v48  ;;  %v4603_v47 = vsel %vm7271_vm9, %v5717_v32, %v4602_v15  ;;  %v5720_v61 = vrot.slane %v4566_v40, 11  ;;  %v4952_v32 = vld [vmem:[#allocation2 + $0x7c] sm:$0xe]  ;;  %v4953_v15 = vld [vmem:[#allocation2 + $0x80] sm:$0x1] }
 0x2f4   : > { %6402 = vmatprep.mubr.bf16.mxu1 %v6775_v16  ;;  %6431 = vmatpush3.bf16.msra.mxu1 %v6774_v55  ;;  %v4595_v55 = vsel %vm7271_vm9, %v5715_v0, %v4594_v44  ;;  %v5723_v21 = vcombine.low %v4603_v47, %v4607_v5  ;;  %v5746_v16 = vrot.slane %v4942_v38, 9  ;;  %v5751_v5 = vrot.slane %v4952_v32, 9 }
 0x2f5   : > { %6432 = vmatprep.subr.bf16.mxu1 %v6777_v13  ;;  %6427 = vmatmul.mubr.bf16.gmra.mxu0 %v5704_v23  ;;  %v5722_v33 = vcombine.low %v4595_v55, %v4599_v52  ;;  %v5752_v52 = vrot.slane %v4954_v57, 9  ;;  %v4998_v40 = vrot.slane %v4953_v15, 5 }
 0x2f6   : > { %6459 = vmatpush3.bf16.msra.mxu0 %v6778_v48  ;;  %6470 = vmatprep.mubr.bf16.mxu0 %v6779_v4  ;;  %v4978_v48 = vrot.slane %v4943_v45, 5  ;;  %v4975_v4 = vsel %vm7277_vm10, %v5745_v3, %v4974_v18 }
 0x2f7   : > { %6460 = vmatprep.subr.bf16.mxu0 %v6782_v39  ;;  %v4999_v55 = vsel %vm7277_vm10, %v5751_v5, %v4998_v40 }
 0x2f8   : > { %6433 = vmatpush3.bf16.msra.mxu1 %v6777_v13  ;;  %v4614_v13 = vrot.slane %v4567_v62, 7  ;;  %v4979_v23 = vsel %vm7277_vm10, %v5746_v16, %v4978_v48 }
 0x2f9   : > { %6434 = vmatprep.subr.bf16.mxu1 %v6781_v27 }
 0x2fa   : > { %6461 = vmatpush3.bf16.msra.mxu0 %v6782_v39  ;;  %v4615_v30 = vsel %vm7271_vm9, %v5720_v61, %v4614_v13 }
 0x2fb   : > { %6403 = vmatmul.mubr.bf16.gmra.mxu1 %v6780_v54  ;;  %6462 = vmatprep.subr.bf16.mxu0 %v6784_v14  ;;  %v5753_v54 = vcombine.low %v4975_v4, %v4979_v23 }
 0x2fc   : > { %6435 = vmatpush3.bf16.msra.mxu1 %v6781_v27  ;;  %6446 = vmatprep.mubr.bf16.mxu1 %v5721_v26  ;;  %v4611_v27 = vsel %vm7271_vm9, %v5719_v2, %v4610_v35  ;;  %v6801_v26 = vld [vmem:[#allocation8 + $0x208] sm:$0xff]  }
 0x2fd   : > { %6436 = vmatprep.subr.bf16.mxu1 %v6783_v50  ;;  %v5724_v39 = vcombine.low %v4611_v27, %v4615_v30 }
 0x2fe   : > { %6463 = vmatpush3.bf16.msra.mxu0 %v6784_v14  ;;  %v4947_v14 = vld [vmem:[#allocation2 + $0x5c] sm:$0x1] }
 0x2ff   : > { %6464 = vmatprep.subr.bf16.mxu0 %v6786_v56  ;;  %v4986_v19 = vrot.slane %v4947_v14, 5 }
 0x300   : > { %6437 = vmatpush3.bf16.msra.mxu1 %v6783_v50  ;;  %v6800_v50 = vld [vmem:[#allocation8 + $0x210] sm:$0xff]  }
 0x301   : > { %6438 = vmatprep.subr.bf16.mxu1 %v6785_v49 }
 0x302   : > { %6465 = vmatpush3.bf16.msra.mxu0 %v6786_v56  ;;  %v4951_v56 = vld [vmem:[#allocation2 + $0x74] sm:$0x1] }
 0x303   : > { %6466 = vmatprep.subr.bf16.mxu0 %v6788_v59 }
 0x304   : > { %6439 = vmatpush3.bf16.msra.mxu1 %v6785_v49  ;;  %v4950_v49 = vld [vmem:[#allocation2 + $0x70] sm:$0xe] }
 0x305   : > { %6440 = vmatprep.subr.bf16.mxu1 %v6787_v10  ;;  %v5750_v24 = vrot.slane %v4950_v49, 9 }
 0x306   : > { %6467 = vmatpush3.bf16.msra.mxu0 %v6788_v59  ;;  %v4944_v59 = vld [vmem:[#allocation2 + $0x4c] sm:$0xe] }
 0x307   : > { %6468 = vmatprep.subr.bf16.mxu0 %v6790_v1  ;;  %v5747_v41 = vrot.slane %v4944_v59, 9 }
 0x308   : > { %6441 = vmatpush3.bf16.msra.mxu1 %v6787_v10  ;;  %v6802_v10 = vld [vmem:[#allocation8 + $0x200] sm:$0xff]  }
 0x309   : > { %6442 = vmatprep.subr.bf16.mxu1 %v6789_v53 }
 0x30a   : > { %6469 = vmatpush3.bf16.msra.mxu0 %v6790_v1  ;;  %v5748_v1 = vrot.slane %v4946_v31, 9 }
 0x30c   : > { %6443 = vmatpush3.bf16.msra.mxu1 %v6789_v53  ;;  %v4945_v53 = vld [vmem:[#allocation2 + $0x50] sm:$0x1]  ;;  %v4987_v11 = vsel %vm7277_vm10, %v5748_v1, %v4986_v19 }
 0x30d   : > { %6444 = vmatprep.subr.bf16.mxu1 %v6791_v34  ;;  %6471 = vmatmul.mubr.bf16.vlgmr.msra.gmra.mxu0 %v6792_v6  ;;  %v4982_v46 = vrot.slane %v4945_v53, 5 }
 0x30e   : > { %6474 = vmatprep.mubr.bf16.mxu0 %v6793_v7  ;;  %v5002_v7 = vrot.slane %v4955_v37, 5 }
 0x30f   : > { %v4983_v0 = vsel %vm7277_vm10, %v5747_v41, %v4982_v46 }
 0x310   : > { %6445 = vmatpush3.bf16.msra.mxu1 %v6791_v34  ;;  %v4994_v34 = vrot.slane %v4951_v56, 5  ;;  %v5754_v44 = vcombine.low %v4983_v0, %v4987_v11  ;;  %v5003_v62 = vsel %vm7277_vm10, %v5752_v52, %v5002_v7  ;;  %v5616_v11 = vld [vmem:[%s8139_s7] ss:$0 sm:$0xff] }
 0x311   : > { %6478 = vmatprep.subr.bf16.mxu1 %v6794_v42  ;;  %v5756_v38 = vcombine.low %v4999_v55, %v5003_v62 }
 0x312   : > { %v4995_v9 = vsel %vm7277_vm10, %v5750_v24, %v4994_v34 }
 0x313   : > { %6447 = vmatmul.mubr.bf16.vlgmr.msra.gmra.mxu1 %v5722_v33 }
 0x314   : > { %6450 = vmatprep.mubr.bf16.mxu1 %v5723_v21  ;;  %6479 = vmatpush3.bf16.msra.mxu1 %v6794_v42  ;;  %v4991_v42 = vsel %vm7277_vm10, %v5749_v58, %v4990_v51 }
 0x315   : > { %6480 = vmatprep.subr.bf16.mxu1 %v6795_v20  ;;  %6475 = vmatmul.mubr.bf16.gmra.mxu0 %v6796_v22  ;;  %v5755_v6 = vcombine.low %v4991_v42, %v4995_v9 }
 0x318   : > { %6481 = vmatpush3.bf16.msra.mxu1 %v6795_v20 }
 0x319   : > { %6482 = vmatprep.subr.bf16.mxu1 %v6797_v36 }
 0x31b   : > { %6451 = vmatmul.mubr.bf16.gmra.mxu1 %v5724_v39 }
 0x31c   : > { %6483 = vmatpush3.bf16.msra.mxu1 %v6797_v36  ;;  %6494 = vmatprep.mubr.bf16.mxu1 %v5753_v54 }
 0x31d   : > { %6484 = vmatprep.subr.bf16.mxu1 %v6798_v12 }
 0x320   : > { %6485 = vmatpush3.bf16.msra.mxu1 %v6798_v12 }
 0x321   : > { %6486 = vmatprep.subr.bf16.mxu1 %v6799_v17 }
 0x324   : > { %6487 = vmatpush3.bf16.msra.mxu1 %v6799_v17 }
 0x325   : > { %6488 = vmatprep.subr.bf16.mxu1 %v6800_v50 }
 0x328   : > { %6489 = vmatpush3.bf16.msra.mxu1 %v6800_v50 }
 0x329   : > { %6490 = vmatprep.subr.bf16.mxu1 %v6801_v26 }
 0x32c   : > { %6491 = vmatpush3.bf16.msra.mxu1 %v6801_v26 }
 0x32d   : > { %6492 = vmatprep.subr.bf16.mxu1 %v6802_v10 }
 0x330   : > { %6493 = vmatpush3.bf16.msra.mxu1 %v6802_v10 }
 0x333   : > { %6495 = vmatmul.mubr.bf16.vlgmr.msra.gmra.mxu1 %v5754_v44 }
 0x334   : > { %6498 = vmatprep.mubr.bf16.mxu1 %v5755_v6 }
 0x33b   : > { %6499 = vmatmul.mubr.bf16.gmra.mxu1 %v5756_v38 }
 0x36c   : > { %v6328_v43 = vpop.f32.mrf.mxu0 }
 0x36e   : > { %v3689_v21 = vpop.f32.mrf.mxu0 }
 0x370   : > { %v6329_v13 = vpop.f32.mrf.mxu0 }
 0x372   : > { %v6304_v45 = vpop.f32.mrf.mxu1  ;;  %v3692_v8 = vpop.f32.mrf.mxu0 }
 0x373   : > { %v3536_v57 = vadd.f32 %v6304_v45, %v5616_v11 }
 0x374   : > { %v3527_v33 = vpop.f32.mrf.mxu1 }
 0x375   : > { %v6332_v48 = vpop.f32.mrf.mxu0  ;;  %v3528_v44 = vadd.f32 %v5616_v11, %v3527_v33  ;;  %v3722_v32 = vadd.f32 %v6328_v43, %v3536_v57 }
 0x376   : > { %v6305_v47 = vpop.f32.mrf.mxu1 }
 0x377   : > { %v7986_v35 = vpop.f32.mrf.mxu0  ;;  %v3539_v42 = vadd.f32 %v6305_v47, %v5616_v11  ;;  %v3720_v5 = vadd.f32 %v3689_v21, %v3528_v44 }
 0x378   : > { %v3530_v20 = vpop.f32.mrf.mxu1 }
 0x379   : > { %v7988_v36 = vpop.f32.mrf.mxu0  ;;  %v3531_v6 = vadd.f32 %v5616_v11, %v3530_v20  ;;  %v3723_v38 = vadd.f32 %v6329_v13, %v3539_v42 }
 0x37b   : > { %v6308_v60 = vpop.f32.mrf.mxu1  ;;  %v7990_v18 = vpop.f32.mrf.mxu0 }
 0x37c   : > { %v3552_v62 = vadd.f32 %v6308_v60, %v5616_v11 }
 0x37d   : > { %v3543_v61 = vpop.f32.mrf.mxu1 }
 0x37e   : > { %v3726_v47 = vadd.f32 %v6332_v48, %v3552_v62 }
 0x37f   : > { %v6309_v28 = vpop.f32.mrf.mxu1 }
 0x381   : > { %v7984_v16 = vpop.f32.mrf.mxu1 }
 0x382   : > { %v3547_v20 = vadd.f32 %v5616_v11, %v7984_v16 }
 0x38d   : > { %v6376_v30 = vpop.f32.mrf.mxu0 }
 0x38f   : > { %v4125_v27 = vpop.f32.mrf.mxu0 }
 0x391   : > { %v6377_v4 = vpop.f32.mrf.mxu0 }
 0x393   : > { %v6352_v2 = vpop.f32.mrf.mxu1  ;;  %v4128_v54 = vpop.f32.mrf.mxu0 }
 0x394   : > { %v3940_v7 = vadd.f32 %v6352_v2, %v3722_v32 }
 0x395   : > { %v3907_v29 = vpop.f32.mrf.mxu1  ;;  %v7996_v50 = vpop.f32.mrf.mxu0 }
 0x396   : > { %v3938_v55 = vadd.f32 %v3907_v29, %v3720_v5 }
 0x397   : > { %v6353_v3 = vpop.f32.mrf.mxu1  ;;  %v7998_v31 = vpop.f32.mrf.mxu0 }
 0x398   : > { %v3941_v45 = vadd.f32 %v6353_v3, %v3723_v38  ;;  %v4156_v57 = vadd.f32 %v4125_v27, %v3938_v55  ;;  %v3725_v27 = vadd.f32 %v7990_v18, %v3547_v20 }
 0x399   : > { %v3910_v22 = vpop.f32.mrf.mxu1  ;;  %v8000_v49 = vpop.f32.mrf.mxu0 }
 0x39a   : > { %v4159_v29 = vadd.f32 %v6377_v4, %v3941_v45  ;;  %v8288_v45 = vld [vmem:[#allocation23_spill] sm:$0xff] }
 0x39b   : > { %v6356_v23 = vpop.f32.mrf.mxu1  ;;  %v8002_v10 = vpop.f32.mrf.mxu0 }
 0x39c   : > { %8274 = vst [vmem:[#allocation38_spill] sm:$0xff] %v8002_v10  ;;  %v4158_v10 = vadd.f32 %v6376_v30, %v3940_v7  ;;  %v8281_v30 = vld [vmem:[#allocation14_spill] sm:$0xff] }
 0x39d   : > { %v3923_v39 = vpop.f32.mrf.mxu1  ;;  %v485_v44 = vsub.s32 1, %v8281_v30 }
 0x39f   : > { %v7992_v12 = vpop.f32.mrf.mxu1 }
 0x3a1   : > { %v7994_v17 = vpop.f32.mrf.mxu1 }
 0x3ad   : > { %v6424_v53 = vpop.f32.mrf.mxu0 }
 0x3af   : > { %v4513_v19 = vpop.f32.mrf.mxu0 }
 0x3b1   : > { %v6425_v25 = vpop.f32.mrf.mxu0 }
 0x3b3   : > { %v6400_v26 = vpop.f32.mrf.mxu1  ;;  %v8008_v34 = vpop.f32.mrf.mxu0 }
 0x3b4   : > { %v4328_v43 = vadd.f32 %v6400_v26, %v4158_v10 }
 0x3b5   : > { %v4295_v14 = vpop.f32.mrf.mxu1  ;;  %v8012_v46 = vpop.f32.mrf.mxu0 }
 0x3b6   : > { %8277 = vst [vmem:[#allocation55_spill] sm:$0xff] %v8012_v46  ;;  %v4326_v60 = vadd.f32 %v4295_v14, %v4156_v57 }
 0x3b7   : > { %v6401_v56 = vpop.f32.mrf.mxu1  ;;  %v8014_v51 = vpop.f32.mrf.mxu0 }
 0x3b8   : > { %8278 = vst [vmem:[#allocation57_spill] sm:$0xff] %v8014_v51  ;;  %v3544_v51 = vadd.f32 %v5616_v11, %v3543_v61  ;;  %v4544_v4 = vadd.f32 %v4513_v19, %v4326_v60 }
 0x3b9   : > { %v4298_v59 = vpop.f32.mrf.mxu1  ;;  %v8019_v37 = vpop.f32.mrf.mxu0 }
 0x3ba   : > { %8279 = vst [vmem:[#allocation40_spill] sm:$0xff] %v8019_v37  ;;  %v3724_v21 = vadd.f32 %v7986_v35, %v3544_v51 }
 0x3bb   : > { %v6404_v1 = vpop.f32.mrf.mxu1  ;;  %v8021_v15 = vpop.f32.mrf.mxu0 }
 0x3bc   : > { %8280 = vst [vmem:[#allocation41_spill] sm:$0xff] %v8021_v15  ;;  %v3944_v15 = vadd.f32 %v6356_v23, %v3726_v47  ;;  %v3942_v61 = vadd.f32 %v3923_v39, %v3724_v21  ;;  %v3943_v39 = vadd.f32 %v7994_v17, %v3725_v27 }
 0x3bd   : > { %v8004_v63 = vpop.f32.mrf.mxu1 }
 0x3be   : > { %v4162_v23 = vadd.f32 %v7996_v50, %v3944_v15 }
 0x3bf   : > { %v8006_v24 = vpop.f32.mrf.mxu1 }
 0x3c0   : > { %8275 = vst [vmem:[#allocation47_spill] sm:$0xff] %v8006_v24  ;;  %v3555_v24 = vadd.f32 %v6309_v28, %v5616_v11  ;;  %v4329_v28 = vadd.f32 %v6401_v56, %v4159_v29  ;;  %v8284_v11 = vld [vmem:[#allocation55_spill] sm:$0xff] }
 0x3c1   : > { %v8010_v41 = vpop.f32.mrf.mxu1  ;;  %v8289_v47 = vld [vmem:[#allocation40_spill] sm:$0xff] }
 0x3c2   : > { %8276 = vst [vmem:[#allocation53_spill] sm:$0xff] %v8010_v41  ;;  %v3721_v41 = vadd.f32 %v3692_v8, %v3531_v6  ;;  %v3727_v8 = vadd.f32 %v7988_v36, %v3555_v24  ;;  %v4332_v36 = vadd.f32 %v6404_v1, %v4162_v23  ;;  %v4547_v56 = vadd.f32 %v6425_v25, %v4329_v28 }
 0x3c4   : > { %v3939_v33 = vadd.f32 %v3910_v22, %v3721_v41  ;;  %v4546_v22 = vadd.f32 %v6424_v53, %v4328_v43  ;;  %v3945_v48 = vadd.f32 %v7992_v12, %v3727_v8  ;;  %v6803_v12 = vld [vmem:[%s8135_s3] sm:$0x3] }
 0x3c5   : > { %v8035_v18 = vrot.slane %v6803_v12, %v485_v44  ;;  %v8283_v41 = vld [vmem:[#allocation38_spill] sm:$0xff] }
 0x3c6   : > { %v4157_v3 = vadd.f32 %v4128_v54, %v3939_v33  ;;  %v4160_v54 = vadd.f32 %v7998_v31, %v3942_v61  ;;  %v8290_v61 = vld [vmem:[#allocation41_spill] sm:$0xff] }
 0x3c7   : > { %v8282_v24 = vld [vmem:[#allocation47_spill] sm:$0xff]  ;;  %v680_v33 = vadd.f32 %v8288_v45, %v8035_v18 }
 0x3c8   : > { %v4327_v16 = vadd.f32 %v4298_v59, %v4157_v3  ;;  %v4330_v50 = vadd.f32 %v8004_v63, %v4160_v54  ;;  %v4163_v59 = vadd.f32 %v8000_v49, %v3945_v48  ;;  %v8285_v49 = vld [vmem:[#allocation17_spill] sm:$0xff] }
 0x3c9   : > { %v670_v15 = vadd.f32 %v8285_v49, %v8035_v18 }
 0x3ca   : > { %v4545_v53 = vadd.f32 %v8008_v34, %v4327_v16  ;;  %v4333_v25 = vadd.f32 %v8282_v24, %v4163_v59  ;;  %v8286_v34 = vld [vmem:[#allocation53_spill] sm:$0xff] }
 0x3cc   : > { %v4551_v43 = vadd.f32 %v8289_v47, %v4333_v25 }
 0x3cd   : > { %v6472_v40 = vpop.f32.mrf.mxu0 }
 0x3cf   : > { %v4901_v37 = vpop.f32.mrf.mxu0 }
 0x3d1   : > { %v6473_v13 = vpop.f32.mrf.mxu0 }
 0x3d3   : > { %v6448_v58 = vpop.f32.mrf.mxu1  ;;  %v4904_v14 = vpop.f32.mrf.mxu0 }
 0x3d4   : > { %v4764_v26 = vadd.f32 %v6448_v58, %v4546_v22  ;;  %v4161_v58 = vadd.f32 %v8283_v41, %v3943_v39 }
 0x3d5   : > { %v4731_v9 = vpop.f32.mrf.mxu1  ;;  %v6476_v1 = vpop.f32.mrf.mxu0 }
 0x3d6   : > { %v4762_v10 = vadd.f32 %v4731_v9, %v4544_v4  ;;  %v4934_v31 = vadd.f32 %v6472_v40, %v4764_v26  ;;  %v4550_v9 = vadd.f32 %v8284_v11, %v4332_v36  ;;  %v4331_v6 = vadd.f32 %v8286_v34, %v4161_v58  ;;  %v8292_v36 = vld [vmem:[#allocation21_spill] sm:$0xff]  ;;  %v8294_v11 = vld [vmem:[#allocation27_spill] sm:$0xff] }
 0x3d7   : > { %v6449_v0 = vpop.f32.mrf.mxu1  ;;  %v4917_v62 = vpop.f32.mrf.mxu0  ;;  %v674_v54 = vadd.f32 %v8292_v36, %v8035_v18  ;;  %v8295_v34 = vld [vmem:[#allocation33_spill] sm:$0xff] }
 0x3d8   : > { %v4765_v17 = vadd.f32 %v6449_v0, %v4547_v56  ;;  %v4932_v63 = vadd.f32 %v4901_v37, %v4762_v10  ;;  %v8287_v0 = vld [vmem:[#allocation57_spill] sm:$0xff]  ;;  %v4549_v8 = vadd.f32 %v8290_v61, %v4331_v6  ;;  %v704_v6 = vadd.f32 %v8295_v34, %v8035_v18 }
 0x3d9   : > { %v4734_v52 = vpop.f32.mrf.mxu1  ;;  %v4548_v5 = vadd.f32 %v8287_v0, %v4330_v50  ;;  %v6477_v28 = vpop.f32.mrf.mxu0 }
 0x3da   : > { %v4763_v51 = vadd.f32 %v4734_v52, %v4545_v53  ;;  %v4935_v38 = vadd.f32 %v6473_v13, %v4765_v17  ;;  %v8293_v17 = vld [vmem:[#allocation31_spill] sm:$0xff] }
 0x3db   : > { %v6452_v46 = vpop.f32.mrf.mxu1  ;;  %v4920_v50 = vpop.f32.mrf.mxu0 }
 0x3dc   : > { %v4768_v7 = vadd.f32 %v6452_v46, %v4550_v9  ;;  %v4933_v20 = vadd.f32 %v4904_v14, %v4763_v51  ;;  %v690_v9 = vadd.f32 %v8294_v11, %v8035_v18 }
 0x3dd   : > { %v4747_v2 = vpop.f32.mrf.mxu1 }
 0x3de   : > { %v4766_v37 = vadd.f32 %v4747_v2, %v4548_v5  ;;  %v4938_v44 = vadd.f32 %v6476_v1, %v4768_v7  ;;  %v8291_v2 = vld [vmem:[#allocation25_spill] sm:$0xff]  ;;  %v700_v1 = vadd.f32 %v8293_v17, %v8035_v18 }
 0x3df   : > { %v6453_v35 = vpop.f32.mrf.mxu1  ;;  %v684_v27 = vadd.f32 %v8291_v2, %v8035_v18 }
 0x3e0   : > { %v4769_v29 = vadd.f32 %v6453_v35, %v4551_v43  ;;  %v4936_v26 = vadd.f32 %v4917_v62, %v4766_v37 }
 0x3e1   : > { %v4750_v19 = vpop.f32.mrf.mxu1 }
 0x3e2   : > { %v4767_v16 = vadd.f32 %v4750_v19, %v4549_v8  ;;  %v4939_v12 = vadd.f32 %v6477_v28, %v4769_v29 }
 0x3e4   : > { %v4937_v25 = vadd.f32 %v4920_v50, %v4767_v16 }
 0x3f3   : > { %v6496_v42 = vpop.f32.mrf.mxu1 }
 0x3f4   : > { %v5152_v32 = vadd.f32 %v6496_v42, %v4934_v31 }
 0x3f5   : > { %v5119_v40 = vpop.f32.mrf.mxu1 }
 0x3f6   : > { %vm5160_vm9 = vcmp.ge.f32.partialorder %v5152_v32, 0.0  ;;  %v5168_v55 = vmul.f32 0.01, %v5152_v32  ;;  %v5150_v52 = vadd.f32 %v5119_v40, %v4932_v63  ;;  %v8296_v40 = vld [vmem:[#allocation29_spill] sm:$0xff] }
 0x3f7   : > { %v6497_v57 = vpop.f32.mrf.mxu1  ;;  %v694_v62 = vadd.f32 %v8296_v40, %v8035_v18 }
 0x3f8   : > { %v5176_v21 = vsel %vm5160_vm9, %v5152_v32, %v5168_v55  ;;  %vm5158_vm10 = vcmp.ge.f32.partialorder %v5150_v52, 0.0  ;;  %v5166_v46 = vmul.f32 0.01, %v5150_v52  ;;  %v5153_v60 = vadd.f32 %v6497_v57, %v4935_v38 }
 0x3f9   : > { %v5184_v3 = vadd.f32 %v5176_v21, %v680_v33  ;;  %v5122_v30 = vpop.f32.mrf.mxu1 }
 0x3fa   : > { %v5174_v13 = vsel %vm5158_vm10, %v5150_v52, %v5166_v46  ;;  %vm5161_vm4 = vcmp.ge.f32.partialorder %v5153_v60, 0.0  ;;  %v5169_v22 = vmul.f32 0.01, %v5153_v60  ;;  %v5151_v48 = vadd.f32 %v5122_v30, %v4933_v20 }
 0x3fb   : > { %5192 = vst [vmem:[%s8056_s21 + $0x10] sm:$0xff] %v5184_v3  ;;  %v5182_v23 = vadd.f32 %v5174_v13, %v670_v15  ;;  %v6500_v35 = vpop.f32.mrf.mxu1 }
 0x3fc   : > { %v5177_v4 = vsel %vm5161_vm4, %v5153_v60, %v5169_v22  ;;  %vm5159_vm5 = vcmp.ge.f32.partialorder %v5151_v48, 0.0  ;;  %v5167_v14 = vmul.f32 0.01, %v5151_v48  ;;  %v5156_v39 = vadd.f32 %v6500_v35, %v4938_v44 }
 0x3fd   : > { %5190 = vst [vmem:[%s8056_s21] sm:$0xff] %v5182_v23  ;;  %v5185_v10 = vadd.f32 %v5177_v4, %v684_v27  ;;  %v5135_v56 = vpop.f32.mrf.mxu1 }
 0x3fe   : > { %v5175_v59 = vsel %vm5159_vm5, %v5151_v48, %v5167_v14  ;;  %vm5164_vm6 = vcmp.ge.f32.partialorder %v5156_v39, 0.0  ;;  %v5172_v53 = vmul.f32 0.01, %v5156_v39  ;;  %v5154_v19 = vadd.f32 %v5135_v56, %v4936_v26 }
 0x3ff   : > { %5193 = vst [vmem:[%s8056_s21 + $0x18] sm:$0xff] %v5185_v10  ;;  %v5183_v31 = vadd.f32 %v5175_v59, %v674_v54  ;;  %v6501_v24 = vpop.f32.mrf.mxu1 }
 0x400   : > { %v5180_v41 = vsel %vm5164_vm6, %v5156_v39, %v5172_v53  ;;  %vm5162_vm7 = vcmp.ge.f32.partialorder %v5154_v19, 0.0  ;;  %v5170_v58 = vmul.f32 0.01, %v5154_v19  ;;  %v5157_v51 = vadd.f32 %v6501_v24, %v4939_v12 }
 0x401   : > { %5191 = vst [vmem:[%s8056_s21 + $0x8] sm:$0xff] %v5183_v31  ;;  %v5188_v42 = vadd.f32 %v5180_v41, %v700_v1  ;;  %v5138_v32 = vpop.f32.mrf.mxu1 }
 0x402   : > { %v5178_v63 = vsel %vm5162_vm7, %v5154_v19, %v5170_v58  ;;  %vm5165_vm8 = vcmp.ge.f32.partialorder %v5157_v51, 0.0  ;;  %v5173_v49 = vmul.f32 0.01, %v5157_v51  ;;  %v5155_v15 = vadd.f32 %v5138_v32, %v4937_v25 }
 0x403   : > { %5196 = vst [vmem:[%s8056_s21 + $0x30] sm:$0xff] %v5188_v42  ;;  %v5186_v7 = vadd.f32 %v5178_v63, %v690_v9 }
 0x404   : > { %v5181_v0 = vsel %vm5165_vm8, %v5157_v51, %v5173_v49  ;;  %vm5163_vm11 = vcmp.ge.f32.partialorder %v5155_v15, 0.0  ;;  %v5171_v5 = vmul.f32 0.01, %v5155_v15 }
 0x405   : > { %5194 = vst [vmem:[%s8056_s21 + $0x20] sm:$0xff] %v5186_v7  ;;  %v5189_v55 = vadd.f32 %v5181_v0, %v704_v6 }
 0x406   : > { %v5179_v52 = vsel %vm5163_vm11, %v5155_v15, %v5171_v5 }
 0x407   : > { %5197 = vst [vmem:[%s8056_s21 + $0x38] sm:$0xff] %v5189_v55  ;;  %v5187_v38 = vadd.f32 %v5179_v52, %v694_v62 }
 0x409   : > { %5195 = vst [vmem:[%s8056_s21 + $0x28] sm:$0xff] %v5187_v38 }
 0x40a   : > { %6895 = shalt.err (!%p6892_p1)
}
 0x40b   : > { %s6896_s14 = scalar_lea.hbm %s8079_s20, 1024  ;;  %s6900_s21 = scalar_lea.hbm %s8140_s8, 2048 }
 0x40c   : > { %p6897_p2 = scmp.ne.s32.totalorder %s8079_s20, %s6896_s14  ;;  %p6901_p6 = scmp.lt.s32.totalorder %s8079_s20, %s8140_s8 }
 0x40d   : > { %p6902_p10 = scmp.lt.s32.totalorder %s6900_s21, %s6896_s14 }
 0x40e   : > { %p6898_p3 = pnand %p6897_p2, %p7064_p4 }
 0x40f   : > { %p6903_p11 = por %p6902_p10, %p6901_p6 }
 0x410   : > { %p6899_p5 = pneg %p6898_p3 }
 0x412   : > { %p6904_p13 = pnand %p6903_p11, %p6899_p5 }
 0x414   : > { %6907 = shalt.err (!%p6904_p13)
}
 0x415   : > { %s6977_s19 = smov 128   ;;  %s6978_s23 = smov 8  }
 0x416   : > { %6514 = dma.vmem_to_hbm [thread:$0]  (%p7064_p4), %s8081_s25, 1024, %s8079_s20, %s8087_s30, %s6977_s19, %s6977_s19, %s6978_s23  }
 0x417 PF: > { %p6536_p0 = scmp.ge.s32.totalorder %s6966_s10, 2  ;;  %s5229_s11 = sand.u32 1, %s6946_s27  }
 0x418   : > { %s5230_s24 = scalar_lea.sflag [#allocation5], %s5229_s11 }
 0x419   : > { %p6527_p7 = pnand %p6536_p0, %p7071_p8 }
 0x41b   : > { %p6528_p9 = pneg %p6527_p7 }
 0x41d   : > { %6941 = dma.done.wait (%p6528_p9), %s5230_s24, 1024  }
 0x41e   : > { %6943 = vsyncadd (%p6528_p9), %s5230_s24, 4294966272  ;;  %s23_s10 = sadd.s32 1, %s6966_s10   ;;  %s8297_s15 = sld [smem:[#allocation13_spill]] }
 0x41f   : > { %p20_p12 = scmp.ge.s32.totalorder %s23_s10, 4   ;;  %s8298_s27 = smov %s6950_s28 }
 0x420   : > { %s8299_s28 = smov %s6954_s29  ;;  %s8300_s29 = smov %s7077_s18 }
 0x421   : > { %s8301_s30 = smov %s6962_s9  ;;  %22 = sbr.rel (!%p20_p12) target bundleno = 6 (0x6), region = 121 }
 0x424   : > { %s8302_s9 = smov %s8297_s15 }
 0x426   :  { %5235 = vsyncpa [#allocation4], 1 }
 0x427   :  { %5237 = vsyncpa [#allocation4 + $0x1], 1 }
 0x428   :  { %5238 = vsyncpa [#allocation7], 1 }
 0x429   :  { %5239 = vsyncpa [#allocation5], 1 }
 0x42a   :  { %5241 = vsyncpa [#allocation5 + $0x1], 1 }

// kernel: tpu_custom_call.1
= control target key start
LH: loop header
LB: loop body
LE: loop exit
PB: predicated region body
PF: predicated region fallthrough
CT: control target
= control target key end

     0   :  { %13 = vsyncpa [#allocation4], 0  ;;  %s8132_s0 = inlined_call_operand.vmem [shape: bf16[2,1,128,128], index: 0, kind: input, shape index: {}]   ;;  %s8133_s1 = inlined_call_operand.vmem [shape: f32[1,128,1], index: 1, kind: input, shape index: {}]   ;;  %s8134_s2 = inlined_call_operand.hbm [shape: bf16[128,256], index: 2, kind: input, shape index: {}]   ;;  %s8135_s3 = inlined_call_operand.vmem [shape: f32[1,256], index: 3, kind: input, shape index: {}]   ;;  %s8136_s4 = inlined_call_operand.hbm [shape: bf16[9,128,128], index: 4, kind: input, shape index: {}]   ;;  %s8137_s5 = inlined_call_operand.vmem [shape: f32[1,128], index: 5, kind: input, shape index: {}]   ;;  %s8138_s6 = inlined_call_operand.hbm [shape: bf16[9,128,128], index: 6, kind: input, shape index: {}]   ;;  %s8139_s7 = inlined_call_operand.vmem [shape: f32[1,128], index: 7, kind: input, shape index: {}]   ;;  %s8140_s8 = inlined_call_operand.hbm [shape: f32[2,1,64,128], index: 8, kind: output, shape index: {}]  }
   0x1   :  { %14 = vsyncpa [#allocation7], 0 }
   0x2   :  { %15 = vsyncpa [#allocation5], 0 }
   0x3   :  { %17 = vsyncpa [#allocation5 + $0x1], 0  ;;  %s7024_s27 = smov 0   ;;  %s7026_s28 = smov 0  }
   0x4   :  { %s7028_s29 = smov 0   ;;  %s7030_s30 = smov 0  }
   0x5   :  { %s7032_s9 = smov 0   ;;  %s7034_s10 = smov 0  }
   0x6 LB: > { %s5342_s11 = sadd.s32 4294967295, %s6966_s10   ;;  %s5343_s12 = sadd.s32 4294967294, %s6966_s10   ;;  %s6966_s10 = sphi %s7034_s10, %s23_s10   ;;  %s6962_s9 = sphi %s7032_s9, %s8302_s9   ;;  %s6958_s30 = sphi %s7030_s30, %s8301_s30   ;;  %s6954_s29 = sphi %s7028_s29, %s8300_s29   ;;  %s6950_s28 = sphi %s7026_s28, %s8299_s28   ;;  %s6946_s27 = sphi %s7024_s27, %s8298_s27  }
   0x7   : > { %s35_s13 = sadd.s32 1, %s6962_s9  ;;  %s224_s14 = sadd.s32 1, %s6954_s29 }
   0x8   : > { %p37_p0 = scmp.ge.s32.totalorder %s35_s13, 2  ;;  %p234_p1 = scmp.ne.s32.totalorder %s6954_s29, %s6950_s28 }
   0x9   : > { %p235_p2 = scmp.eq.s32.totalorder %s5342_s11, 1  ;;  %p240_p3 = scmp.ne.s32.totalorder %s6950_s28, %s6946_s27 }
   0xa   : > { %s8304_s13 = smov (%p37_p0, %s35_s13), 0  ;;  %p241_p5 = scmp.eq.s32.totalorder %s5343_s12, 1 }
   0xb   : > { %8162 = sst [smem:[#allocation13_spill]] %s8304_s13  ;;  %p7064_p4 = por %p235_p2, %p234_p1 }
   0xc   : > { %s219_s16 = ssub.s32 %s6962_s9, %s8304_s13  ;;  %p5344_p6 = scmp.ge.s32.totalorder %s6966_s10, 1 }
   0xd   : > { %p222_p7 = scmp.eq.s32.totalorder %s219_s16, 0  ;;  %p7071_p8 = por %p241_p5, %p240_p3 }
   0xe   : > { %p248_p9 = scmp.lt.s32.totalorder %s6966_s10, 3  ;;  %p7083_p11 = scmp.eq.s32.totalorder %s5342_s11, 0 }
   0xf   : > { %s7077_s18 = scalar_select %p222_p7, %s6954_s29, %s224_s14  }
  0x10   : > { %p7079_p10 = pnand %p5344_p6, %p248_p9  ;;  %s6968_s21 = smov [#allocation6]  }
  0x11   : > { %s284_s22 = sshll.u32 %s6968_s21, 4  ;;  %s6969_s24 = smov [#allocation3]   ;;  %s285_s22 = int_to_ptr.vmem [resolvable:$true] %s284_s22 }
  0x12   : > { %p6516_p12 = pneg %p7079_p10  ;;  %s268_s25 = sshll.u32 %s6969_s24, 4  ;;  %s269_s25 = int_to_ptr.vmem [resolvable:$true] %s268_s25 }
  0x13   : > { %s6815_s26 = scalar_lea.vmem %s285_s22, 9216  ;;  %p6823_p5 = scmp.lt.s32.totalorder %s285_s22, %s285_s22 }
  0x14   : > { %p7091_p13 = pnand %p7083_p11, %p6516_p12  ;;  %p6816_p1 = scmp.ne.s32.totalorder %s285_s22, %s6815_s26 }
  0x15   : > { %p6824_p6 = scmp.lt.s32.totalorder %s6815_s26, %s6815_s26 }
  0x16   : > { %p6806_p0 = pneg %p7091_p13 }
  0x17   : > { %p6825_p7 = por %p6824_p6, %p6823_p5 }
  0x18   : > { %p6818_p2 = pnand %p6816_p1, %p6806_p0 }
  0x1a   : > { %p6819_p3 = pneg %p6818_p2 }
  0x1c   : > { %p6826_p9 = pnand %p6825_p7, %p6819_p3 }
  0x1e   : > { %6829 = shalt.err (!%p6826_p9)
}
  0x1f   : > { %s8142_s11 = smov 64   ;;  %s6971_s12 = smov 4  }
  0x20   : > { %6522 = dma.hbm_to_vmem [thread:$0]  (!%p7091_p13), %s8136_s4, 9216, %s285_s22, [#allocation7], %s8142_s11, %s8142_s11, %s6971_s12  }
  0x21   : > { %s6841_s21 = scalar_lea.vmem %s269_s25, 2048  ;;  %p6849_p3 = scmp.lt.s32.totalorder %s269_s25, %s269_s25 }
  0x22   : > { %p6842_p12 = scmp.ne.s32.totalorder %s269_s25, %s6841_s21  ;;  %p6850_p5 = scmp.lt.s32.totalorder %s6841_s21, %s6841_s21 }
  0x24   : > { %p6844_p1 = pnand %p6842_p12, %p6806_p0  ;;  %p6851_p6 = por %p6850_p5, %p6849_p3 }
  0x26   : > { %p6845_p2 = pneg %p6844_p1 }
  0x28   : > { %p6852_p7 = pnand %p6851_p6, %p6845_p2 }
  0x2a   : > { %6855 = shalt.err (!%p6852_p7)
}
  0x2b   : > { %s6972_s24 = smov 128   ;;  %s6973_s26 = smov 8  }
  0x2c   : > { %6519 = dma.hbm_to_vmem [thread:$0]  (!%p7091_p13), %s8134_s2, 2048, %s269_s25, [#allocation4], %s6972_s24, %s6972_s24, %s6973_s26  }
  0x2d   : > { %s6974_s22 = smov [#allocation8]  }
  0x2e   : > { %s300_s16 = sshll.u32 %s6974_s22, 4  ;;  %s301_s16 = int_to_ptr.vmem [resolvable:$true] %s300_s16 }
  0x2f   : > { %s6867_s11 = scalar_lea.vmem %s301_s16, 9216  ;;  %p6875_p2 = scmp.lt.s32.totalorder %s301_s16, %s301_s16 }
  0x30   : > { %p6868_p9 = scmp.ne.s32.totalorder %s301_s16, %s6867_s11  ;;  %p6876_p3 = scmp.lt.s32.totalorder %s6867_s11, %s6867_s11 }
  0x32   : > { %p6870_p12 = pnand %p6868_p9, %p6806_p0  ;;  %p6877_p5 = por %p6876_p3, %p6875_p2 }
  0x34   : > { %p6871_p1 = pneg %p6870_p12 }
  0x36   : > { %p6878_p6 = pnand %p6877_p5, %p6871_p1 }
  0x38   : > { %6881 = shalt.err (!%p6878_p6)
}
  0x39   : > { %s8168_s21 = smov 64   ;;  %331 = sbr.rel (%p7079_p10) target bundleno = 1047 (0x417), region = 52 }
  0x3a   : > { %6525 = dma.hbm_to_vmem [thread:$0]  (!%p7091_p13), %s8138_s6, 9216, %s301_s16, [#allocation7], %s8168_s21, %s8168_s21, %s6971_s12  }
  0x3e   : > { %6933 = dma.done.wait (%p7083_p11), [#allocation4], 2048  }
  0x3f   : > { %6935 = vsyncadd (%p7083_p11), [#allocation4], 4294965248 }
  0x40   : > { %6937 = dma.done.wait (%p7083_p11), [#allocation7], 18432  }
  0x41   : > { %6939 = vsyncadd (%p7083_p11), [#allocation7], 4294948864  ;;  %v6975_v0 = vmov 0   ;;  %p382_p10 = scmp.lt.s32.totalorder %s6958_s30, 1  ;;  %v6597_v1 = vld [vmem:[#allocation3 + $0x74] ss:$8 sps:$4 sm:$0xff]   ;;  %v479_v59 = vlaneseq }
  0x42   : > { %649 = vmatprep.mubr.bf16.mxu0 %v6975_v0  ;;  %397 = vst [vmem:[#allocation2] sm:$0x8] %v6975_v0  ;;  %398 = vst [vmem:[#allocation2 + $0xc] sm:$0x8] %v6975_v0  ;;  %6595 = vset.pattern.permute.xlu0 %v6975_v0  ;;  %v6599_v2 = vld [vmem:[#allocation3 + $0x70] ss:$8 sps:$4 sm:$0xff]  }
  0x43   : > { %399 = vst [vmem:[#allocation2 + $0x18] sm:$0x8] %v6975_v0  ;;  %400 = vst [vmem:[#allocation2 + $0x24] sm:$0x8] %v6975_v0  ;;  %6596 = vset.pattern.permute.xlu1 %v6975_v0  ;;  %617 = vmatprep.subr.bf16.mxu0 %v6597_v1  ;;  %v6600_v3 = vld [vmem:[#allocation3 + $0x64] ss:$8 sps:$4 sm:$0xff]  }
  0x44   : > { %401 = vst [vmem:[#allocation2 + $0x30] sm:$0x8] %v6975_v0  ;;  %402 = vst [vmem:[#allocation2 + $0x3c] sm:$0x8] %v6975_v0  ;;  %s383_s19 = scalar_select %p382_p10, %s6958_s30, 1  ;;  %618 = vmatpush1.bf16.msra.mxu0 %v6599_v2  ;;  %v445_v12 = vld [vmem:[%s8133_s1] sm:$0xff] }
  0x45   : > { %403 = vst [vmem:[#allocation2 + $0x48] sm:$0x8] %v6975_v0  ;;  %404 = vst [vmem:[#allocation2 + $0x54] sm:$0x8] %v6975_v0  ;;  %v6602_v4 = vld [vmem:[#allocation3 + $0x60] ss:$8 sps:$4 sm:$0xff]   ;;  %619 = vmatprep.subr.bf16.mxu0 %v6600_v3  ;;  %772 = vperm.xlu0 %6595, %v445_v12  }
  0x46   : > { %405 = vst [vmem:[#allocation2 + $0x60] sm:$0x8] %v6975_v0  ;;  %406 = vst [vmem:[#allocation2 + $0x6c] sm:$0x8] %v6975_v0  ;;  %v6603_v5 = vld [vmem:[#allocation3 + $0x54] ss:$8 sps:$4 sm:$0xff]  }
  0x47   : > { %407 = vst [vmem:[#allocation2 + $0x78] sm:$0x8] %v6975_v0  ;;  %408 = vst [vmem:[#allocation2 + $0x84] sm:$0x8] %v6975_v0  ;;  %s5770_s20 = sshll.u32 %s383_s19, 6  ;;  %v447_v14 = vld [vmem:[%s8133_s1 + $0x10] sm:$0xff] }
  0x48   : > { %409 = vst [vmem:[#allocation2 + $0x90] sm:$0x8] %v6975_v0  ;;  %410 = vst [vmem:[#allocation2 + $0x9c] sm:$0x8] %v6975_v0  ;;  %620 = vmatpush1.bf16.msra.mxu0 %v6602_v4  ;;  %v6605_v6 = vld [vmem:[#allocation3 + $0x50] ss:$8 sps:$4 sm:$0xff]   ;;  %s7177_s12 = scalar_lea.vmem %s8132_s0, %s5770_s20  ;;  %782 = vperm.xlu1 %6596, %v447_v14  }
  0x49   : > { %411 = vst [vmem:[#allocation2 + $0xa8] sm:$0x8] %v6975_v0  ;;  %412 = vst [vmem:[#allocation2 + $0xb4] sm:$0x8] %v6975_v0  ;;  %621 = vmatprep.subr.bf16.mxu0 %v6603_v5  ;;  %v6606_v7 = vld [vmem:[#allocation3 + $0x44] ss:$8 sps:$4 sm:$0xff]  }
  0x4a   : > { %413 = vst [vmem:[#allocation2 + $0x8] sm:$0x1] %v6975_v0  ;;  %414 = vst [vmem:[#allocation2 + $0x14] sm:$0x1] %v6975_v0  ;;  %v6608_v8 = vld [vmem:[#allocation3 + $0x40] ss:$8 sps:$4 sm:$0xff]  }
  0x4b   : > { %415 = vst [vmem:[#allocation2 + $0x20] sm:$0x1] %v6975_v0  ;;  %416 = vst [vmem:[#allocation2 + $0x2c] sm:$0x1] %v6975_v0  ;;  %v6609_v9 = vld [vmem:[#allocation3 + $0x34] ss:$8 sps:$4 sm:$0xff]  }
  0x4c   : > { %417 = vst [vmem:[#allocation2 + $0x38] sm:$0x1] %v6975_v0  ;;  %418 = vst [vmem:[#allocation2 + $0x44] sm:$0x1] %v6975_v0  ;;  %622 = vmatpush1.bf16.msra.mxu0 %v6605_v6  ;;  %v6611_v10 = vld [vmem:[#allocation3 + $0x30] ss:$8 sps:$4 sm:$0xff]  }
  0x4d   : > { %419 = vst [vmem:[#allocation2 + $0x50] sm:$0x1] %v6975_v0  ;;  %420 = vst [vmem:[#allocation2 + $0x5c] sm:$0x1] %v6975_v0  ;;  %623 = vmatprep.subr.bf16.mxu0 %v6606_v7  ;;  %v6612_v11 = vld [vmem:[#allocation3 + $0x24] ss:$8 sps:$4 sm:$0xff]  }
  0x4e   : > { %421 = vst [vmem:[#allocation2 + $0x68] sm:$0x1] %v6975_v0  ;;  %422 = vst [vmem:[#allocation2 + $0x74] sm:$0x1] %v6975_v0  ;;  %v6614_v13 = vld [vmem:[#allocation3 + $0x20] ss:$8 sps:$4 sm:$0xff]  }
  0x4f   : > { %423 = vst [vmem:[#allocation2 + $0x80] sm:$0x1] %v6975_v0  ;;  %424 = vst [vmem:[#allocation2 + $0x8c] sm:$0x1] %v6975_v0  ;;  %v6615_v15 = vld [vmem:[#allocation3 + $0x14] ss:$8 sps:$4 sm:$0xff]  }
  0x50   : > { %425 = vst [vmem:[#allocation2 + $0x98] sm:$0x1] %v6975_v0  ;;  %426 = vst [vmem:[#allocation2 + $0xa4] sm:$0x1] %v6975_v0  ;;  %624 = vmatpush1.bf16.msra.mxu0 %v6608_v8  ;;  %v446_v16 = vld [vmem:[%s8133_s1 + $0x8] sm:$0xff]  ;;  %v448_v17 = vld [vmem:[%s8133_s1 + $0x18] sm:$0xff] }
  0x51   : > { %427 = vst [vmem:[#allocation2 + $0xb0] sm:$0x1] %v6975_v0  ;;  %428 = vst [vmem:[#allocation2 + $0xbc] sm:$0x1] %v6975_v0  ;;  %625 = vmatprep.subr.bf16.mxu0 %v6609_v9  ;;  %v6617_v18 = vld [vmem:[#allocation3 + $0x10] ss:$8 sps:$4 sm:$0xff]   ;;  %777 = vperm.xlu0 %6595, %v446_v16  }
  0x52   : > { %v6618_v19 = vld [vmem:[#allocation3 + $0x4] ss:$8 sps:$4 sm:$0xff]   ;;  %787 = vperm.xlu1 %6596, %v448_v17   ;;  %v6620_v22 = vld [vmem:[#allocation3] ss:$8 sps:$4 sm:$0xff]   ;;  %v451_v23 = vld [vmem:[%s8133_s1 + $0x30] sm:$0xff]  ;;  %v7248_v60 = vshrl.u32 %v479_v59, 7 }
  0x53   : > { %v449_v20 = vld [vmem:[%s8133_s1 + $0x20] sm:$0xff]  ;;  %v450_v21 = vld [vmem:[%s8133_s1 + $0x28] sm:$0xff]  ;;  %v452_v24 = vld [vmem:[%s8133_s1 + $0x38] sm:$0xff]  ;;  %vm994_vm3 = vcmask 1040384   ;;  %vm995_vm5 = vcmask 1044484   ;;  %vm1475_vm6 = vcmask 1042432  }
  0x54   : > { %626 = vmatpush1.bf16.msra.mxu0 %v6611_v10  ;;  %v6621_v25 = vld [vmem:[%s7177_s12] sm:$0xff]   ;;  %v454_v27 = vld [vmem:[%s8133_s1 + $0x48] sm:$0xff]  ;;  %v455_v28 = vld [vmem:[%s8133_s1 + $0x50] sm:$0xff]  ;;  %8169 = vst [vmem:[#allocation14_spill] sm:$0xff] %v7248_v60  ;;  %v481_v61 = vsub.s32 0, %v7248_v60  ;;  %vm1476_vm7 = vcmask 1046532  }
  0x55   : > { %627 = vmatprep.subr.bf16.mxu0 %v6612_v11  ;;  %792 = vperm.xlu0 %6595, %v449_v20   ;;  %v453_v26 = vld [vmem:[%s8133_s1 + $0x40] sm:$0xff]  ;;  %v456_v29 = vld [vmem:[%s8133_s1 + $0x58] sm:$0xff]  ;;  %v6622_v30 = vld [vmem:[%s7177_s12 + $0x8] sm:$0xff]   ;;  %s379_s22 = sand.u32 1, %s6950_s28   ;;  %s5799_s13 = sshll.u32 %s6958_s30, 10 }
  0x56   : > { %797 = vperm.xlu1 %6596, %v450_v21   ;;  %v457_v31 = vld [vmem:[%s8133_s1 + $0x60] sm:$0xff]  ;;  %v458_v32 = vld [vmem:[%s8133_s1 + $0x68] sm:$0xff]  ;;  %v459_v33 = vld [vmem:[%s8133_s1 + $0x70] sm:$0xff]  ;;  %s5354_s16 = sshll.u32 %s379_s22, 6  ;;  %s8079_s20 = scalar_lea.hbm %s8140_s8, %s5799_s13 }
  0x57   : > { %v460_v34 = vld [vmem:[%s8133_s1 + $0x78] sm:$0xff]  ;;  %v6623_v35 = vld [vmem:[%s7177_s12 + $0x10] sm:$0xff]   ;;  %v6625_v37 = vld [vmem:[%s7177_s12 + $0x20] sm:$0xff]   ;;  %s8056_s21 = scalar_lea.vmem [#allocation9], %s5354_s16  ;;  %s8087_s30 = scalar_lea.sflag [#allocation5], %s379_s22 }
  0x58   : > { %628 = vmatpush1.bf16.msra.mxu0 %v6614_v13  ;;  %v6624_v36 = vld [vmem:[%s7177_s12 + $0x18] sm:$0xff]   ;;  %v6626_v38 = vld [vmem:[%s7177_s12 + $0x28] sm:$0xff]   ;;  %v6627_v39 = vld [vmem:[%s7177_s12 + $0x30] sm:$0xff]   ;;  %s5214_s25 = sshll.u32 %s8056_s21, 4  ;;  %s6976_s11 = smov [#allocation9]   ;;  %s8081_s25 = int_to_ptr.vmem [resolvable:$true] %s5214_s25 }
  0x59   : > { %629 = vmatprep.subr.bf16.mxu0 %v6615_v15  ;;  %802 = vperm.xlu0 %6595, %v451_v23   ;;  %v6628_v40 = vld [vmem:[%s7177_s12 + $0x38] sm:$0xff]   ;;  %v6631_v43 = vld [vmem:[#allocation6 + $0x30] sm:$0xff]   ;;  %v6633_v45 = vld [vmem:[#allocation6 + $0x28] sm:$0xff]   ;;  %s6882_s23 = scalar_lea.vmem %s8081_s25, 1024  ;;  %s6886_s24 = sshll.u32 %s6976_s11, 4  ;;  %s6887_s24 = int_to_ptr.vmem [resolvable:$false] %s6886_s24 }
  0x5a   : > { %807 = vperm.xlu1 %6596, %v452_v24   ;;  %v6629_v41 = vld [vmem:[#allocation6 + $0x38] sm:$0xff]   ;;  %v6632_v44 = vld [vmem:[#allocation6 + $0xb0] sm:$0xff]   ;;  %v6634_v46 = vld [vmem:[#allocation6 + $0xa8] sm:$0xff]   ;;  %p6883_p11 = scmp.ne.s32.totalorder %s8081_s25, %s6882_s23  ;;  %s6888_s26 = scalar_lea.vmem %s6887_s24, 2048 }
  0x5b   : > { %v6630_v42 = vld [vmem:[#allocation6 + $0xb8] sm:$0xff]   ;;  %6034 = vmatprep.subr.bf16.mxu1 %v6629_v41  ;;  %v6635_v47 = vld [vmem:[#allocation6 + $0x20] sm:$0xff]   ;;  %v6639_v51 = vld [vmem:[#allocation6 + $0x10] sm:$0xff]   ;;  %p6889_p7 = scmp.lt.s32.totalorder %s8081_s25, %s6887_s24  ;;  %p6890_p9 = scmp.lt.s32.totalorder %s6888_s26, %s6882_s23 }
  0x5c   : > { %630 = vmatpush1.bf16.msra.mxu0 %v6617_v18  ;;  %6035 = vmatpush3.bf16.msra.mxu1 %v6629_v41  ;;  %v6636_v48 = vld [vmem:[#allocation6 + $0xa0] sm:$0xff]   ;;  %v6637_v49 = vld [vmem:[#allocation6 + $0x18] sm:$0xff]   ;;  %v6640_v52 = vld [vmem:[#allocation6 + $0x90] sm:$0xff]   ;;  %p6884_p13 = pnand %p6883_p11, %p7064_p4 }
  0x5d   : > { %631 = vmatprep.subr.bf16.mxu0 %v6618_v19  ;;  %812 = vperm.xlu0 %6595, %v453_v26   ;;  %v6638_v50 = vld [vmem:[#allocation6 + $0x98] sm:$0xff]   ;;  %v6641_v53 = vld [vmem:[#allocation6 + $0x8] sm:$0xff]   ;;  %v6643_v55 = vld [vmem:[#allocation6] sm:$0xff]   ;;  %p6891_p12 = por %p6890_p9, %p6889_p7 }
  0x5e   : > { %817 = vperm.xlu1 %6596, %v454_v27   ;;  %6036 = vmatprep.subr.bf16.mxu1 %v6631_v43  ;;  %v6642_v54 = vld [vmem:[#allocation6 + $0x88] sm:$0xff]   ;;  %v6644_v56 = vld [vmem:[#allocation6 + $0x80] sm:$0xff]   ;;  %v7242_v57 = vld [vmem:[#allocation6 + $0x78] sm:$0xff]   ;;  %p6885_p0 = pneg %p6884_p13 }
  0x5f   : > { %v7244_v58 = vld [vmem:[#allocation6 + $0x138] sm:$0xff]   ;;  %v477_v62 = vld [vmem:[%s8135_s3] sm:$0x3]  ;;  %v946_v26 = vld [vmem:[#allocation2] sm:$0x8] }
  0x60   : > { %632 = vmatpush1.bf16.msra.mxu0 %v6620_v22  ;;  %6037 = vmatpush3.bf16.msra.mxu1 %v6631_v43  ;;  %v7254_v63 = vrot.slane %v477_v62, %v481_v61  ;;  %vm7271_vm9 = vmor %vm994_vm3, %vm995_vm5  ;;  %p6892_p1 = pnand %p6891_p12, %p6885_p0 }
  0x61   : > { %822 = vperm.xlu0 %6595, %v455_v28   ;;  %6090 = vmatprep.subr.bf16.mxu0 %v6630_v42  ;;  %v1428_v28 = vld [vmem:[#allocation2 + $0x8] sm:$0x1]  ;;  %vm7277_vm10 = vmor %vm1475_vm6, %vm1476_vm7 }
  0x62   : > { %827 = vperm.xlu1 %6596, %v456_v29   ;;  %6038 = vmatprep.subr.bf16.mxu1 %v6633_v45 }
  0x63   : > { %650 = vmatmul.mubr.bf16.vlgmr.msra.gmra.mxu0 %v6621_v25 }
  0x64   : > { %657 = vmatprep.mubr.bf16.mxu0 %v6975_v0  ;;  %6091 = vmatpush3.bf16.msra.mxu0 %v6630_v42  ;;  %v8173_v42 = vmov 0 }
  0x65   : > { %832 = vperm.xlu0 %6595, %v457_v31   ;;  %6092 = vmatprep.subr.bf16.mxu0 %v6632_v44  ;;  %v948_v31 = vld [vmem:[#allocation2 + $0xc] sm:$0x8]  ;;  %v8174_v42 = vsel %vm7271_vm9, 4294967295, %v8173_v42 }
  0x66   : > { %837 = vperm.xlu1 %6596, %v458_v32   ;;  %6039 = vmatpush3.bf16.msra.mxu1 %v6633_v45  ;;  %v1430_v32 = vld [vmem:[#allocation2 + $0x14] sm:$0x1]  ;;  %8175 = vst [vmem:[#allocation18_spill] sm:$0xff] %v8174_v42 }
  0x67   : > { %6040 = vmatprep.subr.bf16.mxu1 %v6635_v47 }
  0x68   : > { %6093 = vmatpush3.bf16.msra.mxu0 %v6632_v44  ;;  %v1480_v44 = vrot.slane %v1428_v28, 5 }
  0x69   : > { %842 = vperm.xlu0 %6595, %v459_v33   ;;  %6094 = vmatprep.subr.bf16.mxu0 %v6634_v46 }
  0x6a   : > { %847 = vperm.xlu1 %6596, %v460_v34   ;;  %6041 = vmatpush3.bf16.msra.mxu1 %v6635_v47  ;;  %v5398_v47 = vrot.slane %v948_v31, 11 }
  0x6b   : > { %658 = vmatmul.mubr.bf16.gmra.mxu0 %v6622_v30  ;;  %6042 = vmatprep.subr.bf16.mxu1 %v6637_v49 }
  0x6c   : > { %665 = vmatprep.mubr.bf16.mxu0 %v6975_v0  ;;  %6095 = vmatpush3.bf16.msra.mxu0 %v6634_v46 }
  0x6d   : > { %6096 = vmatprep.subr.bf16.mxu0 %v6636_v48 }
  0x6e   : > { %6043 = vmatpush3.bf16.msra.mxu1 %v6637_v49 }
  0x6f   : > { %6044 = vmatprep.subr.bf16.mxu1 %v6639_v51 }
  0x70   : > { %6097 = vmatpush3.bf16.msra.mxu0 %v6636_v48  ;;  %v8176_v48 = vmov 0 }
  0x71   : > { %6098 = vmatprep.subr.bf16.mxu0 %v6638_v50  ;;  %v8177_v48 = vsel %vm7277_vm10, 4294967295, %v8176_v48 }
  0x72   : > { %6045 = vmatpush3.bf16.msra.mxu1 %v6639_v51  ;;  %8178 = vst [vmem:[#allocation19_spill] sm:$0xff] %v8177_v48 }
  0x73   : > { %666 = vmatmul.mubr.bf16.gmra.mxu0 %v6623_v35  ;;  %6046 = vmatprep.subr.bf16.mxu1 %v6641_v53 }
  0x74   : > { %675 = vmatprep.mubr.bf16.mxu0 %v6975_v0  ;;  %6099 = vmatpush3.bf16.msra.mxu0 %v6638_v50  ;;  %v1484_v50 = vrot.slane %v1430_v32, 5 }
  0x75   : > { %6100 = vmatprep.subr.bf16.mxu0 %v6640_v52 }
  0x76   : > { %6047 = vmatpush3.bf16.msra.mxu1 %v6641_v53 }
  0x77   : > { %6048 = vmatprep.subr.bf16.mxu1 %v6643_v55 }
  0x78   : > { %6101 = vmatpush3.bf16.msra.mxu0 %v6640_v52 }
  0x79   : > { %6102 = vmatprep.subr.bf16.mxu0 %v6642_v54 }
  0x7a   : > { %6049 = vmatpush3.bf16.msra.mxu1 %v6643_v55 }
  0x7b   : > { %676 = vmatmul.mubr.bf16.gmra.mxu0 %v6624_v36  ;;  %6062 = vmatprep.subr.bf16.mxu1 %v7242_v57 }
  0x7c   : > { %685 = vmatprep.mubr.bf16.mxu0 %v6975_v0  ;;  %6103 = vmatpush3.bf16.msra.mxu0 %v6642_v54 }
  0x7d   : > { %6104 = vmatprep.subr.bf16.mxu0 %v6644_v56 }
  0x80   : > { %6105 = vmatpush3.bf16.msra.mxu0 %v6644_v56 }
  0x81   : > { %6146 = vmatprep.subr.bf16.mxu0 %v7244_v58 }
  0x83   : > { %686 = vmatmul.mubr.bf16.gmra.mxu0 %v6625_v37 }
  0x84   : > { %695 = vmatprep.mubr.bf16.mxu0 %v6975_v0 }
  0x8b   : > { %696 = vmatmul.mubr.bf16.gmra.mxu0 %v6626_v38 }
  0x8c   : > { %705 = vmatprep.mubr.bf16.mxu0 %v6975_v0 }
  0x93   : > { %706 = vmatmul.mubr.bf16.gmra.mxu0 %v6627_v39 }
  0x94   : > { %713 = vmatprep.mubr.bf16.mxu0 %v6975_v0 }
  0x9b   : > { %714 = vmatmul.mubr.bf16.gmra.mxu0 %v6628_v40  ;;  %v5397_v40 = vrot.slane %v946_v26, 11 }
  0xc0   : > { %v773_v3 = vpop.permute.xlu0 %772 }
  0xc3   : > { %v7259_v18 = vpop.permute.xlu1 %782 }
  0xc4   : > { %8170 = vst [vmem:[#allocation15_spill] sm:$0xff] %v7259_v18 }
  0xcc   : > { %v778_v13 = vpop.permute.xlu0 %777 }
  0xcd   : > { %v7263_v33 = vpop.permute.xlu1 %787 }
  0xce   : > { %8171 = vst [vmem:[#allocation16_spill] sm:$0xff] %v7263_v33 }
  0xd0   : > { %v7281_v51 = vpop.permute.xlu0 %792 }
  0xd1   : > { %8179 = vst [vmem:[#allocation20_spill] sm:$0xff] %v7281_v51 }
 0x123   : > { %v651_v0 = vpop.f32.mrf.mxu0 }
 0x124   : > { %v652_v1 = vadd.f32 %v651_v0, %v7254_v63 }
 0x125   : > { %v653_v2 = vpop.f32.mrf.mxu0 }
 0x126   : > { %vm722_vm0 = vcmp.ge.f32.partialorder %v652_v1, 0.0  ;;  %v738_v4 = vmul.f32 0.01, %v652_v1  ;;  %v950_v2 = vld [vmem:[#allocation2 + $0x18] sm:$0x8] }
 0x127   : > { %v654_v5 = vpop.f32.mrf.mxu0 }
 0x128   : > { %v754_v6 = vsel %vm722_vm0, %v652_v1, %v738_v4  ;;  %v655_v7 = vadd.f32 %v654_v5, %v7254_v63 }
 0x129   : > { %v850_v8 = vmul.f32 %v773_v3, %v754_v6  ;;  %v656_v9 = vpop.f32.mrf.mxu0 }
 0x12a   : > { %vm723_vm1 = vcmp.ge.f32.partialorder %v655_v7, 0.0  ;;  %v739_v10 = vmul.f32 0.01, %v655_v7  ;;  %v1432_v9 = vld [vmem:[#allocation2 + $0x20] sm:$0x1] }
 0x12b   : > { %v5771_v11 = vpack.c.bf16 %v850_v8, %v850_v8  ;;  %v659_v12 = vpop.f32.mrf.mxu0  ;;  %v952_v8 = vld [vmem:[#allocation2 + $0x24] sm:$0x8] }
 0x12c   : > { %v755_v14 = vsel %vm723_vm1, %v655_v7, %v739_v10  ;;  %v660_v15 = vadd.f32 %v659_v12, %v7254_v63  ;;  %v1434_v10 = vld [vmem:[#allocation2 + $0x2c] sm:$0x1] }
 0x12d   : > { %930 = vst [vmem:[#allocation2 + $0x4] sm:$0xf] %v5771_v11  ;;  %v851_v16 = vmul.f32 %v778_v13, %v755_v14  ;;  %v661_v17 = vpop.f32.mrf.mxu0  ;;  %v7295_v11 = vpop.permute.xlu1 %797 }
 0x12e   : > { %vm724_vm2 = vcmp.ge.f32.partialorder %v660_v15, 0.0  ;;  %v740_v19 = vmul.f32 0.01, %v660_v15  ;;  %8181 = vst [vmem:[#allocation22_spill] sm:$0xff] %v7295_v11 }
 0x12f   : > { %v5772_v20 = vpack.c.bf16 %v851_v16, %v851_v16  ;;  %v662_v21 = vpop.f32.mrf.mxu0 }
 0x130   : > { %v756_v22 = vsel %vm724_vm2, %v660_v15, %v740_v19  ;;  %v663_v23 = vadd.f32 %v662_v21, %v7254_v63  ;;  %v5399_v21 = vrot.slane %v950_v2, 11 }
 0x131   : > { %931 = vst [vmem:[#allocation2 + $0x10] sm:$0xf] %v5772_v20  ;;  %v852_v24 = vmul.f32 %v7259_v18, %v756_v22  ;;  %v664_v25 = vpop.f32.mrf.mxu0 }
 0x132   : > { %vm725_vm4 = vcmp.ge.f32.partialorder %v663_v23, 0.0  ;;  %v741_v27 = vmul.f32 0.01, %v663_v23 }
 0x133   : > { %v5773_v29 = vpack.c.bf16 %v852_v24, %v852_v24  ;;  %v667_v30 = vpop.f32.mrf.mxu0  ;;  %v1488_v24 = vrot.slane %v1432_v9, 5 }
 0x134   : > { %v757_v34 = vsel %vm725_vm4, %v663_v23, %v741_v27  ;;  %v668_v35 = vadd.f32 %v667_v30, %v7254_v63  ;;  %v947_v36 = vld [vmem:[#allocation2 + $0x4] sm:$0x7]  ;;  %v5400_v27 = vrot.slane %v952_v8, 11  ;;  %v7301_v30 = vpop.permute.xlu0 %802 }
 0x135   : > { %v1427_v37 = vld [vmem:[#allocation2 + $0x4] sm:$0xe]  ;;  %932 = vst [vmem:[#allocation2 + $0x1c] sm:$0xf] %v5773_v29  ;;  %v853_v38 = vmul.f32 %v7263_v33, %v757_v34  ;;  %v7267_v39 = vpop.f32.mrf.mxu0  ;;  %v999_v43 = vrot.slane %v947_v36, 7  ;;  %v1492_v29 = vrot.slane %v1434_v10, 5 }
 0x136   : > { %8172 = vst [vmem:[#allocation17_spill] sm:$0xff] %v7267_v39  ;;  %vm726_vm8 = vcmp.ge.f32.partialorder %v668_v35, 0.0  ;;  %v742_v41 = vmul.f32 0.01, %v668_v35  ;;  %v5438_v49 = vrot.slane %v1427_v37, 9  ;;  %8183 = vst [vmem:[#allocation24_spill] sm:$0xff] %v7301_v30 }
 0x137   : > { %v5774_v45 = vpack.c.bf16 %v853_v38, %v853_v38  ;;  %v671_v46 = vpop.f32.mrf.mxu0  ;;  %v1000_v1 = vsel %vm7271_vm9, %v5397_v40, %v999_v43  ;;  %v7304_v36 = vld [vmem:[#allocation2 + $0x30] sm:$0x8]  ;;  %v1436_v43 = vld [vmem:[#allocation2 + $0x38] sm:$0x1] }
 0x138   : > { %v758_v52 = vsel %vm726_vm8, %v668_v35, %v742_v41  ;;  %v672_v53 = vadd.f32 %v671_v46, %v7254_v63  ;;  %v949_v54 = vld [vmem:[#allocation2 + $0x10] sm:$0x7]  ;;  %v1481_v6 = vsel %vm7277_vm10, %v5438_v49, %v1480_v44  ;;  %v956_v46 = vld [vmem:[#allocation2 + $0x3c] sm:$0x8]  ;;  %v1496_v8 = vrot.slane %v1436_v43, 5 }
 0x139   : > { %v1429_v55 = vld [vmem:[#allocation2 + $0x10] sm:$0xe]  ;;  %933 = vst [vmem:[#allocation2 + $0x28] sm:$0xf] %v5774_v45  ;;  %v854_v56 = vmul.f32 %v7281_v51, %v758_v52  ;;  %v7285_v59 = vpop.f32.mrf.mxu0  ;;  %v1003_v61 = vrot.slane %v949_v54, 7 }
 0x13a   : > { %8180 = vst [vmem:[#allocation21_spill] sm:$0xff] %v7285_v59  ;;  %v5439_v62 = vrot.slane %v1429_v55, 9  ;;  %vm727_vm11 = vcmp.ge.f32.partialorder %v672_v53, 0.0  ;;  %v743_v0 = vmul.f32 0.01, %v672_v53  ;;  %v6647_v55 = vld [vmem:[#allocation6 + $0x70] sm:$0xff]  }
 0x13b   : > { %v5775_v3 = vpack.c.bf16 %v854_v56, %v854_v56  ;;  %v677_v4 = vpop.f32.mrf.mxu0  ;;  %v1004_v5 = vsel %vm7271_vm9, %v5398_v47, %v1003_v61  ;;  %v1438_v54 = vld [vmem:[#allocation2 + $0x44] sm:$0x1]  ;;  %v6648_v56 = vld [vmem:[#allocation6 + $0x130] sm:$0xff]   ;;  %v7317_v61 = vpop.permute.xlu1 %807  ;;  %v1442_v43 = vld [vmem:[#allocation2 + $0x5c] sm:$0x1] }
 0x13c   : > { %v1485_v7 = vsel %vm7277_vm10, %v5439_v62, %v1484_v50  ;;  %v759_v12 = vsel %vm727_vm11, %v672_v53, %v743_v0  ;;  %v678_v13 = vadd.f32 %v677_v4, %v7254_v63  ;;  %v5410_v14 = vcombine.low %v1000_v1, %v1004_v5  ;;  %v951_v16 = vld [vmem:[#allocation2 + $0x1c] sm:$0x7]  ;;  %8185 = vst [vmem:[#allocation26_spill] sm:$0xff] %v7317_v61 }
 0x13d   : > { %v5450_v15 = vcombine.low %v1481_v6, %v1485_v7  ;;  %v1431_v17 = vld [vmem:[#allocation2 + $0x1c] sm:$0xe]  ;;  %934 = vst [vmem:[#allocation2 + $0x34] sm:$0xf] %v5775_v3  ;;  %v855_v19 = vmul.f32 %v7295_v11, %v759_v12  ;;  %v7299_v20 = vpop.f32.mrf.mxu0  ;;  %v1007_v23 = vrot.slane %v951_v16, 7  ;;  %v5401_v7 = vrot.slane %v7304_v36, 11 }
 0x13e   : > { %8182 = vst [vmem:[#allocation23_spill] sm:$0xff] %v7299_v20  ;;  %vm728_vm12 = vcmp.ge.f32.partialorder %v678_v13, 0.0  ;;  %v744_v22 = vmul.f32 0.01, %v678_v13  ;;  %6050 = vmatprep.mubr.bf16.mxu1 %v5410_v14  ;;  %v5440_v28 = vrot.slane %v1431_v17, 9  ;;  %v1500_v16 = vrot.slane %v1438_v54, 5 }
 0x13f   : > { %6106 = vmatprep.mubr.bf16.mxu0 %v5450_v15  ;;  %v5776_v25 = vpack.c.bf16 %v855_v19, %v855_v19  ;;  %v681_v26 = vpop.f32.mrf.mxu0  ;;  %v1008_v45 = vsel %vm7271_vm9, %v5399_v21, %v1007_v23  ;;  %v5402_v15 = vrot.slane %v956_v46, 11  ;;  %v6649_v17 = vld [vmem:[#allocation6 + $0x68] sm:$0xff]   ;;  %v7326_v19 = vpop.permute.xlu0 %812 }
 0x140   : > { %v760_v31 = vsel %vm728_vm12, %v678_v13, %v744_v22  ;;  %v682_v32 = vadd.f32 %v681_v26, %v7254_v63  ;;  %v953_v34 = vld [vmem:[#allocation2 + $0x28] sm:$0x7]  ;;  %v1489_v52 = vsel %vm7277_vm10, %v5440_v28, %v1488_v24  ;;  %8187 = vst [vmem:[#allocation28_spill] sm:$0xff] %v7326_v19  ;;  %v7331_v26 = vld [vmem:[#allocation2 + $0x50] sm:$0x1]  ;;  %v7344_v46 = vpop.permute.xlu1 %817 }
 0x141   : > { %v1433_v35 = vld [vmem:[#allocation2 + $0x28] sm:$0xe]  ;;  %935 = vst [vmem:[#allocation2 + $0x40] sm:$0xf] %v5776_v25  ;;  %v856_v37 = vmul.f32 %v7301_v30, %v760_v31  ;;  %v7307_v38 = vpop.f32.mrf.mxu0  ;;  %v1011_v40 = vrot.slane %v953_v34, 7  ;;  %8189 = vst [vmem:[#allocation30_spill] sm:$0xff] %v7344_v46 }
 0x142   : > { %8184 = vst [vmem:[#allocation25_spill] sm:$0xff] %v7307_v38  ;;  %v5441_v41 = vrot.slane %v1433_v35, 9  ;;  %vm729_vm13 = vcmp.ge.f32.partialorder %v682_v32, 0.0  ;;  %v745_v44 = vmul.f32 0.01, %v682_v32 }
 0x143   : > { %v5777_v47 = vpack.c.bf16 %v856_v37, %v856_v37  ;;  %v687_v49 = vpop.f32.mrf.mxu0  ;;  %v1012_v50 = vsel %vm7271_vm9, %v5400_v27, %v1011_v40  ;;  %v7329_v25 = vld [vmem:[#allocation2 + $0x48] sm:$0x8]  ;;  %v960_v35 = vld [vmem:[#allocation2 + $0x54] sm:$0x8] }
 0x144   : > { %v1493_v53 = vsel %vm7277_vm10, %v5441_v41, %v1492_v29  ;;  %v761_v62 = vsel %vm729_vm13, %v682_v32, %v745_v44  ;;  %v688_v0 = vadd.f32 %v687_v49, %v7254_v63  ;;  %v5411_v1 = vcombine.low %v1008_v45, %v1012_v50  ;;  %v955_v3 = vld [vmem:[#allocation2 + $0x34] sm:$0x7]  ;;  %v6650_v29 = vld [vmem:[#allocation6 + $0x128] sm:$0xff]   ;;  %v6651_v44 = vld [vmem:[#allocation6 + $0x60] sm:$0xff]  }
 0x145   : > { %v5451_v2 = vcombine.low %v1489_v52, %v1493_v53  ;;  %v1435_v4 = vld [vmem:[#allocation2 + $0x34] sm:$0xe]  ;;  %936 = vst [vmem:[#allocation2 + $0x4c] sm:$0xf] %v5777_v47  ;;  %v857_v5 = vmul.f32 %v7317_v61, %v761_v62  ;;  %v7321_v6 = vpop.f32.mrf.mxu0  ;;  %v1015_v10 = vrot.slane %v955_v3, 7  ;;  %v6652_v45 = vld [vmem:[#allocation6 + $0x120] sm:$0xff]  }
 0x146   : > { %8186 = vst [vmem:[#allocation27_spill] sm:$0xff] %v7321_v6  ;;  %vm730_vm14 = vcmp.ge.f32.partialorder %v688_v0, 0.0  ;;  %v746_v9 = vmul.f32 0.01, %v688_v0  ;;  %6051 = vmatmul.mubr.bf16.vlgmr.msra.gmra.mxu1 %v5411_v1  ;;  %v5442_v12 = vrot.slane %v1435_v4, 9 }
 0x147   : > { %6107 = vmatmul.mubr.bf16.vlgmr.msra.gmra.mxu0 %v5451_v2  ;;  %v5778_v13 = vpack.c.bf16 %v857_v5, %v857_v5  ;;  %v691_v14 = vpop.f32.mrf.mxu0  ;;  %6063 = vmatpush3.bf16.msra.mxu1 %v7242_v57  ;;  %v1016_v32 = vsel %vm7271_vm9, %v5401_v7, %v1015_v10  ;;  %v5404_v7 = vrot.slane %v960_v35, 11  ;;  %v7352_v10 = vpop.permute.xlu0 %822  ;;  %v1446_v35 = vld [vmem:[#allocation2 + $0x74] sm:$0x1] }
 0x148   : > { %6147 = vmatpush3.bf16.msra.mxu0 %v7244_v58  ;;  %v762_v21 = vsel %vm730_vm14, %v688_v0, %v746_v9  ;;  %v692_v22 = vadd.f32 %v691_v14, %v7254_v63  ;;  %v957_v23 = vld [vmem:[#allocation2 + $0x40] sm:$0x7]  ;;  %6064 = vmatprep.subr.bf16.mxu1 %v6647_v55  ;;  %v1497_v34 = vsel %vm7277_vm10, %v5442_v12, %v1496_v8  ;;  %v1508_v8 = vrot.slane %v1442_v43, 5  ;;  %v6653_v9 = vld [vmem:[#allocation6 + $0x58] sm:$0xff]  }
 0x149   : > { %v1437_v24 = vld [vmem:[#allocation2 + $0x40] sm:$0xe]  ;;  %6148 = vmatprep.subr.bf16.mxu0 %v6648_v56  ;;  %937 = vst [vmem:[#allocation2 + $0x58] sm:$0xf] %v5778_v13  ;;  %v858_v57 = vmul.f32 %v7326_v19, %v762_v21  ;;  %v7334_v27 = vpop.f32.mrf.mxu0  ;;  %v1019_v58 = vrot.slane %v957_v23, 7  ;;  %8191 = vst [vmem:[#allocation32_spill] sm:$0xff] %v7352_v10 }
 0x14a   : > { %8188 = vst [vmem:[#allocation29_spill] sm:$0xff] %v7334_v27  ;;  %v5443_v28 = vrot.slane %v1437_v24, 9  ;;  %vm731_vm15 = vcmp.ge.f32.partialorder %v692_v22, 0.0  ;;  %v747_v31 = vmul.f32 0.01, %v692_v22 }
 0x14b   : > { %v5779_v36 = vpack.c.bf16 %v858_v57, %v858_v57  ;;  %v697_v37 = vpop.f32.mrf.mxu0  ;;  %v1020_v40 = vsel %vm7271_vm9, %v5402_v15, %v1019_v58  ;;  %6065 = vmatpush3.bf16.msra.mxu1 %v6647_v55  ;;  %v5403_v55 = vrot.slane %v7329_v25, 11  ;;  %v7357_v21 = vld [vmem:[#allocation2 + $0x68] sm:$0x1]  ;;  %v6654_v25 = vld [vmem:[#allocation6 + $0x118] sm:$0xff]  }
 0x14c   : > { %v1501_v41 = vsel %vm7277_vm10, %v5443_v28, %v1500_v16  ;;  %6149 = vmatpush3.bf16.msra.mxu0 %v6648_v56  ;;  %v763_v47 = vsel %vm731_vm15, %v692_v22, %v747_v31  ;;  %v698_v49 = vadd.f32 %v697_v37, %v7254_v63  ;;  %v5412_v50 = vcombine.low %v1016_v32, %v1020_v40  ;;  %v959_v53 = vld [vmem:[#allocation2 + $0x4c] sm:$0x7]  ;;  %v7355_v16 = vld [vmem:[#allocation2 + $0x60] sm:$0x8]  ;;  %v964_v28 = vld [vmem:[#allocation2 + $0x6c] sm:$0x8]  ;;  %v7370_v40 = vpop.permute.xlu1 %827 }
 0x14d   : > { %v5452_v52 = vcombine.low %v1497_v34, %v1501_v41  ;;  %6066 = vmatprep.subr.bf16.mxu1 %v6649_v17  ;;  %v1439_v54 = vld [vmem:[#allocation2 + $0x4c] sm:$0xe]  ;;  %938 = vst [vmem:[#allocation2 + $0x64] sm:$0xf] %v5779_v36  ;;  %v859_v62 = vmul.f32 %v7344_v46, %v763_v47  ;;  %v7348_v0 = vpop.f32.mrf.mxu0  ;;  %6150 = vmatprep.subr.bf16.mxu0 %v6650_v29  ;;  %v1504_v56 = vrot.slane %v7331_v26, 5  ;;  %v1023_v2 = vrot.slane %v959_v53, 7 }
 0x14e   : > { %8190 = vst [vmem:[#allocation31_spill] sm:$0xff] %v7348_v0  ;;  %vm732_vm0 = vcmp.ge.f32.partialorder %v698_v49, 0.0  ;;  %v748_v1 = vmul.f32 0.01, %v698_v49  ;;  %6054 = vmatprep.mubr.bf16.mxu1 %v5412_v50  ;;  %v5444_v3 = vrot.slane %v1439_v54, 9  ;;  %v6655_v36 = vld [vmem:[#allocation6 + $0x50] sm:$0xff]  }
 0x14f   : > { %6110 = vmatprep.mubr.bf16.mxu0 %v5452_v52  ;;  %v5780_v4 = vpack.c.bf16 %v859_v62, %v859_v62  ;;  %v701_v5 = vpop.f32.mrf.mxu0  ;;  %6067 = vmatpush3.bf16.msra.mxu1 %v6649_v17  ;;  %v1024_v57 = vsel %vm7271_vm9, %v5403_v55, %v1023_v2  ;;  %v6656_v37 = vld [vmem:[#allocation6 + $0x110] sm:$0xff]   ;;  %8193 = vst [vmem:[#allocation34_spill] sm:$0xff] %v7370_v40 }
 0x150   : > { %6151 = vmatpush3.bf16.msra.mxu0 %v6650_v29  ;;  %v764_v12 = vsel %vm732_vm0, %v698_v49, %v748_v1  ;;  %v702_v13 = vadd.f32 %v701_v5, %v7254_v63  ;;  %v961_v14 = vld [vmem:[#allocation2 + $0x58] sm:$0x7]  ;;  %6068 = vmatprep.subr.bf16.mxu1 %v6651_v44  ;;  %v1505_v58 = vsel %vm7277_vm10, %v5444_v3, %v1504_v56  ;;  %v5406_v3 = vrot.slane %v964_v28, 11  ;;  %v6657_v5 = vld [vmem:[#allocation6 + $0x48] sm:$0xff]  }
 0x151   : > { %v1441_v15 = vld [vmem:[#allocation2 + $0x58] sm:$0xe]  ;;  %6152 = vmatprep.subr.bf16.mxu0 %v6652_v45  ;;  %939 = vst [vmem:[#allocation2 + $0x70] sm:$0xf] %v5780_v4  ;;  %v860_v22 = vmul.f32 %v7352_v10, %v764_v12  ;;  %v7360_v17 = vpop.f32.mrf.mxu0  ;;  %v1027_v23 = vrot.slane %v961_v14, 7  ;;  %v1516_v4 = vrot.slane %v1446_v35, 5 }
 0x152   : > { %8192 = vst [vmem:[#allocation33_spill] sm:$0xff] %v7360_v17  ;;  %v5445_v24 = vrot.slane %v1441_v15, 9  ;;  %vm733_vm1 = vcmp.ge.f32.partialorder %v702_v13, 0.0  ;;  %v749_v26 = vmul.f32 0.01, %v702_v13  ;;  %v6661_v35 = vld [vmem:[#allocation6 + $0x40] sm:$0xff]  }
 0x153   : > { %v5781_v29 = vpack.c.bf16 %v860_v22, %v860_v22  ;;  %v707_v31 = vpop.f32.mrf.mxu0  ;;  %v1028_v32 = vsel %vm7271_vm9, %v5404_v7, %v1027_v23  ;;  %6069 = vmatpush3.bf16.msra.mxu1 %v6651_v44  ;;  %v5405_v44 = vrot.slane %v7355_v16, 11  ;;  %v7376_v7 = vpop.permute.xlu0 %832  ;;  %v7379_v15 = vld [vmem:[#allocation2 + $0x78] sm:$0x8]  ;;  %v7381_v16 = vld [vmem:[#allocation2 + $0x80] sm:$0x1] }
 0x154   : > { %v1509_v34 = vsel %vm7277_vm10, %v5445_v24, %v1508_v8  ;;  %6153 = vmatpush3.bf16.msra.mxu0 %v6652_v45  ;;  %v765_v41 = vsel %vm733_vm1, %v702_v13, %v749_v26  ;;  %v708_v43 = vadd.f32 %v707_v31, %v7254_v63  ;;  %v5413_v47 = vcombine.low %v1024_v57, %v1028_v32  ;;  %v963_v50 = vld [vmem:[#allocation2 + $0x64] sm:$0x7]  ;;  %v6658_v24 = vld [vmem:[#allocation6 + $0x108] sm:$0xff]  }
 0x155   : > { %v5453_v49 = vcombine.low %v1505_v58, %v1509_v34  ;;  %6070 = vmatprep.subr.bf16.mxu1 %v6653_v9  ;;  %v1443_v52 = vld [vmem:[#allocation2 + $0x64] sm:$0xe]  ;;  %940 = vst [vmem:[#allocation2 + $0x7c] sm:$0xf] %v5781_v29  ;;  %v861_v53 = vmul.f32 %v7370_v40, %v765_v41  ;;  %v709_v54 = vpop.f32.mrf.mxu0  ;;  %6154 = vmatprep.subr.bf16.mxu0 %v6654_v25  ;;  %v1512_v45 = vrot.slane %v7357_v21, 5  ;;  %v1031_v55 = vrot.slane %v963_v50, 7 }
 0x156   : > { %vm734_vm2 = vcmp.ge.f32.partialorder %v708_v43, 0.0  ;;  %v750_v62 = vmul.f32 0.01, %v708_v43  ;;  %6055 = vmatmul.mubr.bf16.gmra.mxu1 %v5413_v47  ;;  %v5446_v56 = vrot.slane %v1443_v52, 9  ;;  %8194 = vst [vmem:[#allocation35_spill] sm:$0xff] %v7376_v7  ;;  %v6662_v41 = vld [vmem:[#allocation6 + $0x100] sm:$0xff]  }
 0x157   : > { %6111 = vmatmul.mubr.bf16.gmra.mxu0 %v5453_v49  ;;  %v5782_v1 = vpack.c.bf16 %v861_v53, %v861_v53  ;;  %v710_v2 = vpop.f32.mrf.mxu0  ;;  %6071 = vmatpush3.bf16.msra.mxu1 %v6653_v9  ;;  %v1032_v26 = vsel %vm7271_vm9, %v5405_v44, %v1031_v55  ;;  %v968_v58 = vld [vmem:[#allocation2 + $0x84] sm:$0x8]  ;;  %v1450_v34 = vld [vmem:[#allocation2 + $0x8c] sm:$0x1] }
 0x158   : > { %6155 = vmatpush3.bf16.msra.mxu0 %v6654_v25  ;;  %v766_v8 = vsel %vm734_vm2, %v708_v43, %v750_v62  ;;  %v711_v12 = vadd.f32 %v710_v2, %v7254_v63  ;;  %v965_v13 = vld [vmem:[#allocation2 + $0x70] sm:$0x7]  ;;  %6072 = vmatprep.subr.bf16.mxu1 %v6655_v36  ;;  %v1513_v57 = vsel %vm7277_vm10, %v5446_v56, %v1512_v45  ;;  %v7392_v43 = vpop.permute.xlu1 %837 }
 0x159   : > { %v1445_v14 = vld [vmem:[#allocation2 + $0x70] sm:$0xe]  ;;  %6156 = vmatprep.subr.bf16.mxu0 %v6656_v37  ;;  %941 = vst [vmem:[#allocation2 + $0x88] sm:$0xf] %v5782_v1  ;;  %v862_v21 = vmul.f32 %v7376_v7, %v766_v8  ;;  %v712_v9 = vpop.f32.mrf.mxu0  ;;  %v1035_v22 = vrot.slane %v965_v13, 7  ;;  %8195 = vst [vmem:[#allocation36_spill] sm:$0xff] %v7392_v43  ;;  %v843_v13 = vpop.permute.xlu0 %842 }
 0x15a   : > { %v5447_v23 = vrot.slane %v1445_v14, 9  ;;  %vm735_vm3 = vcmp.ge.f32.partialorder %v711_v12, 0.0  ;;  %v751_v25 = vmul.f32 0.01, %v711_v12  ;;  %v6663_v8 = vld [vmem:[#allocation6 + $0xf8] sm:$0xff]  }
 0x15b   : > { %v5783_v28 = vpack.c.bf16 %v862_v21, %v862_v21  ;;  %v715_v29 = vpop.f32.mrf.mxu0  ;;  %v1036_v31 = vsel %vm7271_vm9, %v5406_v3, %v1035_v22  ;;  %6073 = vmatpush3.bf16.msra.mxu1 %v6655_v36  ;;  %v5407_v36 = vrot.slane %v7379_v15, 11  ;;  %v5408_v3 = vrot.slane %v968_v58, 11 }
 0x15c   : > { %v1517_v32 = vsel %vm7277_vm10, %v5447_v23, %v1516_v4  ;;  %6157 = vmatpush3.bf16.msra.mxu0 %v6656_v37  ;;  %v767_v47 = vsel %vm735_vm3, %v711_v12, %v751_v25  ;;  %v716_v49 = vadd.f32 %v715_v29, %v7254_v63  ;;  %v5414_v50 = vcombine.low %v1032_v26, %v1036_v31  ;;  %v967_v53 = vld [vmem:[#allocation2 + $0x7c] sm:$0x7] }
 0x15d   : > { %v5454_v52 = vcombine.low %v1513_v57, %v1517_v32  ;;  %6074 = vmatprep.subr.bf16.mxu1 %v6657_v5  ;;  %v1447_v54 = vld [vmem:[#allocation2 + $0x7c] sm:$0xe]  ;;  %942 = vst [vmem:[#allocation2 + $0x94] sm:$0xf] %v5783_v28  ;;  %v863_v44 = vmul.f32 %v7392_v43, %v767_v47  ;;  %v717_v45 = vpop.f32.mrf.mxu0  ;;  %6158 = vmatprep.subr.bf16.mxu0 %v6658_v24  ;;  %v1520_v37 = vrot.slane %v7381_v16, 5  ;;  %v1039_v55 = vrot.slane %v967_v53, 7  ;;  %v848_v28 = vpop.permute.xlu1 %847 }
 0x15e   : > { %vm736_vm4 = vcmp.ge.f32.partialorder %v716_v49, 0.0  ;;  %v752_v62 = vmul.f32 0.01, %v716_v49  ;;  %6058 = vmatprep.mubr.bf16.mxu1 %v5414_v50  ;;  %v5448_v56 = vrot.slane %v1447_v54, 9  ;;  %v1524_v4 = vrot.slane %v1450_v34, 5  ;;  %v6664_v12 = vld [vmem:[#allocation6 + $0x1b8] sm:$0xff]  }
 0x15f   : > { %6114 = vmatprep.mubr.bf16.mxu0 %v5454_v52  ;;  %v5784_v1 = vpack.c.bf16 %v863_v44, %v863_v44  ;;  %v718_v2 = vpop.f32.mrf.mxu0  ;;  %6075 = vmatpush3.bf16.msra.mxu1 %v6657_v5  ;;  %v1040_v5 = vsel %vm7271_vm9, %v5407_v36, %v1039_v55  ;;  %v6659_v47 = vld [vmem:[#allocation2 + $0x4] ss:$12 sps:$4 sm:$0xff]   ;;  %v6665_v52 = vld [vmem:[#allocation2 + $0x1c] ss:$12 sps:$4 sm:$0xff]   ;;  %v6666_v53 = vld [vmem:[#allocation2 + $0x34] ss:$12 sps:$4 sm:$0xff]  }
 0x160   : > { %6159 = vmatpush3.bf16.msra.mxu0 %v6658_v24  ;;  %v768_v14 = vsel %vm736_vm4, %v716_v49, %v752_v62  ;;  %v719_v15 = vadd.f32 %v718_v2, %v7254_v63  ;;  %v969_v21 = vld [vmem:[#allocation2 + $0x88] sm:$0x7]  ;;  %6076 = vmatprep.subr.bf16.mxu1 %v6661_v35  ;;  %v1521_v24 = vsel %vm7277_vm10, %v5448_v56, %v1520_v37  ;;  %v6667_v54 = vld [vmem:[#allocation2 + $0x34] ss:$12 sps:$4 sm:$0xff]   ;;  %v6668_v44 = vld [vmem:[#allocation2 + $0x4c] ss:$12 sps:$4 sm:$0xff]  }
 0x161   : > { %v1449_v16 = vld [vmem:[#allocation2 + $0x88] sm:$0xe]  ;;  %6160 = vmatprep.subr.bf16.mxu0 %v6662_v41  ;;  %943 = vst [vmem:[#allocation2 + $0xa0] sm:$0xf] %v5784_v1  ;;  %v864_v9 = vmul.f32 %v843_v13, %v768_v14  ;;  %v1043_v22 = vrot.slane %v969_v21, 7  ;;  %v720_v25 = vpop.f32.mrf.mxu0  ;;  %v6677_v1 = vld [vmem:[#allocation6 + $0xe0] sm:$0xff]  }
 0x162   : > { %v5449_v23 = vrot.slane %v1449_v16, 9  ;;  %vm737_vm5 = vcmp.ge.f32.partialorder %v719_v15, 0.0  ;;  %v753_v26 = vmul.f32 0.01, %v719_v15  ;;  %v6660_v49 = vld [vmem:[#allocation2 + $0x1c] ss:$12 sps:$4 sm:$0xff]  }
 0x163   : > { %v5785_v57 = vpack.c.bf16 %v864_v9, %v864_v9  ;;  %v1044_v63 = vsel %vm7271_vm9, %v5408_v3, %v1043_v22  ;;  %6077 = vmatpush3.bf16.msra.mxu1 %v6661_v35  ;;  %v6669_v35 = vld [vmem:[#allocation6 + $0xf0] sm:$0xff]   ;;  %v6671_v45 = vld [vmem:[#allocation6 + $0xe8] sm:$0xff]   ;;  %v1711_v37 = vld [vmem:[#allocation2 + $0x24] sm:$0x8] }
 0x164   : > { %v1525_v58 = vsel %vm7277_vm10, %v5449_v23, %v1524_v4  ;;  %6161 = vmatpush3.bf16.msra.mxu0 %v6662_v41  ;;  %v769_v29 = vsel %vm737_vm5, %v719_v15, %v753_v26  ;;  %v5415_v31 = vcombine.low %v1040_v5, %v1044_v63  ;;  %6118 = vmatprep.subr.bf16.mxu1 %v6663_v8  ;;  %v6670_v41 = vld [vmem:[#allocation6 + $0x1b0] sm:$0xff]   ;;  %v6672_v36 = vld [vmem:[#allocation6 + $0x1a8] sm:$0xff]   ;;  %v2474_v55 = vld [vmem:[#allocation2 + $0x3c] sm:$0x8]  ;;  %v5465_v16 = vrot.slane %v1711_v37, 11 }
 0x165   : > { %v5455_v32 = vcombine.low %v1521_v24, %v1525_v58  ;;  %6202 = vmatprep.subr.bf16.mxu0 %v6664_v12  ;;  %944 = vst [vmem:[#allocation2 + $0xac] sm:$0xf] %v5785_v57  ;;  %v865_v34 = vmul.f32 %v848_v28, %v769_v29  ;;  %v1712_v62 = vld [vmem:[#allocation2 + $0x28] sm:$0x7]  ;;  %v6673_v56 = vld [vmem:[#allocation2 + $0x4c] ss:$12 sps:$4 sm:$0xff]  }
 0x166   : > { %6059 = vmatmul.mubr.bf16.gmra.mxu1 %v5415_v31  ;;  %v6678_v2 = vld [vmem:[#allocation6 + $0x1a0] sm:$0xff]   ;;  %v1709_v3 = vld [vmem:[#allocation2 + $0x18] sm:$0x8]  ;;  %v2472_v4 = vld [vmem:[#allocation2 + $0x30] sm:$0x8]  ;;  %v1763_v9 = vrot.slane %v1712_v62, 7 }
 0x167   : > { %6115 = vmatmul.mubr.bf16.gmra.mxu0 %v5455_v32  ;;  %v5786_v50 = vpack.c.bf16 %v865_v34, %v865_v34  ;;  %6078 = vmatprep.mubr.bf16.mxu1 %v6659_v47  ;;  %v2475_v13 = vld [vmem:[#allocation2 + $0x40] sm:$0x7]  ;;  %v1710_v14 = vld [vmem:[#allocation2 + $0x1c] sm:$0x7]  ;;  %v2473_v15 = vld [vmem:[#allocation2 + $0x34] sm:$0x7] }
 0x168   : > { %6162 = vmatprep.mubr.bf16.mxu0 %v6660_v49  ;;  %v6676_v21 = vld [vmem:[#allocation2 + $0x7c] ss:$12 sps:$4 sm:$0xff]   ;;  %v5531_v22 = vrot.slane %v2474_v55, 11  ;;  %v2526_v23 = vrot.slane %v2475_v13, 7  ;;  %v5464_v5 = vrot.slane %v1709_v3, 11  ;;  %v5530_v24 = vrot.slane %v2472_v4, 11 }
 0x169   : > { %945 = vst [vmem:[#allocation2 + $0xb8] sm:$0xf] %v5786_v50  ;;  %v6679_v25 = vld [vmem:[#allocation6 + $0xd8] sm:$0xff]   ;;  %v1759_v57 = vrot.slane %v1710_v14, 7  ;;  %v2522_v63 = vrot.slane %v2473_v15, 7  ;;  %v1764_v58 = vsel %vm7271_vm9, %v5465_v16, %v1763_v9  ;;  %v6683_v49 = vld [vmem:[#allocation6 + $0xd0] sm:$0xff]  }
 0x16a   : > { %v6680_v26 = vld [vmem:[#allocation6 + $0x198] sm:$0xff]   ;;  %v2527_v28 = vsel %vm7271_vm9, %v5531_v22, %v2526_v23  ;;  %v6682_v31 = vld [vmem:[#allocation2 + $0x94] ss:$12 sps:$4 sm:$0xff]   ;;  %v7411_v32 = vld [vmem:[#allocation2 + $0x30] sm:$0x8] }
 0x16b   : > { %v6681_v29 = vld [vmem:[#allocation2 + $0x7c] ss:$12 sps:$4 sm:$0xff]   ;;  %v1760_v34 = vsel %vm7271_vm9, %v5464_v5, %v1759_v57  ;;  %v2523_v47 = vsel %vm7271_vm9, %v5530_v24, %v2522_v63  ;;  %v6684_v50 = vld [vmem:[#allocation6 + $0x190] sm:$0xff]   ;;  %v5466_v62 = vrot.slane %v7411_v32, 11  ;;  %v7422_v55 = vld [vmem:[#allocation2 + $0x60] sm:$0x8] }
 0x16c   : > { %v6686_v37 = vld [vmem:[#allocation6 + $0x188] sm:$0xff]   ;;  %v7426_v4 = vld [vmem:[#allocation2 + $0x60] sm:$0x8]  ;;  %v1716_v13 = vld [vmem:[#allocation2 + $0x40] sm:$0x7]  ;;  %v5534_v9 = vrot.slane %v7422_v55, 11 }
 0x16d   : > { %v6687_v14 = vld [vmem:[#allocation6 + $0xc0] sm:$0xff]   ;;  %v1714_v22 = vld [vmem:[#allocation2 + $0x34] sm:$0x7]  ;;  %v2477_v23 = vld [vmem:[#allocation2 + $0x4c] sm:$0x7] }
 0x16e   : > { %6079 = vmatmul.mubr.bf16.vlgmr.msra.gmra.mxu1 %v6665_v52  ;;  %v1715_v52 = vld [vmem:[#allocation2 + $0x3c] sm:$0x8]  ;;  %v6688_v15 = vld [vmem:[#allocation6 + $0x180] sm:$0xff]   ;;  %v1718_v24 = vld [vmem:[#allocation2 + $0x4c] sm:$0x7]  ;;  %v2530_v32 = vrot.slane %v2477_v23, 7 }
 0x16f   : > { %6163 = vmatmul.mubr.bf16.vlgmr.msra.gmra.mxu0 %v6666_v53  ;;  %6119 = vmatpush3.bf16.msra.mxu1 %v6663_v8  ;;  %v6674_v8 = vld [vmem:[#allocation2 + $0x64] ss:$12 sps:$4 sm:$0xff]   ;;  %v5476_v53 = vcombine.low %v1760_v34, %v1764_v58  ;;  %v7429_v57 = vld [vmem:[#allocation2 + $0x6c] sm:$0x8]  ;;  %v2487_v55 = vld [vmem:[#allocation2 + $0x88] sm:$0x7] }
 0x170   : > { %6203 = vmatpush3.bf16.msra.mxu0 %v6664_v12  ;;  %6082 = vmatprep.mubr.bf16.mxu1 %v6667_v54  ;;  %v6675_v12 = vld [vmem:[#allocation2 + $0x64] ss:$12 sps:$4 sm:$0xff]   ;;  %v2478_v54 = vld [vmem:[#allocation2 + $0x54] sm:$0x8]  ;;  %v2490_v23 = vld [vmem:[#allocation2 + $0x9c] sm:$0x8] }
 0x171   : > { %6166 = vmatprep.mubr.bf16.mxu0 %v6668_v44  ;;  %6120 = vmatprep.subr.bf16.mxu1 %v6669_v35  ;;  %v7419_v44 = vld [vmem:[#allocation2 + $0x48] sm:$0x8]  ;;  %v2481_v58 = vld [vmem:[#allocation2 + $0x64] sm:$0x7] }
 0x172   : > { %6204 = vmatprep.subr.bf16.mxu0 %v6670_v41  ;;  %v5468_v3 = vrot.slane %v7419_v44, 11  ;;  %v2538_v44 = vrot.slane %v2481_v58, 7  ;;  %v2550_v58 = vrot.slane %v2487_v55, 7 }
 0x173   : > { %6121 = vmatpush3.bf16.msra.mxu1 %v6669_v35  ;;  %v5542_v35 = vcombine.low %v2523_v47, %v2527_v28  ;;  %v5470_v28 = vrot.slane %v7426_v4, 11 }
 0x174   : > { %6205 = vmatpush3.bf16.msra.mxu0 %v6670_v41  ;;  %6122 = vmatprep.subr.bf16.mxu1 %v6671_v45  ;;  %v7417_v41 = vld [vmem:[#allocation2 + $0x48] sm:$0x8] }
 0x175   : > { %6206 = vmatprep.subr.bf16.mxu0 %v6672_v36 }
 0x176   : > { %6083 = vmatmul.mubr.bf16.gmra.mxu1 %v6673_v56  ;;  %v5467_v56 = vrot.slane %v1715_v52, 11  ;;  %v1775_v52 = vrot.slane %v1718_v24, 7  ;;  %v6691_v24 = vld [vmem:[#allocation6 + $0x170] sm:$0xff]  }
 0x177   : > { %6167 = vmatmul.mubr.bf16.gmra.mxu0 %v6674_v8  ;;  %6123 = vmatpush3.bf16.msra.mxu1 %v6671_v45  ;;  %v1719_v45 = vld [vmem:[#allocation2 + $0x54] sm:$0x8]  ;;  %v2479_v8 = vld [vmem:[#allocation2 + $0x58] sm:$0x7] }
 0x178   : > { %6207 = vmatpush3.bf16.msra.mxu0 %v6672_v36  ;;  %6086 = vmatprep.mubr.bf16.mxu1 %v6675_v12  ;;  %v6685_v36 = vld [vmem:[#allocation6 + $0xc8] sm:$0xff]   ;;  %v5469_v16 = vrot.slane %v1719_v45, 11  ;;  %v2534_v5 = vrot.slane %v2479_v8, 7 }
 0x179   : > { %6170 = vmatprep.mubr.bf16.mxu0 %v6676_v21  ;;  %6124 = vmatprep.subr.bf16.mxu1 %v6677_v1  ;;  %v2482_v12 = vld [vmem:[#allocation2 + $0x6c] sm:$0x8]  ;;  %v1720_v21 = vld [vmem:[#allocation2 + $0x58] sm:$0x7] }
 0x17a   : > { %6208 = vmatprep.subr.bf16.mxu0 %v6678_v2  ;;  %v1779_v63 = vrot.slane %v1720_v21, 7  ;;  %v5535_v34 = vrot.slane %v2482_v12, 11  ;;  %v7448_v21 = vld [vmem:[#allocation2 + $0x78] sm:$0x8] }
 0x17b   : > { %6125 = vmatpush3.bf16.msra.mxu1 %v6677_v1  ;;  %v5532_v1 = vrot.slane %v7417_v41, 11  ;;  %v5472_v55 = vrot.slane %v7448_v21, 11  ;;  %v1732_v21 = vld [vmem:[#allocation2 + $0xa0] sm:$0x7] }
 0x17c   : > { %6209 = vmatpush3.bf16.msra.mxu0 %v6678_v2  ;;  %6126 = vmatprep.subr.bf16.mxu1 %v6679_v25  ;;  %v5533_v2 = vrot.slane %v2478_v54, 11 }
 0x17d   : > { %6210 = vmatprep.subr.bf16.mxu0 %v6680_v26 }
 0x17e   : > { %6087 = vmatmul.mubr.bf16.gmra.mxu1 %v6681_v29  ;;  %v7432_v29 = vld [vmem:[#allocation2 + $0x78] sm:$0x8]  ;;  %v2535_v54 = vsel %vm7271_vm9, %v5533_v2, %v2534_v5 }
 0x17f   : > { %6171 = vmatmul.mubr.bf16.gmra.mxu0 %v6682_v31  ;;  %6127 = vmatpush3.bf16.msra.mxu1 %v6679_v25  ;;  %v2483_v25 = vld [vmem:[#allocation2 + $0x70] sm:$0x7]  ;;  %v1767_v31 = vrot.slane %v1714_v22, 7  ;;  %v5536_v45 = vrot.slane %v7432_v29, 11  ;;  %v1728_v22 = vld [vmem:[#allocation2 + $0x88] sm:$0x7] }
 0x180   : > { %6211 = vmatpush3.bf16.msra.mxu0 %v6680_v26  ;;  %6134 = vmatprep.mubr.bf16.mxu1 %v5476_v53  ;;  %v1771_v26 = vrot.slane %v1716_v13, 7  ;;  %v2542_v47 = vrot.slane %v2483_v25, 7  ;;  %v5471_v53 = vrot.slane %v7429_v57, 11  ;;  %v1727_v13 = vld [vmem:[#allocation2 + $0x84] sm:$0x8]  ;;  %v6692_v57 = vld [vmem:[#allocation6 + $0x230] sm:$0xff]  }
 0x181   : > { %6218 = vmatprep.mubr.bf16.mxu0 %v5542_v35  ;;  %6128 = vmatprep.subr.bf16.mxu1 %v6683_v49  ;;  %v2486_v35 = vld [vmem:[#allocation2 + $0x84] sm:$0x8]  ;;  %v1768_v8 = vsel %vm7271_vm9, %v5466_v62, %v1767_v31  ;;  %v2485_v62 = vld [vmem:[#allocation2 + $0x7c] sm:$0x7]  ;;  %v2493_v29 = vld [vmem:[#allocation2 + $0xac] sm:$0x7] }
 0x182   : > { %6212 = vmatprep.subr.bf16.mxu0 %v6684_v50  ;;  %v1772_v41 = vsel %vm7271_vm9, %v5467_v56, %v1771_v26  ;;  %v2531_v56 = vsel %vm7271_vm9, %v5532_v1, %v2530_v32  ;;  %v2543_v2 = vsel %vm7271_vm9, %v5535_v34, %v2542_v47  ;;  %v5537_v12 = vrot.slane %v2486_v35, 11  ;;  %v2491_v26 = vld [vmem:[#allocation2 + $0xa0] sm:$0x7]  ;;  %v1726_v31 = vld [vmem:[#allocation2 + $0x7c] sm:$0x7] }
 0x183   : > { %6129 = vmatpush3.bf16.msra.mxu1 %v6683_v49  ;;  %v6689_v49 = vld [vmem:[#allocation6 + $0x178] sm:$0xff]   ;;  %v5543_v25 = vcombine.low %v2531_v56, %v2535_v54  ;;  %v2539_v1 = vsel %vm7271_vm9, %v5534_v9, %v2538_v44  ;;  %v7454_v32 = vld [vmem:[#allocation2 + $0x2c] sm:$0x1]  ;;  %v5473_v47 = vrot.slane %v1727_v13, 11  ;;  %v1795_v35 = vrot.slane %v1728_v22, 7 }
 0x184   : > { %6213 = vmatpush3.bf16.msra.mxu0 %v6684_v50  ;;  %6130 = vmatprep.subr.bf16.mxu1 %v6685_v36  ;;  %v6690_v50 = vld [vmem:[#allocation6 + $0x238] sm:$0xff]   ;;  %v5544_v34 = vcombine.low %v2539_v1, %v2543_v2  ;;  %v2546_v54 = vrot.slane %v2485_v62, 7  ;;  %v2558_v9 = vrot.slane %v2491_v26, 7  ;;  %v7459_v56 = vld [vmem:[#allocation2 + $0xb4] sm:$0x8]  ;;  %v6694_v2 = vld [vmem:[#allocation6 + $0x228] sm:$0xff]  }
 0x185   : > { %6214 = vmatprep.subr.bf16.mxu0 %v6686_v37  ;;  %v7456_v44 = vld [vmem:[#allocation2 + $0x9c] sm:$0x8]  ;;  %v2247_v62 = vrot.slane %v7454_v32, 5  ;;  %v5541_v1 = vrot.slane %v7459_v56, 11  ;;  %v2957_v32 = vld [vmem:[#allocation2 + $0x38] sm:$0x1] }
 0x187   : > { %6131 = vmatpush3.bf16.msra.mxu1 %v6685_v36  ;;  %v1780_v36 = vsel %vm7271_vm9, %v5469_v16, %v1779_v63  ;;  %v5477_v16 = vcombine.low %v1768_v8, %v1772_v41  ;;  %v1791_v8 = vrot.slane %v1726_v31, 7  ;;  %v1730_v31 = vld [vmem:[#allocation2 + $0x94] sm:$0x7] }
 0x188   : > { %6215 = vmatpush3.bf16.msra.mxu0 %v6686_v37  ;;  %6132 = vmatprep.subr.bf16.mxu1 %v6687_v14  ;;  %v1724_v37 = vld [vmem:[#allocation2 + $0x70] sm:$0x7] }
 0x189   : > { %6216 = vmatprep.subr.bf16.mxu0 %v6688_v15  ;;  %v1787_v63 = vrot.slane %v1724_v37, 7  ;;  %v6693_v37 = vld [vmem:[#allocation6 + $0x168] sm:$0xff]  }
 0x18b   : > { %6133 = vmatpush3.bf16.msra.mxu1 %v6687_v14  ;;  %v1776_v14 = vsel %vm7271_vm9, %v5468_v3, %v1775_v52  ;;  %v2488_v3 = vld [vmem:[#allocation2 + $0x90] sm:$0x8]  ;;  %v2489_v52 = vld [vmem:[#allocation2 + $0x94] sm:$0x7]  ;;  %v1788_v13 = vsel %vm7271_vm9, %v5471_v53, %v1787_v63  ;;  %v2194_v63 = vld [vmem:[#allocation2 + $0x20] sm:$0x1] }
 0x18c   : > { %6217 = vmatpush3.bf16.msra.mxu0 %v6688_v15  ;;  %6174 = vmatprep.subr.bf16.mxu1 %v6689_v49  ;;  %v1722_v15 = vld [vmem:[#allocation2 + $0x64] sm:$0x7]  ;;  %v5478_v5 = vcombine.low %v1776_v14, %v1780_v36  ;;  %v5539_v36 = vrot.slane %v2490_v23, 11  ;;  %v5538_v22 = vrot.slane %v2488_v3, 11  ;;  %v2554_v23 = vrot.slane %v2489_v52, 7 }
 0x18d   : > { %6258 = vmatprep.subr.bf16.mxu0 %v6690_v50  ;;  %v1783_v41 = vrot.slane %v1722_v15, 7  ;;  %v5475_v14 = vrot.slane %v7456_v44, 11  ;;  %v2495_v15 = vld [vmem:[#allocation2 + $0xb8] sm:$0x7]  ;;  %v6696_v3 = vld [vmem:[#allocation6 + $0x220] sm:$0xff]   ;;  %v1803_v52 = vrot.slane %v1732_v21, 7 }
 0x18e   : > { %6135 = vmatmul.mubr.bf16.vlgmr.msra.gmra.mxu1 %v5477_v16  ;;  %v1729_v16 = vld [vmem:[#allocation2 + $0x90] sm:$0x8]  ;;  %v2559_v26 = vsel %vm7271_vm9, %v5539_v36, %v2558_v9  ;;  %v2956_v44 = vld [vmem:[#allocation2 + $0x34] sm:$0xe] }
 0x18f   : > { %6219 = vmatmul.mubr.bf16.vlgmr.msra.gmra.mxu0 %v5543_v25  ;;  %6138 = vmatprep.mubr.bf16.mxu1 %v5478_v5  ;;  %v2959_v25 = vld [vmem:[#allocation2 + $0x44] sm:$0x1]  ;;  %v1784_v53 = vsel %vm7271_vm9, %v5470_v28, %v1783_v41  ;;  %v2492_v5 = vld [vmem:[#allocation2 + $0xa8] sm:$0x8]  ;;  %v1792_v28 = vsel %vm7271_vm9, %v5472_v55, %v1791_v8  ;;  %v2566_v41 = vrot.slane %v2495_v15, 7  ;;  %v5474_v36 = vrot.slane %v1729_v16, 11 }
 0x190   : > { %6175 = vmatpush3.bf16.msra.mxu1 %v6689_v49  ;;  %6222 = vmatprep.mubr.bf16.mxu0 %v5544_v34  ;;  %v2551_v49 = vsel %vm7271_vm9, %v5537_v12, %v2550_v58  ;;  %v2547_v12 = vsel %vm7271_vm9, %v5536_v45, %v2546_v54  ;;  %v2195_v58 = vld [vmem:[#allocation2 + $0x28] sm:$0xe]  ;;  %v2958_v34 = vld [vmem:[#allocation2 + $0x40] sm:$0xe]  ;;  %v3010_v55 = vrot.slane %v2959_v25, 5  ;;  %v1799_v8 = vrot.slane %v1730_v31, 7 }
 0x191   : > { %6259 = vmatpush3.bf16.msra.mxu0 %v6690_v50  ;;  %6176 = vmatprep.subr.bf16.mxu1 %v6691_v24  ;;  %v1796_v50 = vsel %vm7271_vm9, %v5473_v47, %v1795_v35  ;;  %v5545_v4 = vcombine.low %v2547_v12, %v2551_v49  ;;  %v2555_v47 = vsel %vm7271_vm9, %v5538_v22, %v2554_v23  ;;  %v6695_v35 = vld [vmem:[#allocation6 + $0x160] sm:$0xff]   ;;  %v5505_v9 = vrot.slane %v2195_v58, 9  ;;  %v6697_v22 = vld [vmem:[#allocation6 + $0x158] sm:$0xff]   ;;  %v6699_v58 = vld [vmem:[#allocation6 + $0x150] sm:$0xff]  }
 0x192   : > { %6260 = vmatprep.subr.bf16.mxu0 %v6692_v57  ;;  %v5480_v45 = vcombine.low %v1792_v28, %v1796_v50  ;;  %v5546_v54 = vcombine.low %v2555_v47, %v2559_v26  ;;  %v5540_v56 = vrot.slane %v2492_v5, 11  ;;  %v5571_v49 = vrot.slane %v2958_v34, 9  ;;  %v6698_v25 = vld [vmem:[#allocation6 + $0x218] sm:$0xff]   ;;  %v2200_v31 = vld [vmem:[#allocation2 + $0x44] sm:$0x1]  ;;  %v6702_v34 = vld [vmem:[#allocation6 + $0x208] sm:$0xff]  }
 0x193   : > { %v2243_v50 = vrot.slane %v2194_v63, 5  ;;  %v1804_v21 = vsel %vm7271_vm9, %v5475_v14, %v1803_v52  ;;  %v2567_v16 = vsel %vm7271_vm9, %v5541_v1, %v2566_v41  ;;  %v5570_v15 = vrot.slane %v2956_v44, 9  ;;  %v7500_v28 = vld [vmem:[#allocation2 + $0x38] sm:$0x1]  ;;  %v2204_v47 = vld [vmem:[#allocation2 + $0x5c] sm:$0x1] }
 0x194   : > { %6177 = vmatpush3.bf16.msra.mxu1 %v6691_v24  ;;  %v5479_v24 = vcombine.low %v1784_v53, %v1788_v13  ;;  %v2562_v13 = vrot.slane %v2493_v29, 7  ;;  %v2248_v53 = vsel %vm7277_vm10, %v5505_v9, %v2247_v62  ;;  %v3011_v26 = vsel %vm7277_vm10, %v5571_v49, %v3010_v55  ;;  %v2963_v29 = vld [vmem:[#allocation2 + $0x5c] sm:$0x1]  ;;  %v2961_v52 = vld [vmem:[#allocation2 + $0x50] sm:$0x1]  ;;  %v6703_v44 = vld [vmem:[#allocation6 + $0x140] sm:$0xff]  }
 0x195   : > { %6261 = vmatpush3.bf16.msra.mxu0 %v6692_v57  ;;  %6178 = vmatprep.subr.bf16.mxu1 %v6693_v37  ;;  %v2193_v57 = vld [vmem:[#allocation2 + $0x1c] sm:$0xe]  ;;  %v3018_v41 = vrot.slane %v2963_v29, 5  ;;  %v2967_v9 = vld [vmem:[#allocation2 + $0x74] sm:$0x1]  ;;  %v6704_v49 = vld [vmem:[#allocation6 + $0x200] sm:$0xff]  }
 0x196   : > { %6262 = vmatprep.subr.bf16.mxu0 %v6694_v2  ;;  %6139 = vmatmul.mubr.bf16.gmra.mxu1 %v5479_v24  ;;  %v5504_v23 = vrot.slane %v2193_v57, 9  ;;  %v2563_v12 = vsel %vm7271_vm9, %v5540_v56, %v2562_v13  ;;  %v6700_v24 = vld [vmem:[#allocation6 + $0x210] sm:$0xff]   ;;  %v2962_v57 = vld [vmem:[#allocation2 + $0x58] sm:$0xe]  ;;  %v2965_v56 = vld [vmem:[#allocation2 + $0x68] sm:$0x1] }
 0x197   : > { %6223 = vmatmul.mubr.bf16.gmra.mxu0 %v5545_v4  ;;  %6142 = vmatprep.mubr.bf16.mxu1 %v5480_v45  ;;  %v5547_v5 = vcombine.low %v2563_v12, %v2567_v16  ;;  %v2251_v45 = vrot.slane %v7500_v28, 5  ;;  %v2197_v55 = vld [vmem:[#allocation2 + $0x34] sm:$0xe]  ;;  %v2966_v13 = vld [vmem:[#allocation2 + $0x70] sm:$0xe]  ;;  %v3026_v12 = vrot.slane %v2967_v9, 5 }
 0x198   : > { %6179 = vmatpush3.bf16.msra.mxu1 %v6693_v37  ;;  %6226 = vmatprep.mubr.bf16.mxu0 %v5546_v54  ;;  %v3006_v37 = vrot.slane %v2957_v32, 5  ;;  %v2244_v1 = vsel %vm7277_vm10, %v5504_v23, %v2243_v50  ;;  %v6701_v32 = vld [vmem:[#allocation6 + $0x148] sm:$0xff]   ;;  %v2202_v54 = vld [vmem:[#allocation2 + $0x50] sm:$0x1] }
 0x199   : > { %6263 = vmatpush3.bf16.msra.mxu0 %v6694_v2  ;;  %6180 = vmatprep.subr.bf16.mxu1 %v6695_v35  ;;  %v1800_v2 = vsel %vm7271_vm9, %v5474_v36, %v1799_v8  ;;  %v5516_v63 = vcombine.low %v2244_v1, %v2248_v53  ;;  %v2203_v36 = vld [vmem:[#allocation2 + $0x58] sm:$0xe]  ;;  %v2263_v8 = vrot.slane %v2204_v47, 5  ;;  %v2960_v23 = vld [vmem:[#allocation2 + $0x4c] sm:$0xe]  ;;  %v3014_v53 = vrot.slane %v2961_v52, 5 }
 0x19a   : > { %6264 = vmatprep.subr.bf16.mxu0 %v6696_v3  ;;  %v5481_v14 = vcombine.low %v1800_v2, %v1804_v21  ;;  %v3007_v62 = vsel %vm7277_vm10, %v5570_v15, %v3006_v37  ;;  %v2201_v50 = vld [vmem:[#allocation2 + $0x4c] sm:$0xe]  ;;  %v5573_v21 = vrot.slane %v2962_v57, 9  ;;  %v5509_v16 = vrot.slane %v2203_v36, 9  ;;  %v7503_v15 = vld [vmem:[#allocation2 + $0x74] sm:$0x1] }
 0x19b   : > { %v5582_v4 = vcombine.low %v3007_v62, %v3011_v26  ;;  %v5506_v37 = vrot.slane %v2197_v55, 9  ;;  %v5575_v2 = vrot.slane %v2966_v13, 9  ;;  %v7505_v26 = vld [vmem:[#allocation2 + $0x8c] sm:$0x1]  ;;  %v5508_v1 = vrot.slane %v2201_v50, 9  ;;  %v6706_v50 = vld [vmem:[#allocation6 + $0x1f0] sm:$0xff]  }
 0x19c   : > { %6181 = vmatpush3.bf16.msra.mxu1 %v6695_v35  ;;  %v2199_v35 = vld [vmem:[#allocation2 + $0x40] sm:$0xe]  ;;  %v2212_v62 = vld [vmem:[#allocation2 + $0x8c] sm:$0x1]  ;;  %v3019_v28 = vsel %vm7277_vm10, %v5573_v21, %v3018_v41  ;;  %v2206_v29 = vld [vmem:[#allocation2 + $0x68] sm:$0x1] }
 0x19d   : > { %6265 = vmatpush3.bf16.msra.mxu0 %v6696_v3  ;;  %6182 = vmatprep.subr.bf16.mxu1 %v6697_v22  ;;  %v2255_v3 = vrot.slane %v2200_v31, 5  ;;  %v2264_v31 = vsel %vm7277_vm10, %v5509_v16, %v2263_v8  ;;  %v2252_v47 = vsel %vm7277_vm10, %v5506_v37, %v2251_v45  ;;  %v2970_v52 = vld [vmem:[#allocation2 + $0x88] sm:$0xe]  ;;  %v3034_v57 = vrot.slane %v7505_v26, 5  ;;  %v2205_v45 = vld [vmem:[#allocation2 + $0x64] sm:$0xe] }
 0x19e   : > { %6266 = vmatprep.subr.bf16.mxu0 %v6698_v25  ;;  %6143 = vmatmul.mubr.bf16.gmra.mxu1 %v5481_v14  ;;  %v6705_v14 = vld [vmem:[#allocation6 + $0x1f8] sm:$0xff]   ;;  %v2211_v41 = vld [vmem:[#allocation2 + $0x88] sm:$0xe]  ;;  %v2279_v36 = vrot.slane %v2212_v62, 5  ;;  %v2974_v8 = vld [vmem:[#allocation2 + $0xa0] sm:$0xe] }
 0x19f   : > { %6227 = vmatmul.mubr.bf16.gmra.mxu0 %v5547_v5  ;;  %6190 = vmatprep.mubr.bf16.mxu1 %v5516_v63  ;;  %v5572_v5 = vrot.slane %v2960_v23, 9  ;;  %v2259_v63 = vrot.slane %v2202_v54, 5  ;;  %v2210_v54 = vld [vmem:[#allocation2 + $0x80] sm:$0x1]  ;;  %v2968_v16 = vld [vmem:[#allocation2 + $0x7c] sm:$0xe] }
 0x1a0   : > { %6183 = vmatpush3.bf16.msra.mxu1 %v6697_v22  ;;  %6274 = vmatprep.mubr.bf16.mxu0 %v5582_v4  ;;  %v5507_v22 = vrot.slane %v2199_v35, 9  ;;  %v3022_v4 = vrot.slane %v2965_v56, 5  ;;  %v3027_v35 = vsel %vm7277_vm10, %v5575_v2, %v3026_v12  ;;  %v2975_v56 = vld [vmem:[#allocation2 + $0xa4] sm:$0x1]  ;;  %v5513_v37 = vrot.slane %v2211_v41, 9 }
 0x1a1   : > { %6267 = vmatpush3.bf16.msra.mxu0 %v6698_v25  ;;  %6184 = vmatprep.subr.bf16.mxu1 %v6699_v58  ;;  %v2964_v25 = vld [vmem:[#allocation2 + $0x64] sm:$0xe]  ;;  %v3015_v55 = vsel %vm7277_vm10, %v5572_v5, %v3014_v53  ;;  %v2972_v53 = vld [vmem:[#allocation2 + $0x94] sm:$0xe]  ;;  %v2973_v2 = vld [vmem:[#allocation2 + $0x98] sm:$0x1] }
 0x1a2   : > { %6268 = vmatprep.subr.bf16.mxu0 %v6700_v24  ;;  %v5583_v13 = vcombine.low %v3015_v55, %v3019_v28  ;;  %v5510_v12 = vrot.slane %v2205_v45, 9  ;;  %v2267_v26 = vrot.slane %v2206_v29, 5  ;;  %v5579_v5 = vrot.slane %v2974_v8, 9  ;;  %v6707_v28 = vld [vmem:[#allocation6 + $0x1e8] sm:$0xff]   ;;  %v2979_v41 = vld [vmem:[#allocation2 + $0xbc] sm:$0x1] }
 0x1a3   : > { %v2280_v29 = vsel %vm7277_vm10, %v5513_v37, %v2279_v36  ;;  %v2213_v55 = vld [vmem:[#allocation2 + $0x94] sm:$0xe] }
 0x1a4   : > { %6185 = vmatpush3.bf16.msra.mxu1 %v6699_v58  ;;  %v2256_v58 = vsel %vm7277_vm10, %v5507_v22, %v2255_v3  ;;  %v2969_v3 = vld [vmem:[#allocation2 + $0x80] sm:$0x1] }
 0x1a5   : > { %6269 = vmatpush3.bf16.msra.mxu0 %v6700_v24  ;;  %6186 = vmatprep.subr.bf16.mxu1 %v6701_v32  ;;  %v5574_v24 = vrot.slane %v2964_v25, 9  ;;  %v5517_v9 = vcombine.low %v2252_v47, %v2256_v58  ;;  %v3030_v62 = vrot.slane %v2969_v3, 5  ;;  %v2216_v47 = vld [vmem:[#allocation2 + $0xa4] sm:$0x1]  ;;  %v2268_v3 = vsel %vm7277_vm10, %v5510_v12, %v2267_v26  ;;  %v6709_v12 = vld [vmem:[#allocation6 + $0x1d8] sm:$0xff]  }
 0x1a6   : > { %6270 = vmatprep.subr.bf16.mxu0 %v6702_v34  ;;  %v2287_v36 = vrot.slane %v2216_v47, 5  ;;  %v6716_v47 = vld [vmem:[#allocation2 + $0x7c] ss:$12 sps:$4 sm:$0xff]  }
 0x1a7   : > { %v3023_v23 = vsel %vm7277_vm10, %v5574_v24, %v3022_v4  ;;  %v2275_v24 = vrot.slane %v2210_v54, 5  ;;  %v2978_v54 = vld [vmem:[#allocation2 + $0xb8] sm:$0xe] }
 0x1a8   : > { %6187 = vmatpush3.bf16.msra.mxu1 %v6701_v32  ;;  %v2207_v32 = vld [vmem:[#allocation2 + $0x70] sm:$0xe]  ;;  %v5584_v25 = vcombine.low %v3023_v23, %v3027_v35  ;;  %v2976_v23 = vld [vmem:[#allocation2 + $0xac] sm:$0xe] }
 0x1a9   : > { %6271 = vmatpush3.bf16.msra.mxu0 %v6702_v34  ;;  %6188 = vmatprep.subr.bf16.mxu1 %v6703_v44  ;;  %v2271_v34 = vrot.slane %v7503_v15, 5  ;;  %v5511_v21 = vrot.slane %v2207_v32, 9  ;;  %v5577_v15 = vrot.slane %v2970_v52, 9  ;;  %v3038_v32 = vrot.slane %v2973_v2, 5 }
 0x1aa   : > { %6272 = vmatprep.subr.bf16.mxu0 %v6704_v49  ;;  %v5580_v37 = vrot.slane %v2976_v23, 9  ;;  %v6723_v23 = vld [vmem:[#allocation8 + $0x68] sm:$0xff]  }
 0x1ab   : > { %v2272_v4 = vsel %vm7277_vm10, %v5511_v21, %v2271_v34  ;;  %v3035_v35 = vsel %vm7277_vm10, %v5577_v15, %v3034_v57 }
 0x1ac   : > { %6189 = vmatpush3.bf16.msra.mxu1 %v6703_v44  ;;  %v2260_v44 = vsel %vm7277_vm10, %v5508_v1, %v2259_v63  ;;  %v3042_v1 = vrot.slane %v2975_v56, 5  ;;  %v5576_v63 = vrot.slane %v2968_v16, 9  ;;  %v5519_v34 = vcombine.low %v2268_v3, %v2272_v4  ;;  %v6712_v4 = vld [vmem:[#allocation6 + $0x1c8] sm:$0xff]   ;;  %v6720_v3 = vld [vmem:[#allocation8 + $0x38] sm:$0xff]  }
 0x1ad   : > { %6273 = vmatpush3.bf16.msra.mxu0 %v6704_v49  ;;  %6230 = vmatprep.subr.bf16.mxu1 %v6705_v14  ;;  %v5518_v22 = vcombine.low %v2260_v44, %v2264_v31  ;;  %v2209_v49 = vld [vmem:[#allocation2 + $0x7c] sm:$0xe]  ;;  %v5578_v31 = vrot.slane %v2972_v53, 9  ;;  %v2214_v44 = vld [vmem:[#allocation2 + $0x98] sm:$0x1]  ;;  %v5581_v16 = vrot.slane %v2978_v54, 9 }
 0x1ae   : > { %v5512_v58 = vrot.slane %v2209_v49, 9  ;;  %v3043_v52 = vsel %vm7277_vm10, %v5579_v5, %v3042_v1  ;;  %v3050_v49 = vrot.slane %v2979_v41, 5  ;;  %v2283_v15 = vrot.slane %v2214_v44, 5 }
 0x1af   : > { %6191 = vmatmul.mubr.bf16.vlgmr.msra.gmra.mxu1 %v5517_v9  ;;  %v3031_v9 = vsel %vm7277_vm10, %v5576_v63, %v3030_v62  ;;  %v3039_v56 = vsel %vm7277_vm10, %v5578_v31, %v3038_v32  ;;  %v6714_v31 = vld [vmem:[#allocation2 + $0x4c] ss:$12 sps:$4 sm:$0xff]   ;;  %v6715_v32 = vld [vmem:[#allocation2 + $0x64] ss:$12 sps:$4 sm:$0xff]  }
 0x1b0   : > { %6275 = vmatmul.mubr.bf16.vlgmr.msra.gmra.mxu0 %v5583_v13  ;;  %6194 = vmatprep.mubr.bf16.mxu1 %v5518_v22  ;;  %v2276_v57 = vsel %vm7277_vm10, %v5512_v58, %v2275_v24  ;;  %v5585_v45 = vcombine.low %v3031_v9, %v3035_v35  ;;  %v6708_v13 = vld [vmem:[#allocation6 + $0x1e0] sm:$0xff]   ;;  %v5586_v21 = vcombine.low %v3039_v56, %v3043_v52  ;;  %v6711_v24 = vld [vmem:[#allocation6 + $0x1d0] sm:$0xff]  }
 0x1b1   : > { %6231 = vmatpush3.bf16.msra.mxu1 %v6705_v14  ;;  %6278 = vmatprep.mubr.bf16.mxu0 %v5584_v25  ;;  %v2215_v14 = vld [vmem:[#allocation2 + $0xa0] sm:$0xe]  ;;  %v5520_v8 = vcombine.low %v2276_v57, %v2280_v29  ;;  %v5514_v25 = vrot.slane %v2213_v55, 9  ;;  %v3051_v26 = vsel %vm7277_vm10, %v5581_v16, %v3050_v49  ;;  %v6718_v29 = vld [vmem:[#allocation2 + $0xac] ss:$12 sps:$4 sm:$0xff]  }
 0x1b2   : > { %6232 = vmatprep.subr.bf16.mxu1 %v6706_v50  ;;  %v5515_v22 = vrot.slane %v2215_v14, 9  ;;  %v6710_v58 = vld [vmem:[#allocation2 + $0x34] ss:$12 sps:$4 sm:$0xff]   ;;  %v6719_v14 = vld [vmem:[#allocation8 + $0x78] sm:$0xff]   ;;  %v6724_v16 = vld [vmem:[#allocation8 + $0x28] sm:$0xff]  }
 0x1b3   : > { %v2284_v5 = vsel %vm7277_vm10, %v5514_v25, %v2283_v15  ;;  %v6717_v35 = vld [vmem:[#allocation2 + $0x94] ss:$12 sps:$4 sm:$0xff]   ;;  %6310 = vmatprep.subr.bf16.mxu0 %v6719_v14 }
 0x1b4   : > { %v2288_v2 = vsel %vm7277_vm10, %v5515_v22, %v2287_v36  ;;  %6311 = vmatpush3.bf16.msra.mxu0 %v6719_v14  ;;  %v6722_v22 = vld [vmem:[#allocation8 + $0x30] sm:$0xff]   ;;  %v6725_v49 = vld [vmem:[#allocation8 + $0x60] sm:$0xff]  }
 0x1b5   : > { %6233 = vmatpush3.bf16.msra.mxu1 %v6706_v50  ;;  %v2977_v50 = vld [vmem:[#allocation2 + $0xb0] sm:$0x1]  ;;  %v5521_v1 = vcombine.low %v2284_v5, %v2288_v2  ;;  %v6727_v5 = vld [vmem:[#allocation8 + $0x58] sm:$0xff]  }
 0x1b6   : > { %6234 = vmatprep.subr.bf16.mxu1 %v6707_v28  ;;  %v3046_v53 = vrot.slane %v2977_v50, 5 }
 0x1b7   : > { %6195 = vmatmul.mubr.bf16.gmra.mxu1 %v5519_v34 }
 0x1b8   : > { %6279 = vmatmul.mubr.bf16.gmra.mxu0 %v5585_v45  ;;  %6198 = vmatprep.mubr.bf16.mxu1 %v5520_v8  ;;  %v3047_v63 = vsel %vm7277_vm10, %v5580_v37, %v3046_v53  ;;  %v6721_v8 = vld [vmem:[#allocation8 + $0x70] sm:$0xff]   ;;  %v6726_v37 = vld [vmem:[#allocation8 + $0x20] sm:$0xff]  }
 0x1b9   : > { %6235 = vmatpush3.bf16.msra.mxu1 %v6707_v28  ;;  %6282 = vmatprep.mubr.bf16.mxu0 %v5586_v21  ;;  %v5587_v62 = vcombine.low %v3047_v63, %v3051_v26  ;;  %v6713_v28 = vld [vmem:[#allocation6 + $0x1c0] sm:$0xff]  }
 0x1ba   : > { %6236 = vmatprep.subr.bf16.mxu1 %v6708_v13  ;;  %6312 = vmatprep.subr.bf16.mxu0 %v6721_v8 }
 0x1bb   : > { %6313 = vmatpush3.bf16.msra.mxu0 %v6721_v8  ;;  %v6732_v8 = vld [vmem:[#allocation8 + $0x8] sm:$0xff]  }
 0x1bc   : > { %6314 = vmatprep.subr.bf16.mxu0 %v6723_v23 }
 0x1bd   : > { %6237 = vmatpush3.bf16.msra.mxu1 %v6708_v13 }
 0x1be   : > { %6238 = vmatprep.subr.bf16.mxu1 %v6709_v12 }
 0x1bf   : > { %6199 = vmatmul.mubr.bf16.gmra.mxu1 %v5521_v1  ;;  %6315 = vmatpush3.bf16.msra.mxu0 %v6723_v23  ;;  %v6734_v23 = vld [vmem:[#allocation8] sm:$0xff]  }
 0x1c0   : > { %6283 = vmatmul.mubr.bf16.gmra.mxu0 %v5587_v62  ;;  %6246 = vmatprep.mubr.bf16.mxu1 %v6710_v58  ;;  %v6728_v62 = vld [vmem:[#allocation8 + $0x18] sm:$0xff]  }
 0x1c1   : > { %6239 = vmatpush3.bf16.msra.mxu1 %v6709_v12  ;;  %6316 = vmatprep.subr.bf16.mxu0 %v6725_v49 }
 0x1c2   : > { %6240 = vmatprep.subr.bf16.mxu1 %v6711_v24 }
 0x1c3   : > { %6317 = vmatpush3.bf16.msra.mxu0 %v6725_v49 }
 0x1c4   : > { %6318 = vmatprep.subr.bf16.mxu0 %v6727_v5 }
 0x1c5   : > { %6241 = vmatpush3.bf16.msra.mxu1 %v6711_v24 }
 0x1c6   : > { %6242 = vmatprep.subr.bf16.mxu1 %v6712_v4 }
 0x1c7   : > { %6319 = vmatpush3.bf16.msra.mxu0 %v6727_v5 }
 0x1c9   : > { %6243 = vmatpush3.bf16.msra.mxu1 %v6712_v4  ;;  %v6729_v4 = vld [vmem:[#allocation8 + $0x50] sm:$0xff]  }
 0x1ca   : > { %6244 = vmatprep.subr.bf16.mxu1 %v6713_v28  ;;  %6320 = vmatprep.subr.bf16.mxu0 %v6729_v4 }
 0x1cb   : > { %6321 = vmatpush3.bf16.msra.mxu0 %v6729_v4  ;;  %v7619_v4 = vld [vmem:[#allocation8 + $0xb8] sm:$0xff]  }
 0x1cc   : > { %8198 = vst [vmem:[#allocation39_spill] sm:$0xff] %v7619_v4 }
 0x1cd   : > { %6245 = vmatpush3.bf16.msra.mxu1 %v6713_v28 }
 0x1ce   : > { %6286 = vmatprep.subr.bf16.mxu1 %v6720_v3 }
 0x1d0   : > { %6247 = vmatmul.mubr.bf16.vlgmr.msra.gmra.mxu1 %v6714_v31 }
 0x1d1   : > { %6250 = vmatprep.mubr.bf16.mxu1 %v6715_v32  ;;  %6287 = vmatpush3.bf16.msra.mxu1 %v6720_v3  ;;  %v6730_v32 = vld [vmem:[#allocation8 + $0x10] sm:$0xff]  }
 0x1d2   : > { %6288 = vmatprep.subr.bf16.mxu1 %v6722_v22 }
 0x1d5   : > { %6289 = vmatpush3.bf16.msra.mxu1 %v6722_v22  ;;  %v6733_v22 = vld [vmem:[#allocation8 + $0x40] sm:$0xff]  }
 0x1d6   : > { %6290 = vmatprep.subr.bf16.mxu1 %v6724_v16 }
 0x1d8   : > { %6251 = vmatmul.mubr.bf16.gmra.mxu1 %v6716_v47 }
 0x1d9   : > { %6254 = vmatprep.mubr.bf16.mxu1 %v6717_v35  ;;  %6291 = vmatpush3.bf16.msra.mxu1 %v6724_v16 }
 0x1da   : > { %6292 = vmatprep.subr.bf16.mxu1 %v6726_v37 }
 0x1dd   : > { %6293 = vmatpush3.bf16.msra.mxu1 %v6726_v37  ;;  %v7613_v37 = vld [vmem:[#allocation8 + $0xf8] sm:$0xff]  }
 0x1de   : > { %6294 = vmatprep.subr.bf16.mxu1 %v6728_v62  ;;  %8196 = vst [vmem:[#allocation37_spill] sm:$0xff] %v7613_v37 }
 0x1e0   : > { %6255 = vmatmul.mubr.bf16.gmra.mxu1 %v6718_v29  ;;  %v6731_v29 = vld [vmem:[#allocation8 + $0x48] sm:$0xff]  }
 0x1e1   : > { %6295 = vmatpush3.bf16.msra.mxu1 %v6728_v62  ;;  %6322 = vmatprep.subr.bf16.mxu0 %v6731_v29 }
 0x1e2   : > { %6296 = vmatprep.subr.bf16.mxu1 %v6730_v32  ;;  %6323 = vmatpush3.bf16.msra.mxu0 %v6731_v29 }
 0x1e3   : > { %6324 = vmatprep.subr.bf16.mxu0 %v6733_v22 }
 0x1e5   : > { %6297 = vmatpush3.bf16.msra.mxu1 %v6730_v32 }
 0x1e6   : > { %6298 = vmatprep.subr.bf16.mxu1 %v6732_v8  ;;  %6325 = vmatpush3.bf16.msra.mxu0 %v6733_v22 }
 0x1e7   : > { %6358 = vmatprep.subr.bf16.mxu0 %v7613_v37 }
 0x1e9   : > { %6299 = vmatpush3.bf16.msra.mxu1 %v6732_v8 }
 0x1ea   : > { %6300 = vmatprep.subr.bf16.mxu1 %v6734_v23 }
 0x1ed   : > { %6301 = vmatpush3.bf16.msra.mxu1 %v6734_v23 }
 0x1ee   : > { %6334 = vmatprep.subr.bf16.mxu1 %v7619_v4 }
 0x206   : > { %v7549_v52 = vpop.f32.mrf.mxu1 }
 0x207   : > { %v7551_v54 = vpop.f32.mrf.mxu0 }
 0x208   : > { %v7553_v41 = vpop.f32.mrf.mxu1 }
 0x209   : > { %v7555_v34 = vpop.f32.mrf.mxu0 }
 0x20a   : > { %v7557_v9 = vpop.f32.mrf.mxu1 }
 0x20b   : > { %v7559_v57 = vpop.f32.mrf.mxu0 }
 0x20c   : > { %v7561_v55 = vpop.f32.mrf.mxu1 }
 0x20d   : > { %v7563_v44 = vpop.f32.mrf.mxu0 }
 0x216   : > { %v7565_v36 = vpop.f32.mrf.mxu1 }
 0x217   : > { %v7567_v45 = vpop.f32.mrf.mxu0 }
 0x218   : > { %v7569_v56 = vpop.f32.mrf.mxu1 }
 0x219   : > { %v7571_v13 = vpop.f32.mrf.mxu0 }
 0x21a   : > { %v7573_v50 = vpop.f32.mrf.mxu1 }
 0x21b   : > { %v7575_v21 = vpop.f32.mrf.mxu0 }
 0x21c   : > { %v7577_v25 = vpop.f32.mrf.mxu1 }
 0x21d   : > { %v7579_v15 = vpop.f32.mrf.mxu0 }
 0x226   : > { %v7581_v53 = vpop.f32.mrf.mxu1 }
 0x227   : > { %v7583_v2 = vpop.f32.mrf.mxu0 }
 0x228   : > { %v7585_v12 = vpop.f32.mrf.mxu1 }
 0x229   : > { %v7587_v26 = vpop.f32.mrf.mxu0 }
 0x22a   : > { %v7589_v1 = vpop.f32.mrf.mxu1 }
 0x22b   : > { %v7591_v63 = vpop.f32.mrf.mxu0 }
 0x22c   : > { %v7593_v58 = vpop.f32.mrf.mxu1 }
 0x22d   : > { %v7595_v24 = vpop.f32.mrf.mxu0 }
 0x22e   : > { %v7597_v28 = vpop.f32.mrf.mxu1 }
 0x22f   : > { %v7599_v31 = vpop.f32.mrf.mxu0 }
 0x230   : > { %v7601_v47 = vpop.f32.mrf.mxu1 }
 0x231   : > { %v7603_v35 = vpop.f32.mrf.mxu0 }
 0x232   : > { %v7605_v14 = vpop.f32.mrf.mxu1 }
 0x233   : > { %v7607_v3 = vpop.f32.mrf.mxu0 }
 0x234   : > { %v7609_v16 = vpop.f32.mrf.mxu1 }
 0x235   : > { %v7611_v49 = vpop.f32.mrf.mxu0 }
 0x236   : > { %v7615_v5 = vpop.f32.mrf.mxu1 }
 0x237   : > { %v7617_v62 = vpop.f32.mrf.mxu0 }
 0x238   : > { %8197 = vst [vmem:[#allocation38_spill] sm:$0xff] %v7617_v62  ;;  %v7621_v32 = vpop.f32.mrf.mxu1 }
 0x239   : > { %v7623_v27 = vpop.f32.mrf.mxu0 }
 0x23a   : > { %8199 = vst [vmem:[#allocation40_spill] sm:$0xff] %v7623_v27  ;;  %v7626_v29 = vpop.f32.mrf.mxu1 }
 0x23b   : > { %v7628_v17 = vpop.f32.mrf.mxu0 }
 0x23c   : > { %8200 = vst [vmem:[#allocation41_spill] sm:$0xff] %v7628_v17  ;;  %v7631_v6 = vpop.f32.mrf.mxu1 }
 0x23d   : > { %v7633_v8 = vpop.f32.mrf.mxu0 }
 0x23e   : > { %8201 = vst [vmem:[#allocation42_spill] sm:$0xff] %v7633_v8  ;;  %v7635_v0 = vpop.f32.mrf.mxu1 }
 0x23f   : > { %v7637_v59 = vpop.f32.mrf.mxu0 }
 0x240   : > { %8202 = vst [vmem:[#allocation43_spill] sm:$0xff] %v7637_v59  ;;  %v7639_v38 = vpop.f32.mrf.mxu1 }
 0x241   : > { %v7641_v22 = vpop.f32.mrf.mxu0 }
 0x242   : > { %8203 = vst [vmem:[#allocation44_spill] sm:$0xff] %v7641_v22  ;;  %v7643_v20 = vpop.f32.mrf.mxu1 }
 0x243   : > { %v7645_v39 = vpop.f32.mrf.mxu0 }
 0x244   : > { %8204 = vst [vmem:[#allocation45_spill] sm:$0xff] %v7645_v39  ;;  %v7647_v60 = vpop.f32.mrf.mxu1 }
 0x245   : > { %v7649_v23 = vpop.f32.mrf.mxu0 }
 0x246   : > { %8205 = vst [vmem:[#allocation46_spill] sm:$0xff] %v7649_v23 }
 0x24e   : > { %v6136_v48 = vpop.f32.mrf.mxu1 }
 0x24f   : > { %v7651_v4 = vpop.f32.mrf.mxu0 }
 0x250   : > { %8206 = vst [vmem:[#allocation47_spill] sm:$0xff] %v7651_v4  ;;  %v7653_v40 = vpop.f32.mrf.mxu1 }
 0x251   : > { %v7655_v37 = vpop.f32.mrf.mxu0 }
 0x252   : > { %8207 = vst [vmem:[#allocation48_spill] sm:$0xff] %v7655_v37  ;;  %v7657_v43 = vpop.f32.mrf.mxu1 }
 0x253   : > { %v7661_v10 = vpop.f32.mrf.mxu0 }
 0x254   : > { %v7659_v42 = vpop.f32.mrf.mxu1  ;;  %8208 = vst [vmem:[#allocation49_spill] sm:$0xff] %v7661_v10 }
 0x255   : > { %v7667_v46 = vpop.f32.mrf.mxu0 }
 0x256   : > { %v7663_v7 = vpop.f32.mrf.mxu1  ;;  %8209 = vst [vmem:[#allocation50_spill] sm:$0xff] %v7667_v46 }
 0x257   : > { %v7673_v33 = vpop.f32.mrf.mxu0 }
 0x258   : > { %v7665_v61 = vpop.f32.mrf.mxu1  ;;  %8210 = vst [vmem:[#allocation51_spill] sm:$0xff] %v7673_v33 }
 0x259   : > { %v7677_v18 = vpop.f32.mrf.mxu0 }
 0x25a   : > { %v7669_v30 = vpop.f32.mrf.mxu1  ;;  %8211 = vst [vmem:[#allocation52_spill] sm:$0xff] %v7677_v18 }
 0x25b   : > { %v7681_v23 = vpop.f32.mrf.mxu0 }
 0x25c   : > { %v7671_v19 = vpop.f32.mrf.mxu1  ;;  %8213 = vst [vmem:[#allocation54_spill] sm:$0xff] %v7681_v23 }
 0x25d   : > { %v7685_v22 = vpop.f32.mrf.mxu0 }
 0x25e   : > { %v7675_v11 = vpop.f32.mrf.mxu1  ;;  %8215 = vst [vmem:[#allocation56_spill] sm:$0xff] %v7685_v22 }
 0x25f   : > { %v7689_v46 = vpop.f32.mrf.mxu0 }
 0x260   : > { %v7679_v51 = vpop.f32.mrf.mxu1  ;;  %8217 = vst [vmem:[#allocation58_spill] sm:$0xff] %v7689_v46  ;;  %v5409_v46 = vld [vmem:[%s8137_s5] ss:$0 sm:$0xff] }
 0x261   : > { %8212 = vst [vmem:[#allocation53_spill] sm:$0xff] %v7679_v51  ;;  %v7695_v33 = vpop.f32.mrf.mxu0 }
 0x262   : > { %v7683_v39 = vpop.f32.mrf.mxu1  ;;  %8218 = vst [vmem:[#allocation59_spill] sm:$0xff] %v7695_v33  ;;  %v1183_v33 = vadd.f32 %v7549_v52, %v5409_v46  ;;  %v1191_v52 = vadd.f32 %v5409_v46, %v7569_v56  ;;  %v7743_v56 = vld [vmem:[#allocation2 + $0x18] sm:$0x8] }
 0x263   : > { %8214 = vst [vmem:[#allocation55_spill] sm:$0xff] %v7683_v39  ;;  %v7701_v17 = vpop.f32.mrf.mxu0 }
 0x264   : > { %v7687_v10 = vpop.f32.mrf.mxu1  ;;  %8220 = vst [vmem:[#allocation61_spill] sm:$0xff] %v7701_v17  ;;  %v1175_v17 = vadd.f32 %v5409_v46, %v7553_v41 }
 0x265   : > { %8216 = vst [vmem:[#allocation57_spill] sm:$0xff] %v7687_v10  ;;  %v7710_v22 = vpop.f32.mrf.mxu0 }
 0x266   : > { %8223 = vst [vmem:[#allocation64_spill] sm:$0xff] %v7710_v22  ;;  %v1415_v4 = vadd.f32 %v7601_v47, %v1175_v17  ;;  %v1178_v22 = vadd.f32 %v5409_v46, %v7561_v55  ;;  %v1194_v17 = vadd.f32 %v5409_v46, %v7577_v25  ;;  %v1207_v55 = vadd.f32 %v5409_v46, %v7585_v12 }
 0x267   : > { %v1210_v25 = vadd.f32 %v5409_v46, %v7593_v58 }
 0x26f   : > { %v7691_v59 = vpop.f32.mrf.mxu1 }
 0x270   : > { %v7714_v39 = vpop.f32.mrf.mxu0 }
 0x271   : > { %v7693_v8 = vpop.f32.mrf.mxu1 }
 0x273   : > { %v7697_v37 = vpop.f32.mrf.mxu1 }
 0x275   : > { %v7699_v18 = vpop.f32.mrf.mxu1 }
 0x276   : > { %8219 = vst [vmem:[#allocation60_spill] sm:$0xff] %v7699_v18  ;;  %v7721_v18 = vpop.f32.mrf.mxu0 }
 0x277   : > { %v7703_v23 = vpop.f32.mrf.mxu1  ;;  %8226 = vst [vmem:[#allocation67_spill] sm:$0xff] %v7721_v18  ;;  %v7735_v18 = vld [vmem:[#allocation2 + $0xc] sm:$0x8] }
 0x278   : > { %8221 = vst [vmem:[#allocation62_spill] sm:$0xff] %v7703_v23  ;;  %v1417_v23 = vadd.f32 %v7597_v28, %v1183_v33  ;;  %v7733_v28 = vld [vmem:[#allocation2] sm:$0x8]  ;;  %v7741_v47 = vpop.f32.mrf.mxu0 }
 0x279   : > { %v7705_v27 = vpop.f32.mrf.mxu1 }
 0x27a   : > { %8222 = vst [vmem:[#allocation63_spill] sm:$0xff] %v7705_v27  ;;  %v1186_v27 = vadd.f32 %v7557_v9, %v5409_v46  ;;  %v1698_v33 = vadd.f32 %v7551_v54, %v1417_v23  ;;  %v1215_v9 = vadd.f32 %v7581_v53, %v5409_v46  ;;  %v7748_v23 = vld [vmem:[#allocation2 + $0x24] sm:$0x8]  ;;  %v1419_v53 = vadd.f32 %v7621_v32, %v1191_v52 }
 0x27b   : > { %v7712_v10 = vpop.f32.mrf.mxu1  ;;  %v1423_v32 = vadd.f32 %v7639_v38, %v1207_v55  ;;  %v8228_v55 = vld [vmem:[#allocation38_spill] sm:$0xff] }
 0x27c   : > { %8224 = vst [vmem:[#allocation65_spill] sm:$0xff] %v7712_v10  ;;  %v1199_v10 = vadd.f32 %v7565_v36, %v5409_v46  ;;  %v1418_v41 = vadd.f32 %v7605_v14, %v1186_v27  ;;  %v1416_v36 = vadd.f32 %v7609_v16, %v1178_v22  ;;  %v1218_v27 = vadd.f32 %v7589_v1, %v5409_v46 }
 0x27d   : > { %v7717_v51 = vpop.f32.mrf.mxu1  ;;  %v1696_v14 = vadd.f32 %v7555_v34, %v1415_v4  ;;  %v5608_v16 = vrot.slane %v7733_v28, 11  ;;  %v5609_v22 = vrot.slane %v7735_v18, 11  ;;  %v1420_v34 = vadd.f32 %v7631_v6, %v1194_v17 }
 0x27e   : > { %8225 = vst [vmem:[#allocation66_spill] sm:$0xff] %v7717_v51  ;;  %v1202_v51 = vadd.f32 %v7573_v50, %v5409_v46  ;;  %v1421_v54 = vadd.f32 %v7615_v5, %v1199_v10  ;;  %v1977_v50 = vadd.f32 %v6136_v48, %v1698_v33  ;;  %v1699_v48 = vadd.f32 %v7559_v57, %v1418_v41  ;;  %v7763_v5 = vpop.f32.mrf.mxu0 }
 0x27f   : > { %v7727_v62 = vpop.f32.mrf.mxu1  ;;  %v1975_v1 = vadd.f32 %v7653_v40, %v1696_v14  ;;  %v5610_v10 = vrot.slane %v7743_v56, 11  ;;  %v1425_v46 = vadd.f32 %v7635_v0, %v1215_v9  ;;  %v1697_v58 = vadd.f32 %v7563_v44, %v1416_v36  ;;  %v7798_v9 = vld [vmem:[#allocation2 + $0x24] sm:$0x8]  ;;  %v8229_v36 = vld [vmem:[#allocation47_spill] sm:$0xff]  ;;  %v8233_v14 = vld [vmem:[#allocation40_spill] sm:$0xff] }
 0x280   : > { %8227 = vst [vmem:[#allocation68_spill] sm:$0xff] %v7727_v62  ;;  %v1422_v62 = vadd.f32 %v7626_v29, %v1202_v51  ;;  %v5611_v4 = vrot.slane %v7748_v23, 11  ;;  %v1978_v51 = vadd.f32 %v7657_v43, %v1699_v48  ;;  %v1702_v40 = vadd.f32 %v7567_v45, %v1421_v54  ;;  %v7770_v29 = vld [vmem:[#allocation2 + $0x18] sm:$0x8]  ;;  %v7785_v17 = vpop.f32.mrf.mxu0  ;;  %v8231_v54 = vld [vmem:[#allocation55_spill] sm:$0xff] }
 0x281   : > { %v7752_v12 = vpop.f32.mrf.mxu1  ;;  %v2183_v57 = vadd.f32 %v7599_v31, %v1977_v50  ;;  %v1426_v6 = vadd.f32 %v7643_v20, %v1218_v27  ;;  %v1424_v0 = vadd.f32 %v7647_v60, %v1210_v25  ;;  %v1976_v44 = vadd.f32 %v7659_v42, %v1697_v58  ;;  %v8230_v27 = vld [vmem:[#allocation53_spill] sm:$0xff]  ;;  %v8236_v58 = vld [vmem:[#allocation60_spill] sm:$0xff] }
 0x282   : > { %v1700_v52 = vadd.f32 %v7571_v13, %v1419_v53  ;;  %v1981_v38 = vadd.f32 %v7663_v7, %v1702_v40  ;;  %v1703_v43 = vadd.f32 %v7575_v21, %v1422_v62  ;;  %v2181_v31 = vadd.f32 %v7603_v35, %v1975_v1  ;;  %v8232_v50 = vld [vmem:[#allocation57_spill] sm:$0xff]  ;;  %v3191_v25 = vpop.f32.mrf.mxu0 }
 0x283   : > { %v7776_v41 = vpop.f32.mrf.mxu1  ;;  %v2461_v45 = vadd.f32 %v7691_v59, %v2183_v57  ;;  %v1701_v20 = vadd.f32 %v7579_v15, %v1420_v34  ;;  %v1706_v60 = vadd.f32 %v7583_v2, %v1425_v46  ;;  %v5661_v42 = vrot.slane %v7770_v29, 11  ;;  %v8234_v1 = vld [vmem:[#allocation41_spill] sm:$0xff]  ;;  %v8238_v57 = vld [vmem:[#allocation63_spill] sm:$0xff] }
 0x284   : > { %v1979_v33 = vadd.f32 %v7665_v61, %v1700_v52  ;;  %v1982_v13 = vadd.f32 %v7669_v30, %v1703_v43  ;;  %v1704_v7 = vadd.f32 %v7587_v26, %v1423_v32  ;;  %v2459_v21 = vadd.f32 %v7693_v8, %v2181_v31 }
 0x285   : > { %v2184_v59 = vadd.f32 %v7607_v3, %v1978_v51  ;;  %v1980_v35 = vadd.f32 %v7671_v19, %v1701_v20  ;;  %v1707_v61 = vadd.f32 %v7591_v63, %v1426_v6  ;;  %v1705_v15 = vadd.f32 %v7595_v24, %v1424_v0  ;;  %v7796_v62 = vpop.f32.mrf.mxu1  ;;  %v8237_v51 = vld [vmem:[#allocation62_spill] sm:$0xff] }
 0x286   : > { %v2182_v2 = vadd.f32 %v7611_v49, %v1976_v44  ;;  %v1985_v30 = vadd.f32 %v7675_v11, %v1706_v60  ;;  %v2187_v8 = vadd.f32 %v8228_v55, %v1981_v38  ;;  %v2740_v3 = vadd.f32 %v8229_v36, %v2461_v45  ;;  %v8235_v11 = vld [vmem:[#allocation48_spill] sm:$0xff]  ;;  %v8239_v0 = vld [vmem:[#allocation42_spill] sm:$0xff]  ;;  %v8240_v38 = vld [vmem:[#allocation43_spill] sm:$0xff] }
 0x287   : > { %v2462_v26 = vadd.f32 %v7697_v37, %v2184_v59  ;;  %v1983_v19 = vadd.f32 %v8230_v27, %v1704_v7  ;;  %v1986_v63 = vadd.f32 %v8231_v54, %v1707_v61  ;;  %v1984_v24 = vadd.f32 %v8232_v50, %v1705_v15  ;;  %v8242_v60 = vld [vmem:[#allocation65_spill] sm:$0xff]  ;;  %v6281_v7 = vpop.f32.mrf.mxu0  ;;  %v8246_v36 = vld [vmem:[#allocation67_spill] sm:$0xff]  ;;  %v8247_v27 = vld [vmem:[#allocation66_spill] sm:$0xff] }
 0x288   : > { %v2185_v49 = vadd.f32 %v8233_v14, %v1979_v33  ;;  %v2188_v48 = vadd.f32 %v8234_v1, %v1982_v13  ;;  %v2738_v46 = vadd.f32 %v8235_v11, %v2459_v21  ;;  %v5662_v37 = vrot.slane %v7798_v9, 11  ;;  %v8241_v33 = vld [vmem:[#allocation49_spill] sm:$0xff]  ;;  %v8243_v21 = vld [vmem:[#allocation44_spill] sm:$0xff]  ;;  %v8248_v54 = vld [vmem:[#allocation50_spill] sm:$0xff] }
 0x289   : > { %v2460_v32 = vadd.f32 %v8236_v58, %v2182_v2  ;;  %v2465_v40 = vadd.f32 %v8237_v51, %v2187_v8  ;;  %v2186_v44 = vadd.f32 %v8239_v0, %v1980_v35  ;;  %v2191_v43 = vadd.f32 %v8240_v38, %v1985_v30  ;;  %v8244_v61 = vld [vmem:[#allocation45_spill] sm:$0xff]  ;;  %v8245_v2 = vld [vmem:[#allocation46_spill] sm:$0xff]  ;;  %v8249_v14 = vld [vmem:[#allocation51_spill] sm:$0xff] }
 0x28a   : > { %v2463_v6 = vadd.f32 %v8238_v57, %v2185_v49  ;;  %v2741_v20 = vadd.f32 %v8241_v33, %v2462_v26  ;;  %v2466_v13 = vadd.f32 %v8242_v60, %v2188_v48  ;;  %v2189_v59 = vadd.f32 %v8243_v21, %v1983_v19  ;;  %v3194_v48 = vpop.f32.mrf.mxu0  ;;  %v8253_v0 = vld [vmem:[#allocation54_spill] sm:$0xff] }
 0x28b   : > { %v2192_v15 = vadd.f32 %v8244_v61, %v1986_v63  ;;  %v2190_v55 = vadd.f32 %v8245_v2, %v1984_v24  ;;  %v2739_v50 = vadd.f32 %v8248_v54, %v2460_v32  ;;  %v2744_v49 = vadd.f32 %v8249_v14, %v2465_v40  ;;  %v6745_v9 = vld [vmem:[#allocation8 + $0xe0] sm:$0xff]  }
 0x28c   : > { %v6284_v2 = vpop.f32.mrf.mxu0 }
 0x290   : > { %v6248_v53 = vpop.f32.mrf.mxu1 }
 0x291   : > { %v2946_v34 = vadd.f32 %v6248_v53, %v2740_v3  ;;  %v8250_v53 = vld [vmem:[#allocation52_spill] sm:$0xff] }
 0x292   : > { %v2897_v52 = vpop.f32.mrf.mxu1  ;;  %v2742_v1 = vadd.f32 %v8250_v53, %v2463_v6  ;;  %v8254_v6 = vld [vmem:[#allocation15_spill] sm:$0xff] }
 0x293   : > { %v3224_v45 = vadd.f32 %v7714_v39, %v2946_v34  ;;  %v2944_v31 = vadd.f32 %v2897_v52, %v2738_v46  ;;  %v2464_v39 = vadd.f32 %v8247_v27, %v2186_v44  ;;  %v8251_v34 = vld [vmem:[#allocation68_spill] sm:$0xff]  ;;  %v2745_v44 = vadd.f32 %v8253_v0, %v2466_v13 }
 0x294   : > { %v6249_v8 = vpop.f32.mrf.mxu1  ;;  %v2469_v11 = vadd.f32 %v8251_v34, %v2191_v43  ;;  %v8252_v46 = vld [vmem:[#allocation20_spill] sm:$0xff]  ;;  %v2467_v43 = vadd.f32 %v7752_v12, %v2189_v59 }
 0x295   : > { %vm3236_vm6 = vcmp.ge.f32.partialorder %v3224_v45, 0.0  ;;  %v3248_v35 = vmul.f32 0.01, %v3224_v45  ;;  %v3222_v3 = vadd.f32 %v8246_v36, %v2944_v31  ;;  %v2947_v30 = vadd.f32 %v6249_v8, %v2741_v20  ;;  %v8256_v8 = vld [vmem:[#allocation22_spill] sm:$0xff] }
 0x296   : > { %v2900_v26 = vpop.f32.mrf.mxu1 }
 0x297   : > { %v3260_v19 = vsel %vm3236_vm6, %v3224_v45, %v3248_v35  ;;  %vm3234_vm7 = vcmp.ge.f32.partialorder %v3222_v3, 0.0  ;;  %v3246_v63 = vmul.f32 0.01, %v3222_v3  ;;  %v3225_v24 = vadd.f32 %v7741_v47, %v2947_v30  ;;  %v8255_v47 = vld [vmem:[#allocation56_spill] sm:$0xff] }
 0x298   : > { %v3272_v58 = vmul.f32 %v3260_v19, %v8252_v46  ;;  %v2945_v51 = vadd.f32 %v2900_v26, %v2739_v50  ;;  %v6252_v57 = vpop.f32.mrf.mxu1  ;;  %v2743_v20 = vadd.f32 %v8255_v47, %v2464_v39  ;;  %v2470_v39 = vadd.f32 %v7776_v41, %v2192_v15  ;;  %v8258_v26 = vld [vmem:[#allocation16_spill] sm:$0xff]  ;;  %v8262_v47 = vld [vmem:[#allocation61_spill] sm:$0xff] }
 0x299   : > { %v3258_v32 = vsel %vm3234_vm7, %v3222_v3, %v3246_v63  ;;  %vm3237_vm8 = vcmp.ge.f32.partialorder %v3225_v24, 0.0  ;;  %v3249_v52 = vmul.f32 0.01, %v3225_v24  ;;  %v2950_v40 = vadd.f32 %v6252_v57, %v2744_v49  ;;  %v8259_v63 = vld [vmem:[#allocation28_spill] sm:$0xff] }
 0x29a   : > { %v5789_v38 = vpack.c.bf16 %v3272_v58, %v3272_v58  ;;  %v3270_v45 = vmul.f32 %v3258_v32, %v8254_v6  ;;  %v3223_v31 = vadd.f32 %v7763_v5, %v2945_v51  ;;  %v2913_v33 = vpop.f32.mrf.mxu1  ;;  %v2468_v19 = vadd.f32 %v7796_v62, %v2190_v55  ;;  %v7842_v15 = vld [vmem:[#allocation2 + $0x30] sm:$0x8] }
 0x29b   : > { %v3261_v60 = vsel %vm3237_vm8, %v3225_v24, %v3249_v52  ;;  %v3228_v21 = vadd.f32 %v7785_v17, %v2950_v40  ;;  %v2948_v61 = vadd.f32 %v2913_v33, %v2742_v1  ;;  %v8257_v17 = vld [vmem:[#allocation58_spill] sm:$0xff]  ;;  %v3207_v1 = vpop.f32.mrf.mxu0  ;;  %v5612_v6 = vrot.slane %v7842_v15, 11 }
 0x29c   : > { %3332 = vst [vmem:[#allocation2 + $0x1c] sm:$0xf] %v5789_v38  ;;  %v5787_v13 = vpack.c.bf16 %v3270_v45, %v3270_v45  ;;  %v3273_v35 = vmul.f32 %v3261_v60, %v8256_v8  ;;  %vm3235_vm11 = vcmp.ge.f32.partialorder %v3223_v31, 0.0  ;;  %v3247_v36 = vmul.f32 0.01, %v3223_v31  ;;  %v6253_v3 = vpop.f32.mrf.mxu1  ;;  %v8263_v60 = vld [vmem:[#allocation64_spill] sm:$0xff] }
 0x29d   : > { %vm3240_vm12 = vcmp.ge.f32.partialorder %v3228_v21, 0.0  ;;  %v3252_v30 = vmul.f32 0.01, %v3228_v21  ;;  %v3226_v5 = vadd.f32 %v3191_v25, %v2948_v61  ;;  %v2951_v27 = vadd.f32 %v6253_v3, %v2745_v44  ;;  %v8261_v44 = vld [vmem:[#allocation24_spill] sm:$0xff]  ;;  %v6285_v45 = vpop.f32.mrf.mxu0 }
 0x29e   : > { %3330 = vst [vmem:[#allocation2 + $0x4] sm:$0xf] %v5787_v13  ;;  %v5790_v12 = vpack.c.bf16 %v3273_v35, %v3273_v35  ;;  %v3259_v59 = vsel %vm3235_vm11, %v3223_v31, %v3247_v36  ;;  %v2916_v54 = vpop.f32.mrf.mxu1  ;;  %v2748_v50 = vadd.f32 %v8257_v17, %v2469_v11  ;;  %v8260_v11 = vld [vmem:[#allocation59_spill] sm:$0xff]  ;;  %v8264_v13 = vld [vmem:[#allocation30_spill] sm:$0xff] }
 0x29f   : > { %v3271_v14 = vmul.f32 %v3259_v59, %v8258_v26  ;;  %v3264_v49 = vsel %vm3240_vm12, %v3228_v21, %v3252_v30  ;;  %vm3238_vm13 = vcmp.ge.f32.partialorder %v3226_v5, 0.0  ;;  %v3250_v53 = vmul.f32 0.01, %v3226_v5  ;;  %v8265_v17 = vld [vmem:[#allocation26_spill] sm:$0xff] }
 0x2a0   : > { %3333 = vst [vmem:[#allocation2 + $0x28] sm:$0xf] %v5790_v12  ;;  %v3276_v25 = vmul.f32 %v3264_v49, %v8259_v63  ;;  %v3229_v24 = vadd.f32 %v6281_v7, %v2951_v27  ;;  %v2949_v34 = vadd.f32 %v2916_v54, %v2743_v20  ;;  %v6256_v41 = vpop.f32.mrf.mxu1  ;;  %v2746_v57 = vadd.f32 %v8260_v11, %v2467_v43  ;;  %v7846_v7 = vld [vmem:[#allocation2 + $0x3c] sm:$0x8]  ;;  %v3210_v54 = vpop.f32.mrf.mxu0  ;;  %v8266_v49 = vld [vmem:[#allocation35_spill] sm:$0xff] }
 0x2a1   : > { %v5788_v46 = vpack.c.bf16 %v3271_v14, %v3271_v14  ;;  %v3262_v58 = vsel %vm3238_vm13, %v3226_v5, %v3250_v53  ;;  %v2954_v51 = vadd.f32 %v6256_v41, %v2748_v50  ;;  %v2749_v20 = vadd.f32 %v8262_v47, %v2470_v39 }
 0x2a2   : > { %v5793_v0 = vpack.c.bf16 %v3276_v25, %v3276_v25  ;;  %v3274_v32 = vmul.f32 %v3262_v58, %v8261_v44  ;;  %vm3241_vm14 = vcmp.ge.f32.partialorder %v3229_v24, 0.0  ;;  %v3253_v52 = vmul.f32 0.01, %v3229_v24  ;;  %v2929_v40 = vpop.f32.mrf.mxu1 }
 0x2a3   : > { %3331 = vst [vmem:[#allocation2 + $0x10] sm:$0xf] %v5788_v46  ;;  %v3227_v62 = vadd.f32 %v3194_v48, %v2949_v34  ;;  %v3232_v55 = vadd.f32 %v6284_v2, %v2954_v51  ;;  %v2952_v38 = vadd.f32 %v2929_v40, %v2746_v57  ;;  %v2747_v21 = vadd.f32 %v8263_v60, %v2468_v19  ;;  %v7851_v61 = vld [vmem:[#allocation2 + $0x1c] sm:$0x7]  ;;  %v8267_v57 = vld [vmem:[#allocation32_spill] sm:$0xff] }
 0x2a4   : > { %3336 = vst [vmem:[#allocation2 + $0x4c] sm:$0xf] %v5793_v0  ;;  %v5791_v31 = vpack.c.bf16 %v3274_v32, %v3274_v32  ;;  %v3265_v33 = vsel %vm3241_vm14, %v3229_v24, %v3253_v52  ;;  %v6257_v43 = vpop.f32.mrf.mxu1  ;;  %v5613_v5 = vrot.slane %v7846_v7, 11  ;;  %v3384_v59 = vrot.slane %v7851_v61, 7  ;;  %v6739_v32 = vld [vmem:[#allocation8 + $0xf0] sm:$0xff]   ;;  %v8270_v61 = vld [vmem:[#allocation37_spill] sm:$0xff] }
 0x2a5   : > { %v3277_v8 = vmul.f32 %v3265_v33, %v8264_v13  ;;  %vm3239_vm15 = vcmp.ge.f32.partialorder %v3227_v62, 0.0  ;;  %v3251_v48 = vmul.f32 0.01, %v3227_v62  ;;  %vm3244_vm0 = vcmp.ge.f32.partialorder %v3232_v55, 0.0  ;;  %v3343_v30 = vld [vmem:[#allocation2 + $0x4] sm:$0x7] }
 0x2a6   : > { %3334 = vst [vmem:[#allocation2 + $0x34] sm:$0xf] %v5791_v31  ;;  %v3256_v2 = vmul.f32 0.01, %v3232_v55  ;;  %v3230_v35 = vadd.f32 %v3207_v1, %v2952_v38  ;;  %v2955_v36 = vadd.f32 %v6257_v43, %v2749_v20  ;;  %v2932_v3 = vpop.f32.mrf.mxu1  ;;  %v3376_v25 = vrot.slane %v3343_v30, 7  ;;  %v8269_v43 = vld [vmem:[#allocation36_spill] sm:$0xff] }
 0x2a7   : > { %v5794_v27 = vpack.c.bf16 %v3277_v8, %v3277_v8  ;;  %v3263_v39 = vsel %vm3239_vm15, %v3227_v62, %v3251_v48  ;;  %v2953_v12 = vadd.f32 %v2932_v3, %v2747_v21  ;;  %v6737_v63 = vld [vmem:[#allocation2 + $0x1c] ss:$12 sps:$4 sm:$0xff]   ;;  %v3356_v20 = vld [vmem:[#allocation2 + $0x54] sm:$0x8]  ;;  %v3385_v18 = vsel %vm7271_vm9, %v5610_v10, %v3384_v59 }
 0x2a8   : > { %v3275_v50 = vmul.f32 %v3263_v39, %v8265_v17  ;;  %v3268_v26 = vsel %vm3244_vm0, %v3232_v55, %v3256_v2  ;;  %vm3242_vm1 = vcmp.ge.f32.partialorder %v3230_v35, 0.0  ;;  %v3254_v14 = vmul.f32 0.01, %v3230_v35  ;;  %v3349_v24 = vld [vmem:[#allocation2 + $0x28] sm:$0x7]  ;;  %v6740_v8 = vld [vmem:[#allocation8 + $0xb0] sm:$0xff]  }
 0x2a9   : > { %3337 = vst [vmem:[#allocation2 + $0x58] sm:$0xf] %v5794_v27  ;;  %v3280_v53 = vmul.f32 %v3268_v26, %v8266_v49  ;;  %v3233_v1 = vadd.f32 %v6285_v45, %v2955_v36  ;;  %v3231_v19 = vadd.f32 %v3210_v54, %v2953_v12  ;;  %v7858_v34 = vld [vmem:[#allocation2 + $0x28] sm:$0x7]  ;;  %v7861_v52 = vld [vmem:[#allocation2 + $0x48] sm:$0x8]  ;;  %v3377_v33 = vsel %vm7271_vm9, %v5608_v16, %v3376_v25 }
 0x2aa   : > { %v5792_v41 = vpack.c.bf16 %v3275_v50, %v3275_v50  ;;  %v3266_v46 = vsel %vm3242_vm1, %v3230_v35, %v3254_v14  ;;  %v6735_v58 = vld [vmem:[#allocation2 + $0x4] ss:$12 sps:$4 sm:$0xff]   ;;  %v3388_v55 = vrot.slane %v3349_v24, 7  ;;  %v3984_v47 = vrot.slane %v7858_v34, 7  ;;  %v6742_v16 = vld [vmem:[#allocation8 + $0xe8] sm:$0xff]  }
 0x2ab   : > { %v3345_v51 = vld [vmem:[#allocation2 + $0x10] sm:$0x7]  ;;  %v5797_v11 = vpack.c.bf16 %v3280_v53, %v3280_v53  ;;  %v3278_v0 = vmul.f32 %v3266_v46, %v8267_v57  ;;  %vm3245_vm2 = vcmp.ge.f32.partialorder %v3233_v1, 0.0  ;;  %v3257_v44 = vmul.f32 0.01, %v3233_v1  ;;  %6326 = vmatprep.mubr.bf16.mxu0 %v6735_v58  ;;  %v8271_v35 = vld [vmem:[#allocation34_spill] sm:$0xff] }
 0x2ac   : > { %3335 = vst [vmem:[#allocation2 + $0x40] sm:$0xf] %v5792_v41  ;;  %vm3243_vm3 = vcmp.ge.f32.partialorder %v3231_v19, 0.0  ;;  %v3255_v40 = vmul.f32 0.01, %v3231_v19  ;;  %v3380_v62 = vrot.slane %v3345_v51, 7  ;;  %6327 = vmatmul.mubr.bf16.vlgmr.msra.gmra.mxu0 %v6737_v63  ;;  %v3389_v28 = vsel %vm7271_vm9, %v5611_v4, %v3388_v55 }
 0x2ad   : > { %3340 = vst [vmem:[#allocation2 + $0x7c] sm:$0xf] %v5797_v11  ;;  %v5795_v38 = vpack.c.bf16 %v3278_v0, %v3278_v0  ;;  %v3269_v45 = vsel %vm3245_vm2, %v3233_v1, %v3257_v44  ;;  %6359 = vmatpush3.bf16.msra.mxu0 %v8270_v61  ;;  %v3947_v48 = vld [vmem:[#allocation2 + $0x1c] sm:$0x7]  ;;  %v3731_v2 = vld [vmem:[#allocation2 + $0x14] sm:$0x1]  ;;  %v5618_v39 = vcombine.low %v3385_v18, %v3389_v28 }
 0x2ae   : > { %v3281_v60 = vmul.f32 %v3269_v45, %v8269_v43  ;;  %v3267_v21 = vsel %vm3243_vm3, %v3231_v19, %v3255_v40  ;;  %v3381_v13 = vsel %vm7271_vm9, %v5609_v22, %v3380_v62  ;;  %6360 = vmatprep.subr.bf16.mxu0 %v6739_v32  ;;  %v3351_v22 = vld [vmem:[#allocation2 + $0x34] sm:$0x7]  ;;  %v3355_v30 = vld [vmem:[#allocation2 + $0x4c] sm:$0x7]  ;;  %v3730_v23 = vld [vmem:[#allocation2 + $0x10] sm:$0xe]  ;;  %v3985_v63 = vsel %vm7271_vm9, %v5662_v37, %v3984_v47 }
 0x2af   : > { %3338 = vst [vmem:[#allocation2 + $0x64] sm:$0xf] %v5795_v38  ;;  %v3279_v36 = vmul.f32 %v3267_v21, %v8271_v35  ;;  %v5617_v3 = vcombine.low %v3377_v33, %v3381_v13  ;;  %v5614_v4 = vrot.slane %v7861_v52, 11  ;;  %v5615_v12 = vrot.slane %v3356_v20, 11  ;;  %v3729_v54 = vld [vmem:[#allocation2 + $0x8] sm:$0x1] }
 0x2b0   : > { %v5798_v27 = vpack.c.bf16 %v3281_v60, %v3281_v60  ;;  %v3980_v50 = vrot.slane %v3947_v48, 7  ;;  %v3357_v26 = vld [vmem:[#allocation2 + $0x58] sm:$0x7]  ;;  %v3728_v14 = vld [vmem:[#allocation2 + $0x4] sm:$0xe]  ;;  %v3766_v49 = vrot.slane %v3731_v2, 5 }
 0x2b1   : > { %v5796_v17 = vpack.c.bf16 %v3279_v36, %v3279_v36  ;;  %6302 = vmatprep.mubr.bf16.mxu1 %v5617_v3  ;;  %6361 = vmatpush3.bf16.msra.mxu0 %v6739_v32  ;;  %v3392_v56 = vrot.slane %v3351_v22, 7  ;;  %v3400_v10 = vrot.slane %v3355_v30, 7  ;;  %v3404_v59 = vrot.slane %v3357_v26, 7  ;;  %v8272_v1 = vld [vmem:[#allocation39_spill] sm:$0xff]  ;;  %v6746_v52 = vld [vmem:[#allocation8 + $0xa0] sm:$0xff]   ;;  %v6748_v40 = vld [vmem:[#allocation8 + $0x98] sm:$0xff]  }
 0x2b2   : > { %3341 = vst [vmem:[#allocation2 + $0x88] sm:$0xf] %v5798_v27  ;;  %6303 = vmatmul.mubr.bf16.vlgmr.msra.gmra.mxu1 %v5618_v39  ;;  %v5642_v53 = vrot.slane %v3730_v23, 9  ;;  %6362 = vmatprep.subr.bf16.mxu0 %v6742_v16  ;;  %v6743_v24 = vld [vmem:[#allocation2 + $0x4c] ss:$12 sps:$4 sm:$0xff]   ;;  %v5641_v46 = vrot.slane %v3728_v14, 9  ;;  %v3981_v51 = vsel %vm7271_vm9, %v5661_v42, %v3980_v50 }
 0x2b3   : > { %3339 = vst [vmem:[#allocation2 + $0x70] sm:$0xf] %v5796_v17  ;;  %6335 = vmatpush3.bf16.msra.mxu1 %v8272_v1  ;;  %v6741_v19 = vld [vmem:[#allocation2 + $0x34] ss:$12 sps:$4 sm:$0xff]   ;;  %v6744_v41 = vld [vmem:[#allocation8 + $0xa8] sm:$0xff]   ;;  %v3762_v58 = vrot.slane %v3729_v54, 5  ;;  %v3405_v11 = vsel %vm7271_vm9, %v5615_v12, %v3404_v59  ;;  %v5669_v57 = vcombine.low %v3981_v51, %v3985_v63  ;;  %v3393_v37 = vsel %vm7271_vm9, %v5612_v6, %v3392_v56 }
 0x2b4   : > { %v3353_v25 = vld [vmem:[#allocation2 + $0x40] sm:$0x7]  ;;  %6336 = vmatprep.subr.bf16.mxu1 %v6740_v8  ;;  %6330 = vmatprep.mubr.bf16.mxu0 %v6741_v19  ;;  %v3767_v44 = vsel %vm7277_vm10, %v5642_v53, %v3766_v49  ;;  %v3401_v32 = vsel %vm7271_vm9, %v5614_v4, %v3400_v10  ;;  %v6749_v62 = vld [vmem:[#allocation8 + $0xd0] sm:$0xff]   ;;  %v6751_v38 = vld [vmem:[#allocation8 + $0xc8] sm:$0xff]  }
 0x2b5   : > { %v3396_v34 = vrot.slane %v3353_v25, 7  ;;  %6331 = vmatmul.mubr.bf16.gmra.mxu0 %v6743_v24  ;;  %v5620_v15 = vcombine.low %v3401_v32, %v3405_v11  ;;  %v3763_v6 = vsel %vm7277_vm10, %v5641_v46, %v3762_v58  ;;  %v6750_v55 = vld [vmem:[#allocation8 + $0x90] sm:$0xff]   ;;  %v6752_v45 = vld [vmem:[#allocation8 + $0x88] sm:$0xff]   ;;  %v3952_v33 = vld [vmem:[#allocation2 + $0x3c] sm:$0x8] }
 0x2b6   : > { %6363 = vmatpush3.bf16.msra.mxu0 %v6742_v16  ;;  %6374 = vmatprep.mubr.bf16.mxu0 %v5669_v57  ;;  %v5649_v7 = vcombine.low %v3763_v6, %v3767_v44  ;;  %v6753_v47 = vld [vmem:[#allocation8 + $0xc0] sm:$0xff]   ;;  %v3950_v20 = vld [vmem:[#allocation2 + $0x30] sm:$0x8]  ;;  %v3954_v60 = vld [vmem:[#allocation2 + $0x48] sm:$0x8]  ;;  %v5664_v2 = vrot.slane %v3952_v33, 11 }
 0x2b7   : > { %v3397_v0 = vsel %vm7271_vm9, %v5613_v5, %v3396_v34  ;;  %6337 = vmatpush3.bf16.msra.mxu1 %v6740_v8  ;;  %6364 = vmatprep.subr.bf16.mxu0 %v6745_v9  ;;  %v6747_v5 = vld [vmem:[#allocation8 + $0xd8] sm:$0xff]   ;;  %v3953_v43 = vld [vmem:[#allocation2 + $0x40] sm:$0x7]  ;;  %v3956_v21 = vld [vmem:[#allocation2 + $0x54] sm:$0x8]  ;;  %v5663_v27 = vrot.slane %v3950_v20, 11 }
 0x2b8   : > { %v5619_v42 = vcombine.low %v3393_v37, %v3397_v0  ;;  %6338 = vmatprep.subr.bf16.mxu1 %v6744_v41  ;;  %v3957_v61 = vld [vmem:[#allocation2 + $0x58] sm:$0x7]  ;;  %v3735_v13 = vld [vmem:[#allocation2 + $0x2c] sm:$0x1]  ;;  %v3951_v28 = vld [vmem:[#allocation2 + $0x34] sm:$0x7] }
 0x2b9   : > { %v3955_v8 = vld [vmem:[#allocation2 + $0x4c] sm:$0x7]  ;;  %v3734_v16 = vld [vmem:[#allocation2 + $0x28] sm:$0xe]  ;;  %v6754_v48 = vld [vmem:[#allocation8 + $0x80] sm:$0xff]   ;;  %v3992_v35 = vrot.slane %v3953_v43, 7 }
 0x2ba   : > { %6306 = vmatprep.mubr.bf16.mxu1 %v5619_v42  ;;  %6365 = vmatpush3.bf16.msra.mxu0 %v6745_v9  ;;  %v3733_v36 = vld [vmem:[#allocation2 + $0x20] sm:$0x1]  ;;  %v6755_v3 = vld [vmem:[#allocation8 + $0x178] sm:$0xff]   ;;  %v5666_v18 = vrot.slane %v3956_v21, 11  ;;  %v4000_v22 = vrot.slane %v3957_v61, 7  ;;  %v3988_v39 = vrot.slane %v3951_v28, 7 }
 0x2bb   : > { %6307 = vmatmul.mubr.bf16.gmra.mxu1 %v5620_v15  ;;  %6366 = vmatprep.subr.bf16.mxu0 %v6747_v5  ;;  %v3738_v30 = vld [vmem:[#allocation2 + $0x40] sm:$0xe]  ;;  %v3739_v23 = vld [vmem:[#allocation2 + $0x44] sm:$0x1]  ;;  %v5665_v4 = vrot.slane %v3954_v60, 11  ;;  %v3774_v54 = vrot.slane %v3735_v13, 5  ;;  %v3993_v49 = vsel %vm7271_vm9, %v5664_v2, %v3992_v35 }
 0x2bc   : > { %6339 = vmatpush3.bf16.msra.mxu1 %v6744_v41  ;;  %6350 = vmatprep.mubr.bf16.mxu1 %v5649_v7  ;;  %v3732_v12 = vld [vmem:[#allocation2 + $0x1c] sm:$0xe]  ;;  %v3996_v17 = vrot.slane %v3955_v8, 7  ;;  %v5644_v50 = vrot.slane %v3734_v16, 9  ;;  %v3736_v26 = vld [vmem:[#allocation2 + $0x34] sm:$0xe]  ;;  %v4001_v1 = vsel %vm7271_vm9, %v5666_v18, %v4000_v22  ;;  %v3989_v34 = vsel %vm7271_vm9, %v5663_v27, %v3988_v39 }
 0x2bd   : > { %6340 = vmatprep.subr.bf16.mxu1 %v6746_v52  ;;  %v3737_v14 = vld [vmem:[#allocation2 + $0x38] sm:$0x1]  ;;  %v5646_v56 = vrot.slane %v3738_v30, 9  ;;  %v3782_v10 = vrot.slane %v3739_v23, 5  ;;  %v7911_v59 = vld [vmem:[#allocation2 + $0x20] sm:$0x1]  ;;  %v5670_v9 = vcombine.low %v3989_v34, %v3993_v49 }
 0x2be   : > { %6367 = vmatpush3.bf16.msra.mxu0 %v6747_v5  ;;  %v4337_v53 = vld [vmem:[#allocation2 + $0x2c] sm:$0x1]  ;;  %v5643_v19 = vrot.slane %v3732_v12, 9  ;;  %v3770_v63 = vrot.slane %v3733_v36, 5  ;;  %v3960_v25 = vld [vmem:[#allocation2 + $0x6c] sm:$0x8]  ;;  %v3997_v57 = vsel %vm7271_vm9, %v5665_v4, %v3996_v17  ;;  %v3775_v37 = vsel %vm7277_vm10, %v5644_v50, %v3774_v54 }
 0x2bf   : > { %6368 = vmatprep.subr.bf16.mxu0 %v6749_v62  ;;  %v3961_v24 = vld [vmem:[#allocation2 + $0x70] sm:$0x7]  ;;  %v6756_v41 = vld [vmem:[#allocation8 + $0x138] sm:$0xff]   ;;  %v5645_v46 = vrot.slane %v3736_v26, 9  ;;  %v3778_v58 = vrot.slane %v3737_v14, 5  ;;  %v5671_v32 = vcombine.low %v3997_v57, %v4001_v1  ;;  %v3783_v15 = vsel %vm7277_vm10, %v5646_v56, %v3782_v10  ;;  %v6759_v13 = vld [vmem:[#allocation8 + $0x168] sm:$0xff]  }
 0x2c0   : > { %6341 = vmatpush3.bf16.msra.mxu1 %v6746_v52  ;;  %v6757_v51 = vld [vmem:[#allocation8 + $0x170] sm:$0xff]   ;;  %v4336_v11 = vld [vmem:[#allocation2 + $0x28] sm:$0xe]  ;;  %v3958_v0 = vld [vmem:[#allocation2 + $0x60] sm:$0x8]  ;;  %v5668_v6 = vrot.slane %v3960_v25, 11 }
 0x2c1   : > { %6342 = vmatprep.subr.bf16.mxu1 %v6748_v40  ;;  %v3959_v44 = vld [vmem:[#allocation2 + $0x64] sm:$0x7]  ;;  %v3743_v42 = vld [vmem:[#allocation2 + $0x5c] sm:$0x1]  ;;  %v4008_v52 = vrot.slane %v3961_v24, 7  ;;  %v5667_v20 = vrot.slane %v3958_v0, 11 }
 0x2c2   : > { %6369 = vmatpush3.bf16.msra.mxu0 %v6749_v62  ;;  %v4334_v7 = vld [vmem:[#allocation2 + $0x1c] sm:$0xe]  ;;  %v3742_v5 = vld [vmem:[#allocation2 + $0x58] sm:$0xe]  ;;  %v6758_v62 = vld [vmem:[#allocation8 + $0x130] sm:$0xff]   ;;  %v4004_v43 = vrot.slane %v3959_v44, 7 }
 0x2c3   : > { %6370 = vmatprep.subr.bf16.mxu0 %v6751_v38  ;;  %v3740_v60 = vld [vmem:[#allocation2 + $0x4c] sm:$0xe]  ;;  %v3741_v21 = vld [vmem:[#allocation2 + $0x50] sm:$0x1]  ;;  %v5693_v28 = vrot.slane %v4334_v7, 9  ;;  %v5648_v8 = vrot.slane %v3742_v5, 9 }
 0x2c4   : > { %6343 = vmatpush3.bf16.msra.mxu1 %v6748_v40  ;;  %v3771_v40 = vsel %vm7277_vm10, %v5643_v19, %v3770_v63  ;;  %v3790_v16 = vrot.slane %v3743_v42, 5  ;;  %v5647_v35 = vrot.slane %v3740_v60, 9  ;;  %v3786_v36 = vrot.slane %v3741_v21, 5  ;;  %v6760_v23 = vld [vmem:[#allocation8 + $0x128] sm:$0xff]   ;;  %v6762_v27 = vld [vmem:[#allocation8 + $0x160] sm:$0xff]   ;;  %v6764_v50 = vld [vmem:[#allocation8 + $0x158] sm:$0xff]  }
 0x2c5   : > { %6344 = vmatprep.subr.bf16.mxu1 %v6750_v55  ;;  %v5650_v33 = vcombine.low %v3771_v40, %v3775_v37  ;;  %v6763_v54 = vld [vmem:[#allocation8 + $0x120] sm:$0xff]   ;;  %v6761_v17 = vld [vmem:[#allocation2 + $0x1c] ss:$12 sps:$4 sm:$0xff]   ;;  %v6766_v14 = vld [vmem:[#allocation8 + $0x150] sm:$0xff]  }
 0x2c6   : > { %6371 = vmatpush3.bf16.msra.mxu0 %v6751_v38  ;;  %v5694_v38 = vrot.slane %v4336_v11, 9  ;;  %v3791_v30 = vsel %vm7277_vm10, %v5648_v8, %v3790_v16  ;;  %v3787_v4 = vsel %vm7277_vm10, %v5647_v35, %v3786_v36  ;;  %v6765_v26 = vld [vmem:[#allocation8 + $0x118] sm:$0xff]   ;;  %v6767_v49 = vld [vmem:[#allocation8 + $0x110] sm:$0xff]   ;;  %v6768_v56 = vld [vmem:[#allocation8 + $0x148] sm:$0xff]  }
 0x2c7   : > { %6372 = vmatprep.subr.bf16.mxu0 %v6753_v47  ;;  %v5652_v12 = vcombine.low %v3787_v4, %v3791_v30  ;;  %v4340_v10 = vld [vmem:[#allocation2 + $0x40] sm:$0xe]  ;;  %v4344_v1 = vld [vmem:[#allocation2 + $0x58] sm:$0xe]  ;;  %v4345_v19 = vld [vmem:[#allocation2 + $0x5c] sm:$0x1] }
 0x2c8   : > { %6345 = vmatpush3.bf16.msra.mxu1 %v6750_v55  ;;  %v4368_v55 = vrot.slane %v7911_v59, 5  ;;  %v4341_v59 = vld [vmem:[#allocation2 + $0x44] sm:$0x1]  ;;  %v4338_v25 = vld [vmem:[#allocation2 + $0x34] sm:$0xe]  ;;  %v5696_v34 = vrot.slane %v4340_v10, 9 }
 0x2c9   : > { %6346 = vmatprep.subr.bf16.mxu1 %v6752_v45  ;;  %v6770_v63 = vld [vmem:[#allocation8 + $0x140] sm:$0xff]   ;;  %v4339_v24 = vld [vmem:[#allocation2 + $0x38] sm:$0x1]  ;;  %v4388_v11 = vrot.slane %v4345_v19, 5  ;;  %v5695_v57 = vrot.slane %v4338_v25, 9  ;;  %v6787_v10 = vld [vmem:[#allocation8 + $0x190] sm:$0xff]  }
 0x2ca   : > { %6373 = vmatpush3.bf16.msra.mxu0 %v6753_v47  ;;  %v3779_v47 = vsel %vm7277_vm10, %v5645_v46, %v3778_v58  ;;  %v4369_v22 = vsel %vm7277_vm10, %v5693_v28, %v4368_v55  ;;  %v4342_v46 = vld [vmem:[#allocation2 + $0x4c] sm:$0xe]  ;;  %v4343_v58 = vld [vmem:[#allocation2 + $0x50] sm:$0x1]  ;;  %v4376_v37 = vrot.slane %v4339_v24, 5  ;;  %v6772_v0 = vld [vmem:[#allocation8 + $0x1f8] sm:$0xff]  }
 0x2cb   : > { %6406 = vmatprep.subr.bf16.mxu0 %v6755_v3  ;;  %v5651_v61 = vcombine.low %v3779_v47, %v3783_v15  ;;  %v5697_v44 = vrot.slane %v4342_v46, 9  ;;  %v4384_v42 = vrot.slane %v4343_v58, 5  ;;  %v4347_v5 = vld [vmem:[#allocation2 + $0x68] sm:$0x1]  ;;  %v6774_v55 = vld [vmem:[#allocation8 + $0x1b8] sm:$0xff]  }
 0x2cc   : > { %6347 = vmatpush3.bf16.msra.mxu1 %v6752_v45  ;;  %v4372_v45 = vrot.slane %v4337_v53, 5  ;;  %v6769_v53 = vld [vmem:[#allocation8 + $0x108] sm:$0xff]   ;;  %v4377_v7 = vsel %vm7277_vm10, %v5695_v57, %v4376_v37  ;;  %v4554_v60 = vld [vmem:[#allocation2 + $0x3c] sm:$0x8]  ;;  %v4555_v21 = vld [vmem:[#allocation2 + $0x40] sm:$0x7] }
 0x2cd   : > { %6348 = vmatprep.subr.bf16.mxu1 %v6754_v48  ;;  %6375 = vmatmul.mubr.bf16.vlgmr.msra.gmra.mxu0 %v5670_v9  ;;  %v6771_v9 = vld [vmem:[#allocation8 + $0x100] sm:$0xff]   ;;  %v4392_v8 = vrot.slane %v4347_v5, 5  ;;  %v6775_v16 = vld [vmem:[#allocation2 + $0x4c] ss:$12 sps:$4 sm:$0xff]   ;;  %v5714_v36 = vrot.slane %v4554_v60, 11 }
 0x2ce   : > { %6378 = vmatprep.mubr.bf16.mxu0 %v5671_v32  ;;  %6407 = vmatpush3.bf16.msra.mxu0 %v6755_v3  ;;  %v4373_v2 = vsel %vm7277_vm10, %v5694_v38, %v4372_v45  ;;  %v4005_v3 = vsel %vm7271_vm9, %v5667_v20, %v4004_v43  ;;  %v6776_v38 = vld [vmem:[#allocation8 + $0x1f0] sm:$0xff]   ;;  %v4346_v45 = vld [vmem:[#allocation2 + $0x64] sm:$0xe]  ;;  %v4562_v25 = vld [vmem:[#allocation2 + $0x6c] sm:$0x8] }
 0x2cf   : > { %6408 = vmatprep.subr.bf16.mxu0 %v6757_v51  ;;  %v5701_v39 = vcombine.low %v4369_v22, %v4373_v2  ;;  %v4552_v43 = vld [vmem:[#allocation2 + $0x30] sm:$0x8]  ;;  %v5699_v28 = vrot.slane %v4346_v45, 9  ;;  %v4553_v2 = vld [vmem:[#allocation2 + $0x34] sm:$0x7]  ;;  %v5718_v57 = vrot.slane %v4562_v25, 11 }
 0x2d0   : > { %6349 = vmatpush3.bf16.msra.mxu1 %v6754_v48  ;;  %v4009_v48 = vsel %vm7271_vm9, %v5668_v6, %v4008_v52  ;;  %v4348_v6 = vld [vmem:[#allocation2 + $0x70] sm:$0xe]  ;;  %v4349_v52 = vld [vmem:[#allocation2 + $0x74] sm:$0x1]  ;;  %v5713_v22 = vrot.slane %v4552_v43, 11  ;;  %v4586_v30 = vrot.slane %v4553_v2, 7 }
 0x2d1   : > { %6382 = vmatprep.subr.bf16.mxu1 %v6756_v41  ;;  %v5672_v18 = vcombine.low %v4005_v3, %v4009_v48  ;;  %v5700_v47 = vrot.slane %v4348_v6, 9  ;;  %v4396_v20 = vrot.slane %v4349_v52, 5  ;;  %v6778_v48 = vld [vmem:[#allocation8 + $0x1e8] sm:$0xff]   ;;  %v4590_v3 = vrot.slane %v4555_v21, 7  ;;  %v6779_v4 = vld [vmem:[#allocation2 + $0x34] ss:$12 sps:$4 sm:$0xff]  }
 0x2d2   : > { %6409 = vmatpush3.bf16.msra.mxu0 %v6757_v51  ;;  %v5698_v51 = vrot.slane %v4344_v1, 9  ;;  %v6790_v1 = vld [vmem:[#allocation8 + $0x1c0] sm:$0xff]   ;;  %v4558_v19 = vld [vmem:[#allocation2 + $0x54] sm:$0x8]  ;;  %v4563_v24 = vld [vmem:[#allocation2 + $0x70] sm:$0x7] }
 0x2d3   : > { %6351 = vmatmul.mubr.bf16.vlgmr.msra.gmra.mxu1 %v5650_v33  ;;  %6410 = vmatprep.subr.bf16.mxu0 %v6759_v13  ;;  %v4397_v35 = vsel %vm7277_vm10, %v5700_v47, %v4396_v20  ;;  %v4557_v46 = vld [vmem:[#allocation2 + $0x4c] sm:$0x7]  ;;  %v5716_v58 = vrot.slane %v4558_v19, 11  ;;  %v4606_v37 = vrot.slane %v4563_v24, 7  ;;  %v4943_v45 = vld [vmem:[#allocation2 + $0x44] sm:$0x1] }
 0x2d4   : > { %6354 = vmatprep.mubr.bf16.mxu1 %v5651_v61  ;;  %6383 = vmatpush3.bf16.msra.mxu1 %v6756_v41  ;;  %v4380_v41 = vrot.slane %v4341_v59, 5  ;;  %v4389_v15 = vsel %vm7277_vm10, %v5698_v51, %v4388_v11  ;;  %v6773_v61 = vld [vmem:[#allocation2 + $0x34] ss:$12 sps:$4 sm:$0xff]   ;;  %v6788_v59 = vld [vmem:[#allocation8 + $0x1c8] sm:$0xff]   ;;  %v4564_v43 = vld [vmem:[#allocation2 + $0x78] sm:$0x8] }
 0x2d5   : > { %6384 = vmatprep.subr.bf16.mxu1 %v6758_v62  ;;  %6379 = vmatmul.mubr.bf16.gmra.mxu0 %v5672_v18  ;;  %v4393_v18 = vsel %vm7277_vm10, %v5699_v28, %v4392_v8  ;;  %v4560_v11 = vld [vmem:[#allocation2 + $0x60] sm:$0x8]  ;;  %v6792_v6 = vld [vmem:[#allocation2 + $0x4c] ss:$12 sps:$4 sm:$0xff]   ;;  %v4607_v5 = vsel %vm7271_vm9, %v5718_v57, %v4606_v37  ;;  %v6795_v20 = vld [vmem:[#allocation8 + $0x230] sm:$0xff]   ;;  %v5719_v2 = vrot.slane %v4564_v43, 11 }
 0x2d6   : > { %6411 = vmatpush3.bf16.msra.mxu0 %v6759_v13  ;;  %6422 = vmatprep.mubr.bf16.mxu0 %v5701_v39  ;;  %v4381_v32 = vsel %vm7277_vm10, %v5696_v34, %v4380_v41  ;;  %v6777_v13 = vld [vmem:[#allocation8 + $0x1b0] sm:$0xff]   ;;  %v6782_v39 = vld [vmem:[#allocation8 + $0x1e0] sm:$0xff]   ;;  %v4556_v41 = vld [vmem:[#allocation2 + $0x48] sm:$0x8] }
 0x2d7   : > { %6412 = vmatprep.subr.bf16.mxu0 %v6762_v27  ;;  %v5702_v40 = vcombine.low %v4377_v7, %v4381_v32  ;;  %v6791_v34 = vld [vmem:[#allocation8 + $0x180] sm:$0xff]   ;;  %v5717_v32 = vrot.slane %v4560_v11, 11  ;;  %v4565_v60 = vld [vmem:[#allocation2 + $0x7c] sm:$0x7]  ;;  %v4940_v28 = vld [vmem:[#allocation2 + $0x34] sm:$0xe] }
 0x2d8   : > { %6385 = vmatpush3.bf16.msra.mxu1 %v6758_v62  ;;  %v4385_v62 = vsel %vm7277_vm10, %v5697_v44, %v4384_v42  ;;  %v4594_v44 = vrot.slane %v4557_v46, 7  ;;  %v6794_v42 = vld [vmem:[#allocation8 + $0x238] sm:$0xff]   ;;  %v6793_v7 = vld [vmem:[#allocation2 + $0x64] ss:$12 sps:$4 sm:$0xff]   ;;  %v4949_v25 = vld [vmem:[#allocation2 + $0x68] sm:$0x1] }
 0x2d9   : > { %6386 = vmatprep.subr.bf16.mxu1 %v6760_v23  ;;  %v5703_v33 = vcombine.low %v4385_v62, %v4389_v15  ;;  %v4567_v62 = vld [vmem:[#allocation2 + $0x88] sm:$0x7]  ;;  %v4941_v8 = vld [vmem:[#allocation2 + $0x38] sm:$0x1]  ;;  %v4946_v31 = vld [vmem:[#allocation2 + $0x58] sm:$0xe] }
 0x2da   : > { %6413 = vmatpush3.bf16.msra.mxu0 %v6762_v27  ;;  %v6781_v27 = vld [vmem:[#allocation8 + $0x1a8] sm:$0xff]  }
 0x2db   : > { %6355 = vmatmul.mubr.bf16.gmra.mxu1 %v5652_v12  ;;  %6414 = vmatprep.subr.bf16.mxu0 %v6764_v50  ;;  %v4591_v12 = vsel %vm7271_vm9, %v5714_v36, %v4590_v3  ;;  %v6797_v36 = vld [vmem:[#allocation8 + $0x228] sm:$0xff]   ;;  %v5745_v3 = vrot.slane %v4940_v28, 9 }
 0x2dc   : > { %6387 = vmatpush3.bf16.msra.mxu1 %v6760_v23  ;;  %6398 = vmatprep.mubr.bf16.mxu1 %v6761_v17  ;;  %v5704_v23 = vcombine.low %v4393_v18, %v4397_v35  ;;  %v4587_v17 = vsel %vm7271_vm9, %v5713_v22, %v4586_v30  ;;  %v4610_v35 = vrot.slane %v4565_v60, 7  ;;  %v4974_v18 = vrot.slane %v4941_v8, 5  ;;  %v6796_v22 = vld [vmem:[#allocation2 + $0x7c] ss:$12 sps:$4 sm:$0xff]   ;;  %v4955_v37 = vld [vmem:[#allocation2 + $0x8c] sm:$0x1] }
 0x2dd   : > { %6388 = vmatprep.subr.bf16.mxu1 %v6763_v54  ;;  %v4954_v57 = vld [vmem:[#allocation2 + $0x88] sm:$0xe] }
 0x2de   : > { %6415 = vmatpush3.bf16.msra.mxu0 %v6764_v50  ;;  %v6783_v50 = vld [vmem:[#allocation8 + $0x1a0] sm:$0xff]  }
 0x2df   : > { %6416 = vmatprep.subr.bf16.mxu0 %v6766_v14 }
 0x2e0   : > { %6389 = vmatpush3.bf16.msra.mxu1 %v6763_v54  ;;  %v6780_v54 = vld [vmem:[#allocation2 + $0x64] ss:$12 sps:$4 sm:$0xff]  }
 0x2e1   : > { %6390 = vmatprep.subr.bf16.mxu1 %v6765_v26 }
 0x2e2   : > { %6417 = vmatpush3.bf16.msra.mxu0 %v6766_v14  ;;  %v6784_v14 = vld [vmem:[#allocation8 + $0x1d8] sm:$0xff]  }
 0x2e3   : > { %6418 = vmatprep.subr.bf16.mxu0 %v6768_v56 }
 0x2e4   : > { %6391 = vmatpush3.bf16.msra.mxu1 %v6765_v26  ;;  %v5721_v26 = vcombine.low %v4587_v17, %v4591_v12  ;;  %v6798_v12 = vld [vmem:[#allocation8 + $0x220] sm:$0xff]   ;;  %v6799_v17 = vld [vmem:[#allocation8 + $0x218] sm:$0xff]  }
 0x2e5   : > { %6392 = vmatprep.subr.bf16.mxu1 %v6767_v49 }
 0x2e6   : > { %6419 = vmatpush3.bf16.msra.mxu0 %v6768_v56  ;;  %v6786_v56 = vld [vmem:[#allocation8 + $0x1d0] sm:$0xff]  }
 0x2e7   : > { %6420 = vmatprep.subr.bf16.mxu0 %v6770_v63 }
 0x2e8   : > { %6393 = vmatpush3.bf16.msra.mxu1 %v6767_v49  ;;  %v6785_v49 = vld [vmem:[#allocation8 + $0x198] sm:$0xff]  }
 0x2e9   : > { %6394 = vmatprep.subr.bf16.mxu1 %v6769_v53 }
 0x2ea   : > { %6421 = vmatpush3.bf16.msra.mxu0 %v6770_v63  ;;  %v4559_v63 = vld [vmem:[#allocation2 + $0x58] sm:$0x7] }
 0x2eb   : > { %6454 = vmatprep.subr.bf16.mxu0 %v6772_v0  ;;  %v4598_v51 = vrot.slane %v4559_v63, 7  ;;  %v4948_v63 = vld [vmem:[#allocation2 + $0x64] sm:$0xe] }
 0x2ec   : > { %6395 = vmatpush3.bf16.msra.mxu1 %v6769_v53  ;;  %v6789_v53 = vld [vmem:[#allocation8 + $0x188] sm:$0xff]  }
 0x2ed   : > { %6396 = vmatprep.subr.bf16.mxu1 %v6771_v9  ;;  %6423 = vmatmul.mubr.bf16.vlgmr.msra.gmra.mxu0 %v5702_v40  ;;  %v4599_v52 = vsel %vm7271_vm9, %v5716_v58, %v4598_v51  ;;  %v4566_v40 = vld [vmem:[#allocation2 + $0x84] sm:$0x8]  ;;  %v5749_v58 = vrot.slane %v4948_v63, 9  ;;  %v4990_v51 = vrot.slane %v4949_v25, 5 }
 0x2ee   : > { %6426 = vmatprep.mubr.bf16.mxu0 %v5703_v33  ;;  %6455 = vmatpush3.bf16.msra.mxu0 %v6772_v0  ;;  %v5715_v0 = vrot.slane %v4556_v41, 11 }
 0x2ef   : > { %6456 = vmatprep.subr.bf16.mxu0 %v6776_v38 }
 0x2f0   : > { %6397 = vmatpush3.bf16.msra.mxu1 %v6771_v9  ;;  %v4561_v9 = vld [vmem:[#allocation2 + $0x64] sm:$0x7] }
 0x2f1   : > { %6430 = vmatprep.subr.bf16.mxu1 %v6774_v55  ;;  %v4602_v15 = vrot.slane %v4561_v9, 7 }
 0x2f2   : > { %6457 = vmatpush3.bf16.msra.mxu0 %v6776_v38  ;;  %v4942_v38 = vld [vmem:[#allocation2 + $0x40] sm:$0xe] }
 0x2f3   : > { %6399 = vmatmul.mubr.bf16.vlgmr.msra.gmra.mxu1 %v6773_v61  ;;  %6458 = vmatprep.subr.bf16.mxu0 %v6778_v48  ;;  %v4603_v47 = vsel %vm7271_vm9, %v5717_v32, %v4602_v15  ;;  %v5720_v61 = vrot.slane %v4566_v40, 11  ;;  %v4952_v32 = vld [vmem:[#allocation2 + $0x7c] sm:$0xe]  ;;  %v4953_v15 = vld [vmem:[#allocation2 + $0x80] sm:$0x1] }
 0x2f4   : > { %6402 = vmatprep.mubr.bf16.mxu1 %v6775_v16  ;;  %6431 = vmatpush3.bf16.msra.mxu1 %v6774_v55  ;;  %v4595_v55 = vsel %vm7271_vm9, %v5715_v0, %v4594_v44  ;;  %v5723_v21 = vcombine.low %v4603_v47, %v4607_v5  ;;  %v5746_v16 = vrot.slane %v4942_v38, 9  ;;  %v5751_v5 = vrot.slane %v4952_v32, 9 }
 0x2f5   : > { %6432 = vmatprep.subr.bf16.mxu1 %v6777_v13  ;;  %6427 = vmatmul.mubr.bf16.gmra.mxu0 %v5704_v23  ;;  %v5722_v33 = vcombine.low %v4595_v55, %v4599_v52  ;;  %v5752_v52 = vrot.slane %v4954_v57, 9  ;;  %v4998_v40 = vrot.slane %v4953_v15, 5 }
 0x2f6   : > { %6459 = vmatpush3.bf16.msra.mxu0 %v6778_v48  ;;  %6470 = vmatprep.mubr.bf16.mxu0 %v6779_v4  ;;  %v4978_v48 = vrot.slane %v4943_v45, 5  ;;  %v4975_v4 = vsel %vm7277_vm10, %v5745_v3, %v4974_v18 }
 0x2f7   : > { %6460 = vmatprep.subr.bf16.mxu0 %v6782_v39  ;;  %v4999_v55 = vsel %vm7277_vm10, %v5751_v5, %v4998_v40 }
 0x2f8   : > { %6433 = vmatpush3.bf16.msra.mxu1 %v6777_v13  ;;  %v4614_v13 = vrot.slane %v4567_v62, 7  ;;  %v4979_v23 = vsel %vm7277_vm10, %v5746_v16, %v4978_v48 }
 0x2f9   : > { %6434 = vmatprep.subr.bf16.mxu1 %v6781_v27 }
 0x2fa   : > { %6461 = vmatpush3.bf16.msra.mxu0 %v6782_v39  ;;  %v4615_v30 = vsel %vm7271_vm9, %v5720_v61, %v4614_v13 }
 0x2fb   : > { %6403 = vmatmul.mubr.bf16.gmra.mxu1 %v6780_v54  ;;  %6462 = vmatprep.subr.bf16.mxu0 %v6784_v14  ;;  %v5753_v54 = vcombine.low %v4975_v4, %v4979_v23 }
 0x2fc   : > { %6435 = vmatpush3.bf16.msra.mxu1 %v6781_v27  ;;  %6446 = vmatprep.mubr.bf16.mxu1 %v5721_v26  ;;  %v4611_v27 = vsel %vm7271_vm9, %v5719_v2, %v4610_v35  ;;  %v6801_v26 = vld [vmem:[#allocation8 + $0x208] sm:$0xff]  }
 0x2fd   : > { %6436 = vmatprep.subr.bf16.mxu1 %v6783_v50  ;;  %v5724_v39 = vcombine.low %v4611_v27, %v4615_v30 }
 0x2fe   : > { %6463 = vmatpush3.bf16.msra.mxu0 %v6784_v14  ;;  %v4947_v14 = vld [vmem:[#allocation2 + $0x5c] sm:$0x1] }
 0x2ff   : > { %6464 = vmatprep.subr.bf16.mxu0 %v6786_v56  ;;  %v4986_v19 = vrot.slane %v4947_v14, 5 }
 0x300   : > { %6437 = vmatpush3.bf16.msra.mxu1 %v6783_v50  ;;  %v6800_v50 = vld [vmem:[#allocation8 + $0x210] sm:$0xff]  }
 0x301   : > { %6438 = vmatprep.subr.bf16.mxu1 %v6785_v49 }
 0x302   : > { %6465 = vmatpush3.bf16.msra.mxu0 %v6786_v56  ;;  %v4951_v56 = vld [vmem:[#allocation2 + $0x74] sm:$0x1] }
 0x303   : > { %6466 = vmatprep.subr.bf16.mxu0 %v6788_v59 }
 0x304   : > { %6439 = vmatpush3.bf16.msra.mxu1 %v6785_v49  ;;  %v4950_v49 = vld [vmem:[#allocation2 + $0x70] sm:$0xe] }
 0x305   : > { %6440 = vmatprep.subr.bf16.mxu1 %v6787_v10  ;;  %v5750_v24 = vrot.slane %v4950_v49, 9 }
 0x306   : > { %6467 = vmatpush3.bf16.msra.mxu0 %v6788_v59  ;;  %v4944_v59 = vld [vmem:[#allocation2 + $0x4c] sm:$0xe] }
 0x307   : > { %6468 = vmatprep.subr.bf16.mxu0 %v6790_v1  ;;  %v5747_v41 = vrot.slane %v4944_v59, 9 }
 0x308   : > { %6441 = vmatpush3.bf16.msra.mxu1 %v6787_v10  ;;  %v6802_v10 = vld [vmem:[#allocation8 + $0x200] sm:$0xff]  }
 0x309   : > { %6442 = vmatprep.subr.bf16.mxu1 %v6789_v53 }
 0x30a   : > { %6469 = vmatpush3.bf16.msra.mxu0 %v6790_v1  ;;  %v5748_v1 = vrot.slane %v4946_v31, 9 }
 0x30c   : > { %6443 = vmatpush3.bf16.msra.mxu1 %v6789_v53  ;;  %v4945_v53 = vld [vmem:[#allocation2 + $0x50] sm:$0x1]  ;;  %v4987_v11 = vsel %vm7277_vm10, %v5748_v1, %v4986_v19 }
 0x30d   : > { %6444 = vmatprep.subr.bf16.mxu1 %v6791_v34  ;;  %6471 = vmatmul.mubr.bf16.vlgmr.msra.gmra.mxu0 %v6792_v6  ;;  %v4982_v46 = vrot.slane %v4945_v53, 5 }
 0x30e   : > { %6474 = vmatprep.mubr.bf16.mxu0 %v6793_v7  ;;  %v5002_v7 = vrot.slane %v4955_v37, 5 }
 0x30f   : > { %v4983_v0 = vsel %vm7277_vm10, %v5747_v41, %v4982_v46 }
 0x310   : > { %6445 = vmatpush3.bf16.msra.mxu1 %v6791_v34  ;;  %v4994_v34 = vrot.slane %v4951_v56, 5  ;;  %v5754_v44 = vcombine.low %v4983_v0, %v4987_v11  ;;  %v5003_v62 = vsel %vm7277_vm10, %v5752_v52, %v5002_v7  ;;  %v5616_v11 = vld [vmem:[%s8139_s7] ss:$0 sm:$0xff] }
 0x311   : > { %6478 = vmatprep.subr.bf16.mxu1 %v6794_v42  ;;  %v5756_v38 = vcombine.low %v4999_v55, %v5003_v62 }
 0x312   : > { %v4995_v9 = vsel %vm7277_vm10, %v5750_v24, %v4994_v34 }
 0x313   : > { %6447 = vmatmul.mubr.bf16.vlgmr.msra.gmra.mxu1 %v5722_v33 }
 0x314   : > { %6450 = vmatprep.mubr.bf16.mxu1 %v5723_v21  ;;  %6479 = vmatpush3.bf16.msra.mxu1 %v6794_v42  ;;  %v4991_v42 = vsel %vm7277_vm10, %v5749_v58, %v4990_v51 }
 0x315   : > { %6480 = vmatprep.subr.bf16.mxu1 %v6795_v20  ;;  %6475 = vmatmul.mubr.bf16.gmra.mxu0 %v6796_v22  ;;  %v5755_v6 = vcombine.low %v4991_v42, %v4995_v9 }
 0x318   : > { %6481 = vmatpush3.bf16.msra.mxu1 %v6795_v20 }
 0x319   : > { %6482 = vmatprep.subr.bf16.mxu1 %v6797_v36 }
 0x31b   : > { %6451 = vmatmul.mubr.bf16.gmra.mxu1 %v5724_v39 }
 0x31c   : > { %6483 = vmatpush3.bf16.msra.mxu1 %v6797_v36  ;;  %6494 = vmatprep.mubr.bf16.mxu1 %v5753_v54 }
 0x31d   : > { %6484 = vmatprep.subr.bf16.mxu1 %v6798_v12 }
 0x320   : > { %6485 = vmatpush3.bf16.msra.mxu1 %v6798_v12 }
 0x321   : > { %6486 = vmatprep.subr.bf16.mxu1 %v6799_v17 }
 0x324   : > { %6487 = vmatpush3.bf16.msra.mxu1 %v6799_v17 }
 0x325   : > { %6488 = vmatprep.subr.bf16.mxu1 %v6800_v50 }
 0x328   : > { %6489 = vmatpush3.bf16.msra.mxu1 %v6800_v50 }
 0x329   : > { %6490 = vmatprep.subr.bf16.mxu1 %v6801_v26 }
 0x32c   : > { %6491 = vmatpush3.bf16.msra.mxu1 %v6801_v26 }
 0x32d   : > { %6492 = vmatprep.subr.bf16.mxu1 %v6802_v10 }
 0x330   : > { %6493 = vmatpush3.bf16.msra.mxu1 %v6802_v10 }
 0x333   : > { %6495 = vmatmul.mubr.bf16.vlgmr.msra.gmra.mxu1 %v5754_v44 }
 0x334   : > { %6498 = vmatprep.mubr.bf16.mxu1 %v5755_v6 }
 0x33b   : > { %6499 = vmatmul.mubr.bf16.gmra.mxu1 %v5756_v38 }
 0x36c   : > { %v6328_v43 = vpop.f32.mrf.mxu0 }
 0x36e   : > { %v3689_v21 = vpop.f32.mrf.mxu0 }
 0x370   : > { %v6329_v13 = vpop.f32.mrf.mxu0 }
 0x372   : > { %v6304_v45 = vpop.f32.mrf.mxu1  ;;  %v3692_v8 = vpop.f32.mrf.mxu0 }
 0x373   : > { %v3536_v57 = vadd.f32 %v6304_v45, %v5616_v11 }
 0x374   : > { %v3527_v33 = vpop.f32.mrf.mxu1 }
 0x375   : > { %v6332_v48 = vpop.f32.mrf.mxu0  ;;  %v3528_v44 = vadd.f32 %v5616_v11, %v3527_v33  ;;  %v3722_v32 = vadd.f32 %v6328_v43, %v3536_v57 }
 0x376   : > { %v6305_v47 = vpop.f32.mrf.mxu1 }
 0x377   : > { %v7986_v35 = vpop.f32.mrf.mxu0  ;;  %v3539_v42 = vadd.f32 %v6305_v47, %v5616_v11  ;;  %v3720_v5 = vadd.f32 %v3689_v21, %v3528_v44 }
 0x378   : > { %v3530_v20 = vpop.f32.mrf.mxu1 }
 0x379   : > { %v7988_v36 = vpop.f32.mrf.mxu0  ;;  %v3531_v6 = vadd.f32 %v5616_v11, %v3530_v20  ;;  %v3723_v38 = vadd.f32 %v6329_v13, %v3539_v42 }
 0x37b   : > { %v6308_v60 = vpop.f32.mrf.mxu1  ;;  %v7990_v18 = vpop.f32.mrf.mxu0 }
 0x37c   : > { %v3552_v62 = vadd.f32 %v6308_v60, %v5616_v11 }
 0x37d   : > { %v3543_v61 = vpop.f32.mrf.mxu1 }
 0x37e   : > { %v3726_v47 = vadd.f32 %v6332_v48, %v3552_v62 }
 0x37f   : > { %v6309_v28 = vpop.f32.mrf.mxu1 }
 0x381   : > { %v7984_v16 = vpop.f32.mrf.mxu1 }
 0x382   : > { %v3547_v20 = vadd.f32 %v5616_v11, %v7984_v16 }
 0x38d   : > { %v6376_v30 = vpop.f32.mrf.mxu0 }
 0x38f   : > { %v4125_v27 = vpop.f32.mrf.mxu0 }
 0x391   : > { %v6377_v4 = vpop.f32.mrf.mxu0 }
 0x393   : > { %v6352_v2 = vpop.f32.mrf.mxu1  ;;  %v4128_v54 = vpop.f32.mrf.mxu0 }
 0x394   : > { %v3940_v7 = vadd.f32 %v6352_v2, %v3722_v32 }
 0x395   : > { %v3907_v29 = vpop.f32.mrf.mxu1  ;;  %v7996_v50 = vpop.f32.mrf.mxu0 }
 0x396   : > { %v3938_v55 = vadd.f32 %v3907_v29, %v3720_v5 }
 0x397   : > { %v6353_v3 = vpop.f32.mrf.mxu1  ;;  %v7998_v31 = vpop.f32.mrf.mxu0 }
 0x398   : > { %v3941_v45 = vadd.f32 %v6353_v3, %v3723_v38  ;;  %v4156_v57 = vadd.f32 %v4125_v27, %v3938_v55  ;;  %v3725_v27 = vadd.f32 %v7990_v18, %v3547_v20 }
 0x399   : > { %v3910_v22 = vpop.f32.mrf.mxu1  ;;  %v8000_v49 = vpop.f32.mrf.mxu0 }
 0x39a   : > { %v4159_v29 = vadd.f32 %v6377_v4, %v3941_v45  ;;  %v8288_v45 = vld [vmem:[#allocation23_spill] sm:$0xff] }
 0x39b   : > { %v6356_v23 = vpop.f32.mrf.mxu1  ;;  %v8002_v10 = vpop.f32.mrf.mxu0 }
 0x39c   : > { %8274 = vst [vmem:[#allocation38_spill] sm:$0xff] %v8002_v10  ;;  %v4158_v10 = vadd.f32 %v6376_v30, %v3940_v7  ;;  %v8281_v30 = vld [vmem:[#allocation14_spill] sm:$0xff] }
 0x39d   : > { %v3923_v39 = vpop.f32.mrf.mxu1  ;;  %v485_v44 = vsub.s32 1, %v8281_v30 }
 0x39f   : > { %v7992_v12 = vpop.f32.mrf.mxu1 }
 0x3a1   : > { %v7994_v17 = vpop.f32.mrf.mxu1 }
 0x3ad   : > { %v6424_v53 = vpop.f32.mrf.mxu0 }
 0x3af   : > { %v4513_v19 = vpop.f32.mrf.mxu0 }
 0x3b1   : > { %v6425_v25 = vpop.f32.mrf.mxu0 }
 0x3b3   : > { %v6400_v26 = vpop.f32.mrf.mxu1  ;;  %v8008_v34 = vpop.f32.mrf.mxu0 }
 0x3b4   : > { %v4328_v43 = vadd.f32 %v6400_v26, %v4158_v10 }
 0x3b5   : > { %v4295_v14 = vpop.f32.mrf.mxu1  ;;  %v8012_v46 = vpop.f32.mrf.mxu0 }
 0x3b6   : > { %8277 = vst [vmem:[#allocation55_spill] sm:$0xff] %v8012_v46  ;;  %v4326_v60 = vadd.f32 %v4295_v14, %v4156_v57 }
 0x3b7   : > { %v6401_v56 = vpop.f32.mrf.mxu1  ;;  %v8014_v51 = vpop.f32.mrf.mxu0 }
 0x3b8   : > { %8278 = vst [vmem:[#allocation57_spill] sm:$0xff] %v8014_v51  ;;  %v3544_v51 = vadd.f32 %v5616_v11, %v3543_v61  ;;  %v4544_v4 = vadd.f32 %v4513_v19, %v4326_v60 }
 0x3b9   : > { %v4298_v59 = vpop.f32.mrf.mxu1  ;;  %v8019_v37 = vpop.f32.mrf.mxu0 }
 0x3ba   : > { %8279 = vst [vmem:[#allocation40_spill] sm:$0xff] %v8019_v37  ;;  %v3724_v21 = vadd.f32 %v7986_v35, %v3544_v51 }
 0x3bb   : > { %v6404_v1 = vpop.f32.mrf.mxu1  ;;  %v8021_v15 = vpop.f32.mrf.mxu0 }
 0x3bc   : > { %8280 = vst [vmem:[#allocation41_spill] sm:$0xff] %v8021_v15  ;;  %v3944_v15 = vadd.f32 %v6356_v23, %v3726_v47  ;;  %v3942_v61 = vadd.f32 %v3923_v39, %v3724_v21  ;;  %v3943_v39 = vadd.f32 %v7994_v17, %v3725_v27 }
 0x3bd   : > { %v8004_v63 = vpop.f32.mrf.mxu1 }
 0x3be   : > { %v4162_v23 = vadd.f32 %v7996_v50, %v3944_v15 }
 0x3bf   : > { %v8006_v24 = vpop.f32.mrf.mxu1 }
 0x3c0   : > { %8275 = vst [vmem:[#allocation47_spill] sm:$0xff] %v8006_v24  ;;  %v3555_v24 = vadd.f32 %v6309_v28, %v5616_v11  ;;  %v4329_v28 = vadd.f32 %v6401_v56, %v4159_v29  ;;  %v8284_v11 = vld [vmem:[#allocation55_spill] sm:$0xff] }
 0x3c1   : > { %v8010_v41 = vpop.f32.mrf.mxu1  ;;  %v8289_v47 = vld [vmem:[#allocation40_spill] sm:$0xff] }
 0x3c2   : > { %8276 = vst [vmem:[#allocation53_spill] sm:$0xff] %v8010_v41  ;;  %v3721_v41 = vadd.f32 %v3692_v8, %v3531_v6  ;;  %v3727_v8 = vadd.f32 %v7988_v36, %v3555_v24  ;;  %v4332_v36 = vadd.f32 %v6404_v1, %v4162_v23  ;;  %v4547_v56 = vadd.f32 %v6425_v25, %v4329_v28 }
 0x3c4   : > { %v3939_v33 = vadd.f32 %v3910_v22, %v3721_v41  ;;  %v4546_v22 = vadd.f32 %v6424_v53, %v4328_v43  ;;  %v3945_v48 = vadd.f32 %v7992_v12, %v3727_v8  ;;  %v6803_v12 = vld [vmem:[%s8135_s3] sm:$0x3] }
 0x3c5   : > { %v8035_v18 = vrot.slane %v6803_v12, %v485_v44  ;;  %v8283_v41 = vld [vmem:[#allocation38_spill] sm:$0xff] }
 0x3c6   : > { %v4157_v3 = vadd.f32 %v4128_v54, %v3939_v33  ;;  %v4160_v54 = vadd.f32 %v7998_v31, %v3942_v61  ;;  %v8290_v61 = vld [vmem:[#allocation41_spill] sm:$0xff] }
 0x3c7   : > { %v8282_v24 = vld [vmem:[#allocation47_spill] sm:$0xff]  ;;  %v680_v33 = vadd.f32 %v8288_v45, %v8035_v18 }
 0x3c8   : > { %v4327_v16 = vadd.f32 %v4298_v59, %v4157_v3  ;;  %v4330_v50 = vadd.f32 %v8004_v63, %v4160_v54  ;;  %v4163_v59 = vadd.f32 %v8000_v49, %v3945_v48  ;;  %v8285_v49 = vld [vmem:[#allocation17_spill] sm:$0xff] }
 0x3c9   : > { %v670_v15 = vadd.f32 %v8285_v49, %v8035_v18 }
 0x3ca   : > { %v4545_v53 = vadd.f32 %v8008_v34, %v4327_v16  ;;  %v4333_v25 = vadd.f32 %v8282_v24, %v4163_v59  ;;  %v8286_v34 = vld [vmem:[#allocation53_spill] sm:$0xff] }
 0x3cc   : > { %v4551_v43 = vadd.f32 %v8289_v47, %v4333_v25 }
 0x3cd   : > { %v6472_v40 = vpop.f32.mrf.mxu0 }
 0x3cf   : > { %v4901_v37 = vpop.f32.mrf.mxu0 }
 0x3d1   : > { %v6473_v13 = vpop.f32.mrf.mxu0 }
 0x3d3   : > { %v6448_v58 = vpop.f32.mrf.mxu1  ;;  %v4904_v14 = vpop.f32.mrf.mxu0 }
 0x3d4   : > { %v4764_v26 = vadd.f32 %v6448_v58, %v4546_v22  ;;  %v4161_v58 = vadd.f32 %v8283_v41, %v3943_v39 }
 0x3d5   : > { %v4731_v9 = vpop.f32.mrf.mxu1  ;;  %v6476_v1 = vpop.f32.mrf.mxu0 }
 0x3d6   : > { %v4762_v10 = vadd.f32 %v4731_v9, %v4544_v4  ;;  %v4934_v31 = vadd.f32 %v6472_v40, %v4764_v26  ;;  %v4550_v9 = vadd.f32 %v8284_v11, %v4332_v36  ;;  %v4331_v6 = vadd.f32 %v8286_v34, %v4161_v58  ;;  %v8292_v36 = vld [vmem:[#allocation21_spill] sm:$0xff]  ;;  %v8294_v11 = vld [vmem:[#allocation27_spill] sm:$0xff] }
 0x3d7   : > { %v6449_v0 = vpop.f32.mrf.mxu1  ;;  %v4917_v62 = vpop.f32.mrf.mxu0  ;;  %v674_v54 = vadd.f32 %v8292_v36, %v8035_v18  ;;  %v8295_v34 = vld [vmem:[#allocation33_spill] sm:$0xff] }
 0x3d8   : > { %v4765_v17 = vadd.f32 %v6449_v0, %v4547_v56  ;;  %v4932_v63 = vadd.f32 %v4901_v37, %v4762_v10  ;;  %v8287_v0 = vld [vmem:[#allocation57_spill] sm:$0xff]  ;;  %v4549_v8 = vadd.f32 %v8290_v61, %v4331_v6  ;;  %v704_v6 = vadd.f32 %v8295_v34, %v8035_v18 }
 0x3d9   : > { %v4734_v52 = vpop.f32.mrf.mxu1  ;;  %v4548_v5 = vadd.f32 %v8287_v0, %v4330_v50  ;;  %v6477_v28 = vpop.f32.mrf.mxu0 }
 0x3da   : > { %v4763_v51 = vadd.f32 %v4734_v52, %v4545_v53  ;;  %v4935_v38 = vadd.f32 %v6473_v13, %v4765_v17  ;;  %v8293_v17 = vld [vmem:[#allocation31_spill] sm:$0xff] }
 0x3db   : > { %v6452_v46 = vpop.f32.mrf.mxu1  ;;  %v4920_v50 = vpop.f32.mrf.mxu0 }
 0x3dc   : > { %v4768_v7 = vadd.f32 %v6452_v46, %v4550_v9  ;;  %v4933_v20 = vadd.f32 %v4904_v14, %v4763_v51  ;;  %v690_v9 = vadd.f32 %v8294_v11, %v8035_v18 }
 0x3dd   : > { %v4747_v2 = vpop.f32.mrf.mxu1 }
 0x3de   : > { %v4766_v37 = vadd.f32 %v4747_v2, %v4548_v5  ;;  %v4938_v44 = vadd.f32 %v6476_v1, %v4768_v7  ;;  %v8291_v2 = vld [vmem:[#allocation25_spill] sm:$0xff]  ;;  %v700_v1 = vadd.f32 %v8293_v17, %v8035_v18 }
 0x3df   : > { %v6453_v35 = vpop.f32.mrf.mxu1  ;;  %v684_v27 = vadd.f32 %v8291_v2, %v8035_v18 }
 0x3e0   : > { %v4769_v29 = vadd.f32 %v6453_v35, %v4551_v43  ;;  %v4936_v26 = vadd.f32 %v4917_v62, %v4766_v37 }
 0x3e1   : > { %v4750_v19 = vpop.f32.mrf.mxu1 }
 0x3e2   : > { %v4767_v16 = vadd.f32 %v4750_v19, %v4549_v8  ;;  %v4939_v12 = vadd.f32 %v6477_v28, %v4769_v29 }
 0x3e4   : > { %v4937_v25 = vadd.f32 %v4920_v50, %v4767_v16 }
 0x3f3   : > { %v6496_v42 = vpop.f32.mrf.mxu1 }
 0x3f4   : > { %v5152_v32 = vadd.f32 %v6496_v42, %v4934_v31 }
 0x3f5   : > { %v5119_v40 = vpop.f32.mrf.mxu1 }
 0x3f6   : > { %vm5160_vm9 = vcmp.ge.f32.partialorder %v5152_v32, 0.0  ;;  %v5168_v55 = vmul.f32 0.01, %v5152_v32  ;;  %v5150_v52 = vadd.f32 %v5119_v40, %v4932_v63  ;;  %v8296_v40 = vld [vmem:[#allocation29_spill] sm:$0xff] }
 0x3f7   : > { %v6497_v57 = vpop.f32.mrf.mxu1  ;;  %v694_v62 = vadd.f32 %v8296_v40, %v8035_v18 }
 0x3f8   : > { %v5176_v21 = vsel %vm5160_vm9, %v5152_v32, %v5168_v55  ;;  %vm5158_vm10 = vcmp.ge.f32.partialorder %v5150_v52, 0.0  ;;  %v5166_v46 = vmul.f32 0.01, %v5150_v52  ;;  %v5153_v60 = vadd.f32 %v6497_v57, %v4935_v38 }
 0x3f9   : > { %v5184_v3 = vadd.f32 %v5176_v21, %v680_v33  ;;  %v5122_v30 = vpop.f32.mrf.mxu1 }
 0x3fa   : > { %v5174_v13 = vsel %vm5158_vm10, %v5150_v52, %v5166_v46  ;;  %vm5161_vm4 = vcmp.ge.f32.partialorder %v5153_v60, 0.0  ;;  %v5169_v22 = vmul.f32 0.01, %v5153_v60  ;;  %v5151_v48 = vadd.f32 %v5122_v30, %v4933_v20 }
 0x3fb   : > { %5192 = vst [vmem:[%s8056_s21 + $0x10] sm:$0xff] %v5184_v3  ;;  %v5182_v23 = vadd.f32 %v5174_v13, %v670_v15  ;;  %v6500_v35 = vpop.f32.mrf.mxu1 }
 0x3fc   : > { %v5177_v4 = vsel %vm5161_vm4, %v5153_v60, %v5169_v22  ;;  %vm5159_vm5 = vcmp.ge.f32.partialorder %v5151_v48, 0.0  ;;  %v5167_v14 = vmul.f32 0.01, %v5151_v48  ;;  %v5156_v39 = vadd.f32 %v6500_v35, %v4938_v44 }
 0x3fd   : > { %5190 = vst [vmem:[%s8056_s21] sm:$0xff] %v5182_v23  ;;  %v5185_v10 = vadd.f32 %v5177_v4, %v684_v27  ;;  %v5135_v56 = vpop.f32.mrf.mxu1 }
 0x3fe   : > { %v5175_v59 = vsel %vm5159_vm5, %v5151_v48, %v5167_v14  ;;  %vm5164_vm6 = vcmp.ge.f32.partialorder %v5156_v39, 0.0  ;;  %v5172_v53 = vmul.f32 0.01, %v5156_v39  ;;  %v5154_v19 = vadd.f32 %v5135_v56, %v4936_v26 }
 0x3ff   : > { %5193 = vst [vmem:[%s8056_s21 + $0x18] sm:$0xff] %v5185_v10  ;;  %v5183_v31 = vadd.f32 %v5175_v59, %v674_v54  ;;  %v6501_v24 = vpop.f32.mrf.mxu1 }
 0x400   : > { %v5180_v41 = vsel %vm5164_vm6, %v5156_v39, %v5172_v53  ;;  %vm5162_vm7 = vcmp.ge.f32.partialorder %v5154_v19, 0.0  ;;  %v5170_v58 = vmul.f32 0.01, %v5154_v19  ;;  %v5157_v51 = vadd.f32 %v6501_v24, %v4939_v12 }
 0x401   : > { %5191 = vst [vmem:[%s8056_s21 + $0x8] sm:$0xff] %v5183_v31  ;;  %v5188_v42 = vadd.f32 %v5180_v41, %v700_v1  ;;  %v5138_v32 = vpop.f32.mrf.mxu1 }
 0x402   : > { %v5178_v63 = vsel %vm5162_vm7, %v5154_v19, %v5170_v58  ;;  %vm5165_vm8 = vcmp.ge.f32.partialorder %v5157_v51, 0.0  ;;  %v5173_v49 = vmul.f32 0.01, %v5157_v51  ;;  %v5155_v15 = vadd.f32 %v5138_v32, %v4937_v25 }
 0x403   : > { %5196 = vst [vmem:[%s8056_s21 + $0x30] sm:$0xff] %v5188_v42  ;;  %v5186_v7 = vadd.f32 %v5178_v63, %v690_v9 }
 0x404   : > { %v5181_v0 = vsel %vm5165_vm8, %v5157_v51, %v5173_v49  ;;  %vm5163_vm11 = vcmp.ge.f32.partialorder %v5155_v15, 0.0  ;;  %v5171_v5 = vmul.f32 0.01, %v5155_v15 }
 0x405   : > { %5194 = vst [vmem:[%s8056_s21 + $0x20] sm:$0xff] %v5186_v7  ;;  %v5189_v55 = vadd.f32 %v5181_v0, %v704_v6 }
 0x406   : > { %v5179_v52 = vsel %vm5163_vm11, %v5155_v15, %v5171_v5 }
 0x407   : > { %5197 = vst [vmem:[%s8056_s21 + $0x38] sm:$0xff] %v5189_v55  ;;  %v5187_v38 = vadd.f32 %v5179_v52, %v694_v62 }
 0x409   : > { %5195 = vst [vmem:[%s8056_s21 + $0x28] sm:$0xff] %v5187_v38 }
 0x40a   : > { %6895 = shalt.err (!%p6892_p1)
}
 0x40b   : > { %s6896_s14 = scalar_lea.hbm %s8079_s20, 1024  ;;  %s6900_s21 = scalar_lea.hbm %s8140_s8, 2048 }
 0x40c   : > { %p6897_p2 = scmp.ne.s32.totalorder %s8079_s20, %s6896_s14  ;;  %p6901_p6 = scmp.lt.s32.totalorder %s8079_s20, %s8140_s8 }
 0x40d   : > { %p6902_p10 = scmp.lt.s32.totalorder %s6900_s21, %s6896_s14 }
 0x40e   : > { %p6898_p3 = pnand %p6897_p2, %p7064_p4 }
 0x40f   : > { %p6903_p11 = por %p6902_p10, %p6901_p6 }
 0x410   : > { %p6899_p5 = pneg %p6898_p3 }
 0x412   : > { %p6904_p13 = pnand %p6903_p11, %p6899_p5 }
 0x414   : > { %6907 = shalt.err (!%p6904_p13)
}
 0x415   : > { %s6977_s19 = smov 128   ;;  %s6978_s23 = smov 8  }
 0x416   : > { %6514 = dma.vmem_to_hbm [thread:$0]  (%p7064_p4), %s8081_s25, 1024, %s8079_s20, %s8087_s30, %s6977_s19, %s6977_s19, %s6978_s23  }
 0x417 PF: > { %p6536_p0 = scmp.ge.s32.totalorder %s6966_s10, 2  ;;  %s5229_s11 = sand.u32 1, %s6946_s27  }
 0x418   : > { %s5230_s24 = scalar_lea.sflag [#allocation5], %s5229_s11 }
 0x419   : > { %p6527_p7 = pnand %p6536_p0, %p7071_p8 }
 0x41b   : > { %p6528_p9 = pneg %p6527_p7 }
 0x41d   : > { %6941 = dma.done.wait (%p6528_p9), %s5230_s24, 1024  }
 0x41e   : > { %6943 = vsyncadd (%p6528_p9), %s5230_s24, 4294966272  ;;  %s23_s10 = sadd.s32 1, %s6966_s10   ;;  %s8297_s15 = sld [smem:[#allocation13_spill]] }
 0x41f   : > { %p20_p12 = scmp.ge.s32.totalorder %s23_s10, 4   ;;  %s8298_s27 = smov %s6950_s28 }
 0x420   : > { %s8299_s28 = smov %s6954_s29  ;;  %s8300_s29 = smov %s7077_s18 }
 0x421   : > { %s8301_s30 = smov %s6962_s9  ;;  %22 = sbr.rel (!%p20_p12) target bundleno = 6 (0x6), region = 121 }
 0x424   : > { %s8302_s9 = smov %s8297_s15 }
 0x426   :  { %5235 = vsyncpa [#allocation4], 1 }
 0x427   :  { %5237 = vsyncpa [#allocation4 + $0x1], 1 }
 0x428   :  { %5238 = vsyncpa [#allocation7], 1 }
 0x429   :  { %5239 = vsyncpa [#allocation5], 1 }
 0x42a   :  { %5241 = vsyncpa [#allocation5 + $0x1], 1 }

</bundles_post_ra>
